<compile_context>
chip_gen: v7x
topology: tpu7x:2x2x1
jax: 0.10.0
libtpu: 0.0.40
codegen_flags: <defaults>
</compile_context>

<pallas_src>
import jax
import jax.numpy as jnp
from jax.experimental import pallas as pl
from jax.experimental.pallas import tpu as pltpu


# ----------------------------------------------------------------------------
# Fused kernel (one batch element per grid step).
# ----------------------------------------------------------------------------
def _make_kernel(H, W, Cin, D, stride, has_proj, need_xs, cdt):
    Wp = W + 2                       # padded row pitch
    Ho = (H - 1) // stride + 1
    Wo = (W - 1) // stride + 1
    L = H * Wp                       # rows of the dense conv result / LHS slab length
    R = (H + 2) * Wp + 8             # flat pad buffer rows (1 lead zero row + slack)
    f32 = jnp.float32

    def conv3x3_dense(pad_ref, w_ref, acc_ref, Ck):
        # 3x3 "same" conv, stride 1, computed densely over the padded width.
        # acc row i*Wp + m  ==  conv output (row i, col m-1); cols 0 and W+1 are garbage.
        # LHS per tap is a contiguous zero-copy slab of the flat padded buffer.
        for t in range(9):
            kh, kw = divmod(t, 3)
            off = kh * Wp + kw
            part = jnp.dot(pad_ref[off:off + L, :],
                           w_ref[t * Ck:(t + 1) * Ck, :],
                           preferred_element_type=f32)
            if t == 0:
                acc_ref[...] = part
            else:
                acc_ref[...] += part

    def kernel(*refs):
        i = 0
        x_ref = refs[i]; i += 1
        if need_xs:
            xs_ref = refs[i]; i += 1
        s1_ref, b1_ref, w1_ref, alpha_ref, w2_ref, b2_ref = refs[i:i + 6]; i += 6
        if has_proj:
            ws_ref, bs_ref = refs[i:i + 2]; i += 2
        o_ref = refs[i]; i += 1
        pad1, pad2, acc = refs[i:i + 3]; i += 3
        d3 = refs[i] if stride != 1 else None

        # Multiplicative column mask: data columns of the padded width are 1..W.
        col = jax.lax.broadcasted_iota(jnp.int32, (1, Wp, 1), 1)
        colmask = ((col >= 1) & (col <= W)).astype(f32)               # (1, Wp, 1)

        # ---- BN1 (eval mode) on the width-padded input; re-zero the border cols ----
        xb = x_ref[0].astype(f32) * s1_ref[...] + b1_ref[...]         # (H, Wp, Cin)
        xbp = (xb * colmask).astype(cdt)

        pad1[0:1 + Wp, :] = jnp.zeros((1 + Wp, Cin), cdt)
        pad1[1 + (H + 1) * Wp:R, :] = jnp.zeros((R - 1 - (H + 1) * Wp, Cin), cdt)
        pad1[1 + Wp:1 + (H + 1) * Wp, :] = xbp.reshape(L, Cin)

        # ---- conv1 (3x3, stride 1), zero-copy LHS slabs -> shared f32 accumulator ----
        conv3x3_dense(pad1, w1_ref, acc, Cin)

        # ---- PReLU; garbage cols land exactly where pad2 needs zeros -> mask once ----
        v1 = acc[...].reshape(H, Wp, D)
        v1 = jnp.where(v1 >= 0.0, v1, v1 * alpha_ref[...])
        y1p = (v1 * colmask).astype(cdt)

        pad2[0:1 + Wp, :] = jnp.zeros((1 + Wp, D), cdt)
        pad2[1 + (H + 1) * Wp:R, :] = jnp.zeros((R - 1 - (H + 1) * Wp, D), cdt)
        pad2[1 + Wp:1 + (H + 1) * Wp, :] = y1p.reshape(L, D)

        # ---- conv2 (dense; BN2 scale pre-folded into w2) ----
        conv3x3_dense(pad2, w2_ref, acc, D)

        if stride == 1:
            y2 = acc[...].reshape(H, Wp, D)[:, 1:W + 1, :]             # (Ho, Wo, D)
        else:
            # stride selection done ONCE on the f32 result (not per tap):
            for io in range(Ho):                                       # row subsample
                d3[io, :, :] = acc[io * stride * Wp:io * stride * Wp + Wp, :]
            y2 = d3[:, pl.ds(1, Wo, stride), :]                        # col subsample
        y2 = y2 + b2_ref[...]                                          # BN2 bias

        # ---- shortcut ----
        if has_proj:
            src = x_ref[0][:, 1:W + 1, :] if stride == 1 else xs_ref[0]
            sc = jnp.dot(src.reshape(Ho * Wo, Cin), ws_ref[...],
                         preferred_element_type=f32)
            sc = sc.reshape(Ho, Wo, D) + bs_ref[...]
        else:
            # MaxPool2d(1, stride) == strided subsample; added directly.
            src = x_ref[0][:, 1:W + 1, :] if stride == 1 else xs_ref[0]
            sc = src.astype(f32)

        o_ref[0] = (y2 + sc).astype(o_ref.dtype)

    return kernel


def _fold_bn(gamma, beta, mean, var, eps=1e-5):
    scale = gamma / jnp.sqrt(var + eps)
    bias = beta - mean * scale
    return scale.astype(jnp.float32), bias.astype(jnp.float32)


def _nbytes(shape, dtype):
    n = 1
    for s in shape:
        n *= int(s)
    return n * jnp.dtype(dtype).itemsize


# ----------------------------------------------------------------------------
# NHWC entry point (preferred between chained blocks).
# ----------------------------------------------------------------------------
def bottleneck_ir_nhwc(x, p, in_channel, depth, stride,
                       compute_dtype=jnp.bfloat16, out_dtype=jnp.float32):
    """x: [N, H, W, Cin] -> [N, Ho, Wo, depth]. Eval-mode BatchNorm."""
    N, H, W, C = x.shape
    assert C == in_channel
    Ho = (H - 1) // stride + 1
    Wo = (W - 1) // stride + 1
    Wp = W + 2
    has_proj = (in_channel != depth)
    need_xs = (stride != 1)
    cdt = compute_dtype

    # Width-pad + cast once on the host (fused by XLA with the surrounding layout
    # ops) so the kernel's conv-1 pad interior is one contiguous store.
    x_p = jnp.pad(x, ((0, 0), (0, 0), (1, 1), (0, 0))).astype(cdt)     # (N, H, W+2, C)

    s1, b1 = _fold_bn(*p["bn1"])
    w1 = (jnp.transpose(p["w1"], (2, 3, 1, 0))
          .reshape(9 * in_channel, depth).astype(cdt))
    alpha = p["prelu"].astype(jnp.float32).reshape(1, depth)
    s2, b2 = _fold_bn(*p["bn2"])
    w2 = (jnp.transpose(p["w2"], (2, 3, 1, 0))
          .reshape(9 * depth, depth).astype(jnp.float32) * s2[None, :]
          ).astype(cdt)                                                # BN2 scale folded

    inputs = [x_p]
    in_specs = [pl.BlockSpec((1, H, Wp, C), lambda n: (n, 0, 0, 0))]
    if need_xs:
        xs = x[:, ::stride, ::stride, :].astype(cdt)                   # (N, Ho, Wo, C)
        inputs.append(xs)
        in_specs.append(pl.BlockSpec((1, Ho, Wo, C), lambda n: (n, 0, 0, 0)))
    inputs += [s1.reshape(1, -1), b1.reshape(1, -1), w1, alpha, w2, b2.reshape(1, -1)]
    in_specs += [
        pl.BlockSpec((1, in_channel), lambda n: (0, 0)),
        pl.BlockSpec((1, in_channel), lambda n: (0, 0)),
        pl.BlockSpec((9 * in_channel, depth), lambda n: (0, 0)),
        pl.BlockSpec((1, depth), lambda n: (0, 0)),
        pl.BlockSpec((9 * depth, depth), lambda n: (0, 0)),
        pl.BlockSpec((1, depth), lambda n: (0, 0)),
    ]
    if has_proj:
        ss, bs = _fold_bn(*p["bn_sc"])
        ws = (jnp.transpose(p["w_sc"][:, :, 0, 0], (1, 0)).astype(jnp.float32)
              * ss[None, :]).astype(cdt)                               # BN_sc scale folded
        inputs += [ws, bs.reshape(1, -1)]
        in_specs += [pl.BlockSpec((in_channel, depth), lambda n: (0, 0)),
                     pl.BlockSpec((1, depth), lambda n: (0, 0))]

    R = (H + 2) * Wp + 8
    scratch_defs = [
        ((R, in_channel), cdt),            # flat zero-padded BN1(x)
        ((R, depth), cdt),                 # flat zero-padded PReLU(conv1)
        ((H * Wp, depth), jnp.float32),    # shared dense f32 accumulator
    ]
    if stride != 1:
        scratch_defs.append(((Ho, Wp, depth), jnp.float32))            # row-subsampled conv2
    scratch_shapes = [pltpu.VMEM(s, d) for s, d in scratch_defs]

    # VMEM budget from actual usage (scratch + double-buffered per-step blocks),
    # capped below the chip's physical VMEM capacity.
    scratch_bytes = sum(_nbytes(s, d) for s, d in scratch_defs)
    block_bytes = (_nbytes((1, H, Wp, C), cdt)
                   + (_nbytes((1, Ho, Wo, C), cdt) if need_xs else 0)
                   + sum(_nbytes(a.shape, a.dtype) for a in inputs[1 + int(need_xs):])
                   + _nbytes((1, Ho, Wo, depth), out_dtype))
    vmem_needed = scratch_bytes + 2 * block_bytes
    try:
        cap = int(getattr(pltpu.get_tpu_info(), "vmem_capacity_bytes", 64 * 1024 * 1024))
    except Exception:
        cap = 64 * 1024 * 1024
    vmem_limit = max(32 * 1024 * 1024,
                     min(int(vmem_needed * 1.4) + (2 << 20), int(cap * 0.9)))

    flops = 2 * N * (H * Wp * 9 * in_channel * depth
                     + H * Wp * 9 * depth * depth
                     + (Ho * Wo * in_channel * depth if has_proj else 0))
    bytes_accessed = int(sum(int(a.size) * a.dtype.itemsize for a in inputs)
                         + N * Ho * Wo * depth * jnp.dtype(out_dtype).itemsize)

    kernel = _make_kernel(H, W, in_channel, depth, stride, has_proj, need_xs, cdt)

    return pl.pallas_call(
        kernel,
        out_shape=jax.ShapeDtypeStruct((N, Ho, Wo, depth), out_dtype),
        grid_spec=pltpu.PrefetchScalarGridSpec(
            num_scalar_prefetch=0,
            grid=(N,),
            in_specs=in_specs,
            out_specs=pl.BlockSpec((1, Ho, Wo, depth), lambda n: (n, 0, 0, 0)),
            scratch_shapes=scratch_shapes,
        ),
        compiler_params=pltpu.CompilerParams(
            dimension_semantics=("parallel",),
            vmem_limit_bytes=vmem_limit,
        ),
        cost_estimate=pl.CostEstimate(flops=int(flops), transcendentals=0,
                                      bytes_accessed=bytes_accessed),
    )(*inputs)


# NCHW wrapper (parity with the PyTorch module spec).
def bottleneck_ir(x_nchw, p, in_channel, depth, stride,
                  compute_dtype=jnp.bfloat16, out_dtype=jnp.float32):
    x = jnp.transpose(x_nchw, (0, 2, 3, 1))
    out = bottleneck_ir_nhwc(x, p, in_channel, depth, stride, compute_dtype, out_dtype)
    return jnp.transpose(out, (0, 3, 1, 2))


# ----------------------------------------------------------------------------
# Pure-JAX reference (mirrors the PyTorch module, eval-mode BN), for checking.
# ----------------------------------------------------------------------------
def _reference(x_nchw, p, in_channel, depth, stride):
    eps = 1e-5

    def bn(x, g, b, m, v):
        g, b, m, v = (t[None, :, None, None] for t in (g, b, m, v))
        return (x - m) / jnp.sqrt(v + eps) * g + b

    def conv(x, w, s, pad):
        return jax.lax.conv_general_dilated(
            x, w, (s, s), ((pad, pad), (pad, pad)),
            dimension_numbers=("NCHW", "OIHW", "NCHW"),
            precision=jax.lax.Precision.HIGHEST)

    r = bn(x_nchw, *p["bn1"])
    r = conv(r, p["w1"], 1, 1)
    a = p["prelu"][None, :, None, None]
    r = jnp.where(r >= 0, r, a * r)
    r = conv(r, p["w2"], stride, 1)
    r = bn(r, *p["bn2"])

    if in_channel == depth:
        sc = x_nchw[:, :, ::stride, ::stride]
    else:
        sc = conv(x_nchw, p["w_sc"], stride, 0)
        sc = bn(sc, *p["bn_sc"])
    return r + sc


def _make_params(key, Cin, D):
    ks = jax.random.split(key, 16)

    def bn(k0, k1, k2, k3, C):
        return (jax.random.normal(k0, (C,)) * 0.1 + 1.0,
                jax.random.normal(k1, (C,)) * 0.1,
                jax.random.normal(k2, (C,)) * 0.1,
                jax.nn.softplus(jax.random.normal(k3, (C,))) + 0.5)

    return {
        "bn1": bn(ks[1], ks[2], ks[3], ks[4], Cin),
        "w1": jax.random.normal(ks[5], (D, Cin, 3, 3)) * 0.1,
        "prelu": jnp.full((D,), 0.25, jnp.float32),
        "w2": jax.random.normal(ks[6], (D, D, 3, 3)) * 0.1,
        "bn2": bn(ks[7], ks[8], ks[9], ks[10], D),
        "w_sc": jax.random.normal(ks[11], (D, Cin, 1, 1)) * 0.1,
        "bn_sc": bn(ks[12], ks[13], ks[14], ks[15], D),
    }


if __name__ == "__main__":
    key = jax.random.PRNGKey(0)

    # (Cin, D, H, W, stride, compute_dtype, atol, rtol)
    cases = [
        (4, 8, 16, 16, 2, jnp.float32, 5e-3, 0.0),    # exact algorithm check (f32 path)
        (4, 8, 16, 16, 2, jnp.bfloat16, 2e-2, 3e-2),  # projection shortcut, stride 2
        (8, 8, 16, 16, 2, jnp.bfloat16, 2e-2, 3e-2),  # identity shortcut (MaxPool(1,2))
        (4, 8, 16, 16, 1, jnp.bfloat16, 2e-2, 3e-2),  # stride-1 path (shortcut from x_ref)
    ]

    for i, (Cin, D, H, W, stride, cdt, atol, rtol) in enumerate(cases):
        kx, kp = jax.random.split(jax.random.fold_in(key, i))
        x = jax.random.normal(kx, (2, Cin, H, W), jnp.float32)
        params = _make_params(kp, Cin, D)

        out = jax.block_until_ready(
            bottleneck_ir(x, params, Cin, D, stride, compute_dtype=cdt))
        ref = _reference(x, params, Cin, D, stride)

        assert out.shape == ref.shape, (i, out.shape, ref.shape)
        err = float(jnp.max(jnp.abs(out - ref)))
        bound = atol + rtol * float(jnp.max(jnp.abs(ref)))
        assert err <= bound, f"case {i}: max abs err {err} > bound {bound}"

    print("KERNEL_OK")
</pallas_src>

<mosaic_0001>
module attributes {stable_mosaic.version = 11 : i64} {
  func.func @kernel(%arg0: i32, %arg1: memref<1x16x18x4xf32, #tpu.memory_space<vmem>>, %arg2: memref<1x8x8x4xf32, #tpu.memory_space<vmem>>, %arg3: memref<1x4xf32, #tpu.memory_space<vmem>>, %arg4: memref<1x4xf32, #tpu.memory_space<vmem>>, %arg5: memref<36x8xf32, #tpu.memory_space<vmem>>, %arg6: memref<1x8xf32, #tpu.memory_space<vmem>>, %arg7: memref<72x8xf32, #tpu.memory_space<vmem>>, %arg8: memref<1x8xf32, #tpu.memory_space<vmem>>, %arg9: memref<4x8xf32, #tpu.memory_space<vmem>>, %arg10: memref<1x8xf32, #tpu.memory_space<vmem>>, %arg11: memref<1x8x8x8xf32, #tpu.memory_space<vmem>>, %arg12: memref<332x4xf32, #tpu.memory_space<vmem>>, %arg13: memref<332x8xf32, #tpu.memory_space<vmem>>, %arg14: memref<288x8xf32, #tpu.memory_space<vmem>>, %arg15: memref<8x18x8xf32, #tpu.memory_space<vmem>>) attributes {dimension_semantics = [#tpu.dimension_semantics<parallel>], iteration_bounds = array<i64: 2>, scalar_prefetch = 0 : i64, scratch_operands = 4 : i64, tpu.core_type = #tpu.core_type<tc>, window_params = [{transform_indices = @transform_0, window_bounds = array<i64: 1, 16, 18, 4>}, {transform_indices = @transform_1, window_bounds = array<i64: 1, 8, 8, 4>}, {pipeline_mode = #tpu.pipeline_mode<synchronous>, transform_indices = @transform_2, window_bounds = array<i64: 1, 4>}, {pipeline_mode = #tpu.pipeline_mode<synchronous>, transform_indices = @transform_3, window_bounds = array<i64: 1, 4>}, {pipeline_mode = #tpu.pipeline_mode<synchronous>, transform_indices = @transform_4, window_bounds = array<i64: 36, 8>}, {pipeline_mode = #tpu.pipeline_mode<synchronous>, transform_indices = @transform_5, window_bounds = array<i64: 1, 8>}, {pipeline_mode = #tpu.pipeline_mode<synchronous>, transform_indices = @transform_6, window_bounds = array<i64: 72, 8>}, {pipeline_mode = #tpu.pipeline_mode<synchronous>, transform_indices = @transform_7, window_bounds = array<i64: 1, 8>}, {pipeline_mode = #tpu.pipeline_mode<synchronous>, transform_indices = @transform_8, window_bounds = array<i64: 4, 8>}, {pipeline_mode = #tpu.pipeline_mode<synchronous>, transform_indices = @transform_9, window_bounds = array<i64: 1, 8>}, {transform_indices = @transform_10, window_bounds = array<i64: 1, 8, 8, 8>}]} {
    %0 = tpu.iota {dimensions = array<i32: 1>} : vector<1x18x1xi32>
    %c1_i32 = arith.constant 1 : i32
    %1 = vector.broadcast %c1_i32 : i32 to vector<1x18x1xi32>
    %2 = arith.cmpi sge, %0, %1 : vector<1x18x1xi32>
    %c16_i32 = arith.constant 16 : i32
    %3 = vector.broadcast %c16_i32 : i32 to vector<1x18x1xi32>
    %4 = arith.cmpi sle, %0, %3 : vector<1x18x1xi32>
    %5 = arith.andi %2, %4 : vector<1x18x1xi1>
    %6 = arith.extui %5 : vector<1x18x1xi1> to vector<1x18x1xi32>
    %7 = arith.sitofp %6 : vector<1x18x1xi32> to vector<1x18x1xf32>
    %c0 = arith.constant 0 : index
    %c0_0 = arith.constant 0 : index
    %c0_1 = arith.constant 0 : index
    %c0_2 = arith.constant 0 : index
    %8 = vector.load %arg1[%c0, %c0_0, %c0_1, %c0_2] : memref<1x16x18x4xf32, #tpu.memory_space<vmem>>, vector<1x16x18x4xf32>
    %9 = vector.shape_cast %8 : vector<1x16x18x4xf32> to vector<16x18x4xf32>
    %c0_3 = arith.constant 0 : index
    %c0_4 = arith.constant 0 : index
    %10 = vector.load %arg3[%c0_3, %c0_4] : memref<1x4xf32, #tpu.memory_space<vmem>>, vector<1x4xf32>
    %11 = vector.shape_cast %10 : vector<1x4xf32> to vector<1x1x4xf32>
    %12 = vector.broadcast %11 : vector<1x1x4xf32> to vector<16x18x4xf32>
    %13 = arith.mulf %9, %12 : vector<16x18x4xf32>
    %c0_5 = arith.constant 0 : index
    %c0_6 = arith.constant 0 : index
    %14 = vector.load %arg4[%c0_5, %c0_6] : memref<1x4xf32, #tpu.memory_space<vmem>>, vector<1x4xf32>
    %15 = vector.shape_cast %14 : vector<1x4xf32> to vector<1x1x4xf32>
    %16 = vector.broadcast %15 : vector<1x1x4xf32> to vector<16x18x4xf32>
    %17 = arith.addf %13, %16 : vector<16x18x4xf32>
    %18 = vector.broadcast %7 : vector<1x18x1xf32> to vector<16x18x4xf32>
    %19 = arith.mulf %17, %18 : vector<16x18x4xf32>
    %cst = arith.constant 0.000000e+00 : f32
    %20 = vector.broadcast %cst : f32 to vector<19x4xf32>
    %c0_7 = arith.constant 0 : index
    %c0_8 = arith.constant 0 : index
    %21 = vector.load %arg12[%c0_7, %c0_8] : memref<332x4xf32, #tpu.memory_space<vmem>>, vector<19x4xf32>
    tpu.vector_store %arg12[%c0_7, %c0_8], %20 {strides = array<i32>} : memref<332x4xf32, #tpu.memory_space<vmem>>, vector<19x4xf32>,
    %cst_9 = arith.constant 0.000000e+00 : f32
    %22 = vector.broadcast %cst_9 : f32 to vector<25x4xf32>
    %c307 = arith.constant 307 : index
    %c0_10 = arith.constant 0 : index
    %23 = vector.load %arg12[%c307, %c0_10] : memref<332x4xf32, #tpu.memory_space<vmem>>, vector<25x4xf32>
    tpu.vector_store %arg12[%c307, %c0_10], %22 {strides = array<i32>} : memref<332x4xf32, #tpu.memory_space<vmem>>, vector<25x4xf32>,
    %24 = vector.shape_cast %19 : vector<16x18x4xf32> to vector<288x4xf32>
    %c19 = arith.constant 19 : index
    %c0_11 = arith.constant 0 : index
    %25 = vector.load %arg12[%c19, %c0_11] : memref<332x4xf32, #tpu.memory_space<vmem>>, vector<288x4xf32>
    tpu.vector_store %arg12[%c19, %c0_11], %24 {strides = array<i32>} : memref<332x4xf32, #tpu.memory_space<vmem>>, vector<288x4xf32>,
    %c0_12 = arith.constant 0 : index
    %c0_13 = arith.constant 0 : index
    %26 = vector.load %arg12[%c0_12, %c0_13] : memref<332x4xf32, #tpu.memory_space<vmem>>, vector<288x4xf32>
    %c0_14 = arith.constant 0 : index
    %c0_15 = arith.constant 0 : index
    %27 = vector.load %arg5[%c0_14, %c0_15] : memref<36x8xf32, #tpu.memory_space<vmem>>, vector<4x8xf32>
    %cst_16 = arith.constant dense<0.000000e+00> : vector<288x8xf32>
    %28 = tpu.matmul %26, %27, %cst_16 {dimension_numbers = #tpu.dot_dimension_numbers<[1], [0], [0], [1], [0, 0, 1, 1], [], []>} : vector<288x4xf32>, vector<4x8xf32>, vector<288x8xf32> -> vector<288x8xf32>
    %c0_17 = arith.constant 0 : index
    %c0_18 = arith.constant 0 : index
    %29 = vector.load %arg14[%c0_17, %c0_18] : memref<288x8xf32, #tpu.memory_space<vmem>>, vector<288x8xf32>
    tpu.vector_store %arg14[%c0_17, %c0_18], %28 {strides = array<i32>} : memref<288x8xf32, #tpu.memory_space<vmem>>, vector<288x8xf32>,
    %c1 = arith.constant 1 : index
    %c0_19 = arith.constant 0 : index
    %30 = vector.load %arg12[%c1, %c0_19] : memref<332x4xf32, #tpu.memory_space<vmem>>, vector<288x4xf32>
    %c4 = arith.constant 4 : index
    %c0_20 = arith.constant 0 : index
    %31 = vector.load %arg5[%c4, %c0_20] : memref<36x8xf32, #tpu.memory_space<vmem>>, vector<4x8xf32>
    %cst_21 = arith.constant dense<0.000000e+00> : vector<288x8xf32>
    %32 = tpu.matmul %30, %31, %cst_21 {dimension_numbers = #tpu.dot_dimension_numbers<[1], [0], [0], [1], [0, 0, 1, 1], [], []>} : vector<288x4xf32>, vector<4x8xf32>, vector<288x8xf32> -> vector<288x8xf32>
    %c0_22 = arith.constant 0 : index
    %c0_23 = arith.constant 0 : index
    %33 = vector.load %arg14[%c0_22, %c0_23] : memref<288x8xf32, #tpu.memory_space<vmem>>, vector<288x8xf32>
    %34 = arith.addf %33, %32 : vector<288x8xf32>
    %c0_24 = arith.constant 0 : index
    %c0_25 = arith.constant 0 : index
    %35 = vector.load %arg14[%c0_24, %c0_25] : memref<288x8xf32, #tpu.memory_space<vmem>>, vector<288x8xf32>
    tpu.vector_store %arg14[%c0_24, %c0_25], %34 {strides = array<i32>} : memref<288x8xf32, #tpu.memory_space<vmem>>, vector<288x8xf32>,
    %c2 = arith.constant 2 : index
    %c0_26 = arith.constant 0 : index
    %36 = vector.load %arg12[%c2, %c0_26] : memref<332x4xf32, #tpu.memory_space<vmem>>, vector<288x4xf32>
    %c8 = arith.constant 8 : index
    %c0_27 = arith.constant 0 : index
    %37 = vector.load %arg5[%c8, %c0_27] : memref<36x8xf32, #tpu.memory_space<vmem>>, vector<4x8xf32>
    %cst_28 = arith.constant dense<0.000000e+00> : vector<288x8xf32>
    %38 = tpu.matmul %36, %37, %cst_28 {dimension_numbers = #tpu.dot_dimension_numbers<[1], [0], [0], [1], [0, 0, 1, 1], [], []>} : vector<288x4xf32>, vector<4x8xf32>, vector<288x8xf32> -> vector<288x8xf32>
    %c0_29 = arith.constant 0 : index
    %c0_30 = arith.constant 0 : index
    %39 = vector.load %arg14[%c0_29, %c0_30] : memref<288x8xf32, #tpu.memory_space<vmem>>, vector<288x8xf32>
    %40 = arith.addf %39, %38 : vector<288x8xf32>
    %c0_31 = arith.constant 0 : index
    %c0_32 = arith.constant 0 : index
    %41 = vector.load %arg14[%c0_31, %c0_32] : memref<288x8xf32, #tpu.memory_space<vmem>>, vector<288x8xf32>
    tpu.vector_store %arg14[%c0_31, %c0_32], %40 {strides = array<i32>} : memref<288x8xf32, #tpu.memory_space<vmem>>, vector<288x8xf32>,
    %c18 = arith.constant 18 : index
    %c0_33 = arith.constant 0 : index
    %42 = vector.load %arg12[%c18, %c0_33] : memref<332x4xf32, #tpu.memory_space<vmem>>, vector<288x4xf32>
    %c12 = arith.constant 12 : index
    %c0_34 = arith.constant 0 : index
    %43 = vector.load %arg5[%c12, %c0_34] : memref<36x8xf32, #tpu.memory_space<vmem>>, vector<4x8xf32>
    %cst_35 = arith.constant dense<0.000000e+00> : vector<288x8xf32>
    %44 = tpu.matmul %42, %43, %cst_35 {dimension_numbers = #tpu.dot_dimension_numbers<[1], [0], [0], [1], [0, 0, 1, 1], [], []>} : vector<288x4xf32>, vector<4x8xf32>, vector<288x8xf32> -> vector<288x8xf32>
    %c0_36 = arith.constant 0 : index
    %c0_37 = arith.constant 0 : index
    %45 = vector.load %arg14[%c0_36, %c0_37] : memref<288x8xf32, #tpu.memory_space<vmem>>, vector<288x8xf32>
    %46 = arith.addf %45, %44 : vector<288x8xf32>
    %c0_38 = arith.constant 0 : index
    %c0_39 = arith.constant 0 : index
    %47 = vector.load %arg14[%c0_38, %c0_39] : memref<288x8xf32, #tpu.memory_space<vmem>>, vector<288x8xf32>
    tpu.vector_store %arg14[%c0_38, %c0_39], %46 {strides = array<i32>} : memref<288x8xf32, #tpu.memory_space<vmem>>, vector<288x8xf32>,
    %c19_40 = arith.constant 19 : index
    %c0_41 = arith.constant 0 : index
    %48 = vector.load %arg12[%c19_40, %c0_41] : memref<332x4xf32, #tpu.memory_space<vmem>>, vector<288x4xf32>
    %c16 = arith.constant 16 : index
    %c0_42 = arith.constant 0 : index
    %49 = vector.load %arg5[%c16, %c0_42] : memref<36x8xf32, #tpu.memory_space<vmem>>, vector<4x8xf32>
    %cst_43 = arith.constant dense<0.000000e+00> : vector<288x8xf32>
    %50 = tpu.matmul %48, %49, %cst_43 {dimension_numbers = #tpu.dot_dimension_numbers<[1], [0], [0], [1], [0, 0, 1, 1], [], []>} : vector<288x4xf32>, vector<4x8xf32>, vector<288x8xf32> -> vector<288x8xf32>
    %c0_44 = arith.constant 0 : index
    %c0_45 = arith.constant 0 : index
    %51 = vector.load %arg14[%c0_44, %c0_45] : memref<288x8xf32, #tpu.memory_space<vmem>>, vector<288x8xf32>
    %52 = arith.addf %51, %50 : vector<288x8xf32>
    %c0_46 = arith.constant 0 : index
    %c0_47 = arith.constant 0 : index
    %53 = vector.load %arg14[%c0_46, %c0_47] : memref<288x8xf32, #tpu.memory_space<vmem>>, vector<288x8xf32>
    tpu.vector_store %arg14[%c0_46, %c0_47], %52 {strides = array<i32>} : memref<288x8xf32, #tpu.memory_space<vmem>>, vector<288x8xf32>,
    %c20 = arith.constant 20 : index
    %c0_48 = arith.constant 0 : index
    %54 = vector.load %arg12[%c20, %c0_48] : memref<332x4xf32, #tpu.memory_space<vmem>>, vector<288x4xf32>
    %c20_49 = arith.constant 20 : index
    %c0_50 = arith.constant 0 : index
    %55 = vector.load %arg5[%c20_49, %c0_50] : memref<36x8xf32, #tpu.memory_space<vmem>>, vector<4x8xf32>
    %cst_51 = arith.constant dense<0.000000e+00> : vector<288x8xf32>
    %56 = tpu.matmul %54, %55, %cst_51 {dimension_numbers = #tpu.dot_dimension_numbers<[1], [0], [0], [1], [0, 0, 1, 1], [], []>} : vector<288x4xf32>, vector<4x8xf32>, vector<288x8xf32> -> vector<288x8xf32>
    %c0_52 = arith.constant 0 : index
    %c0_53 = arith.constant 0 : index
    %57 = vector.load %arg14[%c0_52, %c0_53] : memref<288x8xf32, #tpu.memory_space<vmem>>, vector<288x8xf32>
    %58 = arith.addf %57, %56 : vector<288x8xf32>
    %c0_54 = arith.constant 0 : index
    %c0_55 = arith.constant 0 : index
    %59 = vector.load %arg14[%c0_54, %c0_55] : memref<288x8xf32, #tpu.memory_space<vmem>>, vector<288x8xf32>
    tpu.vector_store %arg14[%c0_54, %c0_55], %58 {strides = array<i32>} : memref<288x8xf32, #tpu.memory_space<vmem>>, vector<288x8xf32>,
    %c36 = arith.constant 36 : index
    %c0_56 = arith.constant 0 : index
    %60 = vector.load %arg12[%c36, %c0_56] : memref<332x4xf32, #tpu.memory_space<vmem>>, vector<288x4xf32>
    %c24 = arith.constant 24 : index
    %c0_57 = arith.constant 0 : index
    %61 = vector.load %arg5[%c24, %c0_57] : memref<36x8xf32, #tpu.memory_space<vmem>>, vector<4x8xf32>
    %cst_58 = arith.constant dense<0.000000e+00> : vector<288x8xf32>
    %62 = tpu.matmul %60, %61, %cst_58 {dimension_numbers = #tpu.dot_dimension_numbers<[1], [0], [0], [1], [0, 0, 1, 1], [], []>} : vector<288x4xf32>, vector<4x8xf32>, vector<288x8xf32> -> vector<288x8xf32>
    %c0_59 = arith.constant 0 : index
    %c0_60 = arith.constant 0 : index
    %63 = vector.load %arg14[%c0_59, %c0_60] : memref<288x8xf32, #tpu.memory_space<vmem>>, vector<288x8xf32>
    %64 = arith.addf %63, %62 : vector<288x8xf32>
    %c0_61 = arith.constant 0 : index
    %c0_62 = arith.constant 0 : index
    %65 = vector.load %arg14[%c0_61, %c0_62] : memref<288x8xf32, #tpu.memory_space<vmem>>, vector<288x8xf32>
    tpu.vector_store %arg14[%c0_61, %c0_62], %64 {strides = array<i32>} : memref<288x8xf32, #tpu.memory_space<vmem>>, vector<288x8xf32>,
    %c37 = arith.constant 37 : index
    %c0_63 = arith.constant 0 : index
    %66 = vector.load %arg12[%c37, %c0_63] : memref<332x4xf32, #tpu.memory_space<vmem>>, vector<288x4xf32>
    %c28 = arith.constant 28 : index
    %c0_64 = arith.constant 0 : index
    %67 = vector.load %arg5[%c28, %c0_64] : memref<36x8xf32, #tpu.memory_space<vmem>>, vector<4x8xf32>
    %cst_65 = arith.constant dense<0.000000e+00> : vector<288x8xf32>
    %68 = tpu.matmul %66, %67, %cst_65 {dimension_numbers = #tpu.dot_dimension_numbers<[1], [0], [0], [1], [0, 0, 1, 1], [], []>} : vector<288x4xf32>, vector<4x8xf32>, vector<288x8xf32> -> vector<288x8xf32>
    %c0_66 = arith.constant 0 : index
    %c0_67 = arith.constant 0 : index
    %69 = vector.load %arg14[%c0_66, %c0_67] : memref<288x8xf32, #tpu.memory_space<vmem>>, vector<288x8xf32>
    %70 = arith.addf %69, %68 : vector<288x8xf32>
    %c0_68 = arith.constant 0 : index
    %c0_69 = arith.constant 0 : index
    %71 = vector.load %arg14[%c0_68, %c0_69] : memref<288x8xf32, #tpu.memory_space<vmem>>, vector<288x8xf32>
    tpu.vector_store %arg14[%c0_68, %c0_69], %70 {strides = array<i32>} : memref<288x8xf32, #tpu.memory_space<vmem>>, vector<288x8xf32>,
    %c38 = arith.constant 38 : index
    %c0_70 = arith.constant 0 : index
    %72 = vector.load %arg12[%c38, %c0_70] : memref<332x4xf32, #tpu.memory_space<vmem>>, vector<288x4xf32>
    %c32 = arith.constant 32 : index
    %c0_71 = arith.constant 0 : index
    %73 = vector.load %arg5[%c32, %c0_71] : memref<36x8xf32, #tpu.memory_space<vmem>>, vector<4x8xf32>
    %cst_72 = arith.constant dense<0.000000e+00> : vector<288x8xf32>
    %74 = tpu.matmul %72, %73, %cst_72 {dimension_numbers = #tpu.dot_dimension_numbers<[1], [0], [0], [1], [0, 0, 1, 1], [], []>} : vector<288x4xf32>, vector<4x8xf32>, vector<288x8xf32> -> vector<288x8xf32>
    %c0_73 = arith.constant 0 : index
    %c0_74 = arith.constant 0 : index
    %75 = vector.load %arg14[%c0_73, %c0_74] : memref<288x8xf32, #tpu.memory_space<vmem>>, vector<288x8xf32>
    %76 = arith.addf %75, %74 : vector<288x8xf32>
    %c0_75 = arith.constant 0 : index
    %c0_76 = arith.constant 0 : index
    %77 = vector.load %arg14[%c0_75, %c0_76] : memref<288x8xf32, #tpu.memory_space<vmem>>, vector<288x8xf32>
    tpu.vector_store %arg14[%c0_75, %c0_76], %76 {strides = array<i32>} : memref<288x8xf32, #tpu.memory_space<vmem>>, vector<288x8xf32>,
    %c0_77 = arith.constant 0 : index
    %c0_78 = arith.constant 0 : index
    %78 = vector.load %arg14[%c0_77, %c0_78] : memref<288x8xf32, #tpu.memory_space<vmem>>, vector<288x8xf32>
    %79 = vector.shape_cast %78 : vector<288x8xf32> to vector<16x18x8xf32>
    %cst_79 = arith.constant 0.000000e+00 : f32
    %80 = vector.broadcast %cst_79 : f32 to vector<16x18x8xf32>
    %81 = arith.cmpf oge, %79, %80 : vector<16x18x8xf32>
    %c0_80 = arith.constant 0 : index
    %c0_81 = arith.constant 0 : index
    %82 = vector.load %arg6[%c0_80, %c0_81] : memref<1x8xf32, #tpu.memory_space<vmem>>, vector<1x8xf32>
    %83 = vector.shape_cast %82 : vector<1x8xf32> to vector<1x1x8xf32>
    %84 = vector.broadcast %83 : vector<1x1x8xf32> to vector<16x18x8xf32>
    %85 = arith.mulf %79, %84 : vector<16x18x8xf32>
    %86 = arith.select %81, %79, %85 : vector<16x18x8xi1>, vector<16x18x8xf32>
    %87 = vector.broadcast %7 : vector<1x18x1xf32> to vector<16x18x8xf32>
    %88 = arith.mulf %86, %87 : vector<16x18x8xf32>
    %cst_82 = arith.constant 0.000000e+00 : f32
    %89 = vector.broadcast %cst_82 : f32 to vector<19x8xf32>
    %c0_83 = arith.constant 0 : index
    %c0_84 = arith.constant 0 : index
    %90 = vector.load %arg13[%c0_83, %c0_84] : memref<332x8xf32, #tpu.memory_space<vmem>>, vector<19x8xf32>
    tpu.vector_store %arg13[%c0_83, %c0_84], %89 {strides = array<i32>} : memref<332x8xf32, #tpu.memory_space<vmem>>, vector<19x8xf32>,
    %cst_85 = arith.constant 0.000000e+00 : f32
    %91 = vector.broadcast %cst_85 : f32 to vector<25x8xf32>
    %c307_86 = arith.constant 307 : index
    %c0_87 = arith.constant 0 : index
    %92 = vector.load %arg13[%c307_86, %c0_87] : memref<332x8xf32, #tpu.memory_space<vmem>>, vector<25x8xf32>
    tpu.vector_store %arg13[%c307_86, %c0_87], %91 {strides = array<i32>} : memref<332x8xf32, #tpu.memory_space<vmem>>, vector<25x8xf32>,
    %93 = vector.shape_cast %88 : vector<16x18x8xf32> to vector<288x8xf32>
    %c19_88 = arith.constant 19 : index
    %c0_89 = arith.constant 0 : index
    %94 = vector.load %arg13[%c19_88, %c0_89] : memref<332x8xf32, #tpu.memory_space<vmem>>, vector<288x8xf32>
    tpu.vector_store %arg13[%c19_88, %c0_89], %93 {strides = array<i32>} : memref<332x8xf32, #tpu.memory_space<vmem>>, vector<288x8xf32>,
    %c0_90 = arith.constant 0 : index
    %c0_91 = arith.constant 0 : index
    %95 = vector.load %arg13[%c0_90, %c0_91] : memref<332x8xf32, #tpu.memory_space<vmem>>, vector<288x8xf32>
    %c0_92 = arith.constant 0 : index
    %c0_93 = arith.constant 0 : index
    %96 = vector.load %arg7[%c0_92, %c0_93] : memref<72x8xf32, #tpu.memory_space<vmem>>, vector<8x8xf32>
    %cst_94 = arith.constant dense<0.000000e+00> : vector<288x8xf32>
    %97 = tpu.matmul %95, %96, %cst_94 {dimension_numbers = #tpu.dot_dimension_numbers<[1], [0], [0], [1], [0, 0, 1, 1], [], []>} : vector<288x8xf32>, vector<8x8xf32>, vector<288x8xf32> -> vector<288x8xf32>
    %c0_95 = arith.constant 0 : index
    %c0_96 = arith.constant 0 : index
    %98 = vector.load %arg14[%c0_95, %c0_96] : memref<288x8xf32, #tpu.memory_space<vmem>>, vector<288x8xf32>
    tpu.vector_store %arg14[%c0_95, %c0_96], %97 {strides = array<i32>} : memref<288x8xf32, #tpu.memory_space<vmem>>, vector<288x8xf32>,
    %c1_97 = arith.constant 1 : index
    %c0_98 = arith.constant 0 : index
    %99 = vector.load %arg13[%c1_97, %c0_98] : memref<332x8xf32, #tpu.memory_space<vmem>>, vector<288x8xf32>
    %c8_99 = arith.constant 8 : index
    %c0_100 = arith.constant 0 : index
    %100 = vector.load %arg7[%c8_99, %c0_100] : memref<72x8xf32, #tpu.memory_space<vmem>>, vector<8x8xf32>
    %cst_101 = arith.constant dense<0.000000e+00> : vector<288x8xf32>
    %101 = tpu.matmul %99, %100, %cst_101 {dimension_numbers = #tpu.dot_dimension_numbers<[1], [0], [0], [1], [0, 0, 1, 1], [], []>} : vector<288x8xf32>, vector<8x8xf32>, vector<288x8xf32> -> vector<288x8xf32>
    %c0_102 = arith.constant 0 : index
    %c0_103 = arith.constant 0 : index
    %102 = vector.load %arg14[%c0_102, %c0_103] : memref<288x8xf32, #tpu.memory_space<vmem>>, vector<288x8xf32>
    %103 = arith.addf %102, %101 : vector<288x8xf32>
    %c0_104 = arith.constant 0 : index
    %c0_105 = arith.constant 0 : index
    %104 = vector.load %arg14[%c0_104, %c0_105] : memref<288x8xf32, #tpu.memory_space<vmem>>, vector<288x8xf32>
    tpu.vector_store %arg14[%c0_104, %c0_105], %103 {strides = array<i32>} : memref<288x8xf32, #tpu.memory_space<vmem>>, vector<288x8xf32>,
    %c2_106 = arith.constant 2 : index
    %c0_107 = arith.constant 0 : index
    %105 = vector.load %arg13[%c2_106, %c0_107] : memref<332x8xf32, #tpu.memory_space<vmem>>, vector<288x8xf32>
    %c16_108 = arith.constant 16 : index
    %c0_109 = arith.constant 0 : index
    %106 = vector.load %arg7[%c16_108, %c0_109] : memref<72x8xf32, #tpu.memory_space<vmem>>, vector<8x8xf32>
    %cst_110 = arith.constant dense<0.000000e+00> : vector<288x8xf32>
    %107 = tpu.matmul %105, %106, %cst_110 {dimension_numbers = #tpu.dot_dimension_numbers<[1], [0], [0], [1], [0, 0, 1, 1], [], []>} : vector<288x8xf32>, vector<8x8xf32>, vector<288x8xf32> -> vector<288x8xf32>
    %c0_111 = arith.constant 0 : index
    %c0_112 = arith.constant 0 : index
    %108 = vector.load %arg14[%c0_111, %c0_112] : memref<288x8xf32, #tpu.memory_space<vmem>>, vector<288x8xf32>
    %109 = arith.addf %108, %107 : vector<288x8xf32>
    %c0_113 = arith.constant 0 : index
    %c0_114 = arith.constant 0 : index
    %110 = vector.load %arg14[%c0_113, %c0_114] : memref<288x8xf32, #tpu.memory_space<vmem>>, vector<288x8xf32>
    tpu.vector_store %arg14[%c0_113, %c0_114], %109 {strides = array<i32>} : memref<288x8xf32, #tpu.memory_space<vmem>>, vector<288x8xf32>,
    %c18_115 = arith.constant 18 : index
    %c0_116 = arith.constant 0 : index
    %111 = vector.load %arg13[%c18_115, %c0_116] : memref<332x8xf32, #tpu.memory_space<vmem>>, vector<288x8xf32>
    %c24_117 = arith.constant 24 : index
    %c0_118 = arith.constant 0 : index
    %112 = vector.load %arg7[%c24_117, %c0_118] : memref<72x8xf32, #tpu.memory_space<vmem>>, vector<8x8xf32>
    %cst_119 = arith.constant dense<0.000000e+00> : vector<288x8xf32>
    %113 = tpu.matmul %111, %112, %cst_119 {dimension_numbers = #tpu.dot_dimension_numbers<[1], [0], [0], [1], [0, 0, 1, 1], [], []>} : vector<288x8xf32>, vector<8x8xf32>, vector<288x8xf32> -> vector<288x8xf32>
    %c0_120 = arith.constant 0 : index
    %c0_121 = arith.constant 0 : index
    %114 = vector.load %arg14[%c0_120, %c0_121] : memref<288x8xf32, #tpu.memory_space<vmem>>, vector<288x8xf32>
    %115 = arith.addf %114, %113 : vector<288x8xf32>
    %c0_122 = arith.constant 0 : index
    %c0_123 = arith.constant 0 : index
    %116 = vector.load %arg14[%c0_122, %c0_123] : memref<288x8xf32, #tpu.memory_space<vmem>>, vector<288x8xf32>
    tpu.vector_store %arg14[%c0_122, %c0_123], %115 {strides = array<i32>} : memref<288x8xf32, #tpu.memory_space<vmem>>, vector<288x8xf32>,
    %c19_124 = arith.constant 19 : index
    %c0_125 = arith.constant 0 : index
    %117 = vector.load %arg13[%c19_124, %c0_125] : memref<332x8xf32, #tpu.memory_space<vmem>>, vector<288x8xf32>
    %c32_126 = arith.constant 32 : index
    %c0_127 = arith.constant 0 : index
    %118 = vector.load %arg7[%c32_126, %c0_127] : memref<72x8xf32, #tpu.memory_space<vmem>>, vector<8x8xf32>
    %cst_128 = arith.constant dense<0.000000e+00> : vector<288x8xf32>
    %119 = tpu.matmul %117, %118, %cst_128 {dimension_numbers = #tpu.dot_dimension_numbers<[1], [0], [0], [1], [0, 0, 1, 1], [], []>} : vector<288x8xf32>, vector<8x8xf32>, vector<288x8xf32> -> vector<288x8xf32>
    %c0_129 = arith.constant 0 : index
    %c0_130 = arith.constant 0 : index
    %120 = vector.load %arg14[%c0_129, %c0_130] : memref<288x8xf32, #tpu.memory_space<vmem>>, vector<288x8xf32>
    %121 = arith.addf %120, %119 : vector<288x8xf32>
    %c0_131 = arith.constant 0 : index
    %c0_132 = arith.constant 0 : index
    %122 = vector.load %arg14[%c0_131, %c0_132] : memref<288x8xf32, #tpu.memory_space<vmem>>, vector<288x8xf32>
    tpu.vector_store %arg14[%c0_131, %c0_132], %121 {strides = array<i32>} : memref<288x8xf32, #tpu.memory_space<vmem>>, vector<288x8xf32>,
    %c20_133 = arith.constant 20 : index
    %c0_134 = arith.constant 0 : index
    %123 = vector.load %arg13[%c20_133, %c0_134] : memref<332x8xf32, #tpu.memory_space<vmem>>, vector<288x8xf32>
    %c40 = arith.constant 40 : index
    %c0_135 = arith.constant 0 : index
    %124 = vector.load %arg7[%c40, %c0_135] : memref<72x8xf32, #tpu.memory_space<vmem>>, vector<8x8xf32>
    %cst_136 = arith.constant dense<0.000000e+00> : vector<288x8xf32>
    %125 = tpu.matmul %123, %124, %cst_136 {dimension_numbers = #tpu.dot_dimension_numbers<[1], [0], [0], [1], [0, 0, 1, 1], [], []>} : vector<288x8xf32>, vector<8x8xf32>, vector<288x8xf32> -> vector<288x8xf32>
    %c0_137 = arith.constant 0 : index
    %c0_138 = arith.constant 0 : index
    %126 = vector.load %arg14[%c0_137, %c0_138] : memref<288x8xf32, #tpu.memory_space<vmem>>, vector<288x8xf32>
    %127 = arith.addf %126, %125 : vector<288x8xf32>
    %c0_139 = arith.constant 0 : index
    %c0_140 = arith.constant 0 : index
    %128 = vector.load %arg14[%c0_139, %c0_140] : memref<288x8xf32, #tpu.memory_space<vmem>>, vector<288x8xf32>
    tpu.vector_store %arg14[%c0_139, %c0_140], %127 {strides = array<i32>} : memref<288x8xf32, #tpu.memory_space<vmem>>, vector<288x8xf32>,
    %c36_141 = arith.constant 36 : index
    %c0_142 = arith.constant 0 : index
    %129 = vector.load %arg13[%c36_141, %c0_142] : memref<332x8xf32, #tpu.memory_space<vmem>>, vector<288x8xf32>
    %c48 = arith.constant 48 : index
    %c0_143 = arith.constant 0 : index
    %130 = vector.load %arg7[%c48, %c0_143] : memref<72x8xf32, #tpu.memory_space<vmem>>, vector<8x8xf32>
    %cst_144 = arith.constant dense<0.000000e+00> : vector<288x8xf32>
    %131 = tpu.matmul %129, %130, %cst_144 {dimension_numbers = #tpu.dot_dimension_numbers<[1], [0], [0], [1], [0, 0, 1, 1], [], []>} : vector<288x8xf32>, vector<8x8xf32>, vector<288x8xf32> -> vector<288x8xf32>
    %c0_145 = arith.constant 0 : index
    %c0_146 = arith.constant 0 : index
    %132 = vector.load %arg14[%c0_145, %c0_146] : memref<288x8xf32, #tpu.memory_space<vmem>>, vector<288x8xf32>
    %133 = arith.addf %132, %131 : vector<288x8xf32>
    %c0_147 = arith.constant 0 : index
    %c0_148 = arith.constant 0 : index
    %134 = vector.load %arg14[%c0_147, %c0_148] : memref<288x8xf32, #tpu.memory_space<vmem>>, vector<288x8xf32>
    tpu.vector_store %arg14[%c0_147, %c0_148], %133 {strides = array<i32>} : memref<288x8xf32, #tpu.memory_space<vmem>>, vector<288x8xf32>,
    %c37_149 = arith.constant 37 : index
    %c0_150 = arith.constant 0 : index
    %135 = vector.load %arg13[%c37_149, %c0_150] : memref<332x8xf32, #tpu.memory_space<vmem>>, vector<288x8xf32>
    %c56 = arith.constant 56 : index
    %c0_151 = arith.constant 0 : index
    %136 = vector.load %arg7[%c56, %c0_151] : memref<72x8xf32, #tpu.memory_space<vmem>>, vector<8x8xf32>
    %cst_152 = arith.constant dense<0.000000e+00> : vector<288x8xf32>
    %137 = tpu.matmul %135, %136, %cst_152 {dimension_numbers = #tpu.dot_dimension_numbers<[1], [0], [0], [1], [0, 0, 1, 1], [], []>} : vector<288x8xf32>, vector<8x8xf32>, vector<288x8xf32> -> vector<288x8xf32>
    %c0_153 = arith.constant 0 : index
    %c0_154 = arith.constant 0 : index
    %138 = vector.load %arg14[%c0_153, %c0_154] : memref<288x8xf32, #tpu.memory_space<vmem>>, vector<288x8xf32>
    %139 = arith.addf %138, %137 : vector<288x8xf32>
    %c0_155 = arith.constant 0 : index
    %c0_156 = arith.constant 0 : index
    %140 = vector.load %arg14[%c0_155, %c0_156] : memref<288x8xf32, #tpu.memory_space<vmem>>, vector<288x8xf32>
    tpu.vector_store %arg14[%c0_155, %c0_156], %139 {strides = array<i32>} : memref<288x8xf32, #tpu.memory_space<vmem>>, vector<288x8xf32>,
    %c38_157 = arith.constant 38 : index
    %c0_158 = arith.constant 0 : index
    %141 = vector.load %arg13[%c38_157, %c0_158] : memref<332x8xf32, #tpu.memory_space<vmem>>, vector<288x8xf32>
    %c64 = arith.constant 64 : index
    %c0_159 = arith.constant 0 : index
    %142 = vector.load %arg7[%c64, %c0_159] : memref<72x8xf32, #tpu.memory_space<vmem>>, vector<8x8xf32>
    %cst_160 = arith.constant dense<0.000000e+00> : vector<288x8xf32>
    %143 = tpu.matmul %141, %142, %cst_160 {dimension_numbers = #tpu.dot_dimension_numbers<[1], [0], [0], [1], [0, 0, 1, 1], [], []>} : vector<288x8xf32>, vector<8x8xf32>, vector<288x8xf32> -> vector<288x8xf32>
    %c0_161 = arith.constant 0 : index
    %c0_162 = arith.constant 0 : index
    %144 = vector.load %arg14[%c0_161, %c0_162] : memref<288x8xf32, #tpu.memory_space<vmem>>, vector<288x8xf32>
    %145 = arith.addf %144, %143 : vector<288x8xf32>
    %c0_163 = arith.constant 0 : index
    %c0_164 = arith.constant 0 : index
    %146 = vector.load %arg14[%c0_163, %c0_164] : memref<288x8xf32, #tpu.memory_space<vmem>>, vector<288x8xf32>
    tpu.vector_store %arg14[%c0_163, %c0_164], %145 {strides = array<i32>} : memref<288x8xf32, #tpu.memory_space<vmem>>, vector<288x8xf32>,
    %c0_165 = arith.constant 0 : index
    %c0_166 = arith.constant 0 : index
    %147 = vector.load %arg14[%c0_165, %c0_166] : memref<288x8xf32, #tpu.memory_space<vmem>>, vector<18x8xf32>
    %c0_167 = arith.constant 0 : index
    %c0_168 = arith.constant 0 : index
    %c0_169 = arith.constant 0 : index
    %148 = vector.load %arg15[%c0_167, %c0_168, %c0_169] : memref<8x18x8xf32, #tpu.memory_space<vmem>>, vector<1x18x8xf32>
    %149 = vector.shape_cast %148 : vector<1x18x8xf32> to vector<18x8xf32>
    %150 = vector.shape_cast %147 : vector<18x8xf32> to vector<1x18x8xf32>
    tpu.vector_store %arg15[%c0_167, %c0_168, %c0_169], %150 {strides = array<i32>} : memref<8x18x8xf32, #tpu.memory_space<vmem>>, vector<1x18x8xf32>,
    %c36_170 = arith.constant 36 : index
    %c0_171 = arith.constant 0 : index
    %151 = vector.load %arg14[%c36_170, %c0_171] : memref<288x8xf32, #tpu.memory_space<vmem>>, vector<18x8xf32>
    %c1_172 = arith.constant 1 : index
    %c0_173 = arith.constant 0 : index
    %c0_174 = arith.constant 0 : index
    %152 = vector.load %arg15[%c1_172, %c0_173, %c0_174] : memref<8x18x8xf32, #tpu.memory_space<vmem>>, vector<1x18x8xf32>
    %153 = vector.shape_cast %152 : vector<1x18x8xf32> to vector<18x8xf32>
    %154 = vector.shape_cast %151 : vector<18x8xf32> to vector<1x18x8xf32>
    tpu.vector_store %arg15[%c1_172, %c0_173, %c0_174], %154 {strides = array<i32>} : memref<8x18x8xf32, #tpu.memory_space<vmem>>, vector<1x18x8xf32>,
    %c72 = arith.constant 72 : index
    %c0_175 = arith.constant 0 : index
    %155 = vector.load %arg14[%c72, %c0_175] : memref<288x8xf32, #tpu.memory_space<vmem>>, vector<18x8xf32>
    %c2_176 = arith.constant 2 : index
    %c0_177 = arith.constant 0 : index
    %c0_178 = arith.constant 0 : index
    %156 = vector.load %arg15[%c2_176, %c0_177, %c0_178] : memref<8x18x8xf32, #tpu.memory_space<vmem>>, vector<1x18x8xf32>
    %157 = vector.shape_cast %156 : vector<1x18x8xf32> to vector<18x8xf32>
    %158 = vector.shape_cast %155 : vector<18x8xf32> to vector<1x18x8xf32>
    tpu.vector_store %arg15[%c2_176, %c0_177, %c0_178], %158 {strides = array<i32>} : memref<8x18x8xf32, #tpu.memory_space<vmem>>, vector<1x18x8xf32>,
    %c108 = arith.constant 108 : index
    %c0_179 = arith.constant 0 : index
    %159 = vector.load %arg14[%c108, %c0_179] : memref<288x8xf32, #tpu.memory_space<vmem>>, vector<18x8xf32>
    %c3 = arith.constant 3 : index
    %c0_180 = arith.constant 0 : index
    %c0_181 = arith.constant 0 : index
    %160 = vector.load %arg15[%c3, %c0_180, %c0_181] : memref<8x18x8xf32, #tpu.memory_space<vmem>>, vector<1x18x8xf32>
    %161 = vector.shape_cast %160 : vector<1x18x8xf32> to vector<18x8xf32>
    %162 = vector.shape_cast %159 : vector<18x8xf32> to vector<1x18x8xf32>
    tpu.vector_store %arg15[%c3, %c0_180, %c0_181], %162 {strides = array<i32>} : memref<8x18x8xf32, #tpu.memory_space<vmem>>, vector<1x18x8xf32>,
    %c144 = arith.constant 144 : index
    %c0_182 = arith.constant 0 : index
    %163 = vector.load %arg14[%c144, %c0_182] : memref<288x8xf32, #tpu.memory_space<vmem>>, vector<18x8xf32>
    %c4_183 = arith.constant 4 : index
    %c0_184 = arith.constant 0 : index
    %c0_185 = arith.constant 0 : index
    %164 = vector.load %arg15[%c4_183, %c0_184, %c0_185] : memref<8x18x8xf32, #tpu.memory_space<vmem>>, vector<1x18x8xf32>
    %165 = vector.shape_cast %164 : vector<1x18x8xf32> to vector<18x8xf32>
    %166 = vector.shape_cast %163 : vector<18x8xf32> to vector<1x18x8xf32>
    tpu.vector_store %arg15[%c4_183, %c0_184, %c0_185], %166 {strides = array<i32>} : memref<8x18x8xf32, #tpu.memory_space<vmem>>, vector<1x18x8xf32>,
    %c180 = arith.constant 180 : index
    %c0_186 = arith.constant 0 : index
    %167 = vector.load %arg14[%c180, %c0_186] : memref<288x8xf32, #tpu.memory_space<vmem>>, vector<18x8xf32>
    %c5 = arith.constant 5 : index
    %c0_187 = arith.constant 0 : index
    %c0_188 = arith.constant 0 : index
    %168 = vector.load %arg15[%c5, %c0_187, %c0_188] : memref<8x18x8xf32, #tpu.memory_space<vmem>>, vector<1x18x8xf32>
    %169 = vector.shape_cast %168 : vector<1x18x8xf32> to vector<18x8xf32>
    %170 = vector.shape_cast %167 : vector<18x8xf32> to vector<1x18x8xf32>
    tpu.vector_store %arg15[%c5, %c0_187, %c0_188], %170 {strides = array<i32>} : memref<8x18x8xf32, #tpu.memory_space<vmem>>, vector<1x18x8xf32>,
    %c216 = arith.constant 216 : index
    %c0_189 = arith.constant 0 : index
    %171 = vector.load %arg14[%c216, %c0_189] : memref<288x8xf32, #tpu.memory_space<vmem>>, vector<18x8xf32>
    %c6 = arith.constant 6 : index
    %c0_190 = arith.constant 0 : index
    %c0_191 = arith.constant 0 : index
    %172 = vector.load %arg15[%c6, %c0_190, %c0_191] : memref<8x18x8xf32, #tpu.memory_space<vmem>>, vector<1x18x8xf32>
    %173 = vector.shape_cast %172 : vector<1x18x8xf32> to vector<18x8xf32>
    %174 = vector.shape_cast %171 : vector<18x8xf32> to vector<1x18x8xf32>
    tpu.vector_store %arg15[%c6, %c0_190, %c0_191], %174 {strides = array<i32>} : memref<8x18x8xf32, #tpu.memory_space<vmem>>, vector<1x18x8xf32>,
    %c252 = arith.constant 252 : index
    %c0_192 = arith.constant 0 : index
    %175 = vector.load %arg14[%c252, %c0_192] : memref<288x8xf32, #tpu.memory_space<vmem>>, vector<18x8xf32>
    %c7 = arith.constant 7 : index
    %c0_193 = arith.constant 0 : index
    %c0_194 = arith.constant 0 : index
    %176 = vector.load %arg15[%c7, %c0_193, %c0_194] : memref<8x18x8xf32, #tpu.memory_space<vmem>>, vector<1x18x8xf32>
    %177 = vector.shape_cast %176 : vector<1x18x8xf32> to vector<18x8xf32>
    %178 = vector.shape_cast %175 : vector<18x8xf32> to vector<1x18x8xf32>
    tpu.vector_store %arg15[%c7, %c0_193, %c0_194], %178 {strides = array<i32>} : memref<8x18x8xf32, #tpu.memory_space<vmem>>, vector<1x18x8xf32>,
    %c0_195 = arith.constant 0 : index
    %c1_196 = arith.constant 1 : index
    %c0_197 = arith.constant 0 : index
    %179 = tpu.strided_load %arg15[%c0_195, %c1_196, %c0_197] {strides = array<i32: 1, 2, 1>} : memref<8x18x8xf32, #tpu.memory_space<vmem>>, vector<8x8x8xf32>
    %c0_198 = arith.constant 0 : index
    %c0_199 = arith.constant 0 : index
    %180 = vector.load %arg8[%c0_198, %c0_199] : memref<1x8xf32, #tpu.memory_space<vmem>>, vector<1x8xf32>
    %181 = vector.shape_cast %180 : vector<1x8xf32> to vector<1x1x8xf32>
    %182 = vector.broadcast %181 : vector<1x1x8xf32> to vector<8x8x8xf32>
    %183 = arith.addf %179, %182 : vector<8x8x8xf32>
    %c0_200 = arith.constant 0 : index
    %c0_201 = arith.constant 0 : index
    %c0_202 = arith.constant 0 : index
    %c0_203 = arith.constant 0 : index
    %184 = vector.load %arg2[%c0_200, %c0_201, %c0_202, %c0_203] : memref<1x8x8x4xf32, #tpu.memory_space<vmem>>, vector<1x8x8x4xf32>
    %185 = vector.shape_cast %184 : vector<1x8x8x4xf32> to vector<8x8x4xf32>
    %186 = vector.shape_cast %185 : vector<8x8x4xf32> to vector<64x4xf32>
    %c0_204 = arith.constant 0 : index
    %c0_205 = arith.constant 0 : index
    %187 = vector.load %arg9[%c0_204, %c0_205] : memref<4x8xf32, #tpu.memory_space<vmem>>, vector<4x8xf32>
    %cst_206 = arith.constant dense<0.000000e+00> : vector<64x8xf32>
    %188 = tpu.matmul %186, %187, %cst_206 {dimension_numbers = #tpu.dot_dimension_numbers<[1], [0], [0], [1], [0, 0, 1, 1], [], []>} : vector<64x4xf32>, vector<4x8xf32>, vector<64x8xf32> -> vector<64x8xf32>
    %189 = vector.shape_cast %188 : vector<64x8xf32> to vector<8x8x8xf32>
    %c0_207 = arith.constant 0 : index
    %c0_208 = arith.constant 0 : index
    %190 = vector.load %arg10[%c0_207, %c0_208] : memref<1x8xf32, #tpu.memory_space<vmem>>, vector<1x8xf32>
    %191 = vector.shape_cast %190 : vector<1x8xf32> to vector<1x1x8xf32>
    %192 = vector.broadcast %191 : vector<1x1x8xf32> to vector<8x8x8xf32>
    %193 = arith.addf %189, %192 : vector<8x8x8xf32>
    %194 = arith.addf %183, %193 : vector<8x8x8xf32>
    %c0_209 = arith.constant 0 : index
    %c0_210 = arith.constant 0 : index
    %c0_211 = arith.constant 0 : index
    %c0_212 = arith.constant 0 : index
    %195 = vector.load %arg11[%c0_209, %c0_210, %c0_211, %c0_212] : memref<1x8x8x8xf32, #tpu.memory_space<vmem>>, vector<1x8x8x8xf32>
    %196 = vector.shape_cast %195 : vector<1x8x8x8xf32> to vector<8x8x8xf32>
    %197 = vector.shape_cast %194 : vector<8x8x8xf32> to vector<1x8x8x8xf32>
    tpu.vector_store %arg11[%c0_209, %c0_210, %c0_211, %c0_212], %197 {strides = array<i32>} : memref<1x8x8x8xf32, #tpu.memory_space<vmem>>, vector<1x8x8x8xf32>,
    return
  }
  func.func @transform_0(%arg0: i32) -> (i32, i32, i32, i32) {
    %c0_i32 = arith.constant 0 : i32
    %c0_i32_0 = arith.constant 0 : i32
    %c0_i32_1 = arith.constant 0 : i32
    %c0_i32_2 = arith.constant 0 : i32
    return %arg0, %c0_i32, %c0_i32_0, %c0_i32_1 : i32, i32, i32, i32
  }
  func.func @transform_1(%arg0: i32) -> (i32, i32, i32, i32) {
    %c0_i32 = arith.constant 0 : i32
    %c0_i32_0 = arith.constant 0 : i32
    %c0_i32_1 = arith.constant 0 : i32
    %c0_i32_2 = arith.constant 0 : i32
    return %arg0, %c0_i32, %c0_i32_0, %c0_i32_1 : i32, i32, i32, i32
  }
  func.func @transform_2(%arg0: i32) -> (i32, i32) {
    %c0_i32 = arith.constant 0 : i32
    %c0_i32_0 = arith.constant 0 : i32
    %c0_i32_1 = arith.constant 0 : i32
    return %c0_i32, %c0_i32_0 : i32, i32
  }
  func.func @transform_3(%arg0: i32) -> (i32, i32) {
    %c0_i32 = arith.constant 0 : i32
    %c0_i32_0 = arith.constant 0 : i32
    %c0_i32_1 = arith.constant 0 : i32
    return %c0_i32, %c0_i32_0 : i32, i32
  }
  func.func @transform_4(%arg0: i32) -> (i32, i32) {
    %c0_i32 = arith.constant 0 : i32
    %c0_i32_0 = arith.constant 0 : i32
    %c0_i32_1 = arith.constant 0 : i32
    return %c0_i32, %c0_i32_0 : i32, i32
  }
  func.func @transform_5(%arg0: i32) -> (i32, i32) {
    %c0_i32 = arith.constant 0 : i32
    %c0_i32_0 = arith.constant 0 : i32
    %c0_i32_1 = arith.constant 0 : i32
    return %c0_i32, %c0_i32_0 : i32, i32
  }
  func.func @transform_6(%arg0: i32) -> (i32, i32) {
    %c0_i32 = arith.constant 0 : i32
    %c0_i32_0 = arith.constant 0 : i32
    %c0_i32_1 = arith.constant 0 : i32
    return %c0_i32, %c0_i32_0 : i32, i32
  }
  func.func @transform_7(%arg0: i32) -> (i32, i32) {
    %c0_i32 = arith.constant 0 : i32
    %c0_i32_0 = arith.constant 0 : i32
    %c0_i32_1 = arith.constant 0 : i32
    return %c0_i32, %c0_i32_0 : i32, i32
  }
  func.func @transform_8(%arg0: i32) -> (i32, i32) {
    %c0_i32 = arith.constant 0 : i32
    %c0_i32_0 = arith.constant 0 : i32
    %c0_i32_1 = arith.constant 0 : i32
    return %c0_i32, %c0_i32_0 : i32, i32
  }
  func.func @transform_9(%arg0: i32) -> (i32, i32) {
    %c0_i32 = arith.constant 0 : i32
    %c0_i32_0 = arith.constant 0 : i32
    %c0_i32_1 = arith.constant 0 : i32
    return %c0_i32, %c0_i32_0 : i32, i32
  }
  func.func @transform_10(%arg0: i32) -> (i32, i32, i32, i32) {
    %c0_i32 = arith.constant 0 : i32
    %c0_i32_0 = arith.constant 0 : i32
    %c0_i32_1 = arith.constant 0 : i32
    %c0_i32_2 = arith.constant 0 : i32
    return %arg0, %c0_i32, %c0_i32_0, %c0_i32_1 : i32, i32, i32, i32
  }
}

</mosaic_0001>

<bundles_post_ra>
// kernel: tpu_custom_call.1
= control target key start
LH: loop header
LB: loop body
LE: loop exit
PB: predicated region body
PF: predicated region fallthrough
CT: control target
= control target key end

     0   :  { %15 = vsyncpa [#allocation7], 0  ;;  %s19958_s0 = inlined_call_operand.vmem [shape: f32[2,16,18,4], index: 0, kind: input, shape index: {}]   ;;  %s19959_s1 = inlined_call_operand.vmem [shape: f32[2,8,8,4], index: 1, kind: input, shape index: {}]   ;;  %s19960_s2 = inlined_call_operand.vmem [shape: f32[1,4], index: 2, kind: input, shape index: {}]   ;;  %s19961_s3 = inlined_call_operand.vmem [shape: f32[1,4], index: 3, kind: input, shape index: {}]   ;;  %s19962_s4 = inlined_call_operand.vmem [shape: f32[36,8], index: 4, kind: input, shape index: {}]   ;;  %s19963_s5 = inlined_call_operand.vmem [shape: f32[1,8], index: 5, kind: input, shape index: {}]   ;;  %s19964_s6 = inlined_call_operand.vmem [shape: f32[72,8], index: 6, kind: input, shape index: {}]   ;;  %s19965_s7 = inlined_call_operand.vmem [shape: f32[1,8], index: 7, kind: input, shape index: {}]   ;;  %s19966_s8 = inlined_call_operand.vmem [shape: f32[4,8], index: 8, kind: input, shape index: {}]   ;;  %s19967_s9 = inlined_call_operand.vmem [shape: f32[1,8], index: 9, kind: input, shape index: {}]   ;;  %s19968_s10 = inlined_call_operand.hbm [shape: f32[2,8,8,8], index: 10, kind: output, shape index: {}]  }
   0x1   :  { %17 = vsyncpa [#allocation7 + $0x1], 0  ;;  %s16145_s13 = smov 0   ;;  %s16147_s14 = smov 0  }
   0x2   :  { %s16149_s15 = smov 0   ;;  %s16151_s16 = smov 0  }
   0x3 LB: > { %s16166_s17 = sadd.s32 4294967295, %s16078_s16   ;;  %s13540_s18 = sadd.s32 4294967294, %s16078_s16   ;;  %s16078_s16 = sphi %s16151_s16, %s20202_s16   ;;  %s16074_s15 = sphi %s16149_s15, %s20201_s15   ;;  %s16070_s14 = sphi %s16147_s14, %s20200_s14   ;;  %s16066_s13 = sphi %s16145_s13, %s20199_s13  }
   0x4   : > { %s16170_s19 = sadd.s32 1, %s16078_s16   ;;  %s250_s20 = sadd.s32 1, %s16074_s15 }
   0x5   : > { %s247_s21 = ssub.s32 %s16078_s16, %s16170_s19  ;;  %p260_p0 = scmp.ne.s32.totalorder %s16074_s15, %s16070_s14 }
   0x6   : > { %p248_p1 = scmp.eq.s32.totalorder %s247_s21, 0  ;;  %p261_p2 = scmp.eq.s32.totalorder %s16166_s17, 1 }
   0x7   : > { %p266_p3 = scmp.ne.s32.totalorder %s16070_s14, %s16066_s13  ;;  %p267_p4 = scmp.eq.s32.totalorder %s13540_s18, 1 }
   0x8   : > { %s16181_s22 = scalar_select %p248_p1, %s16074_s15, %s250_s20  }
   0x9   : > { %p16183_p5 = por %p261_p2, %p260_p0  ;;  %p16187_p6 = por %p267_p4, %p266_p3 }
   0xa   : > { %p13543_p7 = scmp.ge.s32.totalorder %s16078_s16, 1  ;;  %p325_p8 = scmp.lt.s32.totalorder %s16078_s16, 3 }
   0xc   : > { %p326_p9 = pnand %p13543_p7, %p325_p8 }
   0xe   : > { %329 = sbr.rel (%p326_p9) target bundleno = 1401 (0x579), region = 60 }
  0x15   : > { %v2037_v0 = vld [vmem:[%s19962_s4] sm:$0xf]  ;;  %vm2146_vm0 = vcmask 1043456   ;;  %vm603_vm1 = vcmask 31744   ;;  %v16080_v1 = vmov 0.0   ;;  %p368_p10 = scmp.lt.s32.totalorder %s16166_s17, 1  ;;  %v378_v3 = vlaneseq }
  0x16   : > { %14903 = vmatprep.subr.msk.mxu0 %vm2146_vm0, %v2037_v0  ;;  %604 = vst.msk [vmem:[#allocation2] sm:$0xff] %vm603_vm1, %v16080_v1  ;;  %605 = vst.msk [vmem:[#allocation2 + $0x8] sm:$0xff] %vm603_vm1, %v16080_v1  ;;  %v2969_v2 = vld [vmem:[%s19962_s4 + $0x8] sm:$0xf]  ;;  %15925 = vmatprep.subr.msk.mxu1 %vm2146_vm0, %v2037_v0  ;;  %vm606_vm2 = vcmask 26624   ;;  %vm2395_vm5 = vcmask 64512  }
  0x17   : > { %608 = vst.msk [vmem:[#allocation2 + $0x133] sm:$0xff] %vm603_vm1, %v16080_v1  ;;  %609 = vst.msk [vmem:[#allocation2 + $0x13b] sm:$0xff] %vm603_vm1, %v16080_v1  ;;  %14904 = vmatpush3.msk.msra.mxu0 %vm2146_vm0, %v2037_v0  ;;  %15926 = vmatpush3.msk.msra.mxu1 %vm2146_vm0, %v2037_v0  ;;  %s16216_s29 = scalar_select %p368_p10, %s16166_s17, 1  ;;  %v16218_v4 = vshrl.u32 %v378_v3, 7  ;;  %v16081_v5 = vmov 1983009808  }
  0x18   : > { %610 = vst.msk [vmem:[#allocation2 + $0x143] sm:$0xff] %vm603_vm1, %v16080_v1  ;;  %15015 = vmatprep.subr.msk.mxu0 %vm2146_vm0, %v2969_v2  ;;  %v663_v6 = vunpack.c.l.s4 %v16081_v5  ;;  %v16224_v7 = vld [vmem:[%s19962_s4 + $0x4] sm:$0xf]  ;;  %v16234_v10 = vld [vmem:[%s19960_s2] ss:$0 sm:$0xff]  ;;  %vm7948_vm6 = vcmask 59392  }
  0x19   : > { %607 = vst.msk [vmem:[#allocation2 + $0x10] sm:$0x7] %vm606_vm2, %v16080_v1  ;;  %14959 = vmatprep.subr.msk.mxu1 %vm2146_vm0, %v16224_v7  ;;  %s15927_s12 = smul.u32 384, %s16216_s29  ;;  %v381_v9 = vadd.s32 16, %v16218_v4  ;;  %vm382_vm3 = vcmp.ge.s32.totalorder %v16218_v4, 1  ;;  %s365_s27 = sand.u32 1, %s16070_s14  }
  0x1a   : > { %v664_v8 = vunpack.c.0.s8 %v663_v6  ;;  %v16244_v11 = vld [vmem:[%s19961_s3] ss:$0 sm:$0xff]  ;;  %v16249_v15 = vsel %vm382_vm3, 1.0, %v16080_v1  ;;  %7946 = vst.msk [vmem:[#allocation3] sm:$0xff] %vm2395_vm5, %v16080_v1  ;;  %7947 = vst.msk [vmem:[#allocation3 + $0x8] sm:$0xff] %vm2395_vm5, %v16080_v1  ;;  %s16087_s28 = smov [#allocation6]  }
  0x1b   : > { %s16239_s26 = scalar_lea.vmem %s19958_s0, %s15927_s12  ;;  %vm387_vm4 = vcmp.le.s32.totalorder %v381_v9, 16  ;;  %7950 = vst.msk [vmem:[#allocation3 + $0x133] sm:$0xff] %vm2395_vm5, %v16080_v1  ;;  %7951 = vst.msk [vmem:[#allocation3 + $0x13b] sm:$0xff] %vm2395_vm5, %v16080_v1  ;;  %s14226_s12 = sshll.u32 %s16216_s29, 6 }
  0x1c   : > { %v397_v14 = vld [vmem:[%s16239_s26] sm:$0xff]  ;;  %v16253_v17 = vsub.s32 %v664_v8, %v16218_v4  ;;  %v435_v18 = vld [vmem:[%s16239_s26 + $0x130] sm:$0x3]  ;;  %v436_v19 = vld [vmem:[%s16239_s26 + $0x138] sm:$0xff]  ;;  %v16260_v21 = vsel %vm387_vm4, 1.0, %v16080_v1  ;;  %7952 = vst.msk [vmem:[#allocation3 + $0x143] sm:$0xff] %vm2395_vm5, %v16080_v1  ;;  %s19503_s21 = scalar_lea.vmem %s19959_s1, %s14226_s12 }
  0x1d   : > { %v2001_v12 = vld [vmem:[#allocation2] sm:$0xff]  ;;  %v2002_v13 = vld [vmem:[#allocation2 + $0x8] sm:$0xff]  ;;  %v452_v16 = vmul.f32 %v16234_v10, %v397_v14  ;;  %v490_v22 = vmul.f32 %v16234_v10, %v435_v18  ;;  %v491_v23 = vmul.f32 %v16234_v10, %v436_v19  ;;  %v439_v27 = vld [vmem:[%s16239_s26 + $0x150] sm:$0xff]  ;;  %7949 = vst.msk [vmem:[#allocation3 + $0x10] sm:$0x7] %vm7948_vm6, %v16080_v1  ;;  %s14227_s12 = sshll.u32 %s16166_s17, 10 }
  0x1e   : > { %14905 = vmatprep.mubr.msk.f32.mxu0 %vm603_vm1, %v2001_v12  ;;  %v437_v20 = vld [vmem:[%s16239_s26 + $0x140] sm:$0xff]  ;;  %v398_v25 = vld [vmem:[%s16239_s26 + $0x8] sm:$0xff]  ;;  %v494_v31 = vmul.f32 %v16234_v10, %v439_v27  ;;  %v399_v32 = vld [vmem:[%s16239_s26 + $0x10] sm:$0x3]  ;;  %s19908_s29 = scalar_lea.hbm %s19968_s10, %s14227_s12  ;;  %s19917_s17 = scalar_lea.sflag [#allocation7], %s365_s27 }
  0x1f   : > { %14906 = vmatmul.mubr.msk.f32.vlgmr.msra.gmra.mrb[0].mxu0 %vm603_vm1, %v2002_v13  ;;  %v492_v24 = vmul.f32 %v16234_v10, %v437_v20  ;;  %v438_v26 = vld [vmem:[%s16239_s26 + $0x148] sm:$0x3]  ;;  %v507_v28 = vadd.f32 %v16244_v11, %v452_v16  ;;  %v453_v29 = vmul.f32 %v16234_v10, %v398_v25  ;;  %v545_v33 = vadd.f32 %v16244_v11, %v490_v22  ;;  %v400_v8 = vld [vmem:[%s16239_s26 + $0x18] sm:$0xff]  ;;  %s16020_s30 = sshll.u32 %s16087_s28, 4  ;;  %s16021_s30 = int_to_ptr.vmem [resolvable:$false] %s16020_s30 }
  0x20   : > { %15016 = vmatpush3.msk.msra.mxu0 %vm2146_vm0, %v2969_v2  ;;  %v493_v30 = vmul.f32 %v16234_v10, %v438_v26  ;;  %v546_v34 = vadd.f32 %v16244_v11, %v491_v23  ;;  %v454_v36 = vmul.f32 %v16234_v10, %v399_v32  ;;  %v549_v40 = vadd.f32 %v16244_v11, %v494_v31  ;;  %v440_v26 = vld [vmem:[%s16239_s26 + $0x158] sm:$0xff] }
  0x21   : > { %v547_v35 = vadd.f32 %v16244_v11, %v492_v24  ;;  %v555_v37 = vmul.f32 %v16249_v15, %v507_v28  ;;  %v508_v38 = vadd.f32 %v16244_v11, %v453_v29  ;;  %v593_v41 = vmul.f32 %v16260_v21, %v545_v33 }
  0x22   : > { %v548_v39 = vadd.f32 %v16244_v11, %v493_v30  ;;  %v594_v42 = vmul.f32 %v16249_v15, %v546_v34  ;;  %v597_v24 = vmul.f32 %v16249_v15, %v549_v40  ;;  %v455_v25 = vmul.f32 %v16234_v10, %v400_v8 }
  0x23   : > { %v1211_v43 = vcombine.high %v547_v35, %v547_v35  ;;  %v1218_v44 = vrot.slane %v547_v35, %v16253_v17  ;;  %v661_v45 = vcombine.high %v555_v37, %v555_v37  ;;  %v668_v46 = vrot.slane %v555_v37, %v16253_v17  ;;  %v401_v35 = vld [vmem:[%s16239_s26 + $0x20] sm:$0xff] }
  0x24   : > { %v678_v47 = vcombine.high %v508_v38, %v508_v38  ;;  %v685_v48 = vrot.slane %v508_v38, %v16253_v17  ;;  %v1193_v49 = vrot.slane %v593_v41, %v16253_v17  ;;  %v1194_v50 = vcombine.high %v594_v42, %v594_v42  ;;  %v441_v37 = vld [vmem:[%s16239_s26 + $0x160] sm:$0x3]  ;;  %v3971_v38 = vld [vmem:[%s19962_s4 + $0x10] sm:$0xf] }
  0x25   : > { %v1201_v51 = vrot.slane %v594_v42, %v16253_v17  ;;  %v1225_v52 = vrot.slane %v1211_v43, %v16253_v17  ;;  %v675_v53 = vrot.slane %v661_v45, %v16253_v17  ;;  %v676_v54 = vcombine.high %v668_v46, %v668_v46  ;;  %15127 = vmatprep.subr.msk.mxu0 %vm2146_vm0, %v3971_v38 }
  0x26   : > { %v1226_v55 = vcombine.high %v1218_v44, %v1218_v44  ;;  %v692_v56 = vrot.slane %v678_v47, %v16253_v17  ;;  %v1208_v57 = vrot.slane %v1194_v50, %v16253_v17  ;;  %v693_v0 = vcombine.high %v685_v48, %v685_v48 }
  0x27   : > { %v1209_v58 = vcombine.high %v1201_v51, %v1201_v51  ;;  %v1227_v59 = vcombine.high %v1225_v52, %v1225_v52  ;;  %v1810_v60 = vcombine.low %v1193_v49, %v1201_v51  ;;  %v677_v61 = vcombine.high %v675_v53, %v675_v53 }
  0x28   : > { %v1317_v62 = vcombine.low %v668_v46, %v676_v54  ;;  %v1828_v63 = vcombine.low %v1226_v55, %v1225_v52  ;;  %v1210_v2 = vcombine.high %v1208_v57, %v1208_v57  ;;  %v694_v6 = vcombine.high %v692_v56, %v692_v56  ;;  %v442_v46 = vld [vmem:[%s16239_s26 + $0x168] sm:$0xff] }
  0x29   : > { %v1811_v3 = vcombine.low %v1209_v58, %v1208_v57  ;;  %v1818_v5 = vrot.slane %v1810_v60, %v16253_v17  ;;  %v1318_v9 = vcombine.low %v675_v53, %v677_v61  ;;  %v1334_v14 = vcombine.low %v685_v48, %v693_v0 }
  0x2a   : > { %v1325_v12 = vrot.slane %v1317_v62, %v16253_v17  ;;  %v1842_v13 = vrot.slane %v1828_v63, %v16253_v17  ;;  %v1827_v18 = vcombine.low %v1210_v2, %v1218_v44  ;;  %v1335_v19 = vcombine.low %v692_v56, %v694_v6 }
  0x2b   : > { %v1825_v16 = vrot.slane %v1811_v3, %v16253_v17  ;;  %v596_v20 = vmul.f32 %v16260_v21, %v548_v39  ;;  %v1332_v22 = vrot.slane %v1318_v9, %v16253_v17  ;;  %v1342_v23 = vrot.slane %v1334_v14, %v16253_v17 }
  0x2c   : > { %v1835_v28 = vrot.slane %v1827_v18, %v16253_v17  ;;  %v1349_v29 = vrot.slane %v1335_v19, %v16253_v17  ;;  %v1242_v32 = vrot.slane %v597_v24, %v16253_v17  ;;  %v509_v33 = vadd.f32 %v16244_v11, %v454_v36 }
  0x2d   : > { %v1826_v27 = vcombine.low %v1818_v5, %v1825_v16  ;;  %v1234_v30 = vrot.slane %v596_v20, %v16253_v17  ;;  %v1333_v31 = vcombine.low %v1325_v12, %v1332_v22  ;;  %v510_v34 = vadd.f32 %v16244_v11, %v455_v25 }
  0x2e   : > { %v1843_v39 = vcombine.low %v1835_v28, %v1842_v13  ;;  %v1350_v40 = vcombine.low %v1342_v23, %v1349_v29  ;;  %v495_v42 = vmul.f32 %v16234_v10, %v440_v26  ;;  %v1250_v36 = vcombine.high %v1242_v32, %v1242_v32  ;;  %v402_v26 = vld [vmem:[%s16239_s26 + $0x28] sm:$0x3] }
  0x2f   : > { %1994 = vst.msk [vmem:[#allocation2 + $0xfb] sm:$0xff] %vm603_vm1, %v1826_v27  ;;  %v1844_v41 = vcombine.low %v1227_v59, %v1234_v30  ;;  %1965 = vst.msk [vmem:[#allocation2 + $0x13] sm:$0xff] %vm603_vm1, %v1333_v31  ;;  %v557_v43 = vmul.f32 %v16260_v21, %v509_v33  ;;  %v558_v44 = vmul.f32 %v16249_v15, %v510_v34  ;;  %v403_v30 = vld [vmem:[%s16239_s26 + $0x30] sm:$0xff] }
  0x30   : > { %v1235_v45 = vcombine.high %v597_v24, %v597_v24  ;;  %1995 = vst.msk [vmem:[#allocation2 + $0x103] sm:$0xff] %vm603_vm1, %v1843_v39  ;;  %1966 = vst.msk [vmem:[#allocation2 + $0x1b] sm:$0xff] %vm603_vm1, %v1350_v40  ;;  %v16326_v48 = vadd.f32 %v16244_v11, %v495_v42  ;;  %v456_v49 = vmul.f32 %v16234_v10, %v401_v35  ;;  %v404_v35 = vld [vmem:[%s16239_s26 + $0x38] sm:$0xff]  ;;  %v406_v42 = vld [vmem:[%s16239_s26 + $0x48] sm:$0xff] }
  0x31   : > { %v1852_v47 = vrot.slane %v1844_v41, %v16253_v17  ;;  %v496_v50 = vmul.f32 %v16234_v10, %v441_v37  ;;  %v1845_v51 = vcombine.low %v1242_v32, %v1250_v36  ;;  %v701_v52 = vrot.slane %v557_v43, %v16253_v17  ;;  %v405_v41 = vld [vmem:[%s16239_s26 + $0x40] sm:$0x3] }
  0x32   : > { %v702_v53 = vcombine.high %v558_v44, %v558_v44  ;;  %v709_v54 = vrot.slane %v558_v44, %v16253_v17  ;;  %v1249_v55 = vrot.slane %v1235_v45, %v16253_v17  ;;  %v1259_v56 = vrot.slane %v16326_v48, %v16253_v17 }
  0x33   : > { %v511_v57 = vadd.f32 %v16244_v11, %v456_v49  ;;  %v497_v58 = vmul.f32 %v16234_v10, %v442_v46  ;;  %v1859_v59 = vrot.slane %v1845_v51, %v16253_v17  ;;  %v551_v24 = vadd.f32 %v16244_v11, %v496_v50  ;;  %v407_v46 = vld [vmem:[%s16239_s26 + $0x50] sm:$0xff] }
  0x34   : > { %v716_v60 = vrot.slane %v702_v53, %v16253_v17  ;;  %v717_v61 = vcombine.high %v709_v54, %v709_v54  ;;  %v1351_v62 = vcombine.low %v701_v52, %v709_v54  ;;  %v1251_v63 = vcombine.high %v1249_v55, %v1249_v55 }
  0x35   : > { %v1267_v0 = vcombine.high %v1259_v56, %v1259_v56  ;;  %v719_v2 = vcombine.high %v511_v57, %v511_v57  ;;  %v726_v3 = vrot.slane %v511_v57, %v16253_v17  ;;  %v1860_v5 = vcombine.low %v1852_v47, %v1859_v59 }
  0x36   : > { %v1352_v6 = vcombine.low %v717_v61, %v716_v60  ;;  %v1359_v8 = vrot.slane %v1351_v62, %v16253_v17  ;;  %v718_v9 = vcombine.high %v716_v60, %v716_v60  ;;  %v2003_v12 = vld [vmem:[#allocation2 + $0x10] sm:$0xff]  ;;  %v1861_v13 = vcombine.low %v1249_v55, %v1251_v63  ;;  %v16393_v60 = vld [vmem:[%s19962_s4 + $0xc] sm:$0xf] }
  0x37   : > { %v1862_v14 = vcombine.low %v1259_v56, %v1267_v0  ;;  %v16342_v16 = vrot.slane %v719_v2, %v16253_v17  ;;  %v734_v18 = vcombine.high %v726_v3, %v726_v3  ;;  %14908 = vmatprep.mubr.msk.f32.mxu0 %vm603_vm1, %v2003_v12  ;;  %v2033_v19 = vld [vmem:[#allocation2 + $0x100] sm:$0xff]  ;;  %v2004_v20 = vld [vmem:[#allocation2 + $0x18] sm:$0xff]  ;;  %1996 = vst.msk [vmem:[#allocation2 + $0x10b] sm:$0xff] %vm603_vm1, %v1860_v5 }
  0x38   : > { %v1366_v22 = vrot.slane %v1352_v6, %v16253_v17  ;;  %v1368_v23 = vcombine.low %v718_v9, %v726_v3  ;;  %v552_v25 = vadd.f32 %v16244_v11, %v497_v58  ;;  %14953 = vmatprep.mubr.msk.f32.mxu1 %vm603_vm1, %v2033_v19  ;;  %14909 = vmatmul.mubr.msk.f32.gmra.mrb[2].mxu0 %vm603_vm1, %v2004_v20 }
  0x39   : > { %v1869_v27 = vrot.slane %v1861_v13, %v16253_v17  ;;  %v1876_v28 = vrot.slane %v1862_v14, %v16253_v17  ;;  %v1369_v29 = vcombine.low %v734_v18, %v16342_v16  ;;  %v599_v33 = vmul.f32 %v16260_v21, %v551_v24 }
  0x3a   : > { %v1367_v31 = vcombine.low %v1359_v8, %v1366_v22  ;;  %v1376_v32 = vrot.slane %v1368_v23, %v16253_v17  ;;  %v16359_v34 = vmul.f32 %v16249_v15, %v552_v25  ;;  %v1252_v39 = vcombine.high %v16326_v48, %v16326_v48 }
  0x3b   : > { %v1877_v37 = vcombine.low %v1869_v27, %v1876_v28  ;;  %v1383_v38 = vrot.slane %v1369_v29, %v16253_v17  ;;  %v457_v40 = vmul.f32 %v16234_v10, %v402_v26  ;;  %v1275_v36 = vrot.slane %v599_v33, %v16253_v17 }
  0x3c   : > { %1967 = vst.msk [vmem:[#allocation2 + $0x23] sm:$0xff] %vm603_vm1, %v1367_v31  ;;  %v16372_v43 = vrot.slane %v16359_v34, %v16253_v17  ;;  %v458_v44 = vmul.f32 %v16234_v10, %v403_v30  ;;  %v735_v45 = vcombine.high %v16342_v16, %v16342_v16  ;;  %v1266_v48 = vrot.slane %v1252_v39, %v16253_v17 }
  0x3d   : > { %1997 = vst.msk [vmem:[#allocation2 + $0x113] sm:$0xff] %vm603_vm1, %v1877_v37  ;;  %v1384_v47 = vcombine.low %v1376_v32, %v1383_v38  ;;  %v512_v49 = vadd.f32 %v16244_v11, %v457_v40  ;;  %v459_v50 = vmul.f32 %v16234_v10, %v404_v35  ;;  %v460_v53 = vmul.f32 %v16234_v10, %v405_v41  ;;  %v408_v37 = vld [vmem:[%s16239_s26 + $0x58] sm:$0x3] }
  0x3e   : > { %v1879_v51 = vcombine.low %v1275_v36, %v16372_v43  ;;  %v513_v52 = vadd.f32 %v16244_v11, %v458_v44  ;;  %v461_v54 = vmul.f32 %v16234_v10, %v406_v42  ;;  %v2034_v55 = vld [vmem:[#allocation2 + $0x108] sm:$0xff]  ;;  %v1268_v56 = vcombine.high %v1266_v48, %v1266_v48  ;;  %v409_v42 = vld [vmem:[%s16239_s26 + $0x60] sm:$0xff] }
  0x3f   : > { %1968 = vst.msk [vmem:[#allocation2 + $0x2b] sm:$0xff] %vm603_vm1, %v1384_v47  ;;  %v560_v57 = vmul.f32 %v16260_v21, %v512_v49  ;;  %v514_v58 = vadd.f32 %v16244_v11, %v459_v50  ;;  %v462_v59 = vmul.f32 %v16234_v10, %v407_v46  ;;  %14954 = vmatmul.mubr.msk.f32.vlgmr.msra.gmra.mrb[0].mxu1 %vm603_vm1, %v2034_v55 }
  0x40   : > { %v1893_v61 = vrot.slane %v1879_v51, %v16253_v17  ;;  %v561_v62 = vmul.f32 %v16249_v15, %v513_v52  ;;  %v515_v63 = vadd.f32 %v16244_v11, %v460_v53  ;;  %v516_v0 = vadd.f32 %v16244_v11, %v461_v54  ;;  %14960 = vmatpush3.msk.msra.mxu1 %vm2146_vm0, %v16224_v7  ;;  %v410_v51 = vld [vmem:[%s16239_s26 + $0x68] sm:$0xff] }
  0x41   : > { %v1878_v2 = vcombine.low %v1266_v48, %v1268_v56  ;;  %v742_v3 = vrot.slane %v560_v57, %v16253_v17  ;;  %v767_v5 = vrot.slane %v514_v58, %v16253_v17  ;;  %v760_v6 = vcombine.high %v514_v58, %v514_v58  ;;  %15071 = vmatprep.subr.msk.mxu1 %vm2146_vm0, %v16393_v60  ;;  %v411_v56 = vld [vmem:[%s16239_s26 + $0x70] sm:$0x3] }
  0x42   : > { %v750_v8 = vrot.slane %v561_v62, %v16253_v17  ;;  %v743_v9 = vcombine.high %v561_v62, %v561_v62  ;;  %v563_v12 = vmul.f32 %v16260_v21, %v515_v63  ;;  %v564_v13 = vmul.f32 %v16249_v15, %v516_v0 }
  0x43   : > { %v2005_v14 = vld [vmem:[#allocation2 + $0x20] sm:$0xff]  ;;  %v1886_v16 = vrot.slane %v1878_v2, %v16253_v17  ;;  %v1385_v18 = vcombine.low %v735_v45, %v742_v3  ;;  %v775_v19 = vcombine.high %v767_v5, %v767_v5  ;;  %v774_v7 = vrot.slane %v760_v6, %v16253_v17  ;;  %v412_v3 = vld [vmem:[%s16239_s26 + $0x78] sm:$0xff] }
  0x44   : > { %14911 = vmatprep.mubr.msk.f32.mxu0 %vm603_vm1, %v2005_v14  ;;  %v2035_v20 = vld [vmem:[#allocation2 + $0x110] sm:$0xff]  ;;  %v758_v22 = vcombine.high %v750_v8, %v750_v8  ;;  %v757_v23 = vrot.slane %v743_v9, %v16253_v17  ;;  %v783_v24 = vrot.slane %v563_v12, %v16253_v17  ;;  %v791_v25 = vrot.slane %v564_v13, %v16253_v17 }
  0x45   : > { %14956 = vmatprep.mubr.msk.f32.mxu1 %vm603_vm1, %v2035_v20  ;;  %v1894_v26 = vcombine.low %v1886_v16, %v1893_v61  ;;  %v1393_v27 = vrot.slane %v1385_v18, %v16253_v17  ;;  %v1403_v28 = vcombine.low %v767_v5, %v775_v19  ;;  %v776_v29 = vcombine.high %v774_v7, %v774_v7  ;;  %v2432_v5 = vld [vmem:[#allocation2 + $0x1] sm:$0xff] }
  0x46   : > { %v2006_v30 = vld [vmem:[#allocation2 + $0x28] sm:$0xff]  ;;  %v1386_v31 = vcombine.low %v750_v8, %v758_v22  ;;  %v759_v32 = vcombine.high %v757_v23, %v757_v23  ;;  %v1420_v33 = vcombine.low %v783_v24, %v791_v25  ;;  %v517_v35 = vadd.f32 %v16244_v11, %v462_v59 }
  0x47   : > { %14912 = vmatmul.mubr.msk.f32.gmra.mrb[4].mxu0 %vm603_vm1, %v2006_v30  ;;  %1998 = vst.msk [vmem:[#allocation2 + $0x11b] sm:$0xff] %vm603_vm1, %v1894_v26  ;;  %v1417_v38 = vrot.slane %v1403_v28, %v16253_v17  ;;  %v1419_v39 = vcombine.low %v774_v7, %v776_v29  ;;  %v784_v40 = vcombine.high %v564_v13, %v564_v13  ;;  %v2433_v24 = vld [vmem:[#allocation2 + $0x9] sm:$0xff]  ;;  %v413_v29 = vld [vmem:[%s16239_s26 + $0x80] sm:$0xff]  ;;  %v2434_v30 = vld [vmem:[#allocation2 + $0x11] sm:$0xff] }
  0x48   : > { %v799_v41 = vcombine.high %v791_v25, %v791_v25  ;;  %v1400_v36 = vrot.slane %v1386_v31, %v16253_v17  ;;  %v1402_v44 = vcombine.low %v757_v23, %v759_v32  ;;  %v1434_v45 = vrot.slane %v1420_v33, %v16253_v17 }
  0x49   : > { %v808_v46 = vrot.slane %v517_v35, %v16253_v17  ;;  %v1427_v47 = vrot.slane %v1419_v39, %v16253_v17  ;;  %v798_v48 = vrot.slane %v784_v40, %v16253_v17  ;;  %v463_v49 = vmul.f32 %v16234_v10, %v408_v37 }
  0x4a   : > { %v801_v50 = vcombine.high %v517_v35, %v517_v35  ;;  %v1401_v52 = vcombine.low %v1393_v27, %v1400_v36  ;;  %v1410_v53 = vrot.slane %v1402_v44, %v16253_v17  ;;  %v464_v55 = vmul.f32 %v16234_v10, %v409_v42 }
  0x4b   : > { %v816_v54 = vcombine.high %v808_v46, %v808_v46  ;;  %v1435_v57 = vcombine.low %v1427_v47, %v1434_v45  ;;  %v800_v58 = vcombine.high %v798_v48, %v798_v48  ;;  %v1436_v59 = vcombine.low %v799_v41, %v798_v48 }
  0x4c   : > { %v518_v61 = vadd.f32 %v16244_v11, %v463_v49  ;;  %1969 = vst.msk [vmem:[#allocation2 + $0x33] sm:$0xff] %vm603_vm1, %v1401_v52  ;;  %v1418_v62 = vcombine.low %v1410_v53, %v1417_v38  ;;  %v815_v63 = vrot.slane %v801_v50, %v16253_v17  ;;  %v519_v0 = vadd.f32 %v16244_v11, %v464_v55  ;;  %v2436_v53 = vld [vmem:[#allocation2 + $0x21] sm:$0xff] }
  0x4d   : > { %v465_v2 = vmul.f32 %v16234_v10, %v410_v51  ;;  %1971 = vst.msk [vmem:[#allocation2 + $0x43] sm:$0xff] %vm603_vm1, %v1435_v57  ;;  %v1437_v6 = vcombine.low %v800_v58, %v808_v46  ;;  %v1444_v8 = vrot.slane %v1436_v59, %v16253_v17  ;;  %v466_v12 = vmul.f32 %v16234_v10, %v411_v56  ;;  %v2435_v46 = vld [vmem:[#allocation2 + $0x19] sm:$0xff] }
  0x4e   : > { %v566_v9 = vmul.f32 %v16260_v21, %v518_v61  ;;  %v2036_v13 = vld [vmem:[#allocation2 + $0x118] sm:$0xff]  ;;  %1970 = vst.msk [vmem:[#allocation2 + $0x3b] sm:$0xff] %vm603_vm1, %v1418_v62  ;;  %v817_v14 = vcombine.high %v815_v63, %v815_v63  ;;  %v1453_v16 = vcombine.low %v816_v54, %v815_v63  ;;  %v567_v18 = vmul.f32 %v16249_v15, %v519_v0  ;;  %v414_v62 = vld [vmem:[%s16239_s26 + $0x88] sm:$0x3] }
  0x4f   : > { %v520_v19 = vadd.f32 %v16244_v11, %v465_v2  ;;  %14957 = vmatmul.mubr.msk.f32.gmra.mrb[2].mxu1 %vm603_vm1, %v2036_v13  ;;  %v1451_v7 = vrot.slane %v1437_v6, %v16253_v17  ;;  %v467_v22 = vmul.f32 %v16234_v10, %v412_v3  ;;  %v521_v23 = vadd.f32 %v16244_v11, %v466_v12  ;;  %v2437_v3 = vld [vmem:[#allocation2 + $0x29] sm:$0xff] }
  0x50   : > { %v824_v20 = vrot.slane %v566_v9, %v16253_v17  ;;  %14961 = vmatprep.mubr.msk.f32.mxu1 %vm603_vm1, %v2432_v5  ;;  %v1461_v25 = vrot.slane %v1453_v16, %v16253_v17  ;;  %v825_v26 = vcombine.high %v567_v18, %v567_v18  ;;  %v832_v27 = vrot.slane %v567_v18, %v16253_v17  ;;  %v415_v16 = vld [vmem:[%s16239_s26 + $0x90] sm:$0xff] }
  0x51   : > { %v842_v28 = vcombine.high %v520_v19, %v520_v19  ;;  %v1452_v31 = vcombine.low %v1444_v8, %v1451_v7  ;;  %v849_v33 = vrot.slane %v520_v19, %v16253_v17  ;;  %v522_v35 = vadd.f32 %v16244_v11, %v467_v22  ;;  %v416_v19 = vld [vmem:[%s16239_s26 + $0x98] sm:$0xff] }
  0x52   : > { %v1454_v32 = vcombine.low %v817_v14, %v824_v20  ;;  %v839_v37 = vrot.slane %v825_v26, %v16253_v17  ;;  %v840_v38 = vcombine.high %v832_v27, %v832_v27  ;;  %v569_v40 = vmul.f32 %v16260_v21, %v521_v23 }
  0x53   : > { %v856_v39 = vrot.slane %v842_v28, %v16253_v17  ;;  %v2007_v41 = vld [vmem:[#allocation2 + $0x30] sm:$0xff]  ;;  %14962 = vmatmul.mubr.msk.f32.vlgmr.msra.gmra.mrb[4].mxu1 %vm603_vm1, %v2433_v24  ;;  %1972 = vst.msk [vmem:[#allocation2 + $0x4b] sm:$0xff] %vm603_vm1, %v1452_v31  ;;  %v857_v36 = vcombine.high %v849_v33, %v849_v33  ;;  %v570_v44 = vmul.f32 %v16249_v15, %v522_v35  ;;  %v418_v35 = vld [vmem:[%s16239_s26 + $0xa8] sm:$0xff] }
  0x54   : > { %v1468_v42 = vrot.slane %v1454_v32, %v16253_v17  ;;  %v468_v45 = vmul.f32 %v16234_v10, %v413_v29  ;;  %14914 = vmatprep.mubr.msk.f32.mxu0 %vm603_vm1, %v2007_v41  ;;  %14964 = vmatprep.mubr.msk.f32.mxu1 %vm603_vm1, %v2434_v30  ;;  %v841_v47 = vcombine.high %v839_v37, %v839_v37  ;;  %v2438_v9 = vld [vmem:[#allocation2 + $0x31] sm:$0xff] }
  0x55   : > { %v1470_v48 = vcombine.low %v832_v27, %v840_v38  ;;  %v858_v49 = vcombine.high %v856_v39, %v856_v39  ;;  %v2008_v50 = vld [vmem:[#allocation2 + $0x38] sm:$0xff]  ;;  %v2009_v51 = vld [vmem:[#allocation2 + $0x40] sm:$0xff]  ;;  %v1487_v54 = vcombine.low %v849_v33, %v857_v36  ;;  %v865_v55 = vrot.slane %v569_v40, %v16253_v17  ;;  %15072 = vmatpush3.msk.msra.mxu1 %vm2146_vm0, %v16393_v60 }
  0x56   : > { %v1469_v52 = vcombine.low %v1461_v25, %v1468_v42  ;;  %v866_v56 = vcombine.high %v570_v44, %v570_v44  ;;  %14915 = vmatmul.mubr.msk.f32.gmra.mrb[6].mxu0 %vm603_vm1, %v2008_v50  ;;  %v1471_v57 = vcombine.low %v839_v37, %v841_v47  ;;  %v873_v61 = vrot.slane %v570_v44, %v16253_v17  ;;  %v417_v25 = vld [vmem:[%s16239_s26 + $0xa0] sm:$0x3]  ;;  %v419_v47 = vld [vmem:[%s16239_s26 + $0xb0] sm:$0xff] }
  0x57   : > { %v1478_v58 = vrot.slane %v1470_v48, %v16253_v17  ;;  %v1488_v59 = vcombine.low %v856_v39, %v858_v49  ;;  %14917 = vmatprep.mubr.msk.f32.mxu0 %vm603_vm1, %v2009_v51  ;;  %14965 = vmatmul.mubr.msk.f32.gmra.mrb[6].mxu1 %vm603_vm1, %v2435_v46  ;;  %v1495_v63 = vrot.slane %v1487_v54, %v16253_v17  ;;  %v2439_v30 = vld [vmem:[#allocation2 + $0x39] sm:$0xff]  ;;  %v2440_v39 = vld [vmem:[#allocation2 + $0x41] sm:$0xff] }
  0x58   : > { %1973 = vst.msk [vmem:[#allocation2 + $0x53] sm:$0xff] %vm603_vm1, %v1469_v52  ;;  %v880_v60 = vrot.slane %v866_v56, %v16253_v17  ;;  %v523_v0 = vadd.f32 %v16244_v11, %v468_v45  ;;  %14967 = vmatprep.mubr.msk.f32.mxu1 %vm603_vm1, %v2436_v53  ;;  %v1485_v2 = vrot.slane %v1471_v57, %v16253_v17 }
  0x59   : > { %v1502_v5 = vrot.slane %v1488_v59, %v16253_v17  ;;  %v881_v6 = vcombine.high %v873_v61, %v873_v61  ;;  %v1504_v8 = vcombine.low %v865_v55, %v873_v61  ;;  %v469_v18 = vmul.f32 %v16234_v10, %v414_v62 }
  0x5a   : > { %v882_v12 = vcombine.high %v880_v60, %v880_v60  ;;  %v883_v13 = vcombine.high %v523_v0, %v523_v0  ;;  %v890_v14 = vrot.slane %v523_v0, %v16253_v17  ;;  %v2010_v7 = vld [vmem:[#allocation2 + $0x48] sm:$0xff]  ;;  %v1486_v20 = vcombine.low %v1478_v58, %v1485_v2 }
  0x5b   : > { %v1503_v22 = vcombine.low %v1495_v63, %v1502_v5  ;;  %v1505_v23 = vcombine.low %v881_v6, %v880_v60  ;;  %v1512_v24 = vrot.slane %v1504_v8, %v16253_v17  ;;  %14918 = vmatmul.mubr.msk.f32.gmra.mrb[8].mxu0 %vm603_vm1, %v2010_v7  ;;  %14968 = vmatmul.mubr.msk.f32.gmra.mrb[8].mxu1 %vm603_vm1, %v2437_v3  ;;  %v2441_v53 = vld [vmem:[#allocation2 + $0x49] sm:$0xff] }
  0x5c   : > { %v897_v26 = vrot.slane %v883_v13, %v16253_v17  ;;  %v898_v27 = vcombine.high %v890_v14, %v890_v14  ;;  %v1521_v28 = vcombine.low %v882_v12, %v890_v14  ;;  %1974 = vst.msk [vmem:[#allocation2 + $0x5b] sm:$0xff] %vm603_vm1, %v1486_v20  ;;  %14970 = vmatprep.mubr.msk.f32.mxu1 %vm603_vm1, %v2438_v9 }
  0x5d   : > { %1975 = vst.msk [vmem:[#allocation2 + $0x63] sm:$0xff] %vm603_vm1, %v1503_v22  ;;  %v1519_v29 = vrot.slane %v1505_v23, %v16253_v17  ;;  %v470_v31 = vmul.f32 %v16234_v10, %v415_v16  ;;  %v524_v32 = vadd.f32 %v16244_v11, %v469_v18  ;;  %v471_v33 = vmul.f32 %v16234_v10, %v416_v19  ;;  %v420_v23 = vld [vmem:[%s16239_s26 + $0xb8] sm:$0x3] }
  0x5e   : > { %v1522_v37 = vcombine.low %v898_v27, %v897_v26  ;;  %v1529_v38 = vrot.slane %v1521_v28, %v16253_v17  ;;  %v899_v40 = vcombine.high %v897_v26, %v897_v26  ;;  %v472_v41 = vmul.f32 %v16234_v10, %v417_v25 }
  0x5f   : > { %v2011_v42 = vld [vmem:[#allocation2 + $0x50] sm:$0xff]  ;;  %v1520_v36 = vcombine.low %v1512_v24, %v1519_v29  ;;  %v525_v44 = vadd.f32 %v16244_v11, %v470_v31  ;;  %v572_v45 = vmul.f32 %v16260_v21, %v524_v32  ;;  %v526_v46 = vadd.f32 %v16244_v11, %v471_v33  ;;  %14971 = vmatmul.mubr.msk.f32.gmra.mrb[10].mxu1 %vm603_vm1, %v2439_v30 }
  0x60   : > { %14920 = vmatprep.mubr.msk.f32.mxu0 %vm603_vm1, %v2011_v42  ;;  %v1536_v48 = vrot.slane %v1522_v37, %v16253_v17  ;;  %v473_v49 = vmul.f32 %v16234_v10, %v418_v35  ;;  %v527_v50 = vadd.f32 %v16244_v11, %v472_v41  ;;  %14973 = vmatprep.mubr.msk.f32.mxu1 %vm603_vm1, %v2440_v39  ;;  %v2442_v0 = vld [vmem:[#allocation2 + $0x51] sm:$0xff]  ;;  %v422_v39 = vld [vmem:[%s16239_s26 + $0xc8] sm:$0xff] }
  0x61   : > { %1976 = vst.msk [vmem:[#allocation2 + $0x6b] sm:$0xff] %vm603_vm1, %v1520_v36  ;;  %v573_v51 = vmul.f32 %v16249_v15, %v525_v44  ;;  %v906_v52 = vrot.slane %v572_v45, %v16253_v17  ;;  %v931_v54 = vrot.slane %v526_v46, %v16253_v17  ;;  %v924_v55 = vcombine.high %v526_v46, %v526_v46  ;;  %v423_v45 = vld [vmem:[%s16239_s26 + $0xd0] sm:$0x3]  ;;  %v16549_v46 = vld [vmem:[%s19962_s4 + $0x14] sm:$0xf] }
  0x62   : > { %v1537_v56 = vcombine.low %v1529_v38, %v1536_v48  ;;  %v528_v57 = vadd.f32 %v16244_v11, %v473_v49  ;;  %v575_v58 = vmul.f32 %v16260_v21, %v527_v50  ;;  %v474_v59 = vmul.f32 %v16234_v10, %v419_v47  ;;  %v421_v38 = vld [vmem:[%s16239_s26 + $0xc0] sm:$0xff]  ;;  %15183 = vmatprep.subr.msk.mxu1 %vm2146_vm0, %v16549_v46 }
  0x63   : > { %v914_v61 = vrot.slane %v573_v51, %v16253_v17  ;;  %v1538_v62 = vcombine.low %v899_v40, %v906_v52  ;;  %v907_v63 = vcombine.high %v573_v51, %v573_v51  ;;  %v939_v60 = vcombine.high %v931_v54, %v931_v54  ;;  %v2012_v2 = vld [vmem:[#allocation2 + $0x58] sm:$0xff]  ;;  %14974 = vmatmul.mubr.msk.f32.gmra.mrb[12].mxu1 %vm603_vm1, %v2441_v53 }
  0x64   : > { %v2013_v3 = vld [vmem:[#allocation2 + $0x60] sm:$0xff]  ;;  %1977 = vst.msk [vmem:[#allocation2 + $0x73] sm:$0xff] %vm603_vm1, %v1537_v56  ;;  %v576_v5 = vmul.f32 %v16249_v15, %v528_v57  ;;  %v938_v6 = vrot.slane %v924_v55, %v16253_v17  ;;  %v947_v8 = vrot.slane %v575_v58, %v16253_v17  ;;  %v529_v9 = vadd.f32 %v16244_v11, %v474_v59  ;;  %v424_v53 = vld [vmem:[%s16239_s26 + $0xd8] sm:$0xff] }
  0x65   : > { %14921 = vmatmul.mubr.msk.f32.gmra.mrb[10].mxu0 %vm603_vm1, %v2012_v2  ;;  %v922_v12 = vcombine.high %v914_v61, %v914_v61  ;;  %v1546_v13 = vrot.slane %v1538_v62, %v16253_v17  ;;  %v921_v14 = vrot.slane %v907_v63, %v16253_v17  ;;  %v1556_v16 = vcombine.low %v931_v54, %v939_v60  ;;  %v2443_v18 = vld [vmem:[#allocation2 + $0x59] sm:$0xff]  ;;  %v2444_v22 = vld [vmem:[#allocation2 + $0x61] sm:$0xff] }
  0x66   : > { %14923 = vmatprep.mubr.msk.f32.mxu0 %vm603_vm1, %v2013_v3  ;;  %14976 = vmatprep.mubr.msk.f32.mxu1 %vm603_vm1, %v2442_v0  ;;  %v940_v19 = vcombine.high %v938_v6, %v938_v6  ;;  %v955_v7 = vrot.slane %v576_v5, %v16253_v17  ;;  %v948_v20 = vcombine.high %v576_v5, %v576_v5  ;;  %v425_v3 = vld [vmem:[%s16239_s26 + $0xe0] sm:$0xff] }
  0x67   : > { %v1539_v24 = vcombine.low %v914_v61, %v922_v12  ;;  %v923_v25 = vcombine.high %v921_v14, %v921_v14  ;;  %v1570_v26 = vrot.slane %v1556_v16, %v16253_v17  ;;  %v972_v27 = vrot.slane %v529_v9, %v16253_v17  ;;  %14977 = vmatmul.mubr.msk.f32.gmra.mrb[14].mxu1 %vm603_vm1, %v2443_v18 }
  0x68   : > { %v2014_v28 = vld [vmem:[#allocation2 + $0x68] sm:$0xff]  ;;  %v1572_v29 = vcombine.low %v938_v6, %v940_v19  ;;  %v1573_v30 = vcombine.low %v947_v8, %v955_v7  ;;  %v962_v31 = vrot.slane %v948_v20, %v16253_v17  ;;  %v963_v32 = vcombine.high %v955_v7, %v955_v7  ;;  %14979 = vmatprep.mubr.msk.f32.mxu1 %vm603_vm1, %v2444_v22 }
  0x69   : > { %14924 = vmatmul.mubr.msk.f32.gmra.mrb[12].mxu0 %vm603_vm1, %v2014_v28  ;;  %v1553_v33 = vrot.slane %v1539_v24, %v16253_v17  ;;  %v1555_v35 = vcombine.low %v921_v14, %v923_v25  ;;  %v475_v37 = vmul.f32 %v16234_v10, %v420_v23  ;;  %v2445_v44 = vld [vmem:[#allocation2 + $0x69] sm:$0xff]  ;;  %v965_v51 = vcombine.high %v529_v9, %v529_v9 }
  0x6a   : > { %v1580_v40 = vrot.slane %v1572_v29, %v16253_v17  ;;  %v1587_v41 = vrot.slane %v1573_v30, %v16253_v17  ;;  %v964_v42 = vcombine.high %v962_v31, %v962_v31  ;;  %v1589_v36 = vcombine.low %v963_v32, %v962_v31 }
  0x6b   : > { %v2015_v47 = vld [vmem:[#allocation2 + $0x70] sm:$0xff]  ;;  %v1554_v48 = vcombine.low %v1546_v13, %v1553_v33  ;;  %v1563_v49 = vrot.slane %v1555_v35, %v16253_v17  ;;  %v530_v50 = vadd.f32 %v16244_v11, %v475_v37  ;;  %v980_v57 = vcombine.high %v972_v27, %v972_v27  ;;  %14980 = vmatmul.mubr.msk.f32.gmra.mrb[16].mxu1 %vm603_vm1, %v2445_v44 }
  0x6c   : > { %v2446_v52 = vld [vmem:[#allocation2 + $0x71] sm:$0xff]  ;;  %14926 = vmatprep.mubr.msk.f32.mxu0 %vm603_vm1, %v2015_v47  ;;  %v1588_v54 = vcombine.low %v1580_v40, %v1587_v41  ;;  %v1590_v55 = vcombine.low %v964_v42, %v972_v27  ;;  %v1597_v56 = vrot.slane %v1589_v36, %v16253_v17  ;;  %v979_v61 = vrot.slane %v965_v51, %v16253_v17 }
  0x6d   : > { %1978 = vst.msk [vmem:[#allocation2 + $0x7b] sm:$0xff] %vm603_vm1, %v1554_v48  ;;  %v1571_v58 = vcombine.low %v1563_v49, %v1570_v26  ;;  %v578_v59 = vmul.f32 %v16260_v21, %v530_v50  ;;  %v476_v62 = vmul.f32 %v16234_v10, %v421_v38  ;;  %14982 = vmatprep.mubr.msk.f32.mxu1 %vm603_vm1, %v2446_v52 }
  0x6e   : > { %1980 = vst.msk [vmem:[#allocation2 + $0x8b] sm:$0xff] %vm603_vm1, %v1588_v54  ;;  %v1604_v63 = vrot.slane %v1590_v55, %v16253_v17  ;;  %v477_v60 = vmul.f32 %v16234_v10, %v422_v39  ;;  %v478_v0 = vmul.f32 %v16234_v10, %v423_v45  ;;  %v479_v2 = vmul.f32 %v16234_v10, %v424_v53  ;;  %v426_v55 = vld [vmem:[%s16239_s26 + $0xe8] sm:$0x3] }
  0x6f   : > { %1979 = vst.msk [vmem:[#allocation2 + $0x83] sm:$0xff] %vm603_vm1, %v1571_v58  ;;  %v981_v5 = vcombine.high %v979_v61, %v979_v61  ;;  %v988_v6 = vrot.slane %v578_v59, %v16253_v17  ;;  %v1606_v8 = vcombine.low %v980_v57, %v979_v61  ;;  %v531_v9 = vadd.f32 %v16244_v11, %v476_v62  ;;  %v427_v62 = vld [vmem:[%s16239_s26 + $0xf0] sm:$0xff] }
  0x70   : > { %v1605_v12 = vcombine.low %v1597_v56, %v1604_v63  ;;  %v532_v13 = vadd.f32 %v16244_v11, %v477_v60  ;;  %v533_v14 = vadd.f32 %v16244_v11, %v478_v0  ;;  %v534_v16 = vadd.f32 %v16244_v11, %v479_v2 }
  0x71   : > { %v1607_v18 = vcombine.low %v981_v5, %v988_v6  ;;  %v1614_v19 = vrot.slane %v1606_v8, %v16253_v17  ;;  %v579_v7 = vmul.f32 %v16249_v15, %v531_v9  ;;  %v480_v20 = vmul.f32 %v16234_v10, %v425_v3  ;;  %v16611_v9 = vld [vmem:[%s19960_s2] ss:$0 sm:$0xff] }
  0x72   : > { %1981 = vst.msk [vmem:[#allocation2 + $0x93] sm:$0xff] %vm603_vm1, %v1605_v12  ;;  %v1006_v22 = vcombine.high %v532_v13, %v532_v13  ;;  %v1013_v23 = vrot.slane %v532_v13, %v16253_v17  ;;  %v581_v24 = vmul.f32 %v16260_v21, %v533_v14  ;;  %v582_v25 = vmul.f32 %v16249_v15, %v534_v16  ;;  %v428_v13 = vld [vmem:[%s16239_s26 + $0xf8] sm:$0xff]  ;;  %v429_v14 = vld [vmem:[%s16239_s26 + $0x100] sm:$0x3] }
  0x73   : > { %v1621_v26 = vrot.slane %v1607_v18, %v16253_v17  ;;  %v989_v27 = vcombine.high %v579_v7, %v579_v7  ;;  %v996_v28 = vrot.slane %v579_v7, %v16253_v17  ;;  %v535_v29 = vadd.f32 %v16244_v11, %v480_v20  ;;  %v430_v20 = vld [vmem:[%s16239_s26 + $0x108] sm:$0xff] }
  0x74   : > { %v2016_v30 = vld [vmem:[#allocation2 + $0x78] sm:$0xff]  ;;  %v1020_v31 = vrot.slane %v1006_v22, %v16253_v17  ;;  %v1021_v10 = vcombine.high %v1013_v23, %v1013_v23  ;;  %v1029_v33 = vrot.slane %v581_v24, %v16253_v17  ;;  %v1030_v35 = vcombine.high %v582_v25, %v582_v25 }
  0x75   : > { %v2447_v32 = vld [vmem:[#allocation2 + $0x79] sm:$0xff]  ;;  %14927 = vmatmul.mubr.msk.f32.gmra.mrb[14].mxu0 %vm603_vm1, %v2016_v30  ;;  %v1622_v37 = vcombine.low %v1614_v19, %v1621_v26  ;;  %v1003_v38 = vrot.slane %v989_v27, %v16253_v17  ;;  %v1004_v39 = vcombine.high %v996_v28, %v996_v28  ;;  %v1037_v36 = vrot.slane %v582_v25, %v16253_v17  ;;  %v431_v27 = vld [vmem:[%s16239_s26 + $0x110] sm:$0xff] }
  0x76   : > { %14983 = vmatmul.mubr.msk.f32.gmra.mrb[18].mxu1 %vm603_vm1, %v2447_v32  ;;  %v2017_v40 = vld [vmem:[#allocation2 + $0x80] sm:$0xff]  ;;  %v2018_v41 = vld [vmem:[#allocation2 + $0x88] sm:$0xff]  ;;  %v1022_v42 = vcombine.high %v1020_v31, %v1020_v31  ;;  %v1640_v11 = vcombine.low %v1013_v23, %v1021_v10  ;;  %v1044_v44 = vrot.slane %v1030_v35, %v16253_v17  ;;  %v1047_v49 = vcombine.high %v535_v29, %v535_v29 }
  0x77   : > { %v2448_v45 = vld [vmem:[#allocation2 + $0x81] sm:$0xff]  ;;  %14929 = vmatprep.mubr.msk.f32.mxu0 %vm603_vm1, %v2017_v40  ;;  %1982 = vst.msk [vmem:[#allocation2 + $0x9b] sm:$0xff] %vm603_vm1, %v1622_v37  ;;  %v1005_v47 = vcombine.high %v1003_v38, %v1003_v38  ;;  %v1623_v48 = vcombine.low %v996_v28, %v1004_v39  ;;  %v1045_v52 = vcombine.high %v1037_v36, %v1037_v36  ;;  %v2449_v54 = vld [vmem:[#allocation2 + $0x89] sm:$0xff]  ;;  %v16624_v25 = vld [vmem:[%s19961_s3] ss:$0 sm:$0xff] }
  0x78   : > { %14985 = vmatprep.mubr.msk.f32.mxu1 %vm603_vm1, %v2448_v45  ;;  %v1641_v50 = vcombine.low %v1020_v31, %v1022_v42  ;;  %v1648_v51 = vrot.slane %v1640_v11, %v16253_v17  ;;  %v1657_v53 = vcombine.low %v1029_v33, %v1037_v36  ;;  %v1046_v59 = vcombine.high %v1044_v44, %v1044_v44  ;;  %v432_v33 = vld [vmem:[%s16239_s26 + $0x118] sm:$0x3] }
  0x79   : > { %14930 = vmatmul.mubr.msk.f32.gmra.mrb[16].mxu0 %vm603_vm1, %v2018_v41  ;;  %v2019_v56 = vld [vmem:[#allocation2 + $0x90] sm:$0xff]  ;;  %v1624_v57 = vcombine.low %v1003_v38, %v1005_v47  ;;  %v1631_v58 = vrot.slane %v1623_v48, %v16253_v17  ;;  %v1054_v61 = vrot.slane %v535_v29, %v16253_v17  ;;  %v1658_v0 = vcombine.low %v1045_v52, %v1044_v44 }
  0x7a   : > { %v2450_v63 = vld [vmem:[#allocation2 + $0x91] sm:$0xff]  ;;  %14932 = vmatprep.mubr.msk.f32.mxu0 %vm603_vm1, %v2019_v56  ;;  %v1655_v60 = vrot.slane %v1641_v50, %v16253_v17  ;;  %v1665_v2 = vrot.slane %v1657_v53, %v16253_v17  ;;  %v1061_v3 = vrot.slane %v1047_v49, %v16253_v17  ;;  %14986 = vmatmul.mubr.msk.f32.gmra.mrb[20].mxu1 %vm603_vm1, %v2449_v54 }
  0x7b   : > { %v1638_v5 = vrot.slane %v1624_v57, %v16253_v17  ;;  %v1062_v6 = vcombine.high %v1054_v61, %v1054_v61  ;;  %v1674_v8 = vcombine.low %v1046_v59, %v1054_v61  ;;  %v481_v12 = vmul.f32 %v16611_v9, %v426_v55  ;;  %14988 = vmatprep.mubr.msk.f32.mxu1 %vm603_vm1, %v2450_v63 }
  0x7c   : > { %v1656_v16 = vcombine.low %v1648_v51, %v1655_v60  ;;  %v1672_v18 = vrot.slane %v1658_v0, %v16253_v17  ;;  %v482_v19 = vmul.f32 %v16611_v9, %v427_v62  ;;  %v1063_v7 = vcombine.high %v1061_v3, %v1061_v3 }
  0x7d   : > { %v1639_v22 = vcombine.low %v1631_v58, %v1638_v5  ;;  %v1675_v23 = vcombine.low %v1062_v6, %v1061_v3  ;;  %v1682_v24 = vrot.slane %v1674_v8, %v16253_v17  ;;  %v536_v26 = vadd.f32 %v16624_v25, %v481_v12 }
  0x7e   : > { %v2020_v28 = vld [vmem:[#allocation2 + $0x98] sm:$0xff]  ;;  %1984 = vst.msk [vmem:[#allocation2 + $0xab] sm:$0xff] %vm603_vm1, %v1656_v16  ;;  %v1673_v29 = vcombine.low %v1665_v2, %v1672_v18  ;;  %v537_v30 = vadd.f32 %v16624_v25, %v482_v19  ;;  %v483_v31 = vmul.f32 %v16611_v9, %v428_v13  ;;  %v484_v32 = vmul.f32 %v16611_v9, %v429_v14 }
  0x7f   : > { %v2451_v10 = vld [vmem:[#allocation2 + $0x99] sm:$0xff]  ;;  %14933 = vmatmul.mubr.msk.f32.gmra.mrb[18].mxu0 %vm603_vm1, %v2020_v28  ;;  %1983 = vst.msk [vmem:[#allocation2 + $0xa3] sm:$0xff] %vm603_vm1, %v1639_v22  ;;  %v1689_v35 = vrot.slane %v1675_v23, %v16253_v17  ;;  %v584_v37 = vmul.f32 %v16260_v21, %v536_v26  ;;  %v485_v38 = vmul.f32 %v16611_v9, %v430_v20 }
  0x80   : > { %14989 = vmatmul.mubr.msk.f32.gmra.mrb[22].mxu1 %vm603_vm1, %v2451_v10  ;;  %1985 = vst.msk [vmem:[#allocation2 + $0xb3] sm:$0xff] %vm603_vm1, %v1673_v29  ;;  %v585_v39 = vmul.f32 %v16249_v15, %v537_v30  ;;  %v538_v40 = vadd.f32 %v16624_v25, %v483_v31  ;;  %v539_v41 = vadd.f32 %v16624_v25, %v484_v32  ;;  %v433_v28 = vld [vmem:[%s16239_s26 + $0x120] sm:$0xff] }
  0x81   : > { %v486_v42 = vmul.f32 %v16611_v9, %v431_v27  ;;  %v1690_v11 = vcombine.low %v1682_v24, %v1689_v35  ;;  %v1070_v36 = vrot.slane %v584_v37, %v16253_v17  ;;  %v540_v44 = vadd.f32 %v16624_v25, %v485_v38  ;;  %v434_v35 = vld [vmem:[%s16239_s26 + $0x128] sm:$0xff] }
  0x82   : > { %v487_v45 = vmul.f32 %v16611_v9, %v432_v33  ;;  %v1078_v47 = vrot.slane %v585_v39, %v16253_v17  ;;  %v1071_v48 = vcombine.high %v585_v39, %v585_v39  ;;  %v1095_v49 = vrot.slane %v538_v40, %v16253_v17 }
  0x83   : > { %v587_v50 = vmul.f32 %v16260_v21, %v539_v41  ;;  %1986 = vst.msk [vmem:[#allocation2 + $0xbb] sm:$0xff] %vm603_vm1, %v1690_v11  ;;  %v1691_v51 = vcombine.low %v1063_v7, %v1070_v36  ;;  %v588_v52 = vmul.f32 %v16249_v15, %v540_v44  ;;  %v1088_v53 = vcombine.high %v538_v40, %v538_v40  ;;  %v443_v41 = vld [vmem:[%s16239_s26 + $0x170] sm:$0xff] }
  0x84   : > { %v541_v54 = vadd.f32 %v16624_v25, %v486_v42  ;;  %v1086_v55 = vcombine.high %v1078_v47, %v1078_v47  ;;  %v1085_v56 = vrot.slane %v1071_v48, %v16253_v17  ;;  %v1103_v57 = vcombine.high %v1095_v49, %v1095_v49 }
  0x85   : > { %v1111_v58 = vrot.slane %v587_v50, %v16253_v17  ;;  %v1699_v59 = vrot.slane %v1691_v51, %v16253_v17  ;;  %v1102_v61 = vrot.slane %v1088_v53, %v16253_v17  ;;  %v1119_v62 = vrot.slane %v588_v52, %v16253_v17 }
  0x86   : > { %v1112_v63 = vcombine.high %v588_v52, %v588_v52  ;;  %v2021_v60 = vld [vmem:[#allocation2 + $0xa0] sm:$0xff]  ;;  %v2022_v0 = vld [vmem:[#allocation2 + $0xa8] sm:$0xff]  ;;  %v1692_v2 = vcombine.low %v1078_v47, %v1086_v55  ;;  %v1087_v3 = vcombine.high %v1085_v56, %v1085_v56  ;;  %v1709_v5 = vcombine.low %v1095_v49, %v1103_v57 }
  0x87   : > { %v2452_v6 = vld [vmem:[#allocation2 + $0xa1] sm:$0xff]  ;;  %v1136_v8 = vrot.slane %v541_v54, %v16253_v17  ;;  %14935 = vmatprep.mubr.msk.f32.mxu0 %vm603_vm1, %v2021_v60  ;;  %v2023_v12 = vld [vmem:[#allocation2 + $0xb0] sm:$0xff]  ;;  %v1104_v13 = vcombine.high %v1102_v61, %v1102_v61  ;;  %v1726_v14 = vcombine.low %v1111_v58, %v1119_v62  ;;  %v1127_v23 = vcombine.high %v1119_v62, %v1119_v62 }
  0x88   : > { %14991 = vmatprep.mubr.msk.f32.mxu1 %vm603_vm1, %v2452_v6  ;;  %v1126_v16 = vrot.slane %v1112_v63, %v16253_v17  ;;  %v2453_v18 = vld [vmem:[#allocation2 + $0xa9] sm:$0xff]  ;;  %v2454_v19 = vld [vmem:[#allocation2 + $0xb1] sm:$0xff]  ;;  %14936 = vmatmul.mubr.msk.f32.gmra.mrb[20].mxu0 %vm603_vm1, %v2022_v0  ;;  %v1706_v7 = vrot.slane %v1692_v2, %v16253_v17  ;;  %v1708_v20 = vcombine.low %v1085_v56, %v1087_v3 }
  0x89   : > { %v1723_v22 = vrot.slane %v1709_v5, %v16253_v17  ;;  %14938 = vmatprep.mubr.msk.f32.mxu0 %vm603_vm1, %v2023_v12  ;;  %v1725_v24 = vcombine.low %v1102_v61, %v1104_v13  ;;  %v1740_v26 = vrot.slane %v1726_v14, %v16253_v17  ;;  %14992 = vmatmul.mubr.msk.f32.gmra.mrb[24].mxu1 %vm603_vm1, %v2453_v18 }
  0x8a   : > { %v1128_v27 = vcombine.high %v1126_v16, %v1126_v16  ;;  %v2024_v29 = vld [vmem:[#allocation2 + $0xb8] sm:$0xff]  ;;  %v1707_v30 = vcombine.low %v1699_v59, %v1706_v7  ;;  %v1716_v31 = vrot.slane %v1708_v20, %v16253_v17  ;;  %v1742_v10 = vcombine.low %v1127_v23, %v1126_v16  ;;  %14994 = vmatprep.mubr.msk.f32.mxu1 %vm603_vm1, %v2454_v19 }
  0x8b   : > { %v542_v32 = vadd.f32 %v16624_v25, %v487_v45  ;;  %v2455_v33 = vld [vmem:[#allocation2 + $0xb9] sm:$0xff]  ;;  %v1733_v37 = vrot.slane %v1725_v24, %v16253_v17  ;;  %v1129_v39 = vcombine.high %v541_v54, %v541_v54  ;;  %v1144_v40 = vcombine.high %v1136_v8, %v1136_v8 }
  0x8c   : > { %v1743_v38 = vcombine.low %v1128_v27, %v1136_v8  ;;  %14939 = vmatmul.mubr.msk.f32.gmra.mrb[22].mxu0 %vm603_vm1, %v2024_v29  ;;  %1987 = vst.msk [vmem:[#allocation2 + $0xc3] sm:$0xff] %vm603_vm1, %v1707_v30  ;;  %v1724_v42 = vcombine.low %v1716_v31, %v1723_v22  ;;  %v1750_v11 = vrot.slane %v1742_v10, %v16253_v17  ;;  %v444_v20 = vld [vmem:[%s16239_s26 + $0x178] sm:$0x3]  ;;  %s13544_s26 = sshll.u32 %s365_s27, 6 }
  0x8d   : > { %v590_v36 = vmul.f32 %v16260_v21, %v542_v32  ;;  %v488_v44 = vmul.f32 %v16611_v9, %v433_v28  ;;  %v1741_v45 = vcombine.low %v1733_v37, %v1740_v26  ;;  %v1143_v48 = vrot.slane %v1129_v39, %v16253_v17  ;;  %14995 = vmatmul.mubr.msk.f32.gmra.mrb[26].mxu1 %vm603_vm1, %v2455_v33  ;;  %s19831_s11 = scalar_lea.vmem [#allocation6], %s13544_s26  ;;  %s16022_s26 = scalar_lea.vmem %s16021_s30, 2048 }
  0x8e   : > { %v1757_v47 = vrot.slane %v1743_v38, %v16253_v17  ;;  %v489_v49 = vmul.f32 %v16611_v9, %v434_v35  ;;  %1988 = vst.msk [vmem:[#allocation2 + $0xcb] sm:$0xff] %vm603_vm1, %v1724_v42  ;;  %v498_v52 = vmul.f32 %v16611_v9, %v443_v41  ;;  %v1276_v53 = vcombine.high %v16359_v34, %v16359_v34  ;;  %s13466_s18 = sshll.u32 %s19831_s11, 4  ;;  %s19910_s18 = int_to_ptr.vmem [resolvable:$true] %s13466_s18 }
  0x8f   : > { %v1152_v50 = vrot.slane %v590_v36, %v16253_v17  ;;  %v543_v51 = vadd.f32 %v16624_v25, %v488_v44  ;;  %1989 = vst.msk [vmem:[#allocation2 + $0xd3] sm:$0xff] %vm603_vm1, %v1741_v45  ;;  %v1145_v55 = vcombine.high %v1143_v48, %v1143_v48  ;;  %v1759_v56 = vcombine.low %v1144_v40, %v1143_v48  ;;  %s16016_s25 = scalar_lea.vmem %s19910_s18, 1024  ;;  %p16023_p0 = scmp.lt.s32.totalorder %s19910_s18, %s16021_s30 }
  0x90   : > { %v1758_v54 = vcombine.low %v1750_v11, %v1757_v47  ;;  %v544_v57 = vadd.f32 %v16624_v25, %v489_v49  ;;  %v553_v59 = vadd.f32 %v16624_v25, %v498_v52  ;;  %v1290_v61 = vrot.slane %v1276_v53, %v16253_v17  ;;  %p16017_p11 = scmp.ne.s32.totalorder %s19910_s18, %s16016_s25  ;;  %p16024_p1 = scmp.lt.s32.totalorder %s16022_s26, %s16016_s25 }
  0x91   : > { %v591_v58 = vmul.f32 %v16249_v15, %v543_v51  ;;  %v1291_v62 = vcombine.high %v16372_v43, %v16372_v43  ;;  %v1760_v63 = vcombine.low %v1145_v55, %v1152_v50  ;;  %v1767_v34 = vrot.slane %v1759_v56, %v16253_v17 }
  0x92   : > { %1990 = vst.msk [vmem:[#allocation2 + $0xdb] sm:$0xff] %vm603_vm1, %v1758_v54  ;;  %v1170_v60 = vcombine.high %v544_v57, %v544_v57  ;;  %v1177_v0 = vrot.slane %v544_v57, %v16253_v17  ;;  %v1292_v5 = vcombine.high %v1290_v61, %v1290_v61  ;;  %v1300_v6 = vrot.slane %v553_v59, %v16253_v17  ;;  %p16018_p12 = pnand %p16017_p11, %p16183_p5  ;;  %p16025_p2 = por %p16024_p1, %p16023_p0 }
  0x93   : > { %v1153_v2 = vcombine.high %v591_v58, %v591_v58  ;;  %v1160_v3 = vrot.slane %v591_v58, %v16253_v17  ;;  %v2025_v8 = vld [vmem:[#allocation2 + $0xc0] sm:$0xff]  ;;  %v1774_v12 = vrot.slane %v1760_v63, %v16253_v17  ;;  %v1895_v16 = vcombine.low %v1291_v62, %v1290_v61 }
  0x94   : > { %v1184_v43 = vrot.slane %v1170_v60, %v16253_v17  ;;  %v1185_v13 = vcombine.high %v1177_v0, %v1177_v0  ;;  %v2456_v14 = vld [vmem:[#allocation2 + $0xc1] sm:$0xff]  ;;  %14941 = vmatprep.mubr.msk.f32.mxu0 %vm603_vm1, %v2025_v8  ;;  %v1896_v7 = vcombine.low %v1292_v5, %v1300_v6  ;;  %v499_v37 = vmul.f32 %v16611_v9, %v444_v20  ;;  %v2465_v5 = vld [vmem:[#allocation2 + $0x109] sm:$0xff]  ;;  %v2466_v8 = vld [vmem:[#allocation2 + $0x111] sm:$0xff]  ;;  %p16019_p13 = pneg %p16018_p12 }
  0x95   : > { %v1167_v18 = vrot.slane %v1153_v2, %v16253_v17  ;;  %v1168_v19 = vcombine.high %v1160_v3, %v1160_v3  ;;  %14997 = vmatprep.mubr.msk.f32.mxu1 %vm603_vm1, %v2456_v14  ;;  %v2026_v22 = vld [vmem:[#allocation2 + $0xc8] sm:$0xff]  ;;  %v1775_v23 = vcombine.low %v1767_v34, %v1774_v12  ;;  %v1903_v28 = vrot.slane %v1895_v16, %v16253_v17  ;;  %v16745_v12 = vld [vmem:[%s19962_s4 + $0x18] sm:$0xf] }
  0x96   : > { %v1186_v24 = vcombine.high %v1184_v43, %v1184_v43  ;;  %v1793_v26 = vcombine.low %v1177_v0, %v1185_v13  ;;  %v2457_v27 = vld [vmem:[#allocation2 + $0xc9] sm:$0xff]  ;;  %14942 = vmatmul.mubr.msk.f32.gmra.mrb[24].mxu0 %vm603_vm1, %v2026_v22  ;;  %v2458_v10 = vld [vmem:[#allocation2 + $0xd1] sm:$0xff]  ;;  %v1910_v32 = vrot.slane %v1896_v7, %v16253_v17  ;;  %v1293_v11 = vcombine.high %v553_v59, %v553_v59  ;;  %v2464_v2 = vld [vmem:[#allocation2 + $0x101] sm:$0xff]  ;;  %p16026_p3 = pnand %p16025_p2, %p16019_p13 }
  0x97   : > { %v2027_v29 = vld [vmem:[#allocation2 + $0xd0] sm:$0xff]  ;;  %v1169_v30 = vcombine.high %v1167_v18, %v1167_v18  ;;  %v1776_v31 = vcombine.low %v1160_v3, %v1168_v19  ;;  %14998 = vmatmul.mubr.msk.f32.gmra.mrb[28].mxu1 %vm603_vm1, %v2457_v27  ;;  %1991 = vst.msk [vmem:[#allocation2 + $0xe3] sm:$0xff] %vm603_vm1, %v1775_v23  ;;  %v554_v44 = vadd.f32 %v16624_v25, %v499_v37  ;;  %v2933_v0 = vld [vmem:[#allocation2 + $0x2] sm:$0xff]  ;;  %v2936_v13 = vld [vmem:[#allocation2 + $0x1a] sm:$0xff] }
  0x98   : > { %14944 = vmatprep.mubr.msk.f32.mxu0 %vm603_vm1, %v2027_v29  ;;  %v1794_v33 = vcombine.low %v1184_v43, %v1186_v24  ;;  %v1801_v35 = vrot.slane %v1793_v26, %v16253_v17  ;;  %15000 = vmatprep.mubr.msk.f32.mxu1 %vm603_vm1, %v2458_v10  ;;  %v1911_v42 = vcombine.low %v1903_v28, %v1910_v32  ;;  %v2934_v3 = vld [vmem:[#allocation2 + $0xa] sm:$0xff]  ;;  %v2467_v14 = vld [vmem:[#allocation2 + $0x119] sm:$0xff]  ;;  %v2937_v16 = vld [vmem:[#allocation2 + $0x22] sm:$0xff] }
  0x99   : > { %v2028_v38 = vld [vmem:[#allocation2 + $0xd8] sm:$0xff]  ;;  %v1777_v39 = vcombine.low %v1167_v18, %v1169_v30  ;;  %v1784_v40 = vrot.slane %v1776_v31, %v16253_v17  ;;  %v1308_v45 = vcombine.high %v1300_v6, %v1300_v6  ;;  %v1307_v9 = vrot.slane %v1293_v11, %v16253_v17  ;;  %v16014_v43 = vld [vmem:[%s19962_s4 + $0x10] sm:$0xf]  ;;  %v2941_v22 = vld [vmem:[#allocation2 + $0x42] sm:$0xff] }
  0x9a   : > { %v2459_v41 = vld [vmem:[#allocation2 + $0xd9] sm:$0xff]  ;;  %v1808_v36 = vrot.slane %v1794_v33, %v16253_v17  ;;  %14945 = vmatmul.mubr.msk.f32.gmra.mrb[26].mxu0 %vm603_vm1, %v2028_v38  ;;  %1999 = vst.msk [vmem:[#allocation2 + $0x123] sm:$0xff] %vm603_vm1, %v1911_v42  ;;  %v602_v49 = vmul.f32 %v16260_v21, %v554_v44  ;;  %v2938_v18 = vld [vmem:[#allocation2 + $0x2a] sm:$0xff]  ;;  %v2945_v26 = vld [vmem:[#allocation2 + $0x62] sm:$0xff] }
  0x9b   : > { %v1791_v47 = vrot.slane %v1777_v39, %v16253_v17  ;;  %15001 = vmatmul.mubr.msk.f32.gmra.mrb[30].mxu1 %vm603_vm1, %v2459_v41  ;;  %v1309_v51 = vcombine.high %v1307_v9, %v1307_v9  ;;  %v1912_v52 = vcombine.low %v1308_v45, %v1307_v9  ;;  %v2935_v6 = vld [vmem:[#allocation2 + $0x12] sm:$0xff]  ;;  %v16766_v7 = vld [vmem:[%s19962_s4 + $0x1c] sm:$0xf]  ;;  %v2942_v23 = vld [vmem:[#allocation2 + $0x4a] sm:$0xff] }
  0x9c   : > { %v1809_v48 = vcombine.low %v1801_v35, %v1808_v36  ;;  %v1316_v25 = vrot.slane %v602_v49, %v16253_v17  ;;  %v2939_v19 = vld [vmem:[#allocation2 + $0x32] sm:$0xff]  ;;  %v2940_v20 = vld [vmem:[#allocation2 + $0x3a] sm:$0xff]  ;;  %v2946_v27 = vld [vmem:[#allocation2 + $0x6a] sm:$0xff] }
  0x9d   : > { %v1792_v50 = vcombine.low %v1784_v40, %v1791_v47  ;;  %v1920_v56 = vrot.slane %v1912_v52, %v16253_v17  ;;  %v2943_v24 = vld [vmem:[#allocation2 + $0x52] sm:$0xff]  ;;  %v2948_v29 = vld [vmem:[#allocation2 + $0x7a] sm:$0xff]  ;;  %v2949_v30 = vld [vmem:[#allocation2 + $0x82] sm:$0xff] }
  0x9e   : > { %1993 = vst.msk [vmem:[#allocation2 + $0xf3] sm:$0xff] %vm603_vm1, %v1809_v48  ;;  %v2029_v53 = vld [vmem:[#allocation2 + $0xe0] sm:$0xff]  ;;  %v1913_v55 = vcombine.low %v1309_v51, %v1316_v25  ;;  %v2947_v28 = vld [vmem:[#allocation2 + $0x72] sm:$0xff]  ;;  %v2950_v31 = vld [vmem:[#allocation2 + $0x8a] sm:$0xff] }
  0x9f   : > { %1992 = vst.msk [vmem:[#allocation2 + $0xeb] sm:$0xff] %vm603_vm1, %v1792_v50  ;;  %v2460_v54 = vld [vmem:[#allocation2 + $0xe1] sm:$0xff]  ;;  %14947 = vmatprep.mubr.msk.f32.mxu0 %vm603_vm1, %v2029_v53  ;;  %v2951_v10 = vld [vmem:[#allocation2 + $0x92] sm:$0xff]  ;;  %v2954_v35 = vld [vmem:[#allocation2 + $0xaa] sm:$0xff] }
  0xa0   : > { %15003 = vmatprep.mubr.msk.f32.mxu1 %vm603_vm1, %v2460_v54  ;;  %v1927_v57 = vrot.slane %v1913_v55, %v16253_v17  ;;  %v2952_v32 = vld [vmem:[#allocation2 + $0x9a] sm:$0xff]  ;;  %v2953_v33 = vld [vmem:[#allocation2 + $0xa2] sm:$0xff]  ;;  %v2955_v37 = vld [vmem:[#allocation2 + $0xb2] sm:$0xff] }
  0xa1   : > { %v2956_v38 = vld [vmem:[#allocation2 + $0xba] sm:$0xff]  ;;  %v2957_v39 = vld [vmem:[#allocation2 + $0xc2] sm:$0xff]  ;;  %v2958_v40 = vld [vmem:[#allocation2 + $0xca] sm:$0xff] }
  0xa2   : > { %v1928_v58 = vcombine.low %v1920_v56, %v1927_v57  ;;  %v2959_v41 = vld [vmem:[#allocation2 + $0xd2] sm:$0xff]  ;;  %v2960_v42 = vld [vmem:[#allocation2 + $0xda] sm:$0xff]  ;;  %v2961_v11 = vld [vmem:[#allocation2 + $0xe2] sm:$0xff] }
  0xa3   : > { %v2965_v47 = vld [vmem:[#allocation2 + $0x102] sm:$0xff]  ;;  %v2966_v9 = vld [vmem:[#allocation2 + $0x10a] sm:$0xff]  ;;  %v2967_v48 = vld [vmem:[#allocation2 + $0x112] sm:$0xff] }
  0xa4   : > { %2000 = vst.msk [vmem:[#allocation2 + $0x12b] sm:$0xff] %vm603_vm1, %v1928_v58  ;;  %v2968_v49 = vld [vmem:[#allocation2 + $0x11a] sm:$0xff]  ;;  %v3937_v25 = vld [vmem:[#allocation2 + $0x23] sm:$0xff]  ;;  %v3938_v56 = vld [vmem:[#allocation2 + $0x2b] sm:$0xff] }
  0xa5   : > { %v2032_v34 = vld [vmem:[#allocation2 + $0xf8] sm:$0xff]  ;;  %v3468_v54 = vld [vmem:[#allocation2 + $0x122] sm:$0xff] }
  0xa6   : > { %v2030_v59 = vld [vmem:[#allocation2 + $0xe8] sm:$0xff]  ;;  %v2031_v61 = vld [vmem:[#allocation2 + $0xf0] sm:$0xff]  ;;  %v2463_v60 = vld [vmem:[#allocation2 + $0xf9] sm:$0xff] }
  0xa7   : > { %v2461_v62 = vld [vmem:[#allocation2 + $0xe9] sm:$0xff]  ;;  %14948 = vmatmul.mubr.msk.f32.gmra.mrb[28].mxu0 %vm603_vm1, %v2030_v59  ;;  %v2462_v63 = vld [vmem:[#allocation2 + $0xf1] sm:$0xff]  ;;  %v2964_v45 = vld [vmem:[#allocation2 + $0xfa] sm:$0xff] }
  0xa8   : > { %15004 = vmatmul.mubr.msk.f32.gmra.mrb[32].mxu1 %vm603_vm1, %v2461_v62  ;;  %14950 = vmatprep.mubr.msk.f32.mxu0 %vm603_vm1, %v2031_v61  ;;  %v2962_v36 = vld [vmem:[#allocation2 + $0xea] sm:$0xff]  ;;  %v2963_v44 = vld [vmem:[#allocation2 + $0xf2] sm:$0xff]  ;;  %v3936_v51 = vld [vmem:[#allocation2 + $0x1b] sm:$0xff] }
  0xa9   : > { %15006 = vmatprep.mubr.msk.f32.mxu1 %vm603_vm1, %v2462_v63  ;;  %v3935_v50 = vld [vmem:[#allocation2 + $0x13] sm:$0xff]  ;;  %v16848_v55 = vld [vmem:[%s19962_s4 + $0x20] sm:$0xf] }
  0xaa   : > { %v3939_v58 = vld [vmem:[#allocation2 + $0x33] sm:$0xff]  ;;  %v3940_v61 = vld [vmem:[#allocation2 + $0x3b] sm:$0xff]  ;;  %v3941_v63 = vld [vmem:[#allocation2 + $0x43] sm:$0xff] }
  0xab   : > { %14951 = vmatmul.mubr.msk.f32.gmra.mrb[30].mxu0 %vm603_vm1, %v2032_v34  ;;  %v3469_v57 = vld [vmem:[#allocation2 + $0x12a] sm:$0xff]  ;;  %v4436_v59 = vld [vmem:[#allocation2 + $0x14] sm:$0xff]  ;;  %v4437_v62 = vld [vmem:[#allocation2 + $0x1c] sm:$0xff] }
  0xac   : > { %15007 = vmatmul.mubr.msk.f32.gmra.mrb[34].mxu1 %vm603_vm1, %v2463_v60  ;;  %15017 = vmatprep.mubr.msk.f32.mxu0 %vm603_vm1, %v2933_v0  ;;  %v16863_v34 = vld [vmem:[#allocation2 + $0x24] sm:$0xff]  ;;  %v16870_v0 = vld [vmem:[#allocation2 + $0x2c] sm:$0xff] }
  0xad   : > { %15009 = vmatprep.mubr.msk.f32.mxu1 %vm603_vm1, %v2464_v2  ;;  %v3942_v60 = vld [vmem:[#allocation2 + $0x4b] sm:$0xff]  ;;  %v3943_v2 = vld [vmem:[#allocation2 + $0x53] sm:$0xff] }
  0xaf   : > { %15018 = vmatmul.mubr.msk.f32.vlgmr.msra.gmra.mrb[32].mxu0 %vm603_vm1, %v2934_v3  ;;  %v16872_v3 = vld [vmem:[#allocation2 + $0x34] sm:$0xff] }
  0xb0   : > { %15010 = vmatmul.mubr.msk.f32.gmra.mrb[36].mxu1 %vm603_vm1, %v2465_v5  ;;  %15128 = vmatpush3.msk.msra.mxu0 %vm2146_vm0, %v16014_v43  ;;  %v3944_v5 = vld [vmem:[#allocation2 + $0x5b] sm:$0xff]  ;;  %v3946_v43 = vld [vmem:[#allocation2 + $0x6b] sm:$0xff] }
  0xb1   : > { %15020 = vmatprep.mubr.msk.f32.mxu0 %vm603_vm1, %v2935_v6  ;;  %15012 = vmatprep.mubr.msk.f32.mxu1 %vm603_vm1, %v2466_v8  ;;  %v3945_v8 = vld [vmem:[#allocation2 + $0x63] sm:$0xff] }
  0xb2   : > { %15239 = vmatprep.subr.msk.mxu0 %vm2146_vm0, %v16745_v12 }
  0xb3   : > { %15021 = vmatmul.mubr.msk.f32.gmra.mrb[34].mxu0 %vm603_vm1, %v2936_v13 }
  0xb4   : > { %15013 = vmatmul.mubr.msk.f32.gmra.mrb[38].mxu1 %vm603_vm1, %v2467_v14  ;;  %15023 = vmatprep.mubr.msk.f32.mxu0 %vm603_vm1, %v2937_v16  ;;  %v3947_v14 = vld [vmem:[#allocation2 + $0x73] sm:$0xff] }
  0xb5   : > { %15073 = vmatprep.mubr.msk.f32.mxu1 %vm603_vm1, %v2935_v6  ;;  %v16882_v6 = vld [vmem:[#allocation2 + $0x3c] sm:$0xff] }
  0xb7   : > { %15024 = vmatmul.mubr.msk.f32.gmra.mrb[36].mxu0 %vm603_vm1, %v2938_v18 }
  0xb8   : > { %15074 = vmatmul.mubr.msk.f32.vlgmr.msra.gmra.mrb[40].mxu1 %vm603_vm1, %v2936_v13  ;;  %15026 = vmatprep.mubr.msk.f32.mxu0 %vm603_vm1, %v2939_v19  ;;  %v16892_v13 = vld [vmem:[#allocation2 + $0x4c] sm:$0xff] }
  0xb9   : > { %15076 = vmatprep.mubr.msk.f32.mxu1 %vm603_vm1, %v2937_v16  ;;  %15184 = vmatpush3.msk.msra.mxu1 %vm2146_vm0, %v16549_v46  ;;  %v2944_v46 = vld [vmem:[#allocation2 + $0x5a] sm:$0xff] }
  0xba   : > { %15295 = vmatprep.subr.msk.mxu1 %vm2146_vm0, %v16766_v7  ;;  %v16894_v16 = vld [vmem:[#allocation2 + $0x54] sm:$0xff] }
  0xbb   : > { %15027 = vmatmul.mubr.msk.f32.gmra.mrb[38].mxu0 %vm603_vm1, %v2940_v20 }
  0xbc   : > { %15077 = vmatmul.mubr.msk.f32.gmra.mrb[42].mxu1 %vm603_vm1, %v2938_v18  ;;  %15029 = vmatprep.mubr.msk.f32.mxu0 %vm603_vm1, %v2941_v22  ;;  %v3948_v18 = vld [vmem:[#allocation2 + $0x7b] sm:$0xff] }
  0xbd   : > { %15079 = vmatprep.mubr.msk.f32.mxu1 %vm603_vm1, %v2939_v19  ;;  %v16902_v19 = vld [vmem:[#allocation2 + $0x5c] sm:$0xff] }
  0xbf   : > { %15030 = vmatmul.mubr.msk.f32.gmra.mrb[40].mxu0 %vm603_vm1, %v2942_v23 }
  0xc0   : > { %15080 = vmatmul.mubr.msk.f32.gmra.mrb[44].mxu1 %vm603_vm1, %v2940_v20  ;;  %15032 = vmatprep.mubr.msk.f32.mxu0 %vm603_vm1, %v2943_v24  ;;  %v16904_v20 = vld [vmem:[#allocation2 + $0x64] sm:$0xff] }
  0xc1   : > { %15082 = vmatprep.mubr.msk.f32.mxu1 %vm603_vm1, %v2941_v22 }
  0xc3   : > { %15033 = vmatmul.mubr.msk.f32.gmra.mrb[42].mxu0 %vm603_vm1, %v2944_v46 }
  0xc4   : > { %15083 = vmatmul.mubr.msk.f32.gmra.mrb[46].mxu1 %vm603_vm1, %v2942_v23  ;;  %15035 = vmatprep.mubr.msk.f32.mxu0 %vm603_vm1, %v2945_v26 }
  0xc5   : > { %15085 = vmatprep.mubr.msk.f32.mxu1 %vm603_vm1, %v2943_v24  ;;  %v3950_v24 = vld [vmem:[#allocation2 + $0x8b] sm:$0xff] }
  0xc7   : > { %15036 = vmatmul.mubr.msk.f32.gmra.mrb[44].mxu0 %vm603_vm1, %v2946_v27 }
  0xc8   : > { %15086 = vmatmul.mubr.msk.f32.gmra.mrb[48].mxu1 %vm603_vm1, %v2944_v46  ;;  %15038 = vmatprep.mubr.msk.f32.mxu0 %vm603_vm1, %v2947_v28  ;;  %v16913_v46 = vld [vmem:[#allocation2 + $0x6c] sm:$0xff] }
  0xc9   : > { %15088 = vmatprep.mubr.msk.f32.mxu1 %vm603_vm1, %v2945_v26  ;;  %v3951_v26 = vld [vmem:[#allocation2 + $0x93] sm:$0xff] }
  0xcb   : > { %15039 = vmatmul.mubr.msk.f32.gmra.mrb[46].mxu0 %vm603_vm1, %v2948_v29 }
  0xcc   : > { %15089 = vmatmul.mubr.msk.f32.gmra.mrb[50].mxu1 %vm603_vm1, %v2946_v27  ;;  %15041 = vmatprep.mubr.msk.f32.mxu0 %vm603_vm1, %v2949_v30  ;;  %v16916_v27 = vld [vmem:[#allocation2 + $0x74] sm:$0xff] }
  0xcd   : > { %15091 = vmatprep.mubr.msk.f32.mxu1 %vm603_vm1, %v2947_v28  ;;  %v3952_v28 = vld [vmem:[#allocation2 + $0x9b] sm:$0xff] }
  0xcf   : > { %15042 = vmatmul.mubr.msk.f32.gmra.mrb[48].mxu0 %vm603_vm1, %v2950_v31 }
  0xd0   : > { %15092 = vmatmul.mubr.msk.f32.gmra.mrb[52].mxu1 %vm603_vm1, %v2948_v29  ;;  %15044 = vmatprep.mubr.msk.f32.mxu0 %vm603_vm1, %v2951_v10  ;;  %v16924_v29 = vld [vmem:[#allocation2 + $0x7c] sm:$0xff] }
  0xd1   : > { %15094 = vmatprep.mubr.msk.f32.mxu1 %vm603_vm1, %v2949_v30  ;;  %v3953_v30 = vld [vmem:[#allocation2 + $0xa3] sm:$0xff] }
  0xd3   : > { %15045 = vmatmul.mubr.msk.f32.gmra.mrb[50].mxu0 %vm603_vm1, %v2952_v32 }
  0xd4   : > { %15095 = vmatmul.mubr.msk.f32.gmra.mrb[54].mxu1 %vm603_vm1, %v2950_v31  ;;  %15047 = vmatprep.mubr.msk.f32.mxu0 %vm603_vm1, %v2953_v33  ;;  %v16926_v31 = vld [vmem:[#allocation2 + $0x84] sm:$0xff] }
  0xd5   : > { %15097 = vmatprep.mubr.msk.f32.mxu1 %vm603_vm1, %v2951_v10 }
  0xd7   : > { %15048 = vmatmul.mubr.msk.f32.gmra.mrb[52].mxu0 %vm603_vm1, %v2954_v35 }
  0xd8   : > { %15098 = vmatmul.mubr.msk.f32.gmra.mrb[56].mxu1 %vm603_vm1, %v2952_v32  ;;  %15050 = vmatprep.mubr.msk.f32.mxu0 %vm603_vm1, %v2955_v37 }
  0xd9   : > { %15100 = vmatprep.mubr.msk.f32.mxu1 %vm603_vm1, %v2953_v33  ;;  %v3954_v33 = vld [vmem:[#allocation2 + $0xab] sm:$0xff] }
  0xdb   : > { %15051 = vmatmul.mubr.msk.f32.gmra.mrb[54].mxu0 %vm603_vm1, %v2956_v38 }
  0xdc   : > { %15101 = vmatmul.mubr.msk.f32.gmra.mrb[58].mxu1 %vm603_vm1, %v2954_v35  ;;  %15053 = vmatprep.mubr.msk.f32.mxu0 %vm603_vm1, %v2957_v39  ;;  %v16936_v35 = vld [vmem:[#allocation2 + $0x8c] sm:$0xff] }
  0xdd   : > { %15103 = vmatprep.mubr.msk.f32.mxu1 %vm603_vm1, %v2955_v37  ;;  %v3955_v37 = vld [vmem:[#allocation2 + $0xb3] sm:$0xff] }
  0xdf   : > { %15054 = vmatmul.mubr.msk.f32.gmra.mrb[56].mxu0 %vm603_vm1, %v2958_v40 }
  0xe0   : > { %15104 = vmatmul.mubr.msk.f32.gmra.mrb[60].mxu1 %vm603_vm1, %v2956_v38  ;;  %15056 = vmatprep.mubr.msk.f32.mxu0 %vm603_vm1, %v2959_v41  ;;  %v16938_v38 = vld [vmem:[#allocation2 + $0x94] sm:$0xff] }
  0xe1   : > { %15106 = vmatprep.mubr.msk.f32.mxu1 %vm603_vm1, %v2957_v39  ;;  %v3956_v39 = vld [vmem:[#allocation2 + $0xbb] sm:$0xff] }
  0xe3   : > { %15057 = vmatmul.mubr.msk.f32.gmra.mrb[58].mxu0 %vm603_vm1, %v2960_v42 }
  0xe4   : > { %15107 = vmatmul.mubr.msk.f32.gmra.mrb[62].mxu1 %vm603_vm1, %v2958_v40  ;;  %15059 = vmatprep.mubr.msk.f32.mxu0 %vm603_vm1, %v2961_v11  ;;  %v16946_v40 = vld [vmem:[#allocation2 + $0x9c] sm:$0xff] }
  0xe5   : > { %15109 = vmatprep.mubr.msk.f32.mxu1 %vm603_vm1, %v2959_v41 }
  0xe7   : > { %15060 = vmatmul.mubr.msk.f32.gmra.mrb[60].mxu0 %vm603_vm1, %v2962_v36 }
  0xe8   : > { %15110 = vmatmul.mubr.msk.f32.gmra.mrb[64].mxu1 %vm603_vm1, %v2960_v42  ;;  %15062 = vmatprep.mubr.msk.f32.mxu0 %vm603_vm1, %v2963_v44  ;;  %v3957_v42 = vld [vmem:[#allocation2 + $0xc3] sm:$0xff] }
  0xe9   : > { %15112 = vmatprep.mubr.msk.f32.mxu1 %vm603_vm1, %v2961_v11  ;;  %v16948_v11 = vld [vmem:[#allocation2 + $0xa4] sm:$0xff] }
  0xeb   : > { %15063 = vmatmul.mubr.msk.f32.gmra.mrb[62].mxu0 %vm603_vm1, %v2964_v45 }
  0xec   : > { %15113 = vmatmul.mubr.msk.f32.gmra.mrb[66].mxu1 %vm603_vm1, %v2962_v36  ;;  %15065 = vmatprep.mubr.msk.f32.mxu0 %vm603_vm1, %v2965_v47 }
  0xed   : > { %15115 = vmatprep.mubr.msk.f32.mxu1 %vm603_vm1, %v2963_v44  ;;  %v3958_v44 = vld [vmem:[#allocation2 + $0xcb] sm:$0xff] }
  0xef   : > { %15066 = vmatmul.mubr.msk.f32.gmra.mrb[64].mxu0 %vm603_vm1, %v2966_v9 }
  0xf0   : > { %15116 = vmatmul.mubr.msk.f32.gmra.mrb[68].mxu1 %vm603_vm1, %v2964_v45  ;;  %15068 = vmatprep.mubr.msk.f32.mxu0 %vm603_vm1, %v2967_v48  ;;  %v16958_v45 = vld [vmem:[#allocation2 + $0xac] sm:$0xff] }
  0xf1   : > { %15118 = vmatprep.mubr.msk.f32.mxu1 %vm603_vm1, %v2965_v47  ;;  %v3959_v47 = vld [vmem:[#allocation2 + $0xd3] sm:$0xff] }
  0xf2   : > { %v14907_v52 = vpop.f32.mrb[0].mxu0 }
  0xf3   : > { %15069 = vmatmul.mubr.msk.f32.gmra.mrb[66].mxu0 %vm603_vm1, %v2968_v49  ;;  %2397 = vst.msk [vmem:[#allocation4 + $0x8] sm:$0xff] %vm2395_vm5, %v14907_v52  ;;  %v2216_v53 = vpop.f32.mrb[1].mxu0  ;;  %v16970_v52 = vld [vmem:[#allocation2 + $0xc4] sm:$0xff] }
  0xf4   : > { %15119 = vmatmul.mubr.msk.f32.gmra.mrb[70].mxu1 %vm603_vm1, %v2966_v9  ;;  %15129 = vmatprep.mubr.msk.f32.mxu0 %vm603_vm1, %v3935_v50  ;;  %2396 = vst.msk [vmem:[#allocation4] sm:$0xff] %vm2395_vm5, %v2216_v53  ;;  %v16960_v9 = vld [vmem:[#allocation2 + $0xb4] sm:$0xff]  ;;  %v3962_v53 = vld [vmem:[#allocation2 + $0xeb] sm:$0xff] }
  0xf5   : > { %15121 = vmatprep.mubr.msk.f32.mxu1 %vm603_vm1, %v2967_v48  ;;  %v3960_v48 = vld [vmem:[#allocation2 + $0xdb] sm:$0xff] }
  0xf7   : > { %15130 = vmatmul.mubr.msk.f32.vlgmr.msra.gmra.mrb[68].mxu0 %vm603_vm1, %v3936_v51  ;;  %v3961_v51 = vld [vmem:[#allocation2 + $0xe3] sm:$0xff] }
  0xf8   : > { %15122 = vmatmul.mubr.msk.f32.gmra.mrb[72].mxu1 %vm603_vm1, %v2968_v49  ;;  %15240 = vmatpush3.msk.msra.mxu0 %vm2146_vm0, %v16745_v12  ;;  %v16884_v12 = vld [vmem:[#allocation2 + $0x44] sm:$0xff]  ;;  %v16968_v49 = vld [vmem:[#allocation2 + $0xbc] sm:$0xff] }
  0xf9   : > { %15132 = vmatprep.mubr.msk.f32.mxu0 %vm603_vm1, %v3937_v25  ;;  %15124 = vmatprep.mubr.msk.f32.mxu1 %vm603_vm1, %v3468_v54  ;;  %v16980_v54 = vld [vmem:[#allocation2 + $0xcc] sm:$0xff] }
  0xfa   : > { %15351 = vmatprep.subr.msk.mxu0 %vm2146_vm0, %v16848_v55 }
  0xfb   : > { %15133 = vmatmul.mubr.msk.f32.gmra.mrb[70].mxu0 %vm603_vm1, %v3938_v56 }
  0xfc   : > { %15125 = vmatmul.mubr.msk.f32.gmra.mrb[74].mxu1 %vm603_vm1, %v3469_v57  ;;  %15135 = vmatprep.mubr.msk.f32.mxu0 %vm603_vm1, %v3939_v58  ;;  %v2826_v57 = vld [vmem:[#allocation4 + $0x8] sm:$0xff]  ;;  %v3963_v58 = vld [vmem:[#allocation2 + $0xf3] sm:$0xff] }
  0xfd   : > { %15185 = vmatprep.mubr.msk.f32.mxu1 %vm603_vm1, %v4436_v59  ;;  %v16982_v59 = vld [vmem:[#allocation2 + $0xd4] sm:$0xff] }
  0xff   : > { %15136 = vmatmul.mubr.msk.f32.gmra.mrb[72].mxu0 %vm603_vm1, %v3940_v61 }
 0x100   : > { %15186 = vmatmul.mubr.msk.f32.vlgmr.msra.gmra.mrb[76].mxu1 %vm603_vm1, %v4437_v62  ;;  %15138 = vmatprep.mubr.msk.f32.mxu0 %vm603_vm1, %v3941_v63  ;;  %v2825_v63 = vld [vmem:[#allocation4] sm:$0xff] }
 0x101   : > { %15188 = vmatprep.mubr.msk.f32.mxu1 %vm603_vm1, %v16863_v34  ;;  %15296 = vmatpush3.msk.msra.mxu1 %vm2146_vm0, %v16766_v7  ;;  %v3949_v7 = vld [vmem:[#allocation2 + $0x83] sm:$0xff] }
 0x103   : > { %15139 = vmatmul.mubr.msk.f32.gmra.mrb[74].mxu0 %vm603_vm1, %v3942_v60 }
 0x104   : > { %15189 = vmatmul.mubr.msk.f32.gmra.mrb[78].mxu1 %vm603_vm1, %v16870_v0  ;;  %15141 = vmatprep.mubr.msk.f32.mxu0 %vm603_vm1, %v3943_v2 }
 0x105   : > { %15191 = vmatprep.mubr.msk.f32.mxu1 %vm603_vm1, %v16872_v3 }
 0x107   : > { %15142 = vmatmul.mubr.msk.f32.gmra.mrb[76].mxu0 %vm603_vm1, %v3944_v5  ;;  %v3964_v5 = vld [vmem:[#allocation2 + $0xfb] sm:$0xff] }
 0x108   : > { %15192 = vmatmul.mubr.msk.f32.gmra.mrb[80].mxu1 %vm603_vm1, %v16882_v6  ;;  %15144 = vmatprep.mubr.msk.f32.mxu0 %vm603_vm1, %v3945_v8  ;;  %v16991_v8 = vld [vmem:[#allocation2 + $0xdc] sm:$0xff] }
 0x109   : > { %15194 = vmatprep.mubr.msk.f32.mxu1 %vm603_vm1, %v16884_v12 }
 0x10b   : > { %15145 = vmatmul.mubr.msk.f32.gmra.mrb[78].mxu0 %vm603_vm1, %v3946_v43  ;;  %v14910_v22 = vpop.f32.mrb[2].mxu0 }
 0x10c   : > { %15195 = vmatmul.mubr.msk.f32.gmra.mrb[82].mxu1 %vm603_vm1, %v16892_v13  ;;  %15147 = vmatprep.mubr.msk.f32.mxu0 %vm603_vm1, %v3947_v14  ;;  %2399 = vst.msk [vmem:[#allocation4 + $0x18] sm:$0xff] %vm2395_vm5, %v14910_v22  ;;  %v2226_v23 = vpop.f32.mrb[3].mxu0  ;;  %v16995_v22 = vld [vmem:[#allocation2 + $0xe4] sm:$0xff] }
 0x10d   : > { %15197 = vmatprep.mubr.msk.f32.mxu1 %vm603_vm1, %v16894_v16  ;;  %2398 = vst.msk [vmem:[#allocation4 + $0x10] sm:$0xff] %vm2395_vm5, %v2226_v23 }
 0x10f   : > { %15148 = vmatmul.mubr.msk.f32.gmra.mrb[80].mxu0 %vm603_vm1, %v3948_v18 }
 0x110   : > { %15198 = vmatmul.mubr.msk.f32.gmra.mrb[84].mxu1 %vm603_vm1, %v16902_v19  ;;  %15150 = vmatprep.mubr.msk.f32.mxu0 %vm603_vm1, %v3949_v7  ;;  %v3965_v7 = vld [vmem:[#allocation2 + $0x103] sm:$0xff] }
 0x111   : > { %15200 = vmatprep.mubr.msk.f32.mxu1 %vm603_vm1, %v16904_v20 }
 0x112   : > { %v14955_v10 = vpop.f32.mrb[0].mxu1 }
 0x113   : > { %15151 = vmatmul.mubr.msk.f32.gmra.mrb[82].mxu0 %vm603_vm1, %v3950_v24  ;;  %2429 = vst.msk [vmem:[#allocation4 + $0x108] sm:$0xff] %vm2395_vm5, %v14955_v10  ;;  %v2376_v32 = vpop.f32.mrb[1].mxu1  ;;  %v2828_v18 = vld [vmem:[#allocation4 + $0x18] sm:$0xff]  ;;  %v17005_v10 = vld [vmem:[#allocation2 + $0xec] sm:$0xff] }
 0x114   : > { %15201 = vmatmul.mubr.msk.f32.gmra.mrb[86].mxu1 %vm603_vm1, %v16913_v46  ;;  %15153 = vmatprep.mubr.msk.f32.mxu0 %vm603_vm1, %v3951_v26  ;;  %2428 = vst.msk [vmem:[#allocation4 + $0x100] sm:$0xff] %vm2395_vm5, %v2376_v32  ;;  %v2827_v26 = vld [vmem:[#allocation4 + $0x10] sm:$0xff] }
 0x115   : > { %15203 = vmatprep.mubr.msk.f32.mxu1 %vm603_vm1, %v16916_v27 }
 0x117   : > { %15154 = vmatmul.mubr.msk.f32.gmra.mrb[84].mxu0 %vm603_vm1, %v3952_v28 }
 0x118   : > { %15204 = vmatmul.mubr.msk.f32.gmra.mrb[88].mxu1 %vm603_vm1, %v16924_v29  ;;  %15156 = vmatprep.mubr.msk.f32.mxu0 %vm603_vm1, %v3953_v30  ;;  %v3966_v30 = vld [vmem:[#allocation2 + $0x10b] sm:$0xff] }
 0x119   : > { %15206 = vmatprep.mubr.msk.f32.mxu1 %vm603_vm1, %v16926_v31 }
 0x11a   : > { %v14913_v41 = vpop.f32.mrb[4].mxu0 }
 0x11b   : > { %15157 = vmatmul.mubr.msk.f32.gmra.mrb[86].mxu0 %vm603_vm1, %v3954_v33  ;;  %2401 = vst.msk [vmem:[#allocation4 + $0x28] sm:$0xff] %vm2395_vm5, %v14913_v41  ;;  %v2236_v36 = vpop.f32.mrb[5].mxu0  ;;  %v17008_v41 = vld [vmem:[#allocation2 + $0xf4] sm:$0xff] }
 0x11c   : > { %15207 = vmatmul.mubr.msk.f32.gmra.mrb[90].mxu1 %vm603_vm1, %v16936_v35  ;;  %15159 = vmatprep.mubr.msk.f32.mxu0 %vm603_vm1, %v3955_v37  ;;  %2400 = vst.msk [vmem:[#allocation4 + $0x20] sm:$0xff] %vm2395_vm5, %v2236_v36 }
 0x11d   : > { %15209 = vmatprep.mubr.msk.f32.mxu1 %vm603_vm1, %v16938_v38 }
 0x11f   : > { %15160 = vmatmul.mubr.msk.f32.gmra.mrb[88].mxu0 %vm603_vm1, %v3956_v39  ;;  %v3967_v39 = vld [vmem:[#allocation2 + $0x113] sm:$0xff] }
 0x120   : > { %15210 = vmatmul.mubr.msk.f32.gmra.mrb[92].mxu1 %vm603_vm1, %v16946_v40  ;;  %15162 = vmatprep.mubr.msk.f32.mxu0 %vm603_vm1, %v3957_v42 }
 0x121   : > { %15212 = vmatprep.mubr.msk.f32.mxu1 %vm603_vm1, %v16948_v11 }
 0x122   : > { %v14958_v50 = vpop.f32.mrb[2].mxu1  ;;  %v2830_v37 = vld [vmem:[#allocation4 + $0x28] sm:$0xff] }
 0x123   : > { %15163 = vmatmul.mubr.msk.f32.gmra.mrb[90].mxu0 %vm603_vm1, %v3958_v44  ;;  %2431 = vst.msk [vmem:[#allocation4 + $0x118] sm:$0xff] %vm2395_vm5, %v14958_v50  ;;  %v2386_v25 = vpop.f32.mrb[3].mxu1  ;;  %v3968_v50 = vld [vmem:[#allocation2 + $0x11b] sm:$0xff] }
 0x124   : > { %15213 = vmatmul.mubr.msk.f32.gmra.mrb[94].mxu1 %vm603_vm1, %v16958_v45  ;;  %15165 = vmatprep.mubr.msk.f32.mxu0 %vm603_vm1, %v3959_v47  ;;  %2430 = vst.msk [vmem:[#allocation4 + $0x110] sm:$0xff] %vm2395_vm5, %v2386_v25  ;;  %v2829_v47 = vld [vmem:[#allocation4 + $0x20] sm:$0xff] }
 0x125   : > { %15215 = vmatprep.mubr.msk.f32.mxu1 %vm603_vm1, %v16960_v9 }
 0x126   : > { %v14963_v56 = vpop.f32.mrb[4].mxu1 }
 0x127   : > { %15166 = vmatmul.mubr.msk.f32.gmra.mrb[92].mxu0 %vm603_vm1, %v3960_v48  ;;  %v2862_v61 = vadd.f32 %v14963_v56, %v2826_v57  ;;  %v2646_v62 = vpop.f32.mrb[5].mxu1  ;;  %v3969_v56 = vld [vmem:[#allocation2 + $0x123] sm:$0xff] }
 0x128   : > { %15216 = vmatmul.mubr.msk.f32.gmra.mrb[96].mxu1 %vm603_vm1, %v16968_v49  ;;  %15168 = vmatprep.mubr.msk.f32.mxu0 %vm603_vm1, %v3961_v51  ;;  %v2861_v60 = vadd.f32 %v2825_v63, %v2646_v62  ;;  %v17019_v51 = vld [vmem:[#allocation2 + $0xfc] sm:$0xff]  ;;  %v17022_v57 = vld [vmem:[#allocation2 + $0x104] sm:$0xff] }
 0x129   : > { %15218 = vmatprep.mubr.msk.f32.mxu1 %vm603_vm1, %v16970_v52  ;;  %v14916_v2 = vpop.f32.mrb[6].mxu0  ;;  %2898 = vst.msk [vmem:[#allocation4 + $0x8] sm:$0xff] %vm2395_vm5, %v2862_v61 }
 0x12a   : > { %2403 = vst.msk [vmem:[#allocation4 + $0x38] sm:$0xff] %vm2395_vm5, %v14916_v2  ;;  %v2246_v43 = vpop.f32.mrb[7].mxu0  ;;  %2897 = vst.msk [vmem:[#allocation4] sm:$0xff] %vm2395_vm5, %v2861_v60  ;;  %v14966_v14 = vpop.f32.mrb[6].mxu1  ;;  %v3970_v60 = vld [vmem:[#allocation2 + $0x12b] sm:$0xff] }
 0x12b   : > { %15169 = vmatmul.mubr.msk.f32.gmra.mrb[94].mxu0 %vm603_vm1, %v3962_v53  ;;  %2402 = vst.msk [vmem:[#allocation4 + $0x30] sm:$0xff] %vm2395_vm5, %v2246_v43  ;;  %v2864_v23 = vadd.f32 %v14966_v14, %v2828_v18  ;;  %v2656_v24 = vpop.f32.mrb[7].mxu1  ;;  %v17031_v2 = vld [vmem:[#allocation2 + $0x10c] sm:$0xff]  ;;  %v17034_v14 = vld [vmem:[#allocation2 + $0x114] sm:$0xff] }
 0x12c   : > { %15219 = vmatmul.mubr.msk.f32.gmra.mrb[98].mxu1 %vm603_vm1, %v16980_v54  ;;  %15171 = vmatprep.mubr.msk.f32.mxu0 %vm603_vm1, %v3963_v58  ;;  %v2863_v28 = vadd.f32 %v2827_v26, %v2656_v24 }
 0x12d   : > { %15221 = vmatprep.mubr.msk.f32.mxu1 %vm603_vm1, %v16982_v59  ;;  %2900 = vst.msk [vmem:[#allocation4 + $0x18] sm:$0xff] %vm2395_vm5, %v2864_v23 }
 0x12e   : > { %v14919_v32 = vpop.f32.mrb[8].mxu0  ;;  %2899 = vst.msk [vmem:[#allocation4 + $0x10] sm:$0xff] %vm2395_vm5, %v2863_v28  ;;  %v14969_v33 = vpop.f32.mrb[8].mxu1 }
 0x12f   : > { %15172 = vmatmul.mubr.msk.f32.gmra.mrb[96].mxu0 %vm603_vm1, %v3964_v5  ;;  %2405 = vst.msk [vmem:[#allocation4 + $0x48] sm:$0xff] %vm2395_vm5, %v14919_v32  ;;  %v2256_v42 = vpop.f32.mrb[9].mxu0  ;;  %v2866_v36 = vadd.f32 %v14969_v33, %v2830_v37  ;;  %v2666_v44 = vpop.f32.mrb[9].mxu1 }
 0x130   : > { %15222 = vmatmul.mubr.msk.f32.gmra.mrb[100].mxu1 %vm603_vm1, %v16991_v8  ;;  %15174 = vmatprep.mubr.msk.f32.mxu0 %vm603_vm1, %v3965_v7  ;;  %2404 = vst.msk [vmem:[#allocation4 + $0x40] sm:$0xff] %vm2395_vm5, %v2256_v42  ;;  %v2865_v48 = vadd.f32 %v2829_v47, %v2666_v44 }
 0x131   : > { %15224 = vmatprep.mubr.msk.f32.mxu1 %vm603_vm1, %v16995_v22  ;;  %2902 = vst.msk [vmem:[#allocation4 + $0x28] sm:$0xff] %vm2395_vm5, %v2866_v36  ;;  %v2832_v53 = vld [vmem:[#allocation4 + $0x38] sm:$0xff]  ;;  %v5438_v36 = vld [vmem:[#allocation2 + $0x25] sm:$0xff] }
 0x132   : > { %2901 = vst.msk [vmem:[#allocation4 + $0x20] sm:$0xff] %vm2395_vm5, %v2865_v48  ;;  %v14972_v25 = vpop.f32.mrb[10].mxu1  ;;  %v2831_v62 = vld [vmem:[#allocation4 + $0x30] sm:$0xff] }
 0x133   : > { %15175 = vmatmul.mubr.msk.f32.gmra.mrb[98].mxu0 %vm603_vm1, %v3966_v30  ;;  %v2868_v58 = vadd.f32 %v14972_v25, %v2832_v53  ;;  %v2676_v61 = vpop.f32.mrb[11].mxu1  ;;  %v17046_v30 = vld [vmem:[#allocation2 + $0x11c] sm:$0xff] }
 0x134   : > { %15225 = vmatmul.mubr.msk.f32.gmra.mrb[102].mxu1 %vm603_vm1, %v17005_v10  ;;  %15177 = vmatprep.mubr.msk.f32.mxu0 %vm603_vm1, %v3967_v39  ;;  %v2867_v63 = vadd.f32 %v2831_v62, %v2676_v61  ;;  %v17049_v39 = vld [vmem:[#allocation2 + $0x124] sm:$0xff]  ;;  %v5440_v25 = vld [vmem:[#allocation2 + $0x35] sm:$0xff] }
 0x135   : > { %15227 = vmatprep.mubr.msk.f32.mxu1 %vm603_vm1, %v17008_v41  ;;  %2904 = vst.msk [vmem:[#allocation4 + $0x38] sm:$0xff] %vm2395_vm5, %v2868_v58  ;;  %v5442_v61 = vld [vmem:[#allocation2 + $0x45] sm:$0xff] }
 0x136   : > { %2903 = vst.msk [vmem:[#allocation4 + $0x30] sm:$0xff] %vm2395_vm5, %v2867_v63  ;;  %v14975_v5 = vpop.f32.mrb[12].mxu1  ;;  %v2834_v43 = vld [vmem:[#allocation4 + $0x48] sm:$0xff] }
 0x137   : > { %15178 = vmatmul.mubr.msk.f32.gmra.mrb[100].mxu0 %vm603_vm1, %v3968_v50  ;;  %v2870_v7 = vadd.f32 %v14975_v5, %v2834_v43  ;;  %v2686_v23 = vpop.f32.mrb[13].mxu1  ;;  %v2833_v24 = vld [vmem:[#allocation4 + $0x40] sm:$0xff]  ;;  %v5444_v5 = vld [vmem:[#allocation2 + $0x55] sm:$0xff] }
 0x138   : > { %15228 = vmatmul.mubr.msk.f32.gmra.mrb[104].mxu1 %vm603_vm1, %v17019_v51  ;;  %15180 = vmatprep.mubr.msk.f32.mxu0 %vm603_vm1, %v3969_v56  ;;  %v14922_v18 = vpop.f32.mrb[10].mxu0  ;;  %v2869_v28 = vadd.f32 %v2833_v24, %v2686_v23  ;;  %v5446_v23 = vld [vmem:[#allocation2 + $0x65] sm:$0xff] }
 0x139   : > { %15230 = vmatprep.mubr.msk.f32.mxu1 %vm603_vm1, %v17022_v57  ;;  %2407 = vst.msk [vmem:[#allocation4 + $0x58] sm:$0xff] %vm2395_vm5, %v14922_v18  ;;  %v2266_v26 = vpop.f32.mrb[11].mxu0  ;;  %2906 = vst.msk [vmem:[#allocation4 + $0x48] sm:$0xff] %vm2395_vm5, %v2870_v7 }
 0x13a   : > { %2406 = vst.msk [vmem:[#allocation4 + $0x50] sm:$0xff] %vm2395_vm5, %v2266_v26  ;;  %2905 = vst.msk [vmem:[#allocation4 + $0x40] sm:$0xff] %vm2395_vm5, %v2869_v28  ;;  %v14978_v32 = vpop.f32.mrb[14].mxu1 }
 0x13b   : > { %15181 = vmatmul.mubr.msk.f32.gmra.mrb[102].mxu0 %vm603_vm1, %v3970_v60  ;;  %v2696_v37 = vpop.f32.mrb[15].mxu1 }
 0x13c   : > { %15231 = vmatmul.mubr.msk.f32.gmra.mrb[106].mxu1 %vm603_vm1, %v17031_v2  ;;  %15241 = vmatprep.mubr.msk.f32.mxu0 %vm603_vm1, %v16863_v34  ;;  %v14925_v33 = vpop.f32.mrb[12].mxu0  ;;  %v17061_v34 = vld [vmem:[#allocation2 + $0x12c] sm:$0xff] }
 0x13d   : > { %15233 = vmatprep.mubr.msk.f32.mxu1 %vm603_vm1, %v17034_v14  ;;  %2409 = vst.msk [vmem:[#allocation4 + $0x68] sm:$0xff] %vm2395_vm5, %v14925_v33  ;;  %v2276_v42 = vpop.f32.mrb[13].mxu0 }
 0x13e   : > { %2408 = vst.msk [vmem:[#allocation4 + $0x60] sm:$0xff] %vm2395_vm5, %v2276_v42  ;;  %v14981_v47 = vpop.f32.mrb[16].mxu1 }
 0x13f   : > { %15242 = vmatmul.mubr.msk.f32.vlgmr.msra.gmra.mrb[104].mxu0 %vm603_vm1, %v16870_v0  ;;  %v2706_v50 = vpop.f32.mrb[17].mxu1 }
 0x140   : > { %15234 = vmatmul.mubr.msk.f32.gmra.mrb[108].mxu1 %vm603_vm1, %v17046_v30  ;;  %15352 = vmatpush3.msk.msra.mxu0 %vm2146_vm0, %v16848_v55  ;;  %v2836_v44 = vld [vmem:[#allocation4 + $0x58] sm:$0xff] }
 0x141   : > { %15244 = vmatprep.mubr.msk.f32.mxu0 %vm603_vm1, %v16872_v3  ;;  %15236 = vmatprep.mubr.msk.f32.mxu1 %vm603_vm1, %v17049_v39  ;;  %v2872_v0 = vadd.f32 %v14978_v32, %v2836_v44  ;;  %v2835_v48 = vld [vmem:[#allocation4 + $0x50] sm:$0xff] }
 0x142   : > { %v2871_v55 = vadd.f32 %v2835_v48, %v2696_v37  ;;  %v5439_v3 = vld [vmem:[#allocation2 + $0x2d] sm:$0xff]  ;;  %v5450_v48 = vld [vmem:[#allocation2 + $0x85] sm:$0xff] }
 0x143   : > { %15245 = vmatmul.mubr.msk.f32.gmra.mrb[106].mxu0 %vm603_vm1, %v16882_v6  ;;  %2908 = vst.msk [vmem:[#allocation4 + $0x58] sm:$0xff] %vm2395_vm5, %v2872_v0  ;;  %v5449_v0 = vld [vmem:[#allocation2 + $0x7d] sm:$0xff] }
 0x144   : > { %15237 = vmatmul.mubr.msk.f32.gmra.mrb[110].mxu1 %vm603_vm1, %v17061_v34  ;;  %15247 = vmatprep.mubr.msk.f32.mxu0 %vm603_vm1, %v16884_v12  ;;  %2907 = vst.msk [vmem:[#allocation4 + $0x50] sm:$0xff] %vm2395_vm5, %v2871_v55  ;;  %v2838_v53 = vld [vmem:[#allocation4 + $0x68] sm:$0xff]  ;;  %v5441_v12 = vld [vmem:[#allocation2 + $0x3d] sm:$0xff] }
 0x145   : > { %15297 = vmatprep.mubr.msk.f32.mxu1 %vm603_vm1, %v5438_v36  ;;  %v2874_v56 = vadd.f32 %v14981_v47, %v2838_v53  ;;  %v2837_v58 = vld [vmem:[#allocation4 + $0x60] sm:$0xff]  ;;  %v5448_v36 = vld [vmem:[#allocation2 + $0x75] sm:$0xff] }
 0x146   : > { %v2873_v6 = vadd.f32 %v2837_v58, %v2706_v50  ;;  %v5452_v53 = vld [vmem:[#allocation2 + $0x95] sm:$0xff] }
 0x147   : > { %15248 = vmatmul.mubr.msk.f32.gmra.mrb[108].mxu0 %vm603_vm1, %v16892_v13  ;;  %2910 = vst.msk [vmem:[#allocation4 + $0x68] sm:$0xff] %vm2395_vm5, %v2874_v56 }
 0x148   : > { %15298 = vmatmul.mubr.msk.f32.vlgmr.msra.gmra.mrb[112].mxu1 %vm603_vm1, %v5439_v3  ;;  %15250 = vmatprep.mubr.msk.f32.mxu0 %vm603_vm1, %v16894_v16  ;;  %v14928_v62 = vpop.f32.mrb[14].mxu0  ;;  %2909 = vst.msk [vmem:[#allocation4 + $0x60] sm:$0xff] %vm2395_vm5, %v2873_v6  ;;  %v5443_v16 = vld [vmem:[#allocation2 + $0x4d] sm:$0xff]  ;;  %v5453_v6 = vld [vmem:[#allocation2 + $0x9d] sm:$0xff] }
 0x149   : > { %15300 = vmatprep.mubr.msk.f32.mxu1 %vm603_vm1, %v5440_v25  ;;  %v14984_v63 = vpop.f32.mrb[18].mxu1  ;;  %2411 = vst.msk [vmem:[#allocation4 + $0x78] sm:$0xff] %vm2395_vm5, %v14928_v62  ;;  %v2286_v60 = vpop.f32.mrb[15].mxu0 }
 0x14a   : > { %v2716_v13 = vpop.f32.mrb[19].mxu1  ;;  %2410 = vst.msk [vmem:[#allocation4 + $0x70] sm:$0xff] %vm2395_vm5, %v2286_v60 }
 0x14b   : > { %15251 = vmatmul.mubr.msk.f32.gmra.mrb[110].mxu0 %vm603_vm1, %v16902_v19 }
 0x14c   : > { %15301 = vmatmul.mubr.msk.f32.gmra.mrb[114].mxu1 %vm603_vm1, %v5441_v12  ;;  %15253 = vmatprep.mubr.msk.f32.mxu0 %vm603_vm1, %v16904_v20  ;;  %v14931_v43 = vpop.f32.mrb[16].mxu0  ;;  %v5445_v20 = vld [vmem:[#allocation2 + $0x5d] sm:$0xff] }
 0x14d   : > { %15303 = vmatprep.mubr.msk.f32.mxu1 %vm603_vm1, %v5442_v61  ;;  %2413 = vst.msk [vmem:[#allocation4 + $0x88] sm:$0xff] %vm2395_vm5, %v14931_v43  ;;  %v2296_v18 = vpop.f32.mrb[17].mxu0  ;;  %v14987_v19 = vpop.f32.mrb[20].mxu1  ;;  %v5454_v61 = vld [vmem:[#allocation2 + $0xa5] sm:$0xff] }
 0x14e   : > { %2412 = vst.msk [vmem:[#allocation4 + $0x80] sm:$0xff] %vm2395_vm5, %v2296_v18  ;;  %v2726_v7 = vpop.f32.mrb[21].mxu1  ;;  %v5458_v18 = vld [vmem:[#allocation2 + $0xc5] sm:$0xff] }
 0x14f   : > { %15254 = vmatmul.mubr.msk.f32.gmra.mrb[112].mxu0 %vm603_vm1, %v16913_v46 }
 0x150   : > { %15304 = vmatmul.mubr.msk.f32.gmra.mrb[116].mxu1 %vm603_vm1, %v5443_v16  ;;  %15256 = vmatprep.mubr.msk.f32.mxu0 %vm603_vm1, %v16916_v27  ;;  %v2840_v24 = vld [vmem:[#allocation4 + $0x78] sm:$0xff]  ;;  %v5447_v27 = vld [vmem:[#allocation2 + $0x6d] sm:$0xff] }
 0x151   : > { %15306 = vmatprep.mubr.msk.f32.mxu1 %vm603_vm1, %v5444_v5  ;;  %v2876_v26 = vadd.f32 %v14984_v63, %v2840_v24  ;;  %v2839_v28 = vld [vmem:[#allocation4 + $0x70] sm:$0xff] }
 0x152   : > { %v14934_v46 = vpop.f32.mrb[18].mxu0  ;;  %v2875_v32 = vadd.f32 %v2839_v28, %v2716_v13  ;;  %v5456_v13 = vld [vmem:[#allocation2 + $0xb5] sm:$0xff]  ;;  %v5459_v24 = vld [vmem:[#allocation2 + $0xcd] sm:$0xff] }
 0x153   : > { %15257 = vmatmul.mubr.msk.f32.gmra.mrb[114].mxu0 %vm603_vm1, %v16924_v29  ;;  %v14990_v33 = vpop.f32.mrb[22].mxu1  ;;  %2415 = vst.msk [vmem:[#allocation4 + $0x98] sm:$0xff] %vm2395_vm5, %v14934_v46  ;;  %v2306_v37 = vpop.f32.mrb[19].mxu0  ;;  %2912 = vst.msk [vmem:[#allocation4 + $0x78] sm:$0xff] %vm2395_vm5, %v2876_v26  ;;  %v5460_v26 = vld [vmem:[#allocation2 + $0xd5] sm:$0xff] }
 0x154   : > { %15307 = vmatmul.mubr.msk.f32.gmra.mrb[118].mxu1 %vm603_vm1, %v5445_v20  ;;  %15259 = vmatprep.mubr.msk.f32.mxu0 %vm603_vm1, %v16926_v31  ;;  %v2736_v42 = vpop.f32.mrb[23].mxu1  ;;  %2414 = vst.msk [vmem:[#allocation4 + $0x90] sm:$0xff] %vm2395_vm5, %v2306_v37  ;;  %2911 = vst.msk [vmem:[#allocation4 + $0x70] sm:$0xff] %vm2395_vm5, %v2875_v32  ;;  %v2842_v29 = vld [vmem:[#allocation4 + $0x88] sm:$0xff] }
 0x155   : > { %15309 = vmatprep.mubr.msk.f32.mxu1 %vm603_vm1, %v5446_v23  ;;  %v2878_v44 = vadd.f32 %v14987_v19, %v2842_v29  ;;  %v2841_v47 = vld [vmem:[#allocation4 + $0x80] sm:$0xff] }
 0x156   : > { %v2877_v31 = vadd.f32 %v2841_v47, %v2726_v7  ;;  %v5465_v47 = vld [vmem:[#allocation2 + $0xfd] sm:$0xff] }
 0x157   : > { %15260 = vmatmul.mubr.msk.f32.gmra.mrb[116].mxu0 %vm603_vm1, %v16936_v35  ;;  %2914 = vst.msk [vmem:[#allocation4 + $0x88] sm:$0xff] %vm2395_vm5, %v2878_v44 }
 0x158   : > { %15310 = vmatmul.mubr.msk.f32.gmra.mrb[120].mxu1 %vm603_vm1, %v5447_v27  ;;  %15262 = vmatprep.mubr.msk.f32.mxu0 %vm603_vm1, %v16938_v38  ;;  %2913 = vst.msk [vmem:[#allocation4 + $0x80] sm:$0xff] %vm2395_vm5, %v2877_v31  ;;  %v5451_v38 = vld [vmem:[#allocation2 + $0x8d] sm:$0xff]  ;;  %v5466_v31 = vld [vmem:[#allocation2 + $0x105] sm:$0xff] }
 0x159   : > { %15312 = vmatprep.mubr.msk.f32.mxu1 %vm603_vm1, %v5448_v36  ;;  %v5464_v36 = vld [vmem:[#allocation2 + $0xf5] sm:$0xff] }
 0x15a   : > { %v2844_v35 = vld [vmem:[#allocation4 + $0x98] sm:$0xff] }
 0x15b   : > { %15263 = vmatmul.mubr.msk.f32.gmra.mrb[118].mxu0 %vm603_vm1, %v16946_v40  ;;  %v14937_v50 = vpop.f32.mrb[20].mxu0  ;;  %v2880_v55 = vadd.f32 %v14990_v33, %v2844_v35  ;;  %v2843_v3 = vld [vmem:[#allocation4 + $0x90] sm:$0xff]  ;;  %v5462_v33 = vld [vmem:[#allocation2 + $0xe5] sm:$0xff] }
 0x15c   : > { %15313 = vmatmul.mubr.msk.f32.gmra.mrb[122].mxu1 %vm603_vm1, %v5449_v0  ;;  %15265 = vmatprep.mubr.msk.f32.mxu0 %vm603_vm1, %v16948_v11  ;;  %2417 = vst.msk [vmem:[#allocation4 + $0xa8] sm:$0xff] %vm2395_vm5, %v14937_v50  ;;  %v2316_v25 = vpop.f32.mrb[21].mxu0  ;;  %v2879_v56 = vadd.f32 %v2843_v3, %v2736_v42  ;;  %v14993_v58 = vpop.f32.mrb[24].mxu1  ;;  %v4971_v50 = vld [vmem:[#allocation2 + $0x134] sm:$0xff] }
 0x15d   : > { %15315 = vmatprep.mubr.msk.f32.mxu1 %vm603_vm1, %v5450_v48  ;;  %2416 = vst.msk [vmem:[#allocation4 + $0xa0] sm:$0xff] %vm2395_vm5, %v2316_v25  ;;  %2916 = vst.msk [vmem:[#allocation4 + $0x98] sm:$0xff] %vm2395_vm5, %v2880_v55  ;;  %v2746_v40 = vpop.f32.mrb[25].mxu1 }
 0x15e   : > { %2915 = vst.msk [vmem:[#allocation4 + $0x90] sm:$0xff] %vm2395_vm5, %v2879_v56  ;;  %v5939_v56 = vld [vmem:[#allocation2 + $0x26] sm:$0xff] }
 0x15f   : > { %15266 = vmatmul.mubr.msk.f32.gmra.mrb[120].mxu0 %vm603_vm1, %v16958_v45  ;;  %v14940_v11 = vpop.f32.mrb[22].mxu0  ;;  %v5455_v45 = vld [vmem:[#allocation2 + $0xad] sm:$0xff] }
 0x160   : > { %15316 = vmatmul.mubr.msk.f32.gmra.mrb[124].mxu1 %vm603_vm1, %v5451_v38  ;;  %15268 = vmatprep.mubr.msk.f32.mxu0 %vm603_vm1, %v16960_v9  ;;  %2419 = vst.msk [vmem:[#allocation4 + $0xb8] sm:$0xff] %vm2395_vm5, %v14940_v11  ;;  %v2326_v12 = vpop.f32.mrb[23].mxu0  ;;  %v14996_v62 = vpop.f32.mrb[26].mxu1  ;;  %v5468_v38 = vld [vmem:[#allocation2 + $0x115] sm:$0xff]  ;;  %v3327_v11 = vld [vmem:[#allocation4 + $0x8] sm:$0xff] }
 0x161   : > { %15318 = vmatprep.mubr.msk.f32.mxu1 %vm603_vm1, %v5452_v53  ;;  %2418 = vst.msk [vmem:[#allocation4 + $0xb0] sm:$0xff] %vm2395_vm5, %v2326_v12  ;;  %v2756_v63 = vpop.f32.mrb[27].mxu1  ;;  %v5469_v53 = vld [vmem:[#allocation2 + $0x11d] sm:$0xff] }
 0x163   : > { %15269 = vmatmul.mubr.msk.f32.gmra.mrb[122].mxu0 %vm603_vm1, %v16968_v49  ;;  %v2846_v9 = vld [vmem:[#allocation4 + $0xa8] sm:$0xff]  ;;  %v5457_v49 = vld [vmem:[#allocation2 + $0xbd] sm:$0xff] }
 0x164   : > { %15319 = vmatmul.mubr.msk.f32.gmra.mrb[126].mxu1 %vm603_vm1, %v5453_v6  ;;  %15271 = vmatprep.mubr.msk.f32.mxu0 %vm603_vm1, %v16970_v52  ;;  %v2882_v60 = vadd.f32 %v14993_v58, %v2846_v9  ;;  %v2845_v16 = vld [vmem:[#allocation4 + $0xa0] sm:$0xff] }
 0x165   : > { %15321 = vmatprep.mubr.msk.f32.mxu1 %vm603_vm1, %v5454_v61  ;;  %v2881_v5 = vadd.f32 %v2845_v16, %v2746_v40  ;;  %v5470_v58 = vld [vmem:[#allocation2 + $0x125] sm:$0xff] }
 0x166   : > { %2918 = vst.msk [vmem:[#allocation4 + $0xa8] sm:$0xff] %vm2395_vm5, %v2882_v60  ;;  %v2858_v61 = vld [vmem:[#allocation4 + $0x108] sm:$0xff]  ;;  %v2857_v16 = vld [vmem:[#allocation4 + $0x100] sm:$0xff] }
 0x167   : > { %15272 = vmatmul.mubr.msk.f32.gmra.mrb[124].mxu0 %vm603_vm1, %v16980_v54  ;;  %2917 = vst.msk [vmem:[#allocation4 + $0xa0] sm:$0xff] %vm2395_vm5, %v2881_v5  ;;  %v2848_v52 = vld [vmem:[#allocation4 + $0xb8] sm:$0xff] }
 0x168   : > { %15322 = vmatmul.mubr.msk.f32.gmra.mrb[128].mxu1 %vm603_vm1, %v5455_v45  ;;  %15274 = vmatprep.mubr.msk.f32.mxu0 %vm603_vm1, %v16982_v59  ;;  %v2884_v43 = vadd.f32 %v14996_v62, %v2848_v52  ;;  %v2847_v19 = vld [vmem:[#allocation4 + $0xb0] sm:$0xff] }
 0x169   : > { %15324 = vmatprep.mubr.msk.f32.mxu1 %vm603_vm1, %v5456_v13  ;;  %v14943_v20 = vpop.f32.mrb[24].mxu0  ;;  %v2883_v7 = vadd.f32 %v2847_v19, %v2756_v63  ;;  %v3326_v63 = vld [vmem:[#allocation4] sm:$0xff]  ;;  %v5940_v52 = vld [vmem:[#allocation2 + $0x2e] sm:$0xff]  ;;  %v5941_v19 = vld [vmem:[#allocation2 + $0x36] sm:$0xff] }
 0x16a   : > { %v14999_v23 = vpop.f32.mrb[28].mxu1  ;;  %2421 = vst.msk [vmem:[#allocation4 + $0xc8] sm:$0xff] %vm2395_vm5, %v14943_v20  ;;  %v2336_v54 = vpop.f32.mrb[25].mxu0  ;;  %2920 = vst.msk [vmem:[#allocation4 + $0xb8] sm:$0xff] %vm2395_vm5, %v2884_v43  ;;  %v5472_v20 = vld [vmem:[#allocation2 + $0x135] sm:$0xff] }
 0x16b   : > { %15275 = vmatmul.mubr.msk.f32.gmra.mrb[126].mxu0 %vm603_vm1, %v16991_v8  ;;  %v2766_v59 = vpop.f32.mrb[29].mxu1  ;;  %2420 = vst.msk [vmem:[#allocation4 + $0xc0] sm:$0xff] %vm2395_vm5, %v2336_v54  ;;  %2919 = vst.msk [vmem:[#allocation4 + $0xb0] sm:$0xff] %vm2395_vm5, %v2883_v7 }
 0x16c   : > { %15325 = vmatmul.mubr.msk.f32.gmra.mrb[130].mxu1 %vm603_vm1, %v5457_v49  ;;  %15277 = vmatprep.mubr.msk.f32.mxu0 %vm603_vm1, %v16995_v22  ;;  %v5461_v22 = vld [vmem:[#allocation2 + $0xdd] sm:$0xff] }
 0x16d   : > { %15327 = vmatprep.mubr.msk.f32.mxu1 %vm603_vm1, %v5458_v18  ;;  %v14946_v8 = vpop.f32.mrb[26].mxu0  ;;  %v5471_v18 = vld [vmem:[#allocation2 + $0x12d] sm:$0xff] }
 0x16e   : > { %v15002_v28 = vpop.f32.mrb[30].mxu1  ;;  %2423 = vst.msk [vmem:[#allocation4 + $0xd8] sm:$0xff] %vm2395_vm5, %v14946_v8  ;;  %v2346_v46 = vpop.f32.mrb[27].mxu0 }
 0x16f   : > { %15278 = vmatmul.mubr.msk.f32.gmra.mrb[128].mxu0 %vm603_vm1, %v17005_v10  ;;  %v2776_v32 = vpop.f32.mrb[31].mxu1  ;;  %2422 = vst.msk [vmem:[#allocation4 + $0xd0] sm:$0xff] %vm2395_vm5, %v2346_v46 }
 0x170   : > { %15328 = vmatmul.mubr.msk.f32.gmra.mrb[132].mxu1 %vm603_vm1, %v5459_v24  ;;  %15280 = vmatprep.mubr.msk.f32.mxu0 %vm603_vm1, %v17008_v41  ;;  %v5463_v41 = vld [vmem:[#allocation2 + $0xed] sm:$0xff]  ;;  %v2860_v24 = vld [vmem:[#allocation4 + $0x118] sm:$0xff] }
 0x171   : > { %15330 = vmatprep.mubr.msk.f32.mxu1 %vm603_vm1, %v5460_v26  ;;  %v2850_v27 = vld [vmem:[#allocation4 + $0xc8] sm:$0xff] }
 0x172   : > { %v2886_v10 = vadd.f32 %v14999_v23, %v2850_v27  ;;  %v2849_v37 = vld [vmem:[#allocation4 + $0xc0] sm:$0xff]  ;;  %v3329_v23 = vld [vmem:[#allocation4 + $0x18] sm:$0xff]  ;;  %v2859_v27 = vld [vmem:[#allocation4 + $0x110] sm:$0xff] }
 0x173   : > { %15281 = vmatmul.mubr.msk.f32.gmra.mrb[130].mxu0 %vm603_vm1, %v17019_v51  ;;  %v2885_v42 = vadd.f32 %v2849_v37, %v2766_v59 }
 0x174   : > { %15331 = vmatmul.mubr.msk.f32.gmra.mrb[134].mxu1 %vm603_vm1, %v5461_v22  ;;  %15283 = vmatprep.mubr.msk.f32.mxu0 %vm603_vm1, %v17022_v57  ;;  %2922 = vst.msk [vmem:[#allocation4 + $0xc8] sm:$0xff] %vm2395_vm5, %v2886_v10 }
 0x175   : > { %15333 = vmatprep.mubr.msk.f32.mxu1 %vm603_vm1, %v5462_v33  ;;  %2921 = vst.msk [vmem:[#allocation4 + $0xc0] sm:$0xff] %vm2395_vm5, %v2885_v42  ;;  %v2852_v29 = vld [vmem:[#allocation4 + $0xd8] sm:$0xff] }
 0x176   : > { %v2888_v51 = vadd.f32 %v15002_v28, %v2852_v29  ;;  %v2851_v44 = vld [vmem:[#allocation4 + $0xd0] sm:$0xff]  ;;  %v5942_v42 = vld [vmem:[#allocation2 + $0x3e] sm:$0xff]  ;;  %v5943_v29 = vld [vmem:[#allocation2 + $0x46] sm:$0xff] }
 0x177   : > { %15284 = vmatmul.mubr.msk.f32.gmra.mrb[132].mxu0 %vm603_vm1, %v17031_v2  ;;  %v2887_v57 = vadd.f32 %v2851_v44, %v2776_v32  ;;  %v3328_v28 = vld [vmem:[#allocation4 + $0x10] sm:$0xff]  ;;  %v3331_v44 = vld [vmem:[#allocation4 + $0x28] sm:$0xff] }
 0x178   : > { %15334 = vmatmul.mubr.msk.f32.gmra.mrb[136].mxu1 %vm603_vm1, %v5463_v41  ;;  %15286 = vmatprep.mubr.msk.f32.mxu0 %vm603_vm1, %v17034_v14  ;;  %2924 = vst.msk [vmem:[#allocation4 + $0xd8] sm:$0xff] %vm2395_vm5, %v2888_v51  ;;  %v5467_v14 = vld [vmem:[#allocation2 + $0x10d] sm:$0xff] }
 0x179   : > { %15336 = vmatprep.mubr.msk.f32.mxu1 %vm603_vm1, %v5464_v36  ;;  %2923 = vst.msk [vmem:[#allocation4 + $0xd0] sm:$0xff] %vm2395_vm5, %v2887_v57  ;;  %v5473_v36 = vld [vmem:[#allocation2 + $0x13d] sm:$0xff] }
 0x17a   : > { %v14949_v0 = vpop.f32.mrb[28].mxu0 }
 0x17b   : > { %v15005_v48 = vpop.f32.mrb[32].mxu1  ;;  %2425 = vst.msk [vmem:[#allocation4 + $0xe8] sm:$0xff] %vm2395_vm5, %v14949_v0  ;;  %v2356_v2 = vpop.f32.mrb[29].mxu0  ;;  %15287 = vmatmul.mubr.msk.f32.gmra.mrb[134].mxu0 %vm603_vm1, %v17046_v30  ;;  %v3330_v0 = vld [vmem:[#allocation4 + $0x20] sm:$0xff] }
 0x17c   : > { %v2786_v35 = vpop.f32.mrb[33].mxu1  ;;  %15337 = vmatmul.mubr.msk.f32.gmra.mrb[138].mxu1 %vm603_vm1, %v5465_v47  ;;  %2424 = vst.msk [vmem:[#allocation4 + $0xe0] sm:$0xff] %vm2395_vm5, %v2356_v2  ;;  %15289 = vmatprep.mubr.msk.f32.mxu0 %vm603_vm1, %v17049_v39  ;;  %v4972_v39 = vld [vmem:[#allocation2 + $0x13c] sm:$0xff] }
 0x17d   : > { %15339 = vmatprep.mubr.msk.f32.mxu1 %vm603_vm1, %v5466_v31 }
 0x17e   : > { %v14952_v55 = vpop.f32.mrb[30].mxu0 }
 0x17f   : > { %v15008_v3 = vpop.f32.mrb[34].mxu1  ;;  %2427 = vst.msk [vmem:[#allocation4 + $0xf8] sm:$0xff] %vm2395_vm5, %v14952_v55  ;;  %v2366_v25 = vpop.f32.mrb[31].mxu0  ;;  %15290 = vmatmul.mubr.msk.f32.gmra.mrb[136].mxu0 %vm603_vm1, %v17061_v34 }
 0x180   : > { %v2796_v30 = vpop.f32.mrb[35].mxu1  ;;  %15340 = vmatmul.mubr.msk.f32.gmra.mrb[140].mxu1 %vm603_vm1, %v5467_v14  ;;  %2426 = vst.msk [vmem:[#allocation4 + $0xf0] sm:$0xff] %vm2395_vm5, %v2366_v25  ;;  %15292 = vmatprep.mubr.msk.f32.mxu0 %vm603_vm1, %v4971_v50  ;;  %v5945_v50 = vld [vmem:[#allocation2 + $0x56] sm:$0xff] }
 0x181   : > { %15342 = vmatprep.mubr.msk.f32.mxu1 %vm603_vm1, %v5468_v38  ;;  %v3333_v25 = vld [vmem:[#allocation4 + $0x38] sm:$0xff] }
 0x182   : > { %v15019_v40 = vpop.f32.mrb[32].mxu0  ;;  %v2854_v6 = vld [vmem:[#allocation4 + $0xe8] sm:$0xff] }
 0x183   : > { %v15011_v12 = vpop.f32.mrb[36].mxu1  ;;  %v3363_v62 = vadd.f32 %v15019_v40, %v3327_v11  ;;  %v3147_v34 = vpop.f32.mrb[33].mxu0  ;;  %15293 = vmatmul.mubr.msk.f32.gmra.mrb[138].mxu0 %vm603_vm1, %v4972_v39  ;;  %v2890_v45 = vadd.f32 %v15005_v48, %v2854_v6  ;;  %v2853_v9 = vld [vmem:[#allocation4 + $0xe0] sm:$0xff] }
 0x184   : > { %v2894_v60 = vadd.f32 %v15011_v12, %v2858_v61  ;;  %v2806_v13 = vpop.f32.mrb[37].mxu1  ;;  %15343 = vmatmul.mubr.msk.f32.gmra.mrb[142].mxu1 %vm603_vm1, %v5469_v53  ;;  %v3362_v5 = vadd.f32 %v3326_v63, %v3147_v34  ;;  %15353 = vmatprep.mubr.msk.f32.mxu0 %vm603_vm1, %v5939_v56  ;;  %v2889_v49 = vadd.f32 %v2853_v9, %v2786_v35  ;;  %v5944_v35 = vld [vmem:[#allocation2 + $0x4e] sm:$0xff]  ;;  %v5946_v6 = vld [vmem:[#allocation2 + $0x5e] sm:$0xff]  ;;  %v5947_v61 = vld [vmem:[#allocation2 + $0x66] sm:$0xff] }
 0x185   : > { %v2893_v43 = vadd.f32 %v2857_v16, %v2806_v13  ;;  %15345 = vmatprep.mubr.msk.f32.mxu1 %vm603_vm1, %v5470_v58  ;;  %3399 = vst.msk [vmem:[#allocation4 + $0x8] sm:$0xff] %vm2395_vm5, %v3363_v62  ;;  %2926 = vst.msk [vmem:[#allocation4 + $0xe8] sm:$0xff] %vm2395_vm5, %v2890_v45  ;;  %v3332_v58 = vld [vmem:[#allocation4 + $0x30] sm:$0xff]  ;;  %v3335_v45 = vld [vmem:[#allocation4 + $0x48] sm:$0xff] }
 0x186   : > { %2930 = vst.msk [vmem:[#allocation4 + $0x108] sm:$0xff] %vm2395_vm5, %v2894_v60  ;;  %3398 = vst.msk [vmem:[#allocation4] sm:$0xff] %vm2395_vm5, %v3362_v5  ;;  %v15022_v7 = vpop.f32.mrb[34].mxu0  ;;  %v2856_v54 = vld [vmem:[#allocation4 + $0xf8] sm:$0xff]  ;;  %v3334_v5 = vld [vmem:[#allocation4 + $0x40] sm:$0xff] }
 0x187   : > { %2925 = vst.msk [vmem:[#allocation4 + $0xe0] sm:$0xff] %vm2395_vm5, %v2889_v49  ;;  %2929 = vst.msk [vmem:[#allocation4 + $0x100] sm:$0xff] %vm2395_vm5, %v2893_v43  ;;  %v15014_v59 = vpop.f32.mrb[38].mxu1  ;;  %v3365_v26 = vadd.f32 %v15022_v7, %v3329_v23  ;;  %v3157_v8 = vpop.f32.mrb[35].mxu0  ;;  %15354 = vmatmul.mubr.msk.f32.vlgmr.msra.gmra.mrb[140].mxu0 %vm603_vm1, %v5940_v52  ;;  %v2892_v46 = vadd.f32 %v15008_v3, %v2856_v54  ;;  %v2855_v32 = vld [vmem:[#allocation4 + $0xf0] sm:$0xff]  ;;  %v3337_v54 = vld [vmem:[#allocation4 + $0x58] sm:$0xff] }
 0x188   : > { %v2896_v22 = vadd.f32 %v15014_v59, %v2860_v24  ;;  %v2816_v33 = vpop.f32.mrb[39].mxu1  ;;  %15346 = vmatmul.mubr.msk.f32.gmra.mrb[144].mxu1 %vm603_vm1, %v5471_v18  ;;  %v3364_v10 = vadd.f32 %v3328_v28, %v3157_v8  ;;  %15356 = vmatprep.mubr.msk.f32.mxu0 %vm603_vm1, %v5941_v19  ;;  %v2891_v37 = vadd.f32 %v2855_v32, %v2796_v30  ;;  %v5948_v43 = vld [vmem:[#allocation2 + $0x6e] sm:$0xff]  ;;  %v5949_v19 = vld [vmem:[#allocation2 + $0x76] sm:$0xff] }
 0x189   : > { %v2895_v41 = vadd.f32 %v2859_v27, %v2816_v33  ;;  %15348 = vmatprep.mubr.msk.f32.mxu1 %vm603_vm1, %v5472_v20  ;;  %3401 = vst.msk [vmem:[#allocation4 + $0x18] sm:$0xff] %vm2395_vm5, %v3365_v26  ;;  %2928 = vst.msk [vmem:[#allocation4 + $0xf8] sm:$0xff] %vm2395_vm5, %v2892_v46  ;;  %v3336_v28 = vld [vmem:[#allocation4 + $0x50] sm:$0xff]  ;;  %v5951_v27 = vld [vmem:[#allocation2 + $0x86] sm:$0xff] }
 0x18a   : > { %2932 = vst.msk [vmem:[#allocation4 + $0x118] sm:$0xff] %vm2395_vm5, %v2896_v22  ;;  %3400 = vst.msk [vmem:[#allocation4 + $0x10] sm:$0xff] %vm2395_vm5, %v3364_v10  ;;  %v15025_v51 = vpop.f32.mrb[36].mxu0  ;;  %v5950_v22 = vld [vmem:[#allocation2 + $0x7e] sm:$0xff] }
 0x18b   : > { %2927 = vst.msk [vmem:[#allocation4 + $0xf0] sm:$0xff] %vm2395_vm5, %v2891_v37  ;;  %2931 = vst.msk [vmem:[#allocation4 + $0x110] sm:$0xff] %vm2395_vm5, %v2895_v41  ;;  %v15075_v57 = vpop.f32.mrb[40].mxu1  ;;  %v3367_v47 = vadd.f32 %v15025_v51, %v3331_v44  ;;  %v3167_v31 = vpop.f32.mrb[37].mxu0  ;;  %15357 = vmatmul.mubr.msk.f32.gmra.mrb[142].mxu0 %vm603_vm1, %v5942_v42  ;;  %v3339_v41 = vld [vmem:[#allocation4 + $0x68] sm:$0xff] }
 0x18c   : > { %v3648_v48 = vpop.f32.mrb[41].mxu1  ;;  %15349 = vmatmul.mubr.msk.f32.gmra.mrb[146].mxu1 %vm603_vm1, %v5473_v36  ;;  %v3366_v2 = vadd.f32 %v3330_v0, %v3167_v31  ;;  %15359 = vmatprep.mubr.msk.f32.mxu0 %vm603_vm1, %v5943_v29  ;;  %v3828_v14 = vld [vmem:[#allocation4 + $0x8] sm:$0xff] }
 0x18d   : > { %3403 = vst.msk [vmem:[#allocation4 + $0x28] sm:$0xff] %vm2395_vm5, %v3367_v47  ;;  %v3864_v38 = vadd.f32 %v15075_v57, %v3828_v14  ;;  %v3827_v55 = vld [vmem:[#allocation4] sm:$0xff]  ;;  %v5952_v0 = vld [vmem:[#allocation2 + $0x8e] sm:$0xff] }
 0x18e   : > { %3402 = vst.msk [vmem:[#allocation4 + $0x20] sm:$0xff] %vm2395_vm5, %v3366_v2  ;;  %v15028_v3 = vpop.f32.mrb[38].mxu0  ;;  %v3863_v30 = vadd.f32 %v3827_v55, %v3648_v48  ;;  %v3338_v57 = vld [vmem:[#allocation4 + $0x60] sm:$0xff]  ;;  %v5953_v2 = vld [vmem:[#allocation2 + $0x96] sm:$0xff] }
 0x18f   : > { %v15078_v39 = vpop.f32.mrb[42].mxu1  ;;  %v3369_v53 = vadd.f32 %v15028_v3, %v3333_v25  ;;  %v3177_v56 = vpop.f32.mrb[39].mxu0  ;;  %15360 = vmatmul.mubr.msk.f32.gmra.mrb[144].mxu0 %vm603_vm1, %v5944_v35  ;;  %3900 = vst.msk [vmem:[#allocation4 + $0x8] sm:$0xff] %vm2395_vm5, %v3864_v38  ;;  %v3341_v38 = vld [vmem:[#allocation4 + $0x78] sm:$0xff] }
 0x190   : > { %v3658_v40 = vpop.f32.mrb[43].mxu1  ;;  %v3368_v11 = vadd.f32 %v3332_v58, %v3177_v56  ;;  %15362 = vmatprep.mubr.msk.f32.mxu0 %vm603_vm1, %v5945_v50  ;;  %3899 = vst.msk [vmem:[#allocation4] sm:$0xff] %vm2395_vm5, %v3863_v30  ;;  %v3830_v12 = vld [vmem:[#allocation4 + $0x18] sm:$0xff] }
 0x191   : > { %3405 = vst.msk [vmem:[#allocation4 + $0x38] sm:$0xff] %vm2395_vm5, %v3369_v53  ;;  %v3866_v62 = vadd.f32 %v15078_v39, %v3830_v12  ;;  %v3829_v34 = vld [vmem:[#allocation4 + $0x10] sm:$0xff]  ;;  %v5954_v58 = vld [vmem:[#allocation2 + $0x9e] sm:$0xff] }
 0x192   : > { %3404 = vst.msk [vmem:[#allocation4 + $0x30] sm:$0xff] %vm2395_vm5, %v3368_v11  ;;  %v15031_v63 = vpop.f32.mrb[40].mxu0  ;;  %v3865_v9 = vadd.f32 %v3829_v34, %v3658_v40  ;;  %v3340_v39 = vld [vmem:[#allocation4 + $0x70] sm:$0xff]  ;;  %v5955_v11 = vld [vmem:[#allocation2 + $0xa6] sm:$0xff] }
 0x193   : > { %v15081_v60 = vpop.f32.mrb[44].mxu1  ;;  %v3371_v13 = vadd.f32 %v15031_v63, %v3335_v45  ;;  %v3187_v16 = vpop.f32.mrb[41].mxu0  ;;  %15363 = vmatmul.mubr.msk.f32.gmra.mrb[146].mxu0 %vm603_vm1, %v5946_v6  ;;  %3902 = vst.msk [vmem:[#allocation4 + $0x18] sm:$0xff] %vm2395_vm5, %v3866_v62  ;;  %v3343_v62 = vld [vmem:[#allocation4 + $0x88] sm:$0xff] }
 0x194   : > { %v3668_v49 = vpop.f32.mrb[45].mxu1  ;;  %v3370_v52 = vadd.f32 %v3334_v5, %v3187_v16  ;;  %15365 = vmatprep.mubr.msk.f32.mxu0 %vm603_vm1, %v5947_v61  ;;  %3901 = vst.msk [vmem:[#allocation4 + $0x10] sm:$0xff] %vm2395_vm5, %v3865_v9  ;;  %v3832_v18 = vld [vmem:[#allocation4 + $0x28] sm:$0xff] }
 0x195   : > { %3407 = vst.msk [vmem:[#allocation4 + $0x48] sm:$0xff] %vm2395_vm5, %v3371_v13  ;;  %v3868_v20 = vadd.f32 %v15081_v60, %v3832_v18  ;;  %v3831_v7 = vld [vmem:[#allocation4 + $0x20] sm:$0xff]  ;;  %v5956_v5 = vld [vmem:[#allocation2 + $0xae] sm:$0xff] }
 0x196   : > { %3406 = vst.msk [vmem:[#allocation4 + $0x40] sm:$0xff] %vm2395_vm5, %v3370_v52  ;;  %v15034_v23 = vpop.f32.mrb[42].mxu0  ;;  %v3867_v59 = vadd.f32 %v3831_v7, %v3668_v49  ;;  %v3342_v60 = vld [vmem:[#allocation4 + $0x80] sm:$0xff]  ;;  %v5957_v52 = vld [vmem:[#allocation2 + $0xb6] sm:$0xff] }
 0x197   : > { %v15084_v24 = vpop.f32.mrb[46].mxu1  ;;  %v3373_v26 = vadd.f32 %v15034_v23, %v3337_v54  ;;  %v3197_v8 = vpop.f32.mrb[43].mxu0  ;;  %15366 = vmatmul.mubr.msk.f32.gmra.mrb[148].mxu0 %vm603_vm1, %v5948_v43  ;;  %3904 = vst.msk [vmem:[#allocation4 + $0x28] sm:$0xff] %vm2395_vm5, %v3868_v20  ;;  %v3345_v20 = vld [vmem:[#allocation4 + $0x98] sm:$0xff] }
 0x198   : > { %v3678_v46 = vpop.f32.mrb[47].mxu1  ;;  %v3372_v32 = vadd.f32 %v3336_v28, %v3197_v8  ;;  %15368 = vmatprep.mubr.msk.f32.mxu0 %vm603_vm1, %v5949_v19  ;;  %3903 = vst.msk [vmem:[#allocation4 + $0x20] sm:$0xff] %vm2395_vm5, %v3867_v59  ;;  %v3834_v33 = vld [vmem:[#allocation4 + $0x38] sm:$0xff] }
 0x199   : > { %3409 = vst.msk [vmem:[#allocation4 + $0x58] sm:$0xff] %vm2395_vm5, %v3373_v26  ;;  %v3870_v10 = vadd.f32 %v15084_v24, %v3834_v33  ;;  %v3833_v37 = vld [vmem:[#allocation4 + $0x30] sm:$0xff]  ;;  %v5958_v28 = vld [vmem:[#allocation2 + $0xbe] sm:$0xff] }
 0x19a   : > { %3408 = vst.msk [vmem:[#allocation4 + $0x50] sm:$0xff] %vm2395_vm5, %v3372_v32  ;;  %v15037_v42 = vpop.f32.mrb[44].mxu0  ;;  %v3869_v36 = vadd.f32 %v3833_v37, %v3678_v46  ;;  %v3344_v24 = vld [vmem:[#allocation4 + $0x90] sm:$0xff]  ;;  %v5959_v32 = vld [vmem:[#allocation2 + $0xc6] sm:$0xff] }
 0x19b   : > { %v15087_v29 = vpop.f32.mrb[48].mxu1  ;;  %v3375_v51 = vadd.f32 %v15037_v42, %v3339_v41  ;;  %v3207_v44 = vpop.f32.mrb[45].mxu0  ;;  %15369 = vmatmul.mubr.msk.f32.gmra.mrb[150].mxu0 %vm603_vm1, %v5950_v22  ;;  %3906 = vst.msk [vmem:[#allocation4 + $0x38] sm:$0xff] %vm2395_vm5, %v3870_v10  ;;  %v3347_v10 = vld [vmem:[#allocation4 + $0xa8] sm:$0xff] }
 0x19c   : > { %v3688_v47 = vpop.f32.mrb[49].mxu1  ;;  %v3374_v31 = vadd.f32 %v3338_v57, %v3207_v44  ;;  %15371 = vmatprep.mubr.msk.f32.mxu0 %vm603_vm1, %v5951_v27  ;;  %3905 = vst.msk [vmem:[#allocation4 + $0x30] sm:$0xff] %vm2395_vm5, %v3869_v36  ;;  %v3836_v48 = vld [vmem:[#allocation4 + $0x48] sm:$0xff] }
 0x19d   : > { %3411 = vst.msk [vmem:[#allocation4 + $0x68] sm:$0xff] %vm2395_vm5, %v3375_v51  ;;  %v3872_v35 = vadd.f32 %v15087_v29, %v3836_v48  ;;  %v3835_v14 = vld [vmem:[#allocation4 + $0x40] sm:$0xff]  ;;  %v5960_v57 = vld [vmem:[#allocation2 + $0xce] sm:$0xff] }
 0x19e   : > { %3410 = vst.msk [vmem:[#allocation4 + $0x60] sm:$0xff] %vm2395_vm5, %v3374_v31  ;;  %v15040_v50 = vpop.f32.mrb[46].mxu0  ;;  %v3871_v55 = vadd.f32 %v3835_v14, %v3688_v47  ;;  %v3346_v29 = vld [vmem:[#allocation4 + $0xa0] sm:$0xff]  ;;  %v5961_v31 = vld [vmem:[#allocation2 + $0xd6] sm:$0xff] }
 0x19f   : > { %v15090_v3 = vpop.f32.mrb[50].mxu1  ;;  %v3377_v25 = vadd.f32 %v15040_v50, %v3341_v38  ;;  %v3217_v30 = vpop.f32.mrb[47].mxu0  ;;  %15372 = vmatmul.mubr.msk.f32.gmra.mrb[152].mxu0 %vm603_vm1, %v5952_v0  ;;  %3908 = vst.msk [vmem:[#allocation4 + $0x48] sm:$0xff] %vm2395_vm5, %v3872_v35  ;;  %v3349_v35 = vld [vmem:[#allocation4 + $0xb8] sm:$0xff] }
 0x1a0   : > { %v3698_v53 = vpop.f32.mrb[51].mxu1  ;;  %v3376_v56 = vadd.f32 %v3340_v39, %v3217_v30  ;;  %15374 = vmatprep.mubr.msk.f32.mxu0 %vm603_vm1, %v5953_v2  ;;  %3907 = vst.msk [vmem:[#allocation4 + $0x40] sm:$0xff] %vm2395_vm5, %v3871_v55  ;;  %v3838_v40 = vld [vmem:[#allocation4 + $0x58] sm:$0xff] }
 0x1a1   : > { %3413 = vst.msk [vmem:[#allocation4 + $0x78] sm:$0xff] %vm2395_vm5, %v3377_v25  ;;  %v3874_v6 = vadd.f32 %v15090_v3, %v3838_v40  ;;  %v3837_v12 = vld [vmem:[#allocation4 + $0x50] sm:$0xff]  ;;  %v5962_v39 = vld [vmem:[#allocation2 + $0xde] sm:$0xff] }
 0x1a2   : > { %3412 = vst.msk [vmem:[#allocation4 + $0x70] sm:$0xff] %vm2395_vm5, %v3376_v56  ;;  %v15043_v61 = vpop.f32.mrb[48].mxu0  ;;  %v3873_v34 = vadd.f32 %v3837_v12, %v3698_v53  ;;  %v3348_v3 = vld [vmem:[#allocation4 + $0xb0] sm:$0xff]  ;;  %v5963_v56 = vld [vmem:[#allocation2 + $0xe6] sm:$0xff] }
 0x1a3   : > { %v15093_v63 = vpop.f32.mrb[52].mxu1  ;;  %v3379_v45 = vadd.f32 %v15043_v61, %v3343_v62  ;;  %v3227_v9 = vpop.f32.mrb[49].mxu0  ;;  %15375 = vmatmul.mubr.msk.f32.gmra.mrb[154].mxu0 %vm603_vm1, %v5954_v58  ;;  %3910 = vst.msk [vmem:[#allocation4 + $0x58] sm:$0xff] %vm2395_vm5, %v3874_v6  ;;  %v3351_v6 = vld [vmem:[#allocation4 + $0xc8] sm:$0xff] }
 0x1a4   : > { %v3708_v13 = vpop.f32.mrb[53].mxu1  ;;  %v3378_v16 = vadd.f32 %v3342_v60, %v3227_v9  ;;  %15377 = vmatprep.mubr.msk.f32.mxu0 %vm603_vm1, %v5955_v11  ;;  %3909 = vst.msk [vmem:[#allocation4 + $0x50] sm:$0xff] %vm2395_vm5, %v3873_v34  ;;  %v3840_v49 = vld [vmem:[#allocation4 + $0x68] sm:$0xff] }
 0x1a5   : > { %3415 = vst.msk [vmem:[#allocation4 + $0x88] sm:$0xff] %vm2395_vm5, %v3379_v45  ;;  %v3876_v43 = vadd.f32 %v15093_v63, %v3840_v49  ;;  %v3839_v18 = vld [vmem:[#allocation4 + $0x60] sm:$0xff]  ;;  %v5964_v60 = vld [vmem:[#allocation2 + $0xee] sm:$0xff] }
 0x1a6   : > { %3414 = vst.msk [vmem:[#allocation4 + $0x80] sm:$0xff] %vm2395_vm5, %v3378_v16  ;;  %v15046_v19 = vpop.f32.mrb[50].mxu0  ;;  %v3875_v7 = vadd.f32 %v3839_v18, %v3708_v13  ;;  %v3350_v63 = vld [vmem:[#allocation4 + $0xc0] sm:$0xff]  ;;  %v5965_v16 = vld [vmem:[#allocation2 + $0xf6] sm:$0xff] }
 0x1a7   : > { %v15096_v23 = vpop.f32.mrb[54].mxu1  ;;  %v3381_v54 = vadd.f32 %v15046_v19, %v3345_v20  ;;  %v3237_v59 = vpop.f32.mrb[51].mxu0  ;;  %15378 = vmatmul.mubr.msk.f32.gmra.mrb[156].mxu0 %vm603_vm1, %v5956_v5  ;;  %3912 = vst.msk [vmem:[#allocation4 + $0x68] sm:$0xff] %vm2395_vm5, %v3876_v43  ;;  %v3353_v43 = vld [vmem:[#allocation4 + $0xd8] sm:$0xff]  ;;  %v8819_v20 = vld [vmem:[%s19964_s6] sm:$0xff] }
 0x1a8   : > { %v3718_v26 = vpop.f32.mrb[55].mxu1  ;;  %v3380_v8 = vadd.f32 %v3344_v24, %v3237_v59  ;;  %15380 = vmatprep.mubr.msk.f32.mxu0 %vm603_vm1, %v5957_v52  ;;  %3911 = vst.msk [vmem:[#allocation4 + $0x60] sm:$0xff] %vm2395_vm5, %v3875_v7  ;;  %v3842_v46 = vld [vmem:[#allocation4 + $0x78] sm:$0xff]  ;;  %15407 = vmatprep.subr.mxu1 %v8819_v20 }
 0x1a9   : > { %3417 = vst.msk [vmem:[#allocation4 + $0x98] sm:$0xff] %vm2395_vm5, %v3381_v54  ;;  %v3878_v22 = vadd.f32 %v15096_v23, %v3842_v46  ;;  %v3841_v33 = vld [vmem:[#allocation4 + $0x70] sm:$0xff]  ;;  %15408 = vmatpush3.msra.mxu1 %v8819_v20 }
 0x1aa   : > { %3416 = vst.msk [vmem:[#allocation4 + $0x90] sm:$0xff] %vm2395_vm5, %v3380_v8  ;;  %v15049_v27 = vpop.f32.mrb[52].mxu0  ;;  %v3877_v37 = vadd.f32 %v3841_v33, %v3718_v26  ;;  %v3352_v54 = vld [vmem:[#allocation4 + $0xd0] sm:$0xff]  ;;  %v5966_v26 = vld [vmem:[#allocation2 + $0xfe] sm:$0xff]  ;;  %v3355_v33 = vld [vmem:[#allocation4 + $0xe8] sm:$0xff] }
 0x1ab   : > { %v15099_v42 = vpop.f32.mrb[56].mxu1  ;;  %v3383_v41 = vadd.f32 %v15049_v27, %v3347_v10  ;;  %v3247_v36 = vpop.f32.mrb[53].mxu0  ;;  %15381 = vmatmul.mubr.msk.f32.gmra.mrb[158].mxu0 %vm603_vm1, %v5958_v28  ;;  %3914 = vst.msk [vmem:[#allocation4 + $0x78] sm:$0xff] %vm2395_vm5, %v3878_v22  ;;  %v5967_v28 = vld [vmem:[#allocation2 + $0x106] sm:$0xff]  ;;  %v3360_v20 = vld [vmem:[#allocation4 + $0x110] sm:$0xff] }
 0x1ac   : > { %v3728_v51 = vpop.f32.mrb[57].mxu1  ;;  %v3382_v44 = vadd.f32 %v3346_v29, %v3247_v36  ;;  %15383 = vmatprep.mubr.msk.f32.mxu0 %vm603_vm1, %v5959_v32  ;;  %3913 = vst.msk [vmem:[#allocation4 + $0x70] sm:$0xff] %vm2395_vm5, %v3877_v37  ;;  %v3844_v47 = vld [vmem:[#allocation4 + $0x88] sm:$0xff] }
 0x1ad   : > { %3419 = vst.msk [vmem:[#allocation4 + $0xa8] sm:$0xff] %vm2395_vm5, %v3383_v41  ;;  %v3880_v0 = vadd.f32 %v15099_v42, %v3844_v47  ;;  %v3843_v48 = vld [vmem:[#allocation4 + $0x80] sm:$0xff] }
 0x1ae   : > { %3418 = vst.msk [vmem:[#allocation4 + $0xa0] sm:$0xff] %vm2395_vm5, %v3382_v44  ;;  %v15052_v2 = vpop.f32.mrb[54].mxu0  ;;  %v3879_v14 = vadd.f32 %v3843_v48, %v3728_v51  ;;  %v3354_v41 = vld [vmem:[#allocation4 + $0xe0] sm:$0xff]  ;;  %v5968_v51 = vld [vmem:[#allocation2 + $0x10e] sm:$0xff]  ;;  %v3357_v48 = vld [vmem:[#allocation4 + $0xf8] sm:$0xff] }
 0x1af   : > { %v15102_v50 = vpop.f32.mrb[58].mxu1  ;;  %v3385_v38 = vadd.f32 %v15052_v2, %v3349_v35  ;;  %v3257_v55 = vpop.f32.mrb[55].mxu0  ;;  %15384 = vmatmul.mubr.msk.f32.gmra.mrb[160].mxu0 %vm603_vm1, %v5960_v57  ;;  %3916 = vst.msk [vmem:[#allocation4 + $0x88] sm:$0xff] %vm2395_vm5, %v3880_v0  ;;  %v5969_v57 = vld [vmem:[#allocation2 + $0x116] sm:$0xff] }
 0x1b0   : > { %v3738_v25 = vpop.f32.mrb[59].mxu1  ;;  %v3384_v30 = vadd.f32 %v3348_v3, %v3257_v55  ;;  %15386 = vmatprep.mubr.msk.f32.mxu0 %vm603_vm1, %v5961_v31  ;;  %3915 = vst.msk [vmem:[#allocation4 + $0x80] sm:$0xff] %vm2395_vm5, %v3879_v14  ;;  %v3846_v53 = vld [vmem:[#allocation4 + $0x98] sm:$0xff] }
 0x1b1   : > { %3421 = vst.msk [vmem:[#allocation4 + $0xb8] sm:$0xff] %vm2395_vm5, %v3385_v38  ;;  %v3882_v58 = vadd.f32 %v15102_v50, %v3846_v53  ;;  %v3845_v40 = vld [vmem:[#allocation4 + $0x90] sm:$0xff] }
 0x1b2   : > { %3420 = vst.msk [vmem:[#allocation4 + $0xb0] sm:$0xff] %vm2395_vm5, %v3384_v30  ;;  %v15055_v11 = vpop.f32.mrb[56].mxu0  ;;  %v3881_v12 = vadd.f32 %v3845_v40, %v3738_v25  ;;  %v3356_v38 = vld [vmem:[#allocation4 + $0xf0] sm:$0xff]  ;;  %v5970_v25 = vld [vmem:[#allocation2 + $0x11e] sm:$0xff]  ;;  %v3359_v40 = vld [vmem:[#allocation4 + $0x108] sm:$0xff] }
 0x1b3   : > { %v15105_v61 = vpop.f32.mrb[60].mxu1  ;;  %v3387_v62 = vadd.f32 %v15055_v11, %v3351_v6  ;;  %v3267_v34 = vpop.f32.mrb[57].mxu0  ;;  %15387 = vmatmul.mubr.msk.f32.gmra.mrb[162].mxu0 %vm603_vm1, %v5962_v39  ;;  %3918 = vst.msk [vmem:[#allocation4 + $0x98] sm:$0xff] %vm2395_vm5, %v3882_v58  ;;  %v5971_v39 = vld [vmem:[#allocation2 + $0x126] sm:$0xff] }
 0x1b4   : > { %v3748_v45 = vpop.f32.mrb[61].mxu1  ;;  %v3386_v9 = vadd.f32 %v3350_v63, %v3267_v34  ;;  %15389 = vmatprep.mubr.msk.f32.mxu0 %vm603_vm1, %v5963_v56  ;;  %3917 = vst.msk [vmem:[#allocation4 + $0x90] sm:$0xff] %vm2395_vm5, %v3881_v12  ;;  %v3848_v13 = vld [vmem:[#allocation4 + $0xa8] sm:$0xff] }
 0x1b5   : > { %3423 = vst.msk [vmem:[#allocation4 + $0xc8] sm:$0xff] %vm2395_vm5, %v3387_v62  ;;  %v3884_v5 = vadd.f32 %v15105_v61, %v3848_v13  ;;  %v3847_v49 = vld [vmem:[#allocation4 + $0xa0] sm:$0xff] }
 0x1b6   : > { %3422 = vst.msk [vmem:[#allocation4 + $0xc0] sm:$0xff] %vm2395_vm5, %v3386_v9  ;;  %v15058_v52 = vpop.f32.mrb[58].mxu0  ;;  %v3883_v18 = vadd.f32 %v3847_v49, %v3748_v45  ;;  %v3358_v62 = vld [vmem:[#allocation4 + $0x100] sm:$0xff]  ;;  %v5972_v45 = vld [vmem:[#allocation2 + $0x12e] sm:$0xff]  ;;  %v3361_v49 = vld [vmem:[#allocation4 + $0x118] sm:$0xff] }
 0x1b7   : > { %v15108_v19 = vpop.f32.mrb[62].mxu1  ;;  %v3389_v7 = vadd.f32 %v15058_v52, %v3353_v43  ;;  %v3277_v23 = vpop.f32.mrb[59].mxu0  ;;  %15390 = vmatmul.mubr.msk.f32.gmra.mrb[164].mxu0 %vm603_vm1, %v5964_v60  ;;  %3920 = vst.msk [vmem:[#allocation4 + $0xa8] sm:$0xff] %vm2395_vm5, %v3884_v5  ;;  %v5973_v60 = vld [vmem:[#allocation2 + $0x136] sm:$0xff] }
 0x1b8   : > { %v3758_v59 = vpop.f32.mrb[63].mxu1  ;;  %v3388_v24 = vadd.f32 %v3352_v54, %v3277_v23  ;;  %15392 = vmatprep.mubr.msk.f32.mxu0 %vm603_vm1, %v5965_v16  ;;  %3919 = vst.msk [vmem:[#allocation4 + $0xa0] sm:$0xff] %vm2395_vm5, %v3883_v18  ;;  %v3850_v8 = vld [vmem:[#allocation4 + $0xb8] sm:$0xff] }
 0x1b9   : > { %3425 = vst.msk [vmem:[#allocation4 + $0xd8] sm:$0xff] %vm2395_vm5, %v3389_v7  ;;  %v3886_v46 = vadd.f32 %v15108_v19, %v3850_v8  ;;  %v3849_v32 = vld [vmem:[#allocation4 + $0xb0] sm:$0xff]  ;;  %v5974_v54 = vld [vmem:[#allocation2 + $0x13e] sm:$0xff] }
 0x1ba   : > { %3424 = vst.msk [vmem:[#allocation4 + $0xd0] sm:$0xff] %vm2395_vm5, %v3388_v24  ;;  %v15061_v22 = vpop.f32.mrb[60].mxu0  ;;  %v3885_v27 = vadd.f32 %v3849_v32, %v3758_v59 }
 0x1bb   : > { %v15111_v10 = vpop.f32.mrb[64].mxu1  ;;  %v3391_v37 = vadd.f32 %v15061_v22, %v3355_v33  ;;  %v3287_v42 = vpop.f32.mrb[61].mxu0  ;;  %15393 = vmatmul.mubr.msk.f32.gmra.mrb[166].mxu0 %vm603_vm1, %v5966_v26  ;;  %3922 = vst.msk [vmem:[#allocation4 + $0xb8] sm:$0xff] %vm2395_vm5, %v3886_v46 }
 0x1bc   : > { %v3768_v36 = vpop.f32.mrb[65].mxu1  ;;  %v3390_v29 = vadd.f32 %v3354_v41, %v3287_v42  ;;  %15395 = vmatprep.mubr.msk.f32.mxu0 %vm603_vm1, %v5967_v28  ;;  %3921 = vst.msk [vmem:[#allocation4 + $0xb0] sm:$0xff] %vm2395_vm5, %v3885_v27  ;;  %v3852_v44 = vld [vmem:[#allocation4 + $0xc8] sm:$0xff]  ;;  %v4328_v27 = vld [vmem:[#allocation4] sm:$0xff] }
 0x1bd   : > { %3427 = vst.msk [vmem:[#allocation4 + $0xe8] sm:$0xff] %vm2395_vm5, %v3391_v37  ;;  %v3888_v47 = vadd.f32 %v15111_v10, %v3852_v44  ;;  %v3851_v31 = vld [vmem:[#allocation4 + $0xc0] sm:$0xff]  ;;  %v4329_v28 = vld [vmem:[#allocation4 + $0x8] sm:$0xff] }
 0x1be   : > { %3426 = vst.msk [vmem:[#allocation4 + $0xe0] sm:$0xff] %vm2395_vm5, %v3390_v29  ;;  %v15064_v0 = vpop.f32.mrb[62].mxu0  ;;  %v3887_v2 = vadd.f32 %v3851_v31, %v3768_v36 }
 0x1bf   : > { %v15114_v35 = vpop.f32.mrb[66].mxu1  ;;  %v3393_v14 = vadd.f32 %v15064_v0, %v3357_v48  ;;  %v3297_v50 = vpop.f32.mrb[63].mxu0  ;;  %15396 = vmatmul.mubr.msk.f32.gmra.mrb[168].mxu0 %vm603_vm1, %v5968_v51  ;;  %3924 = vst.msk [vmem:[#allocation4 + $0xc8] sm:$0xff] %vm2395_vm5, %v3888_v47  ;;  %v4331_v51 = vld [vmem:[#allocation4 + $0x18] sm:$0xff]  ;;  %v4330_v0 = vld [vmem:[#allocation4 + $0x10] sm:$0xff] }
 0x1c0   : > { %v3778_v55 = vpop.f32.mrb[67].mxu1  ;;  %v3392_v3 = vadd.f32 %v3356_v38, %v3297_v50  ;;  %15398 = vmatprep.mubr.msk.f32.mxu0 %vm603_vm1, %v5969_v57  ;;  %3923 = vst.msk [vmem:[#allocation4 + $0xc0] sm:$0xff] %vm2395_vm5, %v3887_v2  ;;  %v3854_v30 = vld [vmem:[#allocation4 + $0xd8] sm:$0xff] }
 0x1c1   : > { %3429 = vst.msk [vmem:[#allocation4 + $0xf8] sm:$0xff] %vm2395_vm5, %v3393_v14  ;;  %v3890_v53 = vadd.f32 %v15114_v35, %v3854_v30  ;;  %v3853_v56 = vld [vmem:[#allocation4 + $0xd0] sm:$0xff] }
 0x1c2   : > { %3428 = vst.msk [vmem:[#allocation4 + $0xf0] sm:$0xff] %vm2395_vm5, %v3392_v3  ;;  %v15067_v58 = vpop.f32.mrb[64].mxu0  ;;  %v3889_v11 = vadd.f32 %v3853_v56, %v3778_v55  ;;  %v4333_v55 = vld [vmem:[#allocation4 + $0x28] sm:$0xff] }
 0x1c3   : > { %v15117_v6 = vpop.f32.mrb[68].mxu1  ;;  %v3395_v12 = vadd.f32 %v15067_v58, %v3359_v40  ;;  %v3307_v61 = vpop.f32.mrb[65].mxu0  ;;  %15399 = vmatmul.mubr.msk.f32.gmra.mrb[170].mxu0 %vm603_vm1, %v5970_v25  ;;  %3926 = vst.msk [vmem:[#allocation4 + $0xd8] sm:$0xff] %vm2395_vm5, %v3890_v53  ;;  %v4332_v53 = vld [vmem:[#allocation4 + $0x20] sm:$0xff] }
 0x1c4   : > { %v3788_v34 = vpop.f32.mrb[69].mxu1  ;;  %v3394_v63 = vadd.f32 %v3358_v62, %v3307_v61  ;;  %15401 = vmatprep.mubr.msk.f32.mxu0 %vm603_vm1, %v5971_v39  ;;  %3925 = vst.msk [vmem:[#allocation4 + $0xd0] sm:$0xff] %vm2395_vm5, %v3889_v11  ;;  %v3856_v9 = vld [vmem:[#allocation4 + $0xe8] sm:$0xff]  ;;  %v4335_v61 = vld [vmem:[#allocation4 + $0x38] sm:$0xff] }
 0x1c5   : > { %3431 = vst.msk [vmem:[#allocation4 + $0x108] sm:$0xff] %vm2395_vm5, %v3395_v12  ;;  %v3892_v13 = vadd.f32 %v15117_v6, %v3856_v9  ;;  %v3855_v16 = vld [vmem:[#allocation4 + $0xe0] sm:$0xff]  ;;  %v4334_v9 = vld [vmem:[#allocation4 + $0x30] sm:$0xff] }
 0x1c6   : > { %3430 = vst.msk [vmem:[#allocation4 + $0x100] sm:$0xff] %vm2395_vm5, %v3394_v63  ;;  %v15070_v5 = vpop.f32.mrb[66].mxu0  ;;  %v3891_v52 = vadd.f32 %v3855_v16, %v3788_v34 }
 0x1c7   : > { %v15120_v43 = vpop.f32.mrb[70].mxu1  ;;  %v3397_v18 = vadd.f32 %v15070_v5, %v3361_v49  ;;  %v3317_v19 = vpop.f32.mrb[67].mxu0  ;;  %15402 = vmatmul.mubr.msk.f32.gmra.mrb[172].mxu0 %vm603_vm1, %v5972_v45  ;;  %3928 = vst.msk [vmem:[#allocation4 + $0xe8] sm:$0xff] %vm2395_vm5, %v3892_v13 }
 0x1c8   : > { %v3798_v7 = vpop.f32.mrb[71].mxu1  ;;  %v3396_v23 = vadd.f32 %v3360_v20, %v3317_v19  ;;  %15404 = vmatprep.mubr.msk.f32.mxu0 %vm603_vm1, %v5973_v60  ;;  %3927 = vst.msk [vmem:[#allocation4 + $0xe0] sm:$0xff] %vm2395_vm5, %v3891_v52  ;;  %v3858_v59 = vld [vmem:[#allocation4 + $0xf8] sm:$0xff] }
 0x1c9   : > { %3433 = vst.msk [vmem:[#allocation4 + $0x118] sm:$0xff] %vm2395_vm5, %v3397_v18  ;;  %v3894_v24 = vadd.f32 %v15120_v43, %v3858_v59  ;;  %v3857_v26 = vld [vmem:[#allocation4 + $0xf0] sm:$0xff]  ;;  %v4337_v43 = vld [vmem:[#allocation4 + $0x48] sm:$0xff] }
 0x1ca   : > { %3432 = vst.msk [vmem:[#allocation4 + $0x110] sm:$0xff] %vm2395_vm5, %v3396_v23  ;;  %v15131_v8 = vpop.f32.mrb[68].mxu0  ;;  %v3893_v46 = vadd.f32 %v3857_v26, %v3798_v7  ;;  %v4336_v23 = vld [vmem:[#allocation4 + $0x40] sm:$0xff] }
 0x1cb   : > { %v15123_v32 = vpop.f32.mrb[72].mxu1  ;;  %v4365_v22 = vadd.f32 %v15131_v8, %v4329_v28  ;;  %v4149_v33 = vpop.f32.mrb[69].mxu0  ;;  %15405 = vmatmul.mubr.msk.f32.gmra.mrb[174].mxu0 %vm603_vm1, %v5974_v54  ;;  %3930 = vst.msk [vmem:[#allocation4 + $0xf8] sm:$0xff] %vm2395_vm5, %v3894_v24 }
 0x1cc   : > { %v3808_v10 = vpop.f32.mrb[73].mxu1  ;;  %v4364_v37 = vadd.f32 %v4328_v27, %v4149_v33  ;;  %3929 = vst.msk [vmem:[#allocation4 + $0xf0] sm:$0xff] %vm2395_vm5, %v3893_v46  ;;  %v3860_v42 = vld [vmem:[#allocation4 + $0x108] sm:$0xff]  ;;  %v4339_v46 = vld [vmem:[#allocation4 + $0x58] sm:$0xff] }
 0x1cd   : > { %4401 = vst.msk [vmem:[#allocation4 + $0x8] sm:$0xff] %vm2395_vm5, %v4365_v22  ;;  %v3896_v41 = vadd.f32 %v15123_v32, %v3860_v42  ;;  %v3859_v36 = vld [vmem:[#allocation4 + $0x100] sm:$0xff] }
 0x1ce   : > { %4400 = vst.msk [vmem:[#allocation4] sm:$0xff] %vm2395_vm5, %v4364_v37  ;;  %v15134_v29 = vpop.f32.mrb[70].mxu0  ;;  %v3895_v44 = vadd.f32 %v3859_v36, %v3808_v10  ;;  %v4338_v10 = vld [vmem:[#allocation4 + $0x50] sm:$0xff] }
 0x1cf   : > { %v15126_v57 = vpop.f32.mrb[74].mxu1  ;;  %v4367_v47 = vadd.f32 %v15134_v29, %v4331_v51  ;;  %v4159_v31 = vpop.f32.mrb[71].mxu0  ;;  %3932 = vst.msk [vmem:[#allocation4 + $0x108] sm:$0xff] %vm2395_vm5, %v3896_v41 }
 0x1d0   : > { %v3818_v48 = vpop.f32.mrb[75].mxu1  ;;  %v4366_v2 = vadd.f32 %v4330_v0, %v4159_v31  ;;  %3931 = vst.msk [vmem:[#allocation4 + $0x100] sm:$0xff] %vm2395_vm5, %v3895_v44  ;;  %v3862_v35 = vld [vmem:[#allocation4 + $0x118] sm:$0xff]  ;;  %v4341_v44 = vld [vmem:[#allocation4 + $0x68] sm:$0xff] }
 0x1d1   : > { %4403 = vst.msk [vmem:[#allocation4 + $0x18] sm:$0xff] %vm2395_vm5, %v4367_v47  ;;  %v3898_v14 = vadd.f32 %v15126_v57, %v3862_v35  ;;  %v3861_v50 = vld [vmem:[#allocation4 + $0x110] sm:$0xff] }
 0x1d2   : > { %4402 = vst.msk [vmem:[#allocation4 + $0x10] sm:$0xff] %vm2395_vm5, %v4366_v2  ;;  %v15137_v38 = vpop.f32.mrb[72].mxu0  ;;  %v3897_v3 = vadd.f32 %v3861_v50, %v3818_v48  ;;  %v4340_v48 = vld [vmem:[#allocation4 + $0x60] sm:$0xff] }
 0x1d3   : > { %v15187_v25 = vpop.f32.mrb[76].mxu1  ;;  %v4369_v30 = vadd.f32 %v15137_v38, %v4333_v55  ;;  %v4169_v39 = vpop.f32.mrb[73].mxu0  ;;  %3934 = vst.msk [vmem:[#allocation4 + $0x118] sm:$0xff] %vm2395_vm5, %v3898_v14 }
 0x1d4   : > { %v4650_v56 = vpop.f32.mrb[77].mxu1  ;;  %v4368_v58 = vadd.f32 %v4332_v53, %v4169_v39  ;;  %3933 = vst.msk [vmem:[#allocation4 + $0x110] sm:$0xff] %vm2395_vm5, %v3897_v3  ;;  %v4830_v40 = vld [vmem:[#allocation4 + $0x8] sm:$0xff]  ;;  %v4343_v3 = vld [vmem:[#allocation4 + $0x78] sm:$0xff] }
 0x1d5   : > { %4405 = vst.msk [vmem:[#allocation4 + $0x28] sm:$0xff] %vm2395_vm5, %v4369_v30  ;;  %v4866_v11 = vadd.f32 %v15187_v25, %v4830_v40  ;;  %v4829_v6 = vld [vmem:[#allocation4] sm:$0xff] }
 0x1d6   : > { %4404 = vst.msk [vmem:[#allocation4 + $0x20] sm:$0xff] %vm2395_vm5, %v4368_v58  ;;  %v15140_v12 = vpop.f32.mrb[74].mxu0  ;;  %v4865_v62 = vadd.f32 %v4829_v6, %v4650_v56  ;;  %v4342_v56 = vld [vmem:[#allocation4 + $0x70] sm:$0xff] }
 0x1d7   : > { %v15190_v34 = vpop.f32.mrb[78].mxu1  ;;  %v4371_v63 = vadd.f32 %v15140_v12, %v4335_v61  ;;  %v4179_v45 = vpop.f32.mrb[75].mxu0  ;;  %4902 = vst.msk [vmem:[#allocation4 + $0x8] sm:$0xff] %vm2395_vm5, %v4866_v11 }
 0x1d8   : > { %v4660_v60 = vpop.f32.mrb[79].mxu1  ;;  %v4370_v13 = vadd.f32 %v4334_v9, %v4179_v45  ;;  %4901 = vst.msk [vmem:[#allocation4] sm:$0xff] %vm2395_vm5, %v4865_v62  ;;  %v4832_v16 = vld [vmem:[#allocation4 + $0x18] sm:$0xff]  ;;  %v4345_v62 = vld [vmem:[#allocation4 + $0x88] sm:$0xff] }
 0x1d9   : > { %4407 = vst.msk [vmem:[#allocation4 + $0x38] sm:$0xff] %vm2395_vm5, %v4371_v63  ;;  %v4868_v5 = vadd.f32 %v15190_v34, %v4832_v16  ;;  %v4831_v49 = vld [vmem:[#allocation4 + $0x10] sm:$0xff] }
 0x1da   : > { %4406 = vst.msk [vmem:[#allocation4 + $0x30] sm:$0xff] %vm2395_vm5, %v4370_v13  ;;  %v15143_v52 = vpop.f32.mrb[76].mxu0  ;;  %v4867_v18 = vadd.f32 %v4831_v49, %v4660_v60  ;;  %v4344_v60 = vld [vmem:[#allocation4 + $0x80] sm:$0xff] }
 0x1db   : > { %v15193_v19 = vpop.f32.mrb[80].mxu1  ;;  %v4373_v20 = vadd.f32 %v15143_v52, %v4337_v43  ;;  %v4189_v7 = vpop.f32.mrb[77].mxu0  ;;  %4904 = vst.msk [vmem:[#allocation4 + $0x18] sm:$0xff] %vm2395_vm5, %v4868_v5 }
 0x1dc   : > { %v4670_v54 = vpop.f32.mrb[81].mxu1  ;;  %v4372_v59 = vadd.f32 %v4336_v23, %v4189_v7  ;;  %4903 = vst.msk [vmem:[#allocation4 + $0x10] sm:$0xff] %vm2395_vm5, %v4867_v18  ;;  %v4834_v24 = vld [vmem:[#allocation4 + $0x28] sm:$0xff]  ;;  %v4347_v18 = vld [vmem:[#allocation4 + $0x98] sm:$0xff] }
 0x1dd   : > { %4409 = vst.msk [vmem:[#allocation4 + $0x48] sm:$0xff] %vm2395_vm5, %v4373_v20  ;;  %v4870_v26 = vadd.f32 %v15193_v19, %v4834_v24  ;;  %v4833_v8 = vld [vmem:[#allocation4 + $0x20] sm:$0xff] }
 0x1de   : > { %4408 = vst.msk [vmem:[#allocation4 + $0x40] sm:$0xff] %vm2395_vm5, %v4372_v59  ;;  %v15146_v28 = vpop.f32.mrb[78].mxu0  ;;  %v4869_v32 = vadd.f32 %v4833_v8, %v4670_v54  ;;  %v4346_v54 = vld [vmem:[#allocation4 + $0x90] sm:$0xff] }
 0x1df   : > { %v15196_v22 = vpop.f32.mrb[82].mxu1  ;;  %v4375_v33 = vadd.f32 %v15146_v28, %v4339_v46  ;;  %v4199_v27 = vpop.f32.mrb[79].mxu0  ;;  %4906 = vst.msk [vmem:[#allocation4 + $0x28] sm:$0xff] %vm2395_vm5, %v4870_v26 }
 0x1e0   : > { %v4680_v37 = vpop.f32.mrb[83].mxu1  ;;  %v4374_v42 = vadd.f32 %v4338_v10, %v4199_v27  ;;  %4905 = vst.msk [vmem:[#allocation4 + $0x20] sm:$0xff] %vm2395_vm5, %v4869_v32  ;;  %v4836_v41 = vld [vmem:[#allocation4 + $0x38] sm:$0xff]  ;;  %v4349_v32 = vld [vmem:[#allocation4 + $0xa8] sm:$0xff] }
 0x1e1   : > { %4411 = vst.msk [vmem:[#allocation4 + $0x58] sm:$0xff] %vm2395_vm5, %v4375_v33  ;;  %v4872_v36 = vadd.f32 %v15196_v22, %v4836_v41  ;;  %v4835_v29 = vld [vmem:[#allocation4 + $0x30] sm:$0xff] }
 0x1e2   : > { %4410 = vst.msk [vmem:[#allocation4 + $0x50] sm:$0xff] %vm2395_vm5, %v4374_v42  ;;  %v15149_v51 = vpop.f32.mrb[80].mxu0  ;;  %v4871_v57 = vadd.f32 %v4835_v29, %v4680_v37  ;;  %v4348_v37 = vld [vmem:[#allocation4 + $0xa0] sm:$0xff] }
 0x1e3   : > { %v15199_v47 = vpop.f32.mrb[84].mxu1  ;;  %v4377_v31 = vadd.f32 %v15149_v51, %v4341_v44  ;;  %v4209_v0 = vpop.f32.mrb[81].mxu0  ;;  %4908 = vst.msk [vmem:[#allocation4 + $0x38] sm:$0xff] %vm2395_vm5, %v4872_v36 }
 0x1e4   : > { %v4690_v2 = vpop.f32.mrb[85].mxu1  ;;  %v4376_v35 = vadd.f32 %v4340_v48, %v4209_v0  ;;  %4907 = vst.msk [vmem:[#allocation4 + $0x30] sm:$0xff] %vm2395_vm5, %v4871_v57  ;;  %v4838_v14 = vld [vmem:[#allocation4 + $0x48] sm:$0xff]  ;;  %v4351_v57 = vld [vmem:[#allocation4 + $0xb8] sm:$0xff] }
 0x1e5   : > { %4413 = vst.msk [vmem:[#allocation4 + $0x68] sm:$0xff] %vm2395_vm5, %v4377_v31  ;;  %v4874_v50 = vadd.f32 %v15199_v47, %v4838_v14  ;;  %v4837_v38 = vld [vmem:[#allocation4 + $0x40] sm:$0xff] }
 0x1e6   : > { %4412 = vst.msk [vmem:[#allocation4 + $0x60] sm:$0xff] %vm2395_vm5, %v4376_v35  ;;  %v15152_v55 = vpop.f32.mrb[82].mxu0  ;;  %v4873_v25 = vadd.f32 %v4837_v38, %v4690_v2  ;;  %v4350_v2 = vld [vmem:[#allocation4 + $0xb0] sm:$0xff] }
 0x1e7   : > { %v15202_v30 = vpop.f32.mrb[86].mxu1  ;;  %v4379_v39 = vadd.f32 %v15152_v55, %v4343_v3  ;;  %v4219_v53 = vpop.f32.mrb[83].mxu0  ;;  %4910 = vst.msk [vmem:[#allocation4 + $0x48] sm:$0xff] %vm2395_vm5, %v4874_v50  ;;  %v9245_v55 = vld [vmem:[%s19964_s6 + $0x8] sm:$0xff]  ;;  %v8783_v3 = vld [vmem:[#allocation3] sm:$0xff] }
 0x1e8   : > { %v4700_v58 = vpop.f32.mrb[87].mxu1  ;;  %v4378_v40 = vadd.f32 %v4342_v56, %v4219_v53  ;;  %4909 = vst.msk [vmem:[#allocation4 + $0x40] sm:$0xff] %vm2395_vm5, %v4873_v25  ;;  %v4840_v11 = vld [vmem:[#allocation4 + $0x58] sm:$0xff]  ;;  %15463 = vmatprep.subr.mxu0 %v9245_v55  ;;  %15409 = vmatprep.mubr.msk.f32.mxu1 %vm2395_vm5, %v8783_v3 }
 0x1e9   : > { %4415 = vst.msk [vmem:[#allocation4 + $0x78] sm:$0xff] %vm2395_vm5, %v4379_v39  ;;  %v4876_v6 = vadd.f32 %v15202_v30, %v4840_v11  ;;  %v4839_v12 = vld [vmem:[#allocation4 + $0x50] sm:$0xff]  ;;  %v4353_v30 = vld [vmem:[#allocation4 + $0xc8] sm:$0xff]  ;;  %v8784_v56 = vld [vmem:[#allocation3 + $0x8] sm:$0xff]  ;;  %15464 = vmatpush3.msra.mxu0 %v9245_v55 }
 0x1ea   : > { %4414 = vst.msk [vmem:[#allocation4 + $0x70] sm:$0xff] %vm2395_vm5, %v4378_v40  ;;  %v15155_v61 = vpop.f32.mrb[84].mxu0  ;;  %v4875_v34 = vadd.f32 %v4839_v12, %v4700_v58  ;;  %v9209_v58 = vld [vmem:[#allocation3 + $0x1] sm:$0xff]  ;;  %15410 = vmatmul.mubr.msk.f32.vlgmr.msra.gmra.mrb[148].mxu1 %vm2395_vm5, %v8784_v56  ;;  %v4360_v55 = vld [vmem:[#allocation4 + $0x100] sm:$0xff] }
 0x1eb   : > { %v15205_v63 = vpop.f32.mrb[88].mxu1  ;;  %v4381_v45 = vadd.f32 %v15155_v61, %v4345_v62  ;;  %v4229_v9 = vpop.f32.mrb[85].mxu0  ;;  %4912 = vst.msk [vmem:[#allocation4 + $0x58] sm:$0xff] %vm2395_vm5, %v4876_v6  ;;  %v4352_v6 = vld [vmem:[#allocation4 + $0xc0] sm:$0xff]  ;;  %15465 = vmatprep.mubr.msk.f32.mxu0 %vm2395_vm5, %v9209_v58  ;;  %v4363_v58 = vld [vmem:[#allocation4 + $0x118] sm:$0xff] }
 0x1ec   : > { %v4710_v13 = vpop.f32.mrb[89].mxu1  ;;  %v4380_v16 = vadd.f32 %v4344_v60, %v4229_v9  ;;  %4911 = vst.msk [vmem:[#allocation4 + $0x50] sm:$0xff] %vm2395_vm5, %v4875_v34  ;;  %v4842_v5 = vld [vmem:[#allocation4 + $0x68] sm:$0xff]  ;;  %v9210_v61 = vld [vmem:[#allocation3 + $0x9] sm:$0xff] }
 0x1ed   : > { %4417 = vst.msk [vmem:[#allocation4 + $0x88] sm:$0xff] %vm2395_vm5, %v4381_v45  ;;  %v4878_v49 = vadd.f32 %v15205_v63, %v4842_v5  ;;  %v4841_v52 = vld [vmem:[#allocation4 + $0x60] sm:$0xff]  ;;  %15466 = vmatmul.mubr.msk.f32.vlgmr.msra.gmra.mrb[176].mxu0 %vm2395_vm5, %v9210_v61  ;;  %v4355_v60 = vld [vmem:[#allocation4 + $0xd8] sm:$0xff]  ;;  %v4362_v61 = vld [vmem:[#allocation4 + $0x110] sm:$0xff] }
 0x1ee   : > { %4416 = vst.msk [vmem:[#allocation4 + $0x80] sm:$0xff] %vm2395_vm5, %v4380_v16  ;;  %v15158_v43 = vpop.f32.mrb[86].mxu0  ;;  %v4877_v19 = vadd.f32 %v4841_v52, %v4710_v13  ;;  %v4354_v52 = vld [vmem:[#allocation4 + $0xd0] sm:$0xff] }
 0x1ef   : > { %v15208_v20 = vpop.f32.mrb[90].mxu1  ;;  %v4383_v7 = vadd.f32 %v15158_v43, %v4347_v18  ;;  %v4239_v23 = vpop.f32.mrb[87].mxu0  ;;  %4914 = vst.msk [vmem:[#allocation4 + $0x68] sm:$0xff] %vm2395_vm5, %v4878_v49 }
 0x1f0   : > { %v4720_v59 = vpop.f32.mrb[91].mxu1  ;;  %v4382_v24 = vadd.f32 %v4346_v54, %v4239_v23  ;;  %4913 = vst.msk [vmem:[#allocation4 + $0x60] sm:$0xff] %vm2395_vm5, %v4877_v19  ;;  %v4844_v26 = vld [vmem:[#allocation4 + $0x78] sm:$0xff]  ;;  %v4357_v54 = vld [vmem:[#allocation4 + $0xe8] sm:$0xff] }
 0x1f1   : > { %4419 = vst.msk [vmem:[#allocation4 + $0x98] sm:$0xff] %vm2395_vm5, %v4383_v7  ;;  %v4880_v8 = vadd.f32 %v15208_v20, %v4844_v26  ;;  %v4843_v28 = vld [vmem:[#allocation4 + $0x70] sm:$0xff] }
 0x1f2   : > { %4418 = vst.msk [vmem:[#allocation4 + $0x90] sm:$0xff] %vm2395_vm5, %v4382_v24  ;;  %v15161_v46 = vpop.f32.mrb[88].mxu0  ;;  %v4879_v22 = vadd.f32 %v4843_v28, %v4720_v59  ;;  %v4356_v28 = vld [vmem:[#allocation4 + $0xe0] sm:$0xff] }
 0x1f3   : > { %v15211_v33 = vpop.f32.mrb[92].mxu1  ;;  %v4385_v27 = vadd.f32 %v15161_v46, %v4349_v32  ;;  %v4249_v10 = vpop.f32.mrb[89].mxu0  ;;  %4916 = vst.msk [vmem:[#allocation4 + $0x78] sm:$0xff] %vm2395_vm5, %v4880_v8 }
 0x1f4   : > { %v4730_v42 = vpop.f32.mrb[93].mxu1  ;;  %v4384_v41 = vadd.f32 %v4348_v37, %v4249_v10  ;;  %4915 = vst.msk [vmem:[#allocation4 + $0x70] sm:$0xff] %vm2395_vm5, %v4879_v22  ;;  %v4846_v36 = vld [vmem:[#allocation4 + $0x88] sm:$0xff]  ;;  %v4359_v37 = vld [vmem:[#allocation4 + $0xf8] sm:$0xff] }
 0x1f5   : > { %4421 = vst.msk [vmem:[#allocation4 + $0xa8] sm:$0xff] %vm2395_vm5, %v4385_v27  ;;  %v4882_v29 = vadd.f32 %v15211_v33, %v4846_v36  ;;  %v4845_v51 = vld [vmem:[#allocation4 + $0x80] sm:$0xff] }
 0x1f6   : > { %4420 = vst.msk [vmem:[#allocation4 + $0xa0] sm:$0xff] %vm2395_vm5, %v4384_v41  ;;  %v15164_v44 = vpop.f32.mrb[90].mxu0  ;;  %v4881_v47 = vadd.f32 %v4845_v51, %v4730_v42  ;;  %v4358_v51 = vld [vmem:[#allocation4 + $0xf0] sm:$0xff] }
 0x1f7   : > { %v15214_v31 = vpop.f32.mrb[94].mxu1  ;;  %v4387_v0 = vadd.f32 %v15164_v44, %v4351_v57  ;;  %v4259_v48 = vpop.f32.mrb[91].mxu0  ;;  %4918 = vst.msk [vmem:[#allocation4 + $0x88] sm:$0xff] %vm2395_vm5, %v4882_v29 }
 0x1f8   : > { %v4740_v35 = vpop.f32.mrb[95].mxu1  ;;  %v4386_v14 = vadd.f32 %v4350_v2, %v4259_v48  ;;  %4917 = vst.msk [vmem:[#allocation4 + $0x80] sm:$0xff] %vm2395_vm5, %v4881_v47  ;;  %v4848_v1 = vld [vmem:[#allocation4 + $0x98] sm:$0xff] }
 0x1f9   : > { %4423 = vst.msk [vmem:[#allocation4 + $0xb8] sm:$0xff] %vm2395_vm5, %v4387_v0  ;;  %v4884_v50 = vadd.f32 %v15214_v31, %v4848_v1  ;;  %v4847_v38 = vld [vmem:[#allocation4 + $0x90] sm:$0xff] }
 0x1fa   : > { %4422 = vst.msk [vmem:[#allocation4 + $0xb0] sm:$0xff] %vm2395_vm5, %v4386_v14  ;;  %v15167_v25 = vpop.f32.mrb[92].mxu0  ;;  %v4883_v39 = vadd.f32 %v4847_v38, %v4740_v35  ;;  %v9743_v31 = vld [vmem:[%s19964_s6 + $0x10] sm:$0xff]  ;;  %v4361_v35 = vld [vmem:[#allocation4 + $0x108] sm:$0xff] }
 0x1fb   : > { %v15217_v53 = vpop.f32.mrb[96].mxu1  ;;  %v4389_v40 = vadd.f32 %v15167_v25, %v4353_v30  ;;  %v4269_v11 = vpop.f32.mrb[93].mxu0  ;;  %4920 = vst.msk [vmem:[#allocation4 + $0x98] sm:$0xff] %vm2395_vm5, %v4884_v50  ;;  %15519 = vmatprep.subr.mxu1 %v9743_v31 }
 0x1fc   : > { %v4750_v12 = vpop.f32.mrb[97].mxu1  ;;  %v4388_v62 = vadd.f32 %v4352_v6, %v4269_v11  ;;  %4919 = vst.msk [vmem:[#allocation4 + $0x90] sm:$0xff] %vm2395_vm5, %v4883_v39  ;;  %v4850_v34 = vld [vmem:[#allocation4 + $0xa8] sm:$0xff]  ;;  %15520 = vmatpush3.msra.mxu1 %v9743_v31 }
 0x1fd   : > { %4425 = vst.msk [vmem:[#allocation4 + $0xc8] sm:$0xff] %vm2395_vm5, %v4389_v40  ;;  %v4886_v63 = vadd.f32 %v15217_v53, %v4850_v34  ;;  %v4849_v45 = vld [vmem:[#allocation4 + $0xa0] sm:$0xff] }
 0x1fe   : > { %4424 = vst.msk [vmem:[#allocation4 + $0xc0] sm:$0xff] %vm2395_vm5, %v4388_v62  ;;  %v15170_v9 = vpop.f32.mrb[94].mxu0  ;;  %v4885_v13 = vadd.f32 %v4849_v45, %v4750_v12 }
 0x1ff   : > { %v15220_v16 = vpop.f32.mrb[98].mxu1  ;;  %v4391_v5 = vadd.f32 %v15170_v9, %v4355_v60  ;;  %v4279_v49 = vpop.f32.mrb[95].mxu0  ;;  %4922 = vst.msk [vmem:[#allocation4 + $0xa8] sm:$0xff] %vm2395_vm5, %v4886_v63 }
 0x200   : > { %v4760_v43 = vpop.f32.mrb[99].mxu1  ;;  %v4390_v18 = vadd.f32 %v4354_v52, %v4279_v49  ;;  %4921 = vst.msk [vmem:[#allocation4 + $0xa0] sm:$0xff] %vm2395_vm5, %v4885_v13  ;;  %v4852_v19 = vld [vmem:[#allocation4 + $0xb8] sm:$0xff]  ;;  %v5331_v13 = vld [vmem:[#allocation4 + $0x8] sm:$0xff] }
 0x201   : > { %4427 = vst.msk [vmem:[#allocation4 + $0xd8] sm:$0xff] %vm2395_vm5, %v4391_v5  ;;  %v4888_v20 = vadd.f32 %v15220_v16, %v4852_v19  ;;  %v4851_v7 = vld [vmem:[#allocation4 + $0xb0] sm:$0xff] }
 0x202   : > { %4426 = vst.msk [vmem:[#allocation4 + $0xd0] sm:$0xff] %vm2395_vm5, %v4390_v18  ;;  %v15173_v23 = vpop.f32.mrb[96].mxu0  ;;  %v4887_v59 = vadd.f32 %v4851_v7, %v4760_v43  ;;  %v5330_v43 = vld [vmem:[#allocation4] sm:$0xff] }
 0x203   : > { %v15223_v24 = vpop.f32.mrb[100].mxu1  ;;  %v4393_v26 = vadd.f32 %v15173_v23, %v4357_v54  ;;  %v4289_v8 = vpop.f32.mrb[97].mxu0  ;;  %4924 = vst.msk [vmem:[#allocation4 + $0xb8] sm:$0xff] %vm2395_vm5, %v4888_v20 }
 0x204   : > { %v4770_v46 = vpop.f32.mrb[101].mxu1  ;;  %v4392_v32 = vadd.f32 %v4356_v28, %v4289_v8  ;;  %4923 = vst.msk [vmem:[#allocation4 + $0xb0] sm:$0xff] %vm2395_vm5, %v4887_v59  ;;  %v4854_v22 = vld [vmem:[#allocation4 + $0xc8] sm:$0xff]  ;;  %v5333_v59 = vld [vmem:[#allocation4 + $0x18] sm:$0xff] }
 0x205   : > { %4429 = vst.msk [vmem:[#allocation4 + $0xe8] sm:$0xff] %vm2395_vm5, %v4393_v26  ;;  %v4890_v33 = vadd.f32 %v15223_v24, %v4854_v22  ;;  %v4853_v27 = vld [vmem:[#allocation4 + $0xc0] sm:$0xff] }
 0x206   : > { %4428 = vst.msk [vmem:[#allocation4 + $0xe0] sm:$0xff] %vm2395_vm5, %v4392_v32  ;;  %v15176_v10 = vpop.f32.mrb[98].mxu0  ;;  %v4889_v42 = vadd.f32 %v4853_v27, %v4770_v46  ;;  %v5332_v46 = vld [vmem:[#allocation4 + $0x10] sm:$0xff] }
 0x207   : > { %v15226_v41 = vpop.f32.mrb[102].mxu1  ;;  %v4395_v36 = vadd.f32 %v15176_v10, %v4359_v37  ;;  %v4299_v29 = vpop.f32.mrb[99].mxu0  ;;  %4926 = vst.msk [vmem:[#allocation4 + $0xc8] sm:$0xff] %vm2395_vm5, %v4890_v33 }
 0x208   : > { %v4780_v44 = vpop.f32.mrb[103].mxu1  ;;  %v4394_v57 = vadd.f32 %v4358_v51, %v4299_v29  ;;  %4925 = vst.msk [vmem:[#allocation4 + $0xc0] sm:$0xff] %vm2395_vm5, %v4889_v42  ;;  %v4856_v47 = vld [vmem:[#allocation4 + $0xd8] sm:$0xff]  ;;  %v5335_v42 = vld [vmem:[#allocation4 + $0x28] sm:$0xff] }
 0x209   : > { %4431 = vst.msk [vmem:[#allocation4 + $0xf8] sm:$0xff] %vm2395_vm5, %v4395_v36  ;;  %v4892_v0 = vadd.f32 %v15226_v41, %v4856_v47  ;;  %v4855_v48 = vld [vmem:[#allocation4 + $0xd0] sm:$0xff] }
 0x20a   : > { %4430 = vst.msk [vmem:[#allocation4 + $0xf0] sm:$0xff] %vm2395_vm5, %v4394_v57  ;;  %v15179_v2 = vpop.f32.mrb[100].mxu0  ;;  %v4891_v14 = vadd.f32 %v4855_v48, %v4780_v44  ;;  %v5334_v44 = vld [vmem:[#allocation4 + $0x20] sm:$0xff] }
 0x20b   : > { %v15229_v1 = vpop.f32.mrb[104].mxu1  ;;  %v4397_v50 = vadd.f32 %v15179_v2, %v4361_v35  ;;  %v4309_v38 = vpop.f32.mrb[101].mxu0  ;;  %4928 = vst.msk [vmem:[#allocation4 + $0xd8] sm:$0xff] %vm2395_vm5, %v4892_v0  ;;  %v5337_v35 = vld [vmem:[#allocation4 + $0x38] sm:$0xff] }
 0x20c   : > { %v4790_v3 = vpop.f32.mrb[105].mxu1  ;;  %v4396_v25 = vadd.f32 %v4360_v55, %v4309_v38  ;;  %4927 = vst.msk [vmem:[#allocation4 + $0xd0] sm:$0xff] %vm2395_vm5, %v4891_v14  ;;  %v4858_v30 = vld [vmem:[#allocation4 + $0xe8] sm:$0xff]  ;;  %v5336_v55 = vld [vmem:[#allocation4 + $0x30] sm:$0xff] }
 0x20d   : > { %4433 = vst.msk [vmem:[#allocation4 + $0x108] sm:$0xff] %vm2395_vm5, %v4397_v50  ;;  %v4894_v39 = vadd.f32 %v15229_v1, %v4858_v30  ;;  %v4857_v53 = vld [vmem:[#allocation4 + $0xe0] sm:$0xff] }
 0x20e   : > { %4432 = vst.msk [vmem:[#allocation4 + $0x100] sm:$0xff] %vm2395_vm5, %v4396_v25  ;;  %v15182_v56 = vpop.f32.mrb[102].mxu0  ;;  %v4893_v40 = vadd.f32 %v4857_v53, %v4790_v3 }
 0x20f   : > { %v15232_v11 = vpop.f32.mrb[106].mxu1  ;;  %v4399_v6 = vadd.f32 %v15182_v56, %v4363_v58  ;;  %v4319_v12 = vpop.f32.mrb[103].mxu0  ;;  %4930 = vst.msk [vmem:[#allocation4 + $0xe8] sm:$0xff] %vm2395_vm5, %v4894_v39  ;;  %v5339_v58 = vld [vmem:[#allocation4 + $0x48] sm:$0xff] }
 0x210   : > { %v4800_v62 = vpop.f32.mrb[107].mxu1  ;;  %v4398_v34 = vadd.f32 %v4362_v61, %v4319_v12  ;;  %4929 = vst.msk [vmem:[#allocation4 + $0xe0] sm:$0xff] %vm2395_vm5, %v4893_v40  ;;  %v4860_v63 = vld [vmem:[#allocation4 + $0xf8] sm:$0xff]  ;;  %v5338_v61 = vld [vmem:[#allocation4 + $0x40] sm:$0xff] }
 0x211   : > { %4435 = vst.msk [vmem:[#allocation4 + $0x118] sm:$0xff] %vm2395_vm5, %v4399_v6  ;;  %v4896_v45 = vadd.f32 %v15232_v11, %v4860_v63  ;;  %v4859_v9 = vld [vmem:[#allocation4 + $0xf0] sm:$0xff] }
 0x212   : > { %4434 = vst.msk [vmem:[#allocation4 + $0x110] sm:$0xff] %vm2395_vm5, %v4398_v34  ;;  %v15243_v60 = vpop.f32.mrb[104].mxu0  ;;  %v4895_v16 = vadd.f32 %v4859_v9, %v4800_v62 }
 0x213   : > { %v15235_v5 = vpop.f32.mrb[108].mxu1  ;;  %v5367_v49 = vadd.f32 %v15243_v60, %v5331_v13  ;;  %v5151_v52 = vpop.f32.mrb[105].mxu0  ;;  %4932 = vst.msk [vmem:[#allocation4 + $0xf8] sm:$0xff] %vm2395_vm5, %v4896_v45  ;;  %v5341_v13 = vld [vmem:[#allocation4 + $0x58] sm:$0xff] }
 0x214   : > { %v4810_v18 = vpop.f32.mrb[109].mxu1  ;;  %v5366_v19 = vadd.f32 %v5330_v43, %v5151_v52  ;;  %4931 = vst.msk [vmem:[#allocation4 + $0xf0] sm:$0xff] %vm2395_vm5, %v4895_v16  ;;  %v4862_v20 = vld [vmem:[#allocation4 + $0x108] sm:$0xff]  ;;  %v5340_v43 = vld [vmem:[#allocation4 + $0x50] sm:$0xff] }
 0x215   : > { %5403 = vst.msk [vmem:[#allocation4 + $0x8] sm:$0xff] %vm2395_vm5, %v5367_v49  ;;  %v4898_v7 = vadd.f32 %v15235_v5, %v4862_v20  ;;  %v4861_v23 = vld [vmem:[#allocation4 + $0x100] sm:$0xff] }
 0x216   : > { %5402 = vst.msk [vmem:[#allocation4] sm:$0xff] %vm2395_vm5, %v5366_v19  ;;  %v15246_v54 = vpop.f32.mrb[106].mxu0  ;;  %v4897_v24 = vadd.f32 %v4861_v23, %v4810_v18 }
 0x217   : > { %v15238_v26 = vpop.f32.mrb[110].mxu1  ;;  %v5369_v8 = vadd.f32 %v15246_v54, %v5333_v59  ;;  %v5161_v28 = vpop.f32.mrb[107].mxu0  ;;  %4934 = vst.msk [vmem:[#allocation4 + $0x108] sm:$0xff] %vm2395_vm5, %v4898_v7  ;;  %v5343_v59 = vld [vmem:[#allocation4 + $0x68] sm:$0xff] }
 0x218   : > { %v4820_v32 = vpop.f32.mrb[111].mxu1  ;;  %v5368_v22 = vadd.f32 %v5332_v46, %v5161_v28  ;;  %4933 = vst.msk [vmem:[#allocation4 + $0x100] sm:$0xff] %vm2395_vm5, %v4897_v24  ;;  %v4864_v33 = vld [vmem:[#allocation4 + $0x118] sm:$0xff]  ;;  %v5342_v46 = vld [vmem:[#allocation4 + $0x60] sm:$0xff] }
 0x219   : > { %5405 = vst.msk [vmem:[#allocation4 + $0x18] sm:$0xff] %vm2395_vm5, %v5369_v8  ;;  %v4900_v27 = vadd.f32 %v15238_v26, %v4864_v33  ;;  %v4863_v10 = vld [vmem:[#allocation4 + $0x110] sm:$0xff] }
 0x21a   : > { %5404 = vst.msk [vmem:[#allocation4 + $0x10] sm:$0xff] %vm2395_vm5, %v5368_v22  ;;  %v15249_v37 = vpop.f32.mrb[108].mxu0  ;;  %v4899_v41 = vadd.f32 %v4863_v10, %v4820_v32 }
 0x21b   : > { %v15299_v36 = vpop.f32.mrb[112].mxu1  ;;  %v5371_v29 = vadd.f32 %v15249_v37, %v5335_v42  ;;  %v5171_v51 = vpop.f32.mrb[109].mxu0  ;;  %4936 = vst.msk [vmem:[#allocation4 + $0x118] sm:$0xff] %vm2395_vm5, %v4900_v27  ;;  %v5345_v42 = vld [vmem:[#allocation4 + $0x78] sm:$0xff] }
 0x21c   : > { %v5652_v57 = vpop.f32.mrb[113].mxu1  ;;  %v5370_v47 = vadd.f32 %v5334_v44, %v5171_v51  ;;  %4935 = vst.msk [vmem:[#allocation4 + $0x110] sm:$0xff] %vm2395_vm5, %v4899_v41  ;;  %v5832_v31 = vld [vmem:[#allocation4 + $0x8] sm:$0xff]  ;;  %v5344_v44 = vld [vmem:[#allocation4 + $0x70] sm:$0xff] }
 0x21d   : > { %5407 = vst.msk [vmem:[#allocation4 + $0x28] sm:$0xff] %vm2395_vm5, %v5371_v29  ;;  %v5868_v0 = vadd.f32 %v15299_v36, %v5832_v31  ;;  %v5831_v48 = vld [vmem:[#allocation4] sm:$0xff] }
 0x21e   : > { %5406 = vst.msk [vmem:[#allocation4 + $0x20] sm:$0xff] %vm2395_vm5, %v5370_v47  ;;  %v15252_v2 = vpop.f32.mrb[110].mxu0  ;;  %v5867_v14 = vadd.f32 %v5831_v48, %v5652_v57 }
 0x21f   : > { %v15302_v1 = vpop.f32.mrb[114].mxu1  ;;  %v5373_v50 = vadd.f32 %v15252_v2, %v5337_v35  ;;  %v5181_v38 = vpop.f32.mrb[111].mxu0  ;;  %5904 = vst.msk [vmem:[#allocation4 + $0x8] sm:$0xff] %vm2395_vm5, %v5868_v0  ;;  %v5347_v35 = vld [vmem:[#allocation4 + $0x88] sm:$0xff] }
 0x220   : > { %v5662_v3 = vpop.f32.mrb[115].mxu1  ;;  %v5372_v25 = vadd.f32 %v5336_v55, %v5181_v38  ;;  %5903 = vst.msk [vmem:[#allocation4] sm:$0xff] %vm2395_vm5, %v5867_v14  ;;  %v5834_v30 = vld [vmem:[#allocation4 + $0x18] sm:$0xff]  ;;  %v5346_v55 = vld [vmem:[#allocation4 + $0x80] sm:$0xff] }
 0x221   : > { %5409 = vst.msk [vmem:[#allocation4 + $0x38] sm:$0xff] %vm2395_vm5, %v5373_v50  ;;  %v5870_v39 = vadd.f32 %v15302_v1, %v5834_v30  ;;  %v5833_v53 = vld [vmem:[#allocation4 + $0x10] sm:$0xff] }
 0x222   : > { %5408 = vst.msk [vmem:[#allocation4 + $0x30] sm:$0xff] %vm2395_vm5, %v5372_v25  ;;  %v15255_v56 = vpop.f32.mrb[112].mxu0  ;;  %v5869_v40 = vadd.f32 %v5833_v53, %v5662_v3 }
 0x223   : > { %v15305_v11 = vpop.f32.mrb[116].mxu1  ;;  %v5375_v6 = vadd.f32 %v15255_v56, %v5339_v58  ;;  %v5191_v12 = vpop.f32.mrb[113].mxu0  ;;  %5906 = vst.msk [vmem:[#allocation4 + $0x18] sm:$0xff] %vm2395_vm5, %v5870_v39  ;;  %v5349_v58 = vld [vmem:[#allocation4 + $0x98] sm:$0xff] }
 0x224   : > { %v5672_v62 = vpop.f32.mrb[117].mxu1  ;;  %v5374_v34 = vadd.f32 %v5338_v61, %v5191_v12  ;;  %5905 = vst.msk [vmem:[#allocation4 + $0x10] sm:$0xff] %vm2395_vm5, %v5869_v40  ;;  %v5836_v63 = vld [vmem:[#allocation4 + $0x28] sm:$0xff]  ;;  %v5348_v61 = vld [vmem:[#allocation4 + $0x90] sm:$0xff] }
 0x225   : > { %5411 = vst.msk [vmem:[#allocation4 + $0x48] sm:$0xff] %vm2395_vm5, %v5375_v6  ;;  %v5872_v45 = vadd.f32 %v15305_v11, %v5836_v63  ;;  %v5835_v9 = vld [vmem:[#allocation4 + $0x20] sm:$0xff] }
 0x226   : > { %5410 = vst.msk [vmem:[#allocation4 + $0x40] sm:$0xff] %vm2395_vm5, %v5374_v34  ;;  %v15258_v60 = vpop.f32.mrb[114].mxu0  ;;  %v5871_v16 = vadd.f32 %v5835_v9, %v5672_v62 }
 0x227   : > { %v15308_v5 = vpop.f32.mrb[118].mxu1  ;;  %v5377_v49 = vadd.f32 %v15258_v60, %v5341_v13  ;;  %v5201_v52 = vpop.f32.mrb[115].mxu0  ;;  %5908 = vst.msk [vmem:[#allocation4 + $0x28] sm:$0xff] %vm2395_vm5, %v5872_v45  ;;  %v5351_v13 = vld [vmem:[#allocation4 + $0xa8] sm:$0xff] }
 0x228   : > { %v5682_v18 = vpop.f32.mrb[119].mxu1  ;;  %v5376_v19 = vadd.f32 %v5340_v43, %v5201_v52  ;;  %5907 = vst.msk [vmem:[#allocation4 + $0x20] sm:$0xff] %vm2395_vm5, %v5871_v16  ;;  %v5838_v20 = vld [vmem:[#allocation4 + $0x38] sm:$0xff]  ;;  %v5350_v43 = vld [vmem:[#allocation4 + $0xa0] sm:$0xff] }
 0x229   : > { %5413 = vst.msk [vmem:[#allocation4 + $0x58] sm:$0xff] %vm2395_vm5, %v5377_v49  ;;  %v5874_v7 = vadd.f32 %v15308_v5, %v5838_v20  ;;  %v5837_v23 = vld [vmem:[#allocation4 + $0x30] sm:$0xff] }
 0x22a   : > { %5412 = vst.msk [vmem:[#allocation4 + $0x50] sm:$0xff] %vm2395_vm5, %v5376_v19  ;;  %v15261_v54 = vpop.f32.mrb[116].mxu0  ;;  %v5873_v24 = vadd.f32 %v5837_v23, %v5682_v18 }
 0x22b   : > { %v15311_v26 = vpop.f32.mrb[120].mxu1  ;;  %v5379_v8 = vadd.f32 %v15261_v54, %v5343_v59  ;;  %v5211_v28 = vpop.f32.mrb[117].mxu0  ;;  %5910 = vst.msk [vmem:[#allocation4 + $0x38] sm:$0xff] %vm2395_vm5, %v5874_v7  ;;  %v5353_v59 = vld [vmem:[#allocation4 + $0xb8] sm:$0xff] }
 0x22c   : > { %v5692_v32 = vpop.f32.mrb[121].mxu1  ;;  %v5378_v22 = vadd.f32 %v5342_v46, %v5211_v28  ;;  %5909 = vst.msk [vmem:[#allocation4 + $0x30] sm:$0xff] %vm2395_vm5, %v5873_v24  ;;  %v5840_v33 = vld [vmem:[#allocation4 + $0x48] sm:$0xff]  ;;  %v5352_v46 = vld [vmem:[#allocation4 + $0xb0] sm:$0xff] }
 0x22d   : > { %5415 = vst.msk [vmem:[#allocation4 + $0x68] sm:$0xff] %vm2395_vm5, %v5379_v8  ;;  %v5876_v27 = vadd.f32 %v15311_v26, %v5840_v33  ;;  %v5839_v10 = vld [vmem:[#allocation4 + $0x40] sm:$0xff] }
 0x22e   : > { %5414 = vst.msk [vmem:[#allocation4 + $0x60] sm:$0xff] %vm2395_vm5, %v5378_v22  ;;  %v15264_v37 = vpop.f32.mrb[118].mxu0  ;;  %v5875_v41 = vadd.f32 %v5839_v10, %v5692_v32 }
 0x22f   : > { %v15314_v36 = vpop.f32.mrb[122].mxu1  ;;  %v5381_v29 = vadd.f32 %v15264_v37, %v5345_v42  ;;  %v5221_v51 = vpop.f32.mrb[119].mxu0  ;;  %5912 = vst.msk [vmem:[#allocation4 + $0x48] sm:$0xff] %vm2395_vm5, %v5876_v27  ;;  %v5355_v42 = vld [vmem:[#allocation4 + $0xc8] sm:$0xff] }
 0x230   : > { %v5702_v57 = vpop.f32.mrb[123].mxu1  ;;  %v5380_v47 = vadd.f32 %v5344_v44, %v5221_v51  ;;  %5911 = vst.msk [vmem:[#allocation4 + $0x40] sm:$0xff] %vm2395_vm5, %v5875_v41  ;;  %v5842_v31 = vld [vmem:[#allocation4 + $0x58] sm:$0xff]  ;;  %v5354_v44 = vld [vmem:[#allocation4 + $0xc0] sm:$0xff] }
 0x231   : > { %5417 = vst.msk [vmem:[#allocation4 + $0x78] sm:$0xff] %vm2395_vm5, %v5381_v29  ;;  %v5878_v0 = vadd.f32 %v15314_v36, %v5842_v31  ;;  %v5841_v48 = vld [vmem:[#allocation4 + $0x50] sm:$0xff] }
 0x232   : > { %5416 = vst.msk [vmem:[#allocation4 + $0x70] sm:$0xff] %vm2395_vm5, %v5380_v47  ;;  %v15267_v2 = vpop.f32.mrb[120].mxu0  ;;  %v5877_v14 = vadd.f32 %v5841_v48, %v5702_v57 }
 0x233   : > { %v15317_v1 = vpop.f32.mrb[124].mxu1  ;;  %v5383_v50 = vadd.f32 %v15267_v2, %v5347_v35  ;;  %v5231_v38 = vpop.f32.mrb[121].mxu0  ;;  %5914 = vst.msk [vmem:[#allocation4 + $0x58] sm:$0xff] %vm2395_vm5, %v5878_v0  ;;  %v5357_v35 = vld [vmem:[#allocation4 + $0xd8] sm:$0xff] }
 0x234   : > { %v5712_v3 = vpop.f32.mrb[125].mxu1  ;;  %v5382_v25 = vadd.f32 %v5346_v55, %v5231_v38  ;;  %5913 = vst.msk [vmem:[#allocation4 + $0x50] sm:$0xff] %vm2395_vm5, %v5877_v14  ;;  %v5844_v30 = vld [vmem:[#allocation4 + $0x68] sm:$0xff]  ;;  %v5356_v55 = vld [vmem:[#allocation4 + $0xd0] sm:$0xff] }
 0x235   : > { %5419 = vst.msk [vmem:[#allocation4 + $0x88] sm:$0xff] %vm2395_vm5, %v5383_v50  ;;  %v5880_v39 = vadd.f32 %v15317_v1, %v5844_v30  ;;  %v5843_v53 = vld [vmem:[#allocation4 + $0x60] sm:$0xff] }
 0x236   : > { %5418 = vst.msk [vmem:[#allocation4 + $0x80] sm:$0xff] %vm2395_vm5, %v5382_v25  ;;  %v15270_v56 = vpop.f32.mrb[122].mxu0  ;;  %v5879_v40 = vadd.f32 %v5843_v53, %v5712_v3 }
 0x237   : > { %v15320_v11 = vpop.f32.mrb[126].mxu1  ;;  %v5385_v6 = vadd.f32 %v15270_v56, %v5349_v58  ;;  %v5241_v12 = vpop.f32.mrb[123].mxu0  ;;  %5916 = vst.msk [vmem:[#allocation4 + $0x68] sm:$0xff] %vm2395_vm5, %v5880_v39  ;;  %v5359_v58 = vld [vmem:[#allocation4 + $0xe8] sm:$0xff] }
 0x238   : > { %v5722_v62 = vpop.f32.mrb[127].mxu1  ;;  %v5384_v34 = vadd.f32 %v5348_v61, %v5241_v12  ;;  %5915 = vst.msk [vmem:[#allocation4 + $0x60] sm:$0xff] %vm2395_vm5, %v5879_v40  ;;  %v5846_v63 = vld [vmem:[#allocation4 + $0x78] sm:$0xff]  ;;  %v5358_v61 = vld [vmem:[#allocation4 + $0xe0] sm:$0xff] }
 0x239   : > { %5421 = vst.msk [vmem:[#allocation4 + $0x98] sm:$0xff] %vm2395_vm5, %v5385_v6  ;;  %v5882_v45 = vadd.f32 %v15320_v11, %v5846_v63  ;;  %v5845_v9 = vld [vmem:[#allocation4 + $0x70] sm:$0xff] }
 0x23a   : > { %5420 = vst.msk [vmem:[#allocation4 + $0x90] sm:$0xff] %vm2395_vm5, %v5384_v34  ;;  %v15273_v60 = vpop.f32.mrb[124].mxu0  ;;  %v5881_v16 = vadd.f32 %v5845_v9, %v5722_v62 }
 0x23b   : > { %v15323_v5 = vpop.f32.mrb[128].mxu1  ;;  %v5387_v49 = vadd.f32 %v15273_v60, %v5351_v13  ;;  %v5251_v52 = vpop.f32.mrb[125].mxu0  ;;  %5918 = vst.msk [vmem:[#allocation4 + $0x78] sm:$0xff] %vm2395_vm5, %v5882_v45  ;;  %v5361_v13 = vld [vmem:[#allocation4 + $0xf8] sm:$0xff] }
 0x23c   : > { %v5732_v18 = vpop.f32.mrb[129].mxu1  ;;  %v5386_v19 = vadd.f32 %v5350_v43, %v5251_v52  ;;  %5917 = vst.msk [vmem:[#allocation4 + $0x70] sm:$0xff] %vm2395_vm5, %v5881_v16  ;;  %v5848_v20 = vld [vmem:[#allocation4 + $0x88] sm:$0xff]  ;;  %v5360_v43 = vld [vmem:[#allocation4 + $0xf0] sm:$0xff] }
 0x23d   : > { %5423 = vst.msk [vmem:[#allocation4 + $0xa8] sm:$0xff] %vm2395_vm5, %v5387_v49  ;;  %v5884_v7 = vadd.f32 %v15323_v5, %v5848_v20  ;;  %v5847_v23 = vld [vmem:[#allocation4 + $0x80] sm:$0xff] }
 0x23e   : > { %5422 = vst.msk [vmem:[#allocation4 + $0xa0] sm:$0xff] %vm2395_vm5, %v5386_v19  ;;  %v15276_v54 = vpop.f32.mrb[126].mxu0  ;;  %v5883_v24 = vadd.f32 %v5847_v23, %v5732_v18 }
 0x23f   : > { %v15326_v26 = vpop.f32.mrb[130].mxu1  ;;  %v5389_v8 = vadd.f32 %v15276_v54, %v5353_v59  ;;  %v5261_v28 = vpop.f32.mrb[127].mxu0  ;;  %5920 = vst.msk [vmem:[#allocation4 + $0x88] sm:$0xff] %vm2395_vm5, %v5884_v7  ;;  %v5363_v59 = vld [vmem:[#allocation4 + $0x108] sm:$0xff] }
 0x240   : > { %v5742_v32 = vpop.f32.mrb[131].mxu1  ;;  %v5388_v22 = vadd.f32 %v5352_v46, %v5261_v28  ;;  %5919 = vst.msk [vmem:[#allocation4 + $0x80] sm:$0xff] %vm2395_vm5, %v5883_v24  ;;  %v5850_v33 = vld [vmem:[#allocation4 + $0x98] sm:$0xff]  ;;  %v5362_v46 = vld [vmem:[#allocation4 + $0x100] sm:$0xff] }
 0x241   : > { %5425 = vst.msk [vmem:[#allocation4 + $0xb8] sm:$0xff] %vm2395_vm5, %v5389_v8  ;;  %v5886_v27 = vadd.f32 %v15326_v26, %v5850_v33  ;;  %v5849_v10 = vld [vmem:[#allocation4 + $0x90] sm:$0xff] }
 0x242   : > { %5424 = vst.msk [vmem:[#allocation4 + $0xb0] sm:$0xff] %vm2395_vm5, %v5388_v22  ;;  %v15279_v37 = vpop.f32.mrb[128].mxu0  ;;  %v5885_v41 = vadd.f32 %v5849_v10, %v5742_v32 }
 0x243   : > { %v15329_v36 = vpop.f32.mrb[132].mxu1  ;;  %v5391_v29 = vadd.f32 %v15279_v37, %v5355_v42  ;;  %v5271_v51 = vpop.f32.mrb[129].mxu0  ;;  %5922 = vst.msk [vmem:[#allocation4 + $0x98] sm:$0xff] %vm2395_vm5, %v5886_v27  ;;  %v5365_v42 = vld [vmem:[#allocation4 + $0x118] sm:$0xff] }
 0x244   : > { %v5752_v57 = vpop.f32.mrb[133].mxu1  ;;  %v5390_v47 = vadd.f32 %v5354_v44, %v5271_v51  ;;  %5921 = vst.msk [vmem:[#allocation4 + $0x90] sm:$0xff] %vm2395_vm5, %v5885_v41  ;;  %v5852_v31 = vld [vmem:[#allocation4 + $0xa8] sm:$0xff]  ;;  %v5364_v44 = vld [vmem:[#allocation4 + $0x110] sm:$0xff] }
 0x245   : > { %5427 = vst.msk [vmem:[#allocation4 + $0xc8] sm:$0xff] %vm2395_vm5, %v5391_v29  ;;  %v5888_v0 = vadd.f32 %v15329_v36, %v5852_v31  ;;  %v5851_v48 = vld [vmem:[#allocation4 + $0xa0] sm:$0xff] }
 0x246   : > { %5426 = vst.msk [vmem:[#allocation4 + $0xc0] sm:$0xff] %vm2395_vm5, %v5390_v47  ;;  %v15282_v2 = vpop.f32.mrb[130].mxu0  ;;  %v5887_v14 = vadd.f32 %v5851_v48, %v5752_v57  ;;  %v16082_v47 = vmov 269488144  }
 0x247   : > { %v15332_v1 = vpop.f32.mrb[134].mxu1  ;;  %v5393_v50 = vadd.f32 %v15282_v2, %v5357_v35  ;;  %v5281_v38 = vpop.f32.mrb[131].mxu0  ;;  %5924 = vst.msk [vmem:[#allocation4 + $0xa8] sm:$0xff] %vm2395_vm5, %v5888_v0  ;;  %v7731_v31 = vunpack.c.l.s4 %v16082_v47  ;;  %v16083_v0 = vmov 842150450  }
 0x248   : > { %v5762_v3 = vpop.f32.mrb[135].mxu1  ;;  %v5392_v25 = vadd.f32 %v5356_v55, %v5281_v38  ;;  %5923 = vst.msk [vmem:[#allocation4 + $0xa0] sm:$0xff] %vm2395_vm5, %v5887_v14  ;;  %v5854_v30 = vld [vmem:[#allocation4 + $0xb8] sm:$0xff]  ;;  %v7738_v48 = vunpack.c.l.s4 %v16083_v0  ;;  %v13885_v35 = vld [vmem:[%s19963_s5] ss:$0 sm:$0xff] }
 0x249   : > { %5429 = vst.msk [vmem:[#allocation4 + $0xd8] sm:$0xff] %vm2395_vm5, %v5393_v50  ;;  %v5890_v39 = vadd.f32 %v15332_v1, %v5854_v30  ;;  %v5853_v53 = vld [vmem:[#allocation4 + $0xb0] sm:$0xff]  ;;  %v16084_v1 = vmov 1414812756   ;;  %v16085_v38 = vmov 1987475062  }
 0x24a   : > { %5428 = vst.msk [vmem:[#allocation4 + $0xd0] sm:$0xff] %vm2395_vm5, %v5392_v25  ;;  %v15285_v56 = vpop.f32.mrb[132].mxu0  ;;  %v5889_v40 = vadd.f32 %v5853_v53, %v5762_v3  ;;  %v7745_v50 = vunpack.c.l.s4 %v16084_v1  ;;  %v7752_v55 = vunpack.c.l.s4 %v16085_v38 }
 0x24b   : > { %v15335_v11 = vpop.f32.mrb[136].mxu1  ;;  %v5395_v6 = vadd.f32 %v15285_v56, %v5359_v58  ;;  %v5291_v12 = vpop.f32.mrb[133].mxu0  ;;  %5926 = vst.msk [vmem:[#allocation4 + $0xb8] sm:$0xff] %vm2395_vm5, %v5890_v39  ;;  %v6333_v39 = vld [vmem:[#allocation4 + $0x8] sm:$0xff] }
 0x24c   : > { %v5772_v62 = vpop.f32.mrb[137].mxu1  ;;  %v5394_v34 = vadd.f32 %v5358_v61, %v5291_v12  ;;  %5925 = vst.msk [vmem:[#allocation4 + $0xb0] sm:$0xff] %vm2395_vm5, %v5889_v40  ;;  %v5856_v63 = vld [vmem:[#allocation4 + $0xc8] sm:$0xff]  ;;  %v7732_v61 = vunpack.c.0.s8 %v7731_v31  ;;  %v16086_v31 = vmov 1.0  }
 0x24d   : > { %5431 = vst.msk [vmem:[#allocation4 + $0xe8] sm:$0xff] %vm2395_vm5, %v5395_v6  ;;  %v5892_v45 = vadd.f32 %v15335_v11, %v5856_v63  ;;  %v5855_v9 = vld [vmem:[#allocation4 + $0xc0] sm:$0xff]  ;;  %v7418_v6 = vcombine.high %v13885_v35, %v13885_v35 }
 0x24e   : > { %5430 = vst.msk [vmem:[#allocation4 + $0xe0] sm:$0xff] %vm2395_vm5, %v5394_v34  ;;  %v15288_v60 = vpop.f32.mrb[134].mxu0  ;;  %v5891_v16 = vadd.f32 %v5855_v9, %v5772_v62  ;;  %v6332_v11 = vld [vmem:[#allocation4] sm:$0xff]  ;;  %v7739_v62 = vunpack.c.0.s8 %v7738_v48  ;;  %v7753_v9 = vunpack.c.0.s8 %v7752_v55  ;;  %v6339_v55 = vld [vmem:[#allocation4 + $0x38] sm:$0xff] }
 0x24f   : > { %v15338_v5 = vpop.f32.mrb[138].mxu1  ;;  %v5397_v49 = vadd.f32 %v15288_v60, %v5361_v13  ;;  %v5301_v52 = vpop.f32.mrb[135].mxu0  ;;  %5928 = vst.msk [vmem:[#allocation4 + $0xc8] sm:$0xff] %vm2395_vm5, %v5892_v45  ;;  %v7746_v45 = vunpack.c.0.s8 %v7745_v50 }
 0x250   : > { %v5782_v18 = vpop.f32.mrb[139].mxu1  ;;  %v5396_v19 = vadd.f32 %v5360_v43, %v5301_v52  ;;  %5927 = vst.msk [vmem:[#allocation4 + $0xc0] sm:$0xff] %vm2395_vm5, %v5891_v16  ;;  %v5858_v20 = vld [vmem:[#allocation4 + $0xd8] sm:$0xff]  ;;  %v17478_v16 = vrot.slane %v13885_v35, %v16253_v17 }
 0x251   : > { %5433 = vst.msk [vmem:[#allocation4 + $0xf8] sm:$0xff] %vm2395_vm5, %v5397_v49  ;;  %v5894_v7 = vadd.f32 %v15338_v5, %v5858_v20  ;;  %v5857_v23 = vld [vmem:[#allocation4 + $0xd0] sm:$0xff]  ;;  %v6335_v49 = vld [vmem:[#allocation4 + $0x18] sm:$0xff] }
 0x252   : > { %5432 = vst.msk [vmem:[#allocation4 + $0xf0] sm:$0xff] %vm2395_vm5, %v5396_v19  ;;  %v15291_v54 = vpop.f32.mrb[136].mxu0  ;;  %v5893_v24 = vadd.f32 %v5857_v23, %v5782_v18  ;;  %v17482_v19 = vrot.slane %v7418_v6, %v16253_v17 }
 0x253   : > { %v15341_v26 = vpop.f32.mrb[140].mxu1  ;;  %v5399_v8 = vadd.f32 %v15291_v54, %v5363_v59  ;;  %v5311_v28 = vpop.f32.mrb[137].mxu0  ;;  %5930 = vst.msk [vmem:[#allocation4 + $0xd8] sm:$0xff] %vm2395_vm5, %v5894_v7  ;;  %v6334_v7 = vld [vmem:[#allocation4 + $0x10] sm:$0xff]  ;;  %v7735_v54 = vsub.s32 %v7732_v61, %v16218_v4  ;;  %v7742_v59 = vsub.s32 %v7739_v62, %v16218_v4 }
 0x254   : > { %v5792_v32 = vpop.f32.mrb[141].mxu1  ;;  %v5398_v22 = vadd.f32 %v5362_v46, %v5311_v28  ;;  %5929 = vst.msk [vmem:[#allocation4 + $0xd0] sm:$0xff] %vm2395_vm5, %v5893_v24  ;;  %v5860_v33 = vld [vmem:[#allocation4 + $0xe8] sm:$0xff]  ;;  %v7756_v28 = vsub.s32 %v7753_v9, %v16218_v4 }
 0x255   : > { %5435 = vst.msk [vmem:[#allocation4 + $0x108] sm:$0xff] %vm2395_vm5, %v5399_v8  ;;  %v5896_v27 = vadd.f32 %v15341_v26, %v5860_v33  ;;  %v5859_v10 = vld [vmem:[#allocation4 + $0xe0] sm:$0xff]  ;;  %v7749_v8 = vsub.s32 %v7746_v45, %v16218_v4  ;;  %v6337_v33 = vld [vmem:[#allocation4 + $0x28] sm:$0xff]  ;;  %v17514_v0 = vrot.slane %v16086_v31, %v7735_v54 }
 0x256   : > { %5434 = vst.msk [vmem:[#allocation4 + $0x100] sm:$0xff] %vm2395_vm5, %v5398_v22  ;;  %v15294_v37 = vpop.f32.mrb[138].mxu0  ;;  %v5895_v41 = vadd.f32 %v5859_v10, %v5792_v32  ;;  %v6336_v4 = vld [vmem:[#allocation4 + $0x20] sm:$0xff]  ;;  %v17512_v47 = vrot.slane %v16249_v15, %v7756_v28 }
 0x257   : > { %v15344_v36 = vpop.f32.mrb[142].mxu1  ;;  %v5401_v29 = vadd.f32 %v15294_v37, %v5365_v42  ;;  %v5321_v51 = vpop.f32.mrb[139].mxu0  ;;  %5932 = vst.msk [vmem:[#allocation4 + $0xe8] sm:$0xff] %vm2395_vm5, %v5896_v27  ;;  %v17494_v27 = vcombine.high %v17478_v16, %v17478_v16  ;;  %v17498_v37 = vcombine.high %v17482_v19, %v17482_v19  ;;  %v17522_v1 = vrot.slane %v16086_v31, %v7749_v8 }
 0x258   : > { %v5802_v57 = vpop.f32.mrb[143].mxu1  ;;  %v5400_v2 = vadd.f32 %v5364_v44, %v5321_v51  ;;  %5931 = vst.msk [vmem:[#allocation4 + $0xe0] sm:$0xff] %vm2395_vm5, %v5895_v41  ;;  %v5862_v14 = vld [vmem:[#allocation4 + $0xf8] sm:$0xff] }
 0x259   : > { %5437 = vst.msk [vmem:[#allocation4 + $0x118] sm:$0xff] %vm2395_vm5, %v5401_v29  ;;  %v5898_v3 = vadd.f32 %v15344_v36, %v5862_v14  ;;  %v5861_v25 = vld [vmem:[#allocation4 + $0xf0] sm:$0xff]  ;;  %v17502_v36 = vrot.slane %v16249_v15, %v7735_v54  ;;  %v17505_v29 = vrot.slane %v16249_v15, %v7742_v59  ;;  %v17520_v14 = vrot.slane %v16086_v31, %v7742_v59 }
 0x25a   : > { %5436 = vst.msk [vmem:[#allocation4 + $0x110] sm:$0xff] %vm2395_vm5, %v5400_v2  ;;  %v15355_v30 = vpop.f32.mrb[140].mxu0  ;;  %v5897_v53 = vadd.f32 %v5861_v25, %v5802_v57  ;;  %v17509_v57 = vrot.slane %v16249_v15, %v7749_v8  ;;  %v17531_v25 = vrot.slane %v16260_v21, %v7735_v54 }
 0x25b   : > { %v15347_v56 = vpop.f32.mrb[144].mxu1  ;;  %v6369_v58 = vadd.f32 %v15355_v30, %v6333_v39  ;;  %v6153_v40 = vpop.f32.mrb[141].mxu0  ;;  %5934 = vst.msk [vmem:[#allocation4 + $0xf8] sm:$0xff] %vm2395_vm5, %v5898_v3  ;;  %v17528_v3 = vrot.slane %v16086_v31, %v7756_v28 }
 0x25c   : > { %v5812_v12 = vpop.f32.mrb[145].mxu1  ;;  %v6368_v34 = vadd.f32 %v6332_v11, %v6153_v40  ;;  %5933 = vst.msk [vmem:[#allocation4 + $0xf0] sm:$0xff] %vm2395_vm5, %v5897_v53  ;;  %v5864_v63 = vld [vmem:[#allocation4 + $0x108] sm:$0xff]  ;;  %v6338_v40 = vld [vmem:[#allocation4 + $0x30] sm:$0xff] }
 0x25d   : > { %6405 = vst.msk [vmem:[#allocation4 + $0x8] sm:$0xff] %vm2395_vm5, %v6369_v58  ;;  %v5900_v60 = vadd.f32 %v15347_v56, %v5864_v63  ;;  %v5863_v13 = vld [vmem:[#allocation4 + $0x100] sm:$0xff] }
 0x25e   : > { %6404 = vst.msk [vmem:[#allocation4] sm:$0xff] %vm2395_vm5, %v6368_v34  ;;  %v15358_v5 = vpop.f32.mrb[142].mxu0  ;;  %v5899_v52 = vadd.f32 %v5863_v13, %v5812_v12 }
 0x25f   : > { %v15350_v43 = vpop.f32.mrb[146].mxu1  ;;  %v6371_v18 = vadd.f32 %v15358_v5, %v6335_v49  ;;  %v6163_v20 = vpop.f32.mrb[143].mxu0  ;;  %5936 = vst.msk [vmem:[#allocation4 + $0x108] sm:$0xff] %vm2395_vm5, %v5900_v60  ;;  %v6341_v5 = vld [vmem:[#allocation4 + $0x48] sm:$0xff] }
 0x260   : > { %v5822_v23 = vpop.f32.mrb[147].mxu1  ;;  %v6370_v24 = vadd.f32 %v6334_v7, %v6163_v20  ;;  %5935 = vst.msk [vmem:[#allocation4 + $0x100] sm:$0xff] %vm2395_vm5, %v5899_v52  ;;  %v5866_v26 = vld [vmem:[#allocation4 + $0x118] sm:$0xff] }
 0x261   : > { %6407 = vst.msk [vmem:[#allocation4 + $0x18] sm:$0xff] %vm2395_vm5, %v6371_v18  ;;  %v5902_v46 = vadd.f32 %v15350_v43, %v5866_v26  ;;  %v5865_v32 = vld [vmem:[#allocation4 + $0x110] sm:$0xff] }
 0x262   : > { %6406 = vst.msk [vmem:[#allocation4 + $0x10] sm:$0xff] %vm2395_vm5, %v6370_v24  ;;  %v15361_v22 = vpop.f32.mrb[144].mxu0  ;;  %v5901_v10 = vadd.f32 %v5865_v32, %v5822_v23  ;;  %v6340_v23 = vld [vmem:[#allocation4 + $0x40] sm:$0xff] }
 0x263   : > { %v6373_v42 = vadd.f32 %v15361_v22, %v6337_v33  ;;  %v6173_v41 = vpop.f32.mrb[145].mxu0  ;;  %5938 = vst.msk [vmem:[#allocation4 + $0x118] sm:$0xff] %vm2395_vm5, %v5902_v46 }
 0x264   : > { %v6441_v51 = vld [vmem:[#allocation4 + $0x8] sm:$0xff]  ;;  %v6372_v44 = vadd.f32 %v6336_v4, %v6173_v41  ;;  %5937 = vst.msk [vmem:[#allocation4 + $0x110] sm:$0xff] %vm2395_vm5, %v5901_v10 }
 0x265   : > { %v6529_v48 = vcombine.high %v6441_v51, %v6441_v51  ;;  %v17517_v2 = vrot.slane %v6441_v51, %v16253_v17  ;;  %v6440_v35 = vld [vmem:[#allocation4] sm:$0xff]  ;;  %6409 = vst.msk [vmem:[#allocation4 + $0x28] sm:$0xff] %vm2395_vm5, %v6373_v42  ;;  %v6343_v42 = vld [vmem:[#allocation4 + $0x58] sm:$0xff] }
 0x266   : > { %v6512_v50 = vcombine.high %v6440_v35, %v6440_v35  ;;  %v17525_v38 = vrot.slane %v6440_v35, %v16253_v17  ;;  %6408 = vst.msk [vmem:[#allocation4 + $0x20] sm:$0xff] %vm2395_vm5, %v6372_v44  ;;  %v15364_v15 = vpop.f32.mrb[146].mxu0 }
 0x267   : > { %v17534_v30 = vrot.slane %v6529_v48, %v16253_v17  ;;  %v17538_v39 = vcombine.high %v17517_v2, %v17517_v2  ;;  %v17542_v53 = vmul.f32 %v17478_v16, %v17517_v2  ;;  %v6375_v56 = vadd.f32 %v15364_v15, %v6339_v55  ;;  %v6183_v58 = vpop.f32.mrb[147].mxu0 }
 0x268   : > { %v17545_v11 = vrot.slane %v6512_v50, %v16253_v17  ;;  %v17549_v21 = vcombine.high %v17525_v38, %v17525_v38  ;;  %v7439_v6 = vmul.f32 %v17478_v16, %v17525_v38  ;;  %v6443_v12 = vld [vmem:[#allocation4 + $0x18] sm:$0xff]  ;;  %v6374_v61 = vadd.f32 %v6338_v40, %v6183_v58  ;;  %v6342_v50 = vld [vmem:[#allocation4 + $0x50] sm:$0xff] }
 0x269   : > { %v6563_v62 = vcombine.high %v6443_v12, %v6443_v12  ;;  %v17554_v34 = vrot.slane %v6443_v12, %v16253_v17  ;;  %v6442_v63 = vld [vmem:[#allocation4 + $0x10] sm:$0xff]  ;;  %6411 = vst.msk [vmem:[#allocation4 + $0x38] sm:$0xff] %vm2395_vm5, %v6375_v56  ;;  %vm7268_vm7 = vcmp.ge.f32.partialorder %v17525_v38, 0.0  ;;  %v17560_v45 = vcombine.high %v17534_v30, %v17534_v30 }
 0x26a   : > { %v6546_v9 = vcombine.high %v6442_v63, %v6442_v63  ;;  %v17563_v60 = vrot.slane %v6442_v63, %v16253_v17  ;;  %6410 = vst.msk [vmem:[#allocation4 + $0x30] sm:$0xff] %vm2395_vm5, %v6374_v61  ;;  %v15367_v13 = vpop.f32.mrb[148].mxu0  ;;  %v17568_v49 = vcombine.high %v17545_v11, %v17545_v11  ;;  %vm7269_vm8 = vcmp.ge.f32.partialorder %v17549_v21, 0.0 }
 0x26b   : > { %v17572_v52 = vrot.slane %v6563_v62, %v16253_v17  ;;  %v17576_v43 = vcombine.high %v17554_v34, %v17554_v34  ;;  %v17580_v18 = vmul.f32 %v17498_v37, %v17554_v34  ;;  %v6377_v20 = vadd.f32 %v15367_v13, %v6341_v5  ;;  %v6193_v7 = vpop.f32.mrb[149].mxu0 }
 0x26c   : > { %v17583_v54 = vrot.slane %v6546_v9, %v16253_v17  ;;  %v17587_v59 = vcombine.high %v17563_v60, %v17563_v60  ;;  %v17591_v24 = vmul.f32 %v17478_v16, %v17563_v60  ;;  %v6445_v26 = vld [vmem:[#allocation4 + $0x28] sm:$0xff]  ;;  %v6376_v8 = vadd.f32 %v6340_v23, %v6193_v7 }
 0x26d   : > { %v6597_v28 = vcombine.high %v6445_v26, %v6445_v26  ;;  %v17594_v46 = vrot.slane %v6445_v26, %v16253_v17  ;;  %v6444_v32 = vld [vmem:[#allocation4 + $0x20] sm:$0xff]  ;;  %6413 = vst.msk [vmem:[#allocation4 + $0x48] sm:$0xff] %vm2395_vm5, %v6377_v20  ;;  %vm7270_vm9 = vcmp.ge.f32.partialorder %v17545_v11, 0.0  ;;  %vm7271_vm10 = vcmp.ge.f32.partialorder %v17568_v49, 0.0  ;;  %v6345_v7 = vld [vmem:[#allocation4 + $0x68] sm:$0xff] }
 0x26e   : > { %v6580_v22 = vcombine.high %v6444_v32, %v6444_v32  ;;  %v17600_v33 = vrot.slane %v6444_v32, %v16253_v17  ;;  %6412 = vst.msk [vmem:[#allocation4 + $0x40] sm:$0xff] %vm2395_vm5, %v6376_v8  ;;  %v15370_v10 = vpop.f32.mrb[150].mxu0  ;;  %v7440_v41 = vmul.f32 %v17494_v27, %v17549_v21  ;;  %v7441_v4 = vmul.f32 %v17482_v19, %v17545_v11 }
 0x26f   : > { %v17608_v51 = vrot.slane %v6597_v28, %v16253_v17  ;;  %v17612_v44 = vcombine.high %v17594_v46, %v17594_v46  ;;  %v17616_v31 = vmul.f32 %v17482_v19, %v17594_v46  ;;  %v6379_v48 = vadd.f32 %v15370_v10, %v6343_v42  ;;  %v6203_v35 = vpop.f32.mrb[151].mxu0 }
 0x270   : > { %v17619_v15 = vrot.slane %v6580_v22, %v16253_v17  ;;  %v17623_v55 = vcombine.high %v17600_v33, %v17600_v33  ;;  %v17627_v56 = vmul.f32 %v17498_v37, %v17600_v33  ;;  %v6447_v58 = vld [vmem:[#allocation4 + $0x38] sm:$0xff]  ;;  %v6378_v40 = vadd.f32 %v6342_v50, %v6203_v35  ;;  %v6344_v22 = vld [vmem:[#allocation4 + $0x60] sm:$0xff] }
 0x271   : > { %v6631_v12 = vcombine.high %v6447_v58, %v6447_v58  ;;  %v17630_v61 = vrot.slane %v6447_v58, %v16253_v17  ;;  %v6446_v62 = vld [vmem:[#allocation4 + $0x30] sm:$0xff]  ;;  %6415 = vst.msk [vmem:[#allocation4 + $0x58] sm:$0xff] %vm2395_vm5, %v6379_v48  ;;  %v7442_v63 = vmul.f32 %v17498_v37, %v17568_v49  ;;  %v7583_v9 = vsel %vm7268_vm7, %v17525_v38, %v7439_v6 }
 0x272   : > { %v6614_v13 = vcombine.high %v6446_v62, %v6446_v62  ;;  %v17639_v5 = vrot.slane %v6446_v62, %v16253_v17  ;;  %6414 = vst.msk [vmem:[#allocation4 + $0x50] sm:$0xff] %vm2395_vm5, %v6378_v40  ;;  %v15373_v20 = vpop.f32.mrb[152].mxu0  ;;  %v7584_v23 = vsel %vm7269_vm8, %v17549_v21, %v7440_v41  ;;  %v7585_v26 = vsel %vm7270_vm9, %v17545_v11, %v7441_v4 }
 0x273   : > { %v17649_v8 = vrot.slane %v6631_v12, %v16253_v17  ;;  %v17653_v38 = vcombine.high %v17630_v61, %v17630_v61  ;;  %v17657_v6 = vmul.f32 %v17494_v27, %v17630_v61  ;;  %v6381_v28 = vadd.f32 %v15373_v20, %v6345_v7  ;;  %v6213_v32 = vpop.f32.mrb[153].mxu0 }
 0x274   : > { %v17660_v21 = vrot.slane %v6614_v13, %v16253_v17  ;;  %v17664_v11 = vcombine.high %v17639_v5, %v17639_v5  ;;  %v17668_v10 = vmul.f32 %v17482_v19, %v17639_v5  ;;  %v6449_v42 = vld [vmem:[#allocation4 + $0x48] sm:$0xff]  ;;  %v6380_v41 = vadd.f32 %v6344_v22, %v6213_v32  ;;  %v6347_v13 = vld [vmem:[#allocation4 + $0x78] sm:$0xff]  ;;  %v6346_v22 = vld [vmem:[#allocation4 + $0x70] sm:$0xff] }
 0x275   : > { %v6665_v4 = vcombine.high %v6449_v42, %v6449_v42  ;;  %v17671_v48 = vrot.slane %v6449_v42, %v16253_v17  ;;  %v6448_v35 = vld [vmem:[#allocation4 + $0x40] sm:$0xff]  ;;  %6417 = vst.msk [vmem:[#allocation4 + $0x68] sm:$0xff] %vm2395_vm5, %v6381_v28  ;;  %v7586_v50 = vsel %vm7271_vm10, %v17568_v49, %v7442_v63  ;;  %v7802_v58 = vmul.f32 %v17502_v36, %v7583_v9 }
 0x276   : > { %v6648_v40 = vcombine.high %v6448_v35, %v6448_v35  ;;  %v17679_v12 = vrot.slane %v6448_v35, %v16253_v17  ;;  %6416 = vst.msk [vmem:[#allocation4 + $0x60] sm:$0xff] %vm2395_vm5, %v6380_v41  ;;  %v15376_v62 = vpop.f32.mrb[154].mxu0  ;;  %v7803_v20 = vmul.f32 %v17505_v29, %v7584_v23  ;;  %v17684_v7 = vmul.f32 %v17509_v57, %v7585_v26 }
 0x277   : > { %20043 = vst [vmem:[#allocation9_spill] sm:$0xff] %v17671_v48  ;;  %v17687_v28 = vrot.slane %v6665_v4, %v16253_v17  ;;  %v17691_v49 = vcombine.high %v17671_v48, %v17671_v48  ;;  %v17695_v63 = vmul.f32 %v17478_v16, %v17671_v48  ;;  %v6383_v9 = vadd.f32 %v15376_v62, %v6347_v13  ;;  %v6223_v32 = vpop.f32.mrb[155].mxu0 }
 0x278   : > { %v17698_v42 = vrot.slane %v6648_v40, %v16253_v17  ;;  %v17702_v23 = vcombine.high %v17679_v12, %v17679_v12  ;;  %v17706_v26 = vmul.f32 %v17494_v27, %v17679_v12  ;;  %v6451_v41 = vld [vmem:[#allocation4 + $0x58] sm:$0xff]  ;;  %v6382_v4 = vadd.f32 %v6346_v22, %v6223_v32  ;;  %v6348_v22 = vld [vmem:[#allocation4 + $0x80] sm:$0xff] }
 0x279   : > { %20044 = vst [vmem:[#allocation10_spill] sm:$0xff] %v17687_v28  ;;  %20045 = vst [vmem:[#allocation11_spill] sm:$0xff] %v17691_v49  ;;  %v6699_v35 = vcombine.high %v6451_v41, %v6451_v41  ;;  %v17709_v49 = vrot.slane %v6451_v41, %v16253_v17  ;;  %v6450_v62 = vld [vmem:[#allocation4 + $0x50] sm:$0xff]  ;;  %v7805_v40 = vmul.f32 %v17512_v47, %v7586_v50  ;;  %vm7272_vm11 = vcmp.ge.f32.partialorder %v17517_v2, 0.0 }
 0x27a   : > { %20046 = vst [vmem:[#allocation12_spill] sm:$0xff] %v17695_v63  ;;  %20047 = vst [vmem:[#allocation13_spill] sm:$0xff] %v17706_v26  ;;  %v8099_v13 = vcombine.low %v7802_v58, %v7803_v20  ;;  %v6682_v63 = vcombine.high %v6450_v62, %v6450_v62  ;;  %v17714_v48 = vrot.slane %v6450_v62, %v16253_v17  ;;  %v15379_v28 = vpop.f32.mrb[156].mxu0  ;;  %v6349_v26 = vld [vmem:[#allocation4 + $0x88] sm:$0xff]  ;;  %vm7273_vm12 = vcmp.ge.f32.partialorder %v17538_v39, 0.0 }
 0x27b   : > { %20048 = vst [vmem:[#allocation14_spill] sm:$0xff] %v17709_v49  ;;  %6419 = vst.msk [vmem:[#allocation4 + $0x78] sm:$0xff] %vm2395_vm5, %v6383_v9  ;;  %v17720_v32 = vrot.slane %v6699_v35, %v16253_v17  ;;  %v17724_v9 = vcombine.high %v17709_v49, %v17709_v49  ;;  %v17728_v50 = vmul.f32 %v17478_v16, %v17709_v49  ;;  %v6233_v20 = vpop.f32.mrb[157].mxu0  ;;  %vm7274_vm13 = vcmp.ge.f32.partialorder %v17534_v30, 0.0 }
 0x27c   : > { %6418 = vst.msk [vmem:[#allocation4 + $0x70] sm:$0xff] %vm2395_vm5, %v6382_v4  ;;  %v6385_v58 = vadd.f32 %v15379_v28, %v6349_v26  ;;  %v17731_v41 = vrot.slane %v6682_v63, %v16253_v17  ;;  %v17735_v4 = vcombine.high %v17714_v48, %v17714_v48  ;;  %v17739_v35 = vmul.f32 %v17478_v16, %v17714_v48  ;;  %v6453_v62 = vld [vmem:[#allocation4 + $0x68] sm:$0xff] }
 0x27d   : > { %20049 = vst [vmem:[#allocation15_spill] sm:$0xff] %v17720_v32  ;;  %20050 = vst [vmem:[#allocation16_spill] sm:$0xff] %v17724_v9  ;;  %v6384_v9 = vadd.f32 %v6348_v22, %v6233_v20  ;;  %v6733_v32 = vcombine.high %v6453_v62, %v6453_v62  ;;  %v17742_v49 = vrot.slane %v6453_v62, %v16253_v17  ;;  %v6452_v28 = vld [vmem:[#allocation4 + $0x60] sm:$0xff]  ;;  %vm7275_vm14 = vcmp.ge.f32.partialorder %v17560_v45, 0.0 }
 0x27e   : > { %20051 = vst [vmem:[#allocation17_spill] sm:$0xff] %v17728_v50  ;;  %20052 = vst [vmem:[#allocation18_spill] sm:$0xff] %v17731_v41  ;;  %v8100_v63 = vcombine.low %v17684_v7, %v7805_v40  ;;  %v8107_v26 = vrot.slane %v8099_v13, %v16253_v17  ;;  %v6716_v50 = vcombine.high %v6452_v28, %v6452_v28  ;;  %v6351_v41 = vld [vmem:[#allocation4 + $0x98] sm:$0xff]  ;;  %vm7276_vm15 = vcmp.ge.f32.partialorder %v17563_v60, 0.0 }
 0x27f   : > { %20053 = vst [vmem:[#allocation19_spill] sm:$0xff] %v17735_v4  ;;  %20054 = vst [vmem:[#allocation20_spill] sm:$0xff] %v17739_v35  ;;  %v17748_v4 = vrot.slane %v6452_v28, %v16253_v17  ;;  %v15382_v35 = vpop.f32.mrb[158].mxu0  ;;  %v17754_v20 = vrot.slane %v6733_v32, %v16253_v17  ;;  %v17758_v7 = vcombine.high %v17742_v49, %v17742_v49  ;;  %vm7277_vm2 = vcmp.ge.f32.partialorder %v17587_v59, 0.0 }
 0x280   : > { %20055 = vst [vmem:[#allocation21_spill] sm:$0xff] %v17742_v49  ;;  %6421 = vst.msk [vmem:[#allocation4 + $0x88] sm:$0xff] %vm2395_vm5, %v6385_v58  ;;  %v17762_v40 = vmul.f32 %v17498_v37, %v17742_v49  ;;  %v6387_v13 = vadd.f32 %v15382_v35, %v6351_v41  ;;  %v6243_v58 = vpop.f32.mrb[159].mxu0  ;;  %v17765_v22 = vrot.slane %v6716_v50, %v16253_v17  ;;  %vm7278_vm3 = vcmp.ge.f32.partialorder %v17583_v54, 0.0 }
 0x281   : > { %20056 = vst [vmem:[#allocation22_spill] sm:$0xff] %v17748_v4  ;;  %6420 = vst.msk [vmem:[#allocation4 + $0x80] sm:$0xff] %vm2395_vm5, %v6384_v9  ;;  %v6350_v9 = vld [vmem:[#allocation4 + $0x90] sm:$0xff]  ;;  %v17769_v62 = vcombine.high %v17748_v4, %v17748_v4  ;;  %v17773_v32 = vmul.f32 %v17498_v37, %v17748_v4  ;;  %v8114_v50 = vrot.slane %v8100_v63, %v16253_v17  ;;  %vm7280_vm6 = vcmp.ge.f32.partialorder %v17554_v34, 0.0 }
 0x282   : > { %20057 = vst [vmem:[#allocation23_spill] sm:$0xff] %v17754_v20  ;;  %20058 = vst [vmem:[#allocation24_spill] sm:$0xff] %v17758_v7  ;;  %v6455_v28 = vld [vmem:[#allocation4 + $0x78] sm:$0xff]  ;;  %v6386_v20 = vadd.f32 %v6350_v9, %v6243_v58  ;;  %v7444_v35 = vmul.f32 %v17494_v27, %v17538_v39  ;;  %v7445_v58 = vmul.f32 %v17482_v19, %v17534_v30  ;;  %vm7281_vm7 = vcmp.ge.f32.partialorder %v17576_v43, 0.0 }
 0x283   : > { %20059 = vst [vmem:[#allocation25_spill] sm:$0xff] %v17762_v40  ;;  %20060 = vst [vmem:[#allocation26_spill] sm:$0xff] %v17765_v22  ;;  %v6767_v7 = vcombine.high %v6455_v28, %v6455_v28  ;;  %v17776_v49 = vrot.slane %v6455_v28, %v16253_v17  ;;  %v6454_v41 = vld [vmem:[#allocation4 + $0x70] sm:$0xff]  ;;  %v7446_v9 = vmul.f32 %v17498_v37, %v17560_v45  ;;  %v15385_v28 = vpop.f32.mrb[160].mxu0  ;;  %vm7282_vm8 = vcmp.ge.f32.partialorder %v17572_v52, 0.0 }
 0x284   : > { %20061 = vst [vmem:[#allocation27_spill] sm:$0xff] %v17769_v62  ;;  %20062 = vst [vmem:[#allocation28_spill] sm:$0xff] %v17773_v32  ;;  %v6750_v40 = vcombine.high %v6454_v41, %v6454_v41  ;;  %v17783_v62 = vrot.slane %v6454_v41, %v16253_v17  ;;  %v8115_v32 = vcombine.low %v8107_v26, %v8114_v50  ;;  %vm7284_vm10 = vcmp.ge.f32.partialorder %v17600_v33, 0.0 }
 0x285   : > { %20063 = vst [vmem:[#allocation29_spill] sm:$0xff] %v17776_v49  ;;  %6423 = vst.msk [vmem:[#allocation4 + $0x98] sm:$0xff] %vm2395_vm5, %v6387_v13  ;;  %v17791_v13 = vrot.slane %v6767_v7, %v16253_v17  ;;  %v17795_v63 = vcombine.high %v17776_v49, %v17776_v49  ;;  %v17799_v41 = vmul.f32 %v17482_v19, %v17776_v49 }
 0x286   : > { %20064 = vst [vmem:[#allocation30_spill] sm:$0xff] %v17783_v62  ;;  %6422 = vst.msk [vmem:[#allocation4 + $0x90] sm:$0xff] %vm2395_vm5, %v6386_v20  ;;  %v6253_v20 = vpop.f32.mrb[161].mxu0  ;;  %v17802_v22 = vrot.slane %v6750_v40, %v16253_v17  ;;  %v17806_v4 = vcombine.high %v17783_v62, %v17783_v62  ;;  %v17810_v7 = vmul.f32 %v17482_v19, %v17783_v62 }
 0x287   : > { %20065 = vst [vmem:[#allocation31_spill] sm:$0xff] %v17791_v13  ;;  %20066 = vst [vmem:[#allocation32_spill] sm:$0xff] %v17795_v63  ;;  %v6457_v13 = vld [vmem:[#allocation4 + $0x88] sm:$0xff]  ;;  %v7587_v63 = vsel %vm7272_vm11, %v17517_v2, %v17542_v53  ;;  %v7588_v50 = vsel %vm7273_vm12, %v17538_v39, %v7444_v35  ;;  %v7590_v2 = vsel %vm7275_vm14, %v17560_v45, %v7446_v9  ;;  %vm7285_vm11 = vcmp.ge.f32.partialorder %v17623_v55, 0.0 }
 0x288   : > { %20067 = vst [vmem:[#allocation33_spill] sm:$0xff] %v17799_v41  ;;  %20068 = vst [vmem:[#allocation34_spill] sm:$0xff] %v17802_v22  ;;  %v6801_v41 = vcombine.high %v6457_v13, %v6457_v13  ;;  %v17817_v26 = vrot.slane %v6457_v13, %v16253_v17  ;;  %v6456_v40 = vld [vmem:[#allocation4 + $0x80] sm:$0xff]  ;;  %v7806_v53 = vmul.f32 %v17514_v0, %v7587_v63  ;;  %v17833_v13 = vpop.f32.mrb[162].mxu0  ;;  %vm7286_vm12 = vcmp.ge.f32.partialorder %v17619_v15, 0.0 }
 0x289   : > { %20069 = vst [vmem:[#allocation35_spill] sm:$0xff] %v17806_v4  ;;  %20070 = vst [vmem:[#allocation36_spill] sm:$0xff] %v17810_v7  ;;  %v7589_v7 = vsel %vm7274_vm13, %v17534_v30, %v7445_v58  ;;  %v6784_v49 = vcombine.high %v6456_v40, %v6456_v40  ;;  %v17827_v4 = vrot.slane %v6456_v40, %v16253_v17  ;;  %v17847_v58 = vpop.f32.mrb[163].mxu0  ;;  %vm7288_vm14 = vcmp.ge.f32.partialorder %v17594_v46, 0.0 }
 0x28a   : > { %20071 = vst [vmem:[#allocation37_spill] sm:$0xff] %v17817_v26  ;;  %8747 = vst.msk [vmem:[#allocation3 + $0x13] sm:$0xff] %vm2395_vm5, %v8115_v32  ;;  %v17836_v32 = vrot.slane %v6801_v41, %v16253_v17  ;;  %v17840_v39 = vcombine.high %v17817_v26, %v17817_v26  ;;  %v17844_v30 = vmul.f32 %v17494_v27, %v17817_v26 }
 0x28b   : > { %20072 = vst [vmem:[#allocation38_spill] sm:$0xff] %v17827_v4  ;;  %v7807_v35 = vmul.f32 %v17520_v14, %v7588_v50  ;;  %v17850_v45 = vrot.slane %v6784_v49, %v16253_v17  ;;  %v17854_v9 = vcombine.high %v17827_v4, %v17827_v4  ;;  %v17858_v63 = vmul.f32 %v17494_v27, %v17827_v4 }
 0x28c   : > { %20073 = vst [vmem:[#allocation39_spill] sm:$0xff] %v17836_v32  ;;  %20074 = vst [vmem:[#allocation40_spill] sm:$0xff] %v17840_v39  ;;  %v6459_v41 = vld [vmem:[#allocation4 + $0x98] sm:$0xff]  ;;  %v7808_v40 = vmul.f32 %v17522_v1, %v7589_v7  ;;  %v7809_v26 = vmul.f32 %v17528_v3, %v7590_v2  ;;  %v6353_v32 = vld [vmem:[#allocation4 + $0xa8] sm:$0xff] }
 0x28d   : > { %20075 = vst [vmem:[#allocation41_spill] sm:$0xff] %v17844_v30  ;;  %20076 = vst [vmem:[#allocation42_spill] sm:$0xff] %v17850_v45  ;;  %v6835_v39 = vcombine.high %v6459_v41, %v6459_v41  ;;  %v17862_v30 = vrot.slane %v6459_v41, %v16253_v17  ;;  %v6458_v50 = vld [vmem:[#allocation4 + $0x90] sm:$0xff]  ;;  %v8116_v49 = vcombine.low %v7806_v53, %v7807_v35  ;;  %v6352_v45 = vld [vmem:[#allocation4 + $0xa0] sm:$0xff] }
 0x28e   : > { %20077 = vst [vmem:[#allocation43_spill] sm:$0xff] %v17854_v9  ;;  %20078 = vst [vmem:[#allocation44_spill] sm:$0xff] %v17858_v63  ;;  %v6818_v62 = vcombine.high %v6458_v50, %v6458_v50  ;;  %v17866_v9 = vrot.slane %v6458_v50, %v16253_v17  ;;  %v6389_v22 = vadd.f32 %v15385_v28, %v6353_v32  ;;  %v17868_v63 = vpop.f32.mrb[164].mxu0 }
 0x28f   : > { %20079 = vst [vmem:[#allocation45_spill] sm:$0xff] %v17862_v30  ;;  %v6388_v4 = vadd.f32 %v6352_v45, %v6253_v20  ;;  %v17871_v7 = vrot.slane %v6835_v39, %v16253_v17  ;;  %v17875_v41 = vcombine.high %v17862_v30, %v17862_v30  ;;  %v17879_v2 = vmul.f32 %v17478_v16, %v17862_v30  ;;  %v17881_v35 = vpop.f32.mrb[165].mxu0 }
 0x290   : > { %20080 = vst [vmem:[#allocation46_spill] sm:$0xff] %v17866_v9  ;;  %v8117_v53 = vcombine.low %v7808_v40, %v7809_v26  ;;  %v17884_v50 = vrot.slane %v6818_v62, %v16253_v17  ;;  %v17888_v28 = vcombine.high %v17866_v9, %v17866_v9  ;;  %v17892_v20 = vmul.f32 %v17478_v16, %v17866_v9 }
 0x291   : > { %20081 = vst [vmem:[#allocation47_spill] sm:$0xff] %v17871_v7  ;;  %20082 = vst [vmem:[#allocation48_spill] sm:$0xff] %v17875_v41  ;;  %v8785_v32 = vld [vmem:[#allocation3 + $0x10] sm:$0xff]  ;;  %v8124_v45 = vrot.slane %v8116_v49, %v16253_v17  ;;  %v6562_v26 = vcombine.high %v17583_v54, %v17583_v54  ;;  %v7591_v40 = vsel %vm7276_vm15, %v17563_v60, %v17591_v24  ;;  %v17911_v49 = vpop.f32.mrb[166].mxu0  ;;  %vm7289_vm15 = vcmp.ge.f32.partialorder %v17612_v44, 0.0 }
 0x292   : > { %20083 = vst [vmem:[#allocation49_spill] sm:$0xff] %v17879_v2  ;;  %20084 = vst [vmem:[#allocation50_spill] sm:$0xff] %v17888_v28  ;;  %v9211_v39 = vld [vmem:[#allocation3 + $0x11] sm:$0xff]  ;;  %15412 = vmatprep.mubr.msk.f32.mxu1 %vm2395_vm5, %v8785_v32  ;;  %v8131_v62 = vrot.slane %v8117_v53, %v16253_v17  ;;  %v17915_v2 = vpop.f32.mrb[167].mxu0  ;;  %v6579_v30 = vcombine.high %v17572_v52, %v17572_v52 }
 0x293   : > { %20085 = vst [vmem:[#allocation51_spill] sm:$0xff] %v17892_v20  ;;  %6425 = vst.msk [vmem:[#allocation4 + $0xa8] sm:$0xff] %vm2395_vm5, %v6389_v22  ;;  %15468 = vmatprep.mubr.msk.f32.mxu0 %vm2395_vm5, %v9211_v39  ;;  %v7448_v22 = vmul.f32 %v17478_v16, %v17587_v59  ;;  %vm7279_vm4 = vcmp.ge.f32.partialorder %v6562_v26, 0.0  ;;  %v7450_v32 = vmul.f32 %v17482_v19, %v6562_v26 }
 0x294   : > { %6424 = vst.msk [vmem:[#allocation4 + $0xa0] sm:$0xff] %vm2395_vm5, %v6388_v4  ;;  %v7449_v4 = vmul.f32 %v17494_v27, %v17583_v54  ;;  %v8132_v53 = vcombine.low %v8124_v45, %v8131_v62  ;;  %v7810_v39 = vmul.f32 %v17531_v25, %v7591_v40  ;;  %vm7283_vm9 = vcmp.ge.f32.partialorder %v6579_v30, 0.0 }
 0x295   : > { %v7592_v41 = vsel %vm7277_vm2, %v17587_v59, %v7448_v22  ;;  %v7594_v60 = vsel %vm7279_vm4, %v6562_v26, %v7450_v32  ;;  %v17930_v59 = vpop.f32.mrb[168].mxu0  ;;  %v7595_v26 = vsel %vm7280_vm6, %v17554_v34, %v17580_v18  ;;  %vm7290_vm2 = vcmp.ge.f32.partialorder %v17608_v51, 0.0 }
 0x296   : > { %v7593_v7 = vsel %vm7278_vm3, %v17583_v54, %v7449_v4  ;;  %8748 = vst.msk [vmem:[#allocation3 + $0x1b] sm:$0xff] %vm2395_vm5, %v8132_v53  ;;  %v7811_v24 = vmul.f32 %v17502_v36, %v7592_v41  ;;  %v7813_v62 = vmul.f32 %v17509_v57, %v7594_v60  ;;  %v7452_v54 = vmul.f32 %v17478_v16, %v17576_v43  ;;  %v17939_v53 = vpop.f32.mrb[169].mxu0 }
 0x297   : > { %v7812_v45 = vmul.f32 %v17505_v29, %v7593_v7  ;;  %v7453_v41 = vmul.f32 %v17494_v27, %v17572_v52  ;;  %v7454_v7 = vmul.f32 %v17482_v19, %v6579_v30  ;;  %vm7292_vm4 = vcmp.ge.f32.partialorder %v17639_v5, 0.0 }
 0x298   : > { %v8133_v40 = vcombine.low %v7810_v39, %v7811_v24  ;;  %v7596_v9 = vsel %vm7281_vm7, %v17576_v43, %v7452_v54  ;;  %vm7293_vm6 = vcmp.ge.f32.partialorder %v17664_v11, 0.0  ;;  %vm7294_vm7 = vcmp.ge.f32.partialorder %v17660_v21, 0.0 }
 0x299   : > { %v8134_v39 = vcombine.low %v7812_v45, %v7813_v62  ;;  %v7597_v34 = vsel %vm7282_vm8, %v17572_v52, %v7453_v41  ;;  %v6355_v41 = vld [vmem:[#allocation4 + $0xb8] sm:$0xff] }
 0x29a   : > { %v6461_v22 = vld [vmem:[#allocation4 + $0xa8] sm:$0xff]  ;;  %v8141_v24 = vrot.slane %v8133_v40, %v16253_v17  ;;  %v7598_v40 = vsel %vm7283_vm9, %v6579_v30, %v7454_v7  ;;  %v6391_v30 = vadd.f32 %v17833_v13, %v6355_v41  ;;  %v7456_v13 = vmul.f32 %v17478_v16, %v17623_v55 }
 0x29b   : > { %v6460_v4 = vld [vmem:[#allocation4 + $0xa0] sm:$0xff]  ;;  %v6869_v32 = vcombine.high %v6461_v22, %v6461_v22  ;;  %v17942_v60 = vrot.slane %v6461_v22, %v16253_v17  ;;  %v8148_v54 = vrot.slane %v8134_v39, %v16253_v17  ;;  %vm7296_vm9 = vcmp.ge.f32.partialorder %v17630_v61, 0.0 }
 0x29c   : > { %v6852_v20 = vcombine.high %v6460_v4, %v6460_v4  ;;  %v17945_v28 = vrot.slane %v6460_v4, %v16253_v17  ;;  %v17968_v4 = vpop.f32.mrb[170].mxu0  ;;  %6427 = vst.msk [vmem:[#allocation4 + $0xb8] sm:$0xff] %vm2395_vm5, %v6391_v30  ;;  %v7460_v30 = vmul.f32 %v17498_v37, %v17612_v44 }
 0x29d   : > { %20086 = vst [vmem:[#allocation52_spill] sm:$0xff] %v17942_v60  ;;  %v17955_v18 = vrot.slane %v6869_v32, %v16253_v17  ;;  %v17959_v22 = vcombine.high %v17942_v60, %v17942_v60  ;;  %v17963_v45 = vmul.f32 %v17498_v37, %v17942_v60  ;;  %v17980_v32 = vpop.f32.mrb[171].mxu0  ;;  %v7815_v60 = vmul.f32 %v17514_v0, %v7596_v9 }
 0x29e   : > { %v17966_v62 = vrot.slane %v6852_v20, %v16253_v17  ;;  %v17972_v43 = vcombine.high %v17945_v28, %v17945_v28  ;;  %v17976_v52 = vmul.f32 %v17478_v16, %v17945_v28  ;;  %v9212_v20 = vld [vmem:[#allocation3 + $0x19] sm:$0xff]  ;;  %v8149_v39 = vcombine.low %v8141_v24, %v8148_v54 }
 0x29f   : > { %20087 = vst [vmem:[#allocation53_spill] sm:$0xff] %v17955_v18  ;;  %20088 = vst [vmem:[#allocation54_spill] sm:$0xff] %v17959_v22  ;;  %v7814_v22 = vmul.f32 %v17512_v47, %v7595_v26  ;;  %v7816_v18 = vmul.f32 %v17520_v14, %v7597_v34  ;;  %15469 = vmatmul.mubr.msk.f32.gmra.mrb[178].mxu0 %vm2395_vm5, %v9212_v20  ;;  %v6596_v9 = vcombine.high %v17619_v15, %v17619_v15  ;;  %v17994_v34 = vpop.f32.mrb[172].mxu0 }
 0x2a0   : > { %20089 = vst [vmem:[#allocation55_spill] sm:$0xff] %v17963_v45  ;;  %20090 = vst [vmem:[#allocation56_spill] sm:$0xff] %v17966_v62  ;;  %v8786_v45 = vld [vmem:[#allocation3 + $0x18] sm:$0xff]  ;;  %v6354_v62 = vld [vmem:[#allocation4 + $0xb0] sm:$0xff]  ;;  %v18006_v24 = vpop.f32.mrb[173].mxu0 }
 0x2a1   : > { %20091 = vst [vmem:[#allocation57_spill] sm:$0xff] %v17972_v43  ;;  %20092 = vst [vmem:[#allocation58_spill] sm:$0xff] %v17976_v52  ;;  %v7817_v43 = vmul.f32 %v17522_v1, %v7598_v40  ;;  %15413 = vmatmul.mubr.msk.f32.gmra.mrb[150].mxu1 %vm2395_vm5, %v8786_v45  ;;  %v6390_v7 = vadd.f32 %v6354_v62, %v17847_v58  ;;  %v8150_v52 = vcombine.low %v7814_v22, %v7815_v60  ;;  %v18018_v20 = vpop.f32.mrb[174].mxu0 }
 0x2a2   : > { %8749 = vst.msk [vmem:[#allocation3 + $0x23] sm:$0xff] %vm2395_vm5, %v8149_v39  ;;  %v7457_v58 = vmul.f32 %v17478_v16, %v17619_v15  ;;  %v7599_v60 = vsel %vm7284_vm10, %v17600_v33, %v17627_v56  ;;  %vm7287_vm13 = vcmp.ge.f32.partialorder %v6596_v9, 0.0  ;;  %v7458_v45 = vmul.f32 %v17494_v27, %v6596_v9 }
 0x2a3   : > { %v8151_v26 = vcombine.low %v7816_v18, %v7817_v43  ;;  %6426 = vst.msk [vmem:[#allocation4 + $0xb0] sm:$0xff] %vm2395_vm5, %v6390_v7  ;;  %v8158_v18 = vrot.slane %v8150_v52, %v16253_v17  ;;  %v7600_v62 = vsel %vm7285_vm11, %v17623_v55, %v7456_v13  ;;  %v7818_v54 = vmul.f32 %v17528_v3, %v7599_v60 }
 0x2a4   : > { %v7601_v43 = vsel %vm7286_vm12, %v17619_v15, %v7457_v58  ;;  %v6613_v40 = vcombine.high %v17608_v51, %v17608_v51  ;;  %v7602_v33 = vsel %vm7287_vm13, %v6596_v9, %v7458_v45  ;;  %v7819_v56 = vmul.f32 %v17531_v25, %v7600_v62  ;;  %v18024_v15 = vpop.f32.mrb[175].mxu0  ;;  %v6463_v45 = vld [vmem:[#allocation4 + $0xb8] sm:$0xff] }
 0x2a5   : > { %v8165_v22 = vrot.slane %v8151_v26, %v16253_v17  ;;  %v7820_v52 = vmul.f32 %v17502_v36, %v7601_v43  ;;  %v7821_v39 = vmul.f32 %v17505_v29, %v7602_v33  ;;  %v7461_v7 = vmul.f32 %v17478_v16, %v17608_v51  ;;  %v6357_v26 = vld [vmem:[#allocation4 + $0xc8] sm:$0xff] }
 0x2a6   : > { %v8167_v55 = vcombine.low %v7818_v54, %v7819_v56  ;;  %vm7291_vm3 = vcmp.ge.f32.partialorder %v6613_v40, 0.0  ;;  %v7462_v13 = vmul.f32 %v17494_v27, %v6613_v40  ;;  %v7603_v58 = vsel %vm7288_vm14, %v17594_v46, %v17616_v31 }
 0x2a7   : > { %v8166_v41 = vcombine.low %v8158_v18, %v8165_v22  ;;  %v8168_v9 = vcombine.low %v7820_v52, %v7821_v39  ;;  %v6393_v60 = vadd.f32 %v17868_v63, %v6357_v26  ;;  %v7604_v43 = vsel %vm7289_vm15, %v17612_v44, %v7460_v30 }
 0x2a8   : > { %v8175_v62 = vrot.slane %v8167_v55, %v16253_v17  ;;  %v7605_v54 = vsel %vm7290_vm2, %v17608_v51, %v7461_v7  ;;  %v6903_v46 = vcombine.high %v6463_v45, %v6463_v45  ;;  %v18046_v31 = vrot.slane %v6463_v45, %v16253_v17 }
 0x2a9   : > { %8750 = vst.msk [vmem:[#allocation3 + $0x2b] sm:$0xff] %vm2395_vm5, %v8166_v41  ;;  %v8787_v18 = vld [vmem:[#allocation3 + $0x20] sm:$0xff]  ;;  %v7822_v41 = vmul.f32 %v17509_v57, %v7603_v58  ;;  %v8182_v33 = vrot.slane %v8168_v9, %v16253_v17  ;;  %6429 = vst.msk [vmem:[#allocation4 + $0xc8] sm:$0xff] %vm2395_vm5, %v6393_v60  ;;  %v7606_v56 = vsel %vm7291_vm3, %v6613_v40, %v7462_v13  ;;  %v6356_v58 = vld [vmem:[#allocation4 + $0xc0] sm:$0xff]  ;;  %vm7297_vm10 = vcmp.ge.f32.partialorder %v17653_v38, 0.0 }
 0x2aa   : > { %v9213_v22 = vld [vmem:[#allocation3 + $0x21] sm:$0xff]  ;;  %15415 = vmatprep.mubr.msk.f32.mxu1 %vm2395_vm5, %v8787_v18  ;;  %v7823_v52 = vmul.f32 %v17512_v47, %v7604_v43  ;;  %v18057_v39 = vrot.slane %v6903_v46, %v16253_v17  ;;  %v18061_v55 = vcombine.high %v18046_v31, %v18046_v31  ;;  %v18065_v30 = vmul.f32 %v17482_v19, %v18046_v31 }
 0x2ab   : > { %15471 = vmatprep.mubr.msk.f32.mxu0 %vm2395_vm5, %v9213_v22  ;;  %v6462_v63 = vld [vmem:[#allocation4 + $0xb0] sm:$0xff]  ;;  %v8183_v7 = vcombine.low %v8175_v62, %v8182_v33  ;;  %v7824_v13 = vmul.f32 %v17514_v0, %v7605_v54  ;;  %v7825_v22 = vmul.f32 %v17520_v14, %v7606_v56  ;;  %v6392_v62 = vadd.f32 %v6356_v58, %v17881_v35 }
 0x2ac   : > { %v6886_v44 = vcombine.high %v6462_v63, %v6462_v63  ;;  %v18052_v51 = vrot.slane %v6462_v63, %v16253_v17  ;;  %v8184_v45 = vcombine.low %v7822_v41, %v7823_v52  ;;  %v6630_v43 = vcombine.high %v17660_v21, %v17660_v21 }
 0x2ad   : > { %8751 = vst.msk [vmem:[#allocation3 + $0x33] sm:$0xff] %vm2395_vm5, %v8183_v7  ;;  %v7464_v54 = vmul.f32 %v17498_v37, %v17664_v11  ;;  %v7465_v46 = vmul.f32 %v17478_v16, %v17660_v21  ;;  %v8185_v41 = vcombine.low %v7824_v13, %v7825_v22  ;;  %6428 = vst.msk [vmem:[#allocation4 + $0xc0] sm:$0xff] %vm2395_vm5, %v6392_v62  ;;  %vm7298_vm11 = vcmp.ge.f32.partialorder %v17649_v8, 0.0 }
 0x2ae   : > { %v18068_v26 = vrot.slane %v6886_v44, %v16253_v17  ;;  %v18072_v40 = vcombine.high %v18052_v51, %v18052_v51  ;;  %v18076_v9 = vmul.f32 %v17498_v37, %v18052_v51  ;;  %v8192_v35 = vrot.slane %v8184_v45, %v16253_v17 }
 0x2af   : > { %vm7295_vm8 = vcmp.ge.f32.partialorder %v6630_v43, 0.0  ;;  %v7466_v63 = vmul.f32 %v17478_v16, %v6630_v43  ;;  %v7607_v44 = vsel %vm7292_vm4, %v17639_v5, %v17668_v10  ;;  %v7608_v56 = vsel %vm7293_vm6, %v17664_v11, %v7464_v54 }
 0x2b0   : > { %v8788_v60 = vld [vmem:[#allocation3 + $0x28] sm:$0xff]  ;;  %v6465_v33 = vld [vmem:[#allocation4 + $0xc8] sm:$0xff]  ;;  %v7609_v52 = vsel %vm7294_vm7, %v17660_v21, %v7465_v46  ;;  %v6647_v7 = vcombine.high %v17649_v8, %v17649_v8  ;;  %v8199_v13 = vrot.slane %v8185_v41, %v16253_v17  ;;  %v7826_v22 = vmul.f32 %v17522_v1, %v7607_v44 }
 0x2b1   : > { %v9214_v18 = vld [vmem:[#allocation3 + $0x29] sm:$0xff]  ;;  %15416 = vmatmul.mubr.msk.f32.gmra.mrb[152].mxu1 %vm2395_vm5, %v8788_v60  ;;  %v6937_v58 = vcombine.high %v6465_v33, %v6465_v33  ;;  %v18105_v60 = vrot.slane %v6465_v33, %v16253_v17  ;;  %v7827_v45 = vmul.f32 %v17528_v3, %v7608_v56  ;;  %v7828_v5 = vmul.f32 %v17531_v25, %v7609_v52 }
 0x2b2   : > { %15472 = vmatmul.mubr.msk.f32.gmra.mrb[180].mxu0 %vm2395_vm5, %v9214_v18  ;;  %v7610_v18 = vsel %vm7295_vm8, %v6630_v43, %v7466_v63  ;;  %v8200_v10 = vcombine.low %v8192_v35, %v8199_v13  ;;  %vm7299_vm12 = vcmp.ge.f32.partialorder %v6647_v7, 0.0  ;;  %v7468_v35 = vmul.f32 %v17482_v19, %v17653_v38 }
 0x2b3   : > { %v7829_v11 = vmul.f32 %v17502_v36, %v7610_v18  ;;  %v18112_v21 = vrot.slane %v6937_v58, %v16253_v17  ;;  %v18116_v62 = vcombine.high %v18105_v60, %v18105_v60  ;;  %v18120_v54 = vmul.f32 %v17494_v27, %v18105_v60 }
 0x2b4   : > { %v8789_v43 = vld [vmem:[#allocation3 + $0x30] sm:$0xff]  ;;  %v8201_v41 = vcombine.low %v7826_v22, %v7827_v45  ;;  %8752 = vst.msk [vmem:[#allocation3 + $0x3b] sm:$0xff] %vm2395_vm5, %v8200_v10  ;;  %v7469_v33 = vmul.f32 %v17498_v37, %v17649_v8  ;;  %v7470_v13 = vmul.f32 %v17478_v16, %v6647_v7  ;;  %v7611_v58 = vsel %vm7296_vm9, %v17630_v61, %v17657_v6 }
 0x2b5   : > { %v9215_v46 = vld [vmem:[#allocation3 + $0x31] sm:$0xff]  ;;  %v8202_v63 = vcombine.low %v7828_v5, %v7829_v11  ;;  %15418 = vmatprep.mubr.msk.f32.mxu1 %vm2395_vm5, %v8789_v43  ;;  %v7612_v45 = vsel %vm7297_vm10, %v17653_v38, %v7468_v35  ;;  %v7830_v43 = vmul.f32 %v17505_v29, %v7611_v58  ;;  %vm7300_vm13 = vcmp.ge.f32.partialorder %v17679_v12, 0.0 }
 0x2b6   : > { %15474 = vmatprep.mubr.msk.f32.mxu0 %vm2395_vm5, %v9215_v46  ;;  %v6464_v44 = vld [vmem:[#allocation4 + $0xc0] sm:$0xff]  ;;  %v8209_v56 = vrot.slane %v8201_v41, %v16253_v17  ;;  %v7613_v5 = vsel %vm7298_vm11, %v17649_v8, %v7469_v33  ;;  %v7614_v10 = vsel %vm7299_vm12, %v6647_v7, %v7470_v13  ;;  %v7831_v46 = vmul.f32 %v17509_v57, %v7612_v45  ;;  %v6359_v8 = vld [vmem:[#allocation4 + $0xd8] sm:$0xff] }
 0x2b7   : > { %v8216_v52 = vrot.slane %v8202_v63, %v16253_v17  ;;  %v6920_v18 = vcombine.high %v6464_v44, %v6464_v44  ;;  %v18138_v22 = vrot.slane %v6464_v44, %v16253_v17  ;;  %v7832_v38 = vmul.f32 %v17512_v47, %v7613_v5  ;;  %v6358_v63 = vld [vmem:[#allocation4 + $0xd0] sm:$0xff]  ;;  %v20093_v5 = vld [vmem:[#allocation13_spill] sm:$0xff] }
 0x2b8   : > { %v7833_v7 = vmul.f32 %v17514_v0, %v7614_v10  ;;  %v8218_v35 = vcombine.low %v7830_v43, %v7831_v46  ;;  %v6395_v33 = vadd.f32 %v17911_v49, %v6359_v8  ;;  %v6394_v44 = vadd.f32 %v6358_v63, %v17915_v2  ;;  %v20094_v10 = vld [vmem:[#allocation10_spill] sm:$0xff] }
 0x2b9   : > { %v8217_v11 = vcombine.low %v8209_v56, %v8216_v52  ;;  %v18145_v41 = vrot.slane %v6920_v18, %v16253_v17  ;;  %v18149_v61 = vcombine.high %v18138_v22, %v18138_v22  ;;  %v18153_v6 = vmul.f32 %v17482_v19, %v18138_v22 }
 0x2ba   : > { %v6664_v56 = vcombine.high %v17698_v42, %v17698_v42  ;;  %vm7301_vm14 = vcmp.ge.f32.partialorder %v17702_v23, 0.0  ;;  %vm7302_vm15 = vcmp.ge.f32.partialorder %v17698_v42, 0.0  ;;  %v8219_v58 = vcombine.low %v7832_v38, %v7833_v7  ;;  %6431 = vst.msk [vmem:[#allocation4 + $0xd8] sm:$0xff] %vm2395_vm5, %v6395_v33  ;;  %6430 = vst.msk [vmem:[#allocation4 + $0xd0] sm:$0xff] %vm2395_vm5, %v6394_v44  ;;  %v20095_v33 = vld [vmem:[#allocation9_spill] sm:$0xff] }
 0x2bb   : > { %8753 = vst.msk [vmem:[#allocation3 + $0x43] sm:$0xff] %vm2395_vm5, %v8217_v11  ;;  %v8790_v52 = vld [vmem:[#allocation3 + $0x38] sm:$0xff]  ;;  %v8226_v18 = vrot.slane %v8218_v35, %v16253_v17  ;;  %v7472_v2 = vmul.f32 %v17482_v19, %v17702_v23  ;;  %v7473_v49 = vmul.f32 %v17498_v37, %v17698_v42  ;;  %v7615_v11 = vsel %vm7300_vm13, %v17679_v12, %v20093_v5 }
 0x2bc   : > { %v9216_v13 = vld [vmem:[#allocation3 + $0x39] sm:$0xff]  ;;  %15419 = vmatmul.mubr.msk.f32.gmra.mrb[154].mxu1 %vm2395_vm5, %v8790_v52  ;;  %vm7303_vm2 = vcmp.ge.f32.partialorder %v6664_v56, 0.0  ;;  %v7474_v45 = vmul.f32 %v17478_v16, %v6664_v56  ;;  %v6681_v43 = vcombine.high %v20094_v10, %v20094_v10  ;;  %v8233_v46 = vrot.slane %v8219_v58, %v16253_v17 }
 0x2bd   : > { %15475 = vmatmul.mubr.msk.f32.gmra.mrb[182].mxu0 %vm2395_vm5, %v9216_v13  ;;  %v7616_v38 = vsel %vm7301_vm14, %v17702_v23, %v7472_v2  ;;  %v7617_v8 = vsel %vm7302_vm15, %v17698_v42, %v7473_v49  ;;  %v7834_v63 = vmul.f32 %v17520_v14, %v7615_v11  ;;  %vm7304_vm3 = vcmp.ge.f32.partialorder %v20095_v33, 0.0  ;;  %v20096_v13 = vld [vmem:[#allocation11_spill] sm:$0xff] }
 0x2be   : > { %v7618_v7 = vsel %vm7303_vm2, %v6664_v56, %v7474_v45  ;;  %v7835_v35 = vmul.f32 %v17522_v1, %v7616_v38  ;;  %v7836_v12 = vmul.f32 %v17528_v3, %v7617_v8  ;;  %v8234_v44 = vcombine.low %v8226_v18, %v8233_v46  ;;  %v20097_v45 = vld [vmem:[#allocation12_spill] sm:$0xff] }
 0x2bf   : > { %v7837_v52 = vmul.f32 %v17531_v25, %v7618_v7  ;;  %vm7305_vm4 = vcmp.ge.f32.partialorder %v20096_v13, 0.0  ;;  %vm7306_vm6 = vcmp.ge.f32.partialorder %v20094_v10, 0.0  ;;  %vm7307_vm7 = vcmp.ge.f32.partialorder %v6681_v43, 0.0 }
 0x2c0   : > { %v8235_v2 = vcombine.low %v7834_v63, %v7835_v35  ;;  %v7476_v42 = vmul.f32 %v17494_v27, %v20096_v13  ;;  %v7477_v56 = vmul.f32 %v17482_v19, %v20094_v10  ;;  %8754 = vst.msk [vmem:[#allocation3 + $0x4b] sm:$0xff] %vm2395_vm5, %v8234_v44  ;;  %v7478_v49 = vmul.f32 %v17498_v37, %v6681_v43 }
 0x2c1   : > { %v8236_v18 = vcombine.low %v7836_v12, %v7837_v52  ;;  %v7619_v5 = vsel %vm7304_vm3, %v20095_v33, %v20097_v45  ;;  %vm7308_vm8 = vcmp.ge.f32.partialorder %v17714_v48, 0.0  ;;  %v6467_v11 = vld [vmem:[#allocation4 + $0xd8] sm:$0xff]  ;;  %v6466_v46 = vld [vmem:[#allocation4 + $0xd0] sm:$0xff] }
 0x2c2   : > { %v8791_v23 = vld [vmem:[#allocation3 + $0x40] sm:$0xff]  ;;  %v8243_v38 = vrot.slane %v8235_v2, %v16253_v17  ;;  %v7620_v8 = vsel %vm7305_vm4, %v20096_v13, %v7476_v42  ;;  %v7621_v63 = vsel %vm7306_vm6, %v20094_v10, %v7477_v56  ;;  %v7838_v7 = vmul.f32 %v17502_v36, %v7619_v5  ;;  %v6361_v5 = vld [vmem:[#allocation4 + $0xe8] sm:$0xff] }
 0x2c3   : > { %v9217_v58 = vld [vmem:[#allocation3 + $0x41] sm:$0xff]  ;;  %15421 = vmatprep.mubr.msk.f32.mxu1 %vm2395_vm5, %v8791_v23  ;;  %v6971_v35 = vcombine.high %v6467_v11, %v6467_v11  ;;  %v18215_v12 = vrot.slane %v6467_v11, %v16253_v17  ;;  %v6954_v33 = vcombine.high %v6466_v46, %v6466_v46  ;;  %v18218_v44 = vrot.slane %v6466_v46, %v16253_v17  ;;  %v6360_v11 = vld [vmem:[#allocation4 + $0xe0] sm:$0xff] }
 0x2c4   : > { %15477 = vmatprep.mubr.msk.f32.mxu0 %vm2395_vm5, %v9217_v58  ;;  %v8250_v52 = vrot.slane %v8236_v18, %v16253_v17  ;;  %v7622_v23 = vsel %vm7307_vm7, %v6681_v43, %v7478_v49  ;;  %v7839_v13 = vmul.f32 %v17505_v29, %v7620_v8  ;;  %v7840_v58 = vmul.f32 %v17509_v57, %v7621_v63 }
 0x2c5   : > { %20098 = vst [vmem:[#allocation13_spill] sm:$0xff] %v18215_v12  ;;  %v18225_v10 = vrot.slane %v6971_v35, %v16253_v17  ;;  %v18229_v2 = vcombine.high %v18215_v12, %v18215_v12  ;;  %v18233_v42 = vmul.f32 %v17478_v16, %v18215_v12  ;;  %v18236_v56 = vrot.slane %v6954_v33, %v16253_v17  ;;  %v20102_v35 = vld [vmem:[#allocation18_spill] sm:$0xff] }
 0x2c6   : > { %v18240_v43 = vcombine.high %v18218_v44, %v18218_v44  ;;  %v18244_v18 = vmul.f32 %v17494_v27, %v18218_v44  ;;  %v8251_v49 = vcombine.low %v8243_v38, %v8250_v52  ;;  %v7841_v45 = vmul.f32 %v17512_v47, %v7622_v23  ;;  %v20104_v23 = vld [vmem:[#allocation20_spill] sm:$0xff] }
 0x2c7   : > { %20099 = vst [vmem:[#allocation10_spill] sm:$0xff] %v18225_v10  ;;  %20100 = vst [vmem:[#allocation9_spill] sm:$0xff] %v18229_v2  ;;  %v8252_v46 = vcombine.low %v7838_v7, %v7839_v13  ;;  %v6397_v8 = vadd.f32 %v17930_v59, %v6361_v5  ;;  %v6396_v63 = vadd.f32 %v6360_v11, %v17939_v53  ;;  %v9218_v2 = vld [vmem:[#allocation3 + $0x49] sm:$0xff]  ;;  %v20103_v10 = vld [vmem:[#allocation19_spill] sm:$0xff]  ;;  %vm7310_vm10 = vcmp.ge.f32.partialorder %v20102_v35, 0.0 }
 0x2c8   : > { %20101 = vst [vmem:[#allocation11_spill] sm:$0xff] %v18233_v42  ;;  %v6698_v33 = vcombine.high %v20102_v35, %v20102_v35  ;;  %v8792_v42 = vld [vmem:[#allocation3 + $0x48] sm:$0xff]  ;;  %8755 = vst.msk [vmem:[#allocation3 + $0x53] sm:$0xff] %vm2395_vm5, %v8251_v49  ;;  %v8253_v12 = vcombine.low %v7840_v58, %v7841_v45  ;;  %vm7309_vm9 = vcmp.ge.f32.partialorder %v20103_v10, 0.0  ;;  %v7480_v38 = vmul.f32 %v17494_v27, %v20103_v10 }
 0x2c9   : > { %15422 = vmatmul.mubr.msk.f32.gmra.mrb[156].mxu1 %vm2395_vm5, %v8792_v42  ;;  %15478 = vmatmul.mubr.msk.f32.gmra.mrb[184].mxu0 %vm2395_vm5, %v9218_v2  ;;  %v8260_v59 = vrot.slane %v8252_v46, %v16253_v17  ;;  %6433 = vst.msk [vmem:[#allocation4 + $0xe8] sm:$0xff] %vm2395_vm5, %v6397_v8  ;;  %6432 = vst.msk [vmem:[#allocation4 + $0xe0] sm:$0xff] %vm2395_vm5, %v6396_v63  ;;  %v7481_v53 = vmul.f32 %v17482_v19, %v20102_v35  ;;  %v20105_v2 = vld [vmem:[#allocation15_spill] sm:$0xff] }
 0x2ca   : > { %vm7311_vm11 = vcmp.ge.f32.partialorder %v6698_v33, 0.0  ;;  %v7482_v7 = vmul.f32 %v17498_v37, %v6698_v33  ;;  %v8267_v52 = vrot.slane %v8253_v12, %v16253_v17  ;;  %v7623_v13 = vsel %vm7308_vm8, %v17714_v48, %v20104_v23  ;;  %v10241_v12 = vld [vmem:[%s19964_s6 + $0x18] sm:$0xff] }
 0x2cb   : > { %v7624_v58 = vsel %vm7309_vm9, %v20103_v10, %v7480_v38  ;;  %v6715_v42 = vcombine.high %v20105_v2, %v20105_v2  ;;  %v7625_v49 = vsel %vm7310_vm10, %v20102_v35, %v7481_v53  ;;  %v7842_v5 = vmul.f32 %v17514_v0, %v7623_v13  ;;  %v20106_v10 = vld [vmem:[#allocation14_spill] sm:$0xff]  ;;  %15575 = vmatprep.subr.mxu0 %v10241_v12  ;;  %v20107_v38 = vld [vmem:[#allocation16_spill] sm:$0xff] }
 0x2cc   : > { %v7626_v45 = vsel %vm7311_vm11, %v6698_v33, %v7482_v7  ;;  %v7843_v11 = vmul.f32 %v17520_v14, %v7624_v58  ;;  %v8268_v46 = vcombine.low %v8260_v59, %v8267_v52  ;;  %v7844_v8 = vmul.f32 %v17522_v1, %v7625_v49  ;;  %15576 = vmatpush3.msra.mxu0 %v10241_v12  ;;  %v6363_v7 = vld [vmem:[#allocation4 + $0xf8] sm:$0xff]  ;;  %v6362_v52 = vld [vmem:[#allocation4 + $0xf0] sm:$0xff]  ;;  %v20108_v49 = vld [vmem:[#allocation17_spill] sm:$0xff] }
 0x2cd   : > { %v7845_v48 = vmul.f32 %v17528_v3, %v7626_v45  ;;  %vm7312_vm12 = vcmp.ge.f32.partialorder %v20106_v10, 0.0  ;;  %vm7313_vm13 = vcmp.ge.f32.partialorder %v20107_v38, 0.0  ;;  %vm7314_vm14 = vcmp.ge.f32.partialorder %v20105_v2, 0.0 }
 0x2ce   : > { %v8269_v63 = vcombine.low %v7842_v5, %v7843_v11  ;;  %vm7315_vm15 = vcmp.ge.f32.partialorder %v6715_v42, 0.0  ;;  %8756 = vst.msk [vmem:[#allocation3 + $0x5b] sm:$0xff] %vm2395_vm5, %v8268_v46  ;;  %v7484_v33 = vmul.f32 %v17478_v16, %v20107_v38  ;;  %v7485_v59 = vmul.f32 %v17494_v27, %v20105_v2 }
 0x2cf   : > { %v8270_v35 = vcombine.low %v7844_v8, %v7845_v48  ;;  %v7486_v53 = vmul.f32 %v17482_v19, %v6715_v42  ;;  %v8793_v23 = vld [vmem:[#allocation3 + $0x50] sm:$0xff]  ;;  %v7627_v45 = vsel %vm7312_vm12, %v20106_v10, %v20108_v49  ;;  %v6399_v5 = vadd.f32 %v17968_v4, %v6363_v7 }
 0x2d0   : > { %v9219_v13 = vld [vmem:[#allocation3 + $0x51] sm:$0xff]  ;;  %v8277_v58 = vrot.slane %v8269_v63, %v16253_v17  ;;  %v6398_v11 = vadd.f32 %v6362_v52, %v17980_v32  ;;  %15424 = vmatprep.mubr.msk.f32.mxu1 %vm2395_vm5, %v8793_v23  ;;  %v7628_v48 = vsel %vm7313_vm13, %v20107_v38, %v7484_v33  ;;  %v7629_v10 = vsel %vm7314_vm14, %v20105_v2, %v7485_v59 }
 0x2d1   : > { %15480 = vmatprep.mubr.msk.f32.mxu0 %vm2395_vm5, %v9219_v13  ;;  %v6469_v12 = vld [vmem:[#allocation4 + $0xe8] sm:$0xff]  ;;  %v6468_v46 = vld [vmem:[#allocation4 + $0xe0] sm:$0xff]  ;;  %v8284_v8 = vrot.slane %v8270_v35, %v16253_v17  ;;  %6435 = vst.msk [vmem:[#allocation4 + $0xf8] sm:$0xff] %vm2395_vm5, %v6399_v5  ;;  %v7630_v38 = vsel %vm7315_vm15, %v6715_v42, %v7486_v53  ;;  %v7846_v33 = vmul.f32 %v17531_v25, %v7627_v45 }
 0x2d2   : > { %v20109_v63 = vld [vmem:[#allocation22_spill] sm:$0xff]  ;;  %v7005_v4 = vcombine.high %v6469_v12, %v6469_v12  ;;  %v18307_v32 = vrot.slane %v6469_v12, %v16253_v17  ;;  %v6988_v7 = vcombine.high %v6468_v46, %v6468_v46  ;;  %v18310_v52 = vrot.slane %v6468_v46, %v16253_v17  ;;  %6434 = vst.msk [vmem:[#allocation4 + $0xf0] sm:$0xff] %vm2395_vm5, %v6398_v11 }
 0x2d3   : > { %vm7316_vm2 = vcmp.ge.f32.partialorder %v20109_v63, 0.0  ;;  %v8285_v35 = vcombine.low %v8277_v58, %v8284_v8  ;;  %v7847_v2 = vmul.f32 %v17502_v36, %v7628_v48  ;;  %v7848_v58 = vmul.f32 %v17505_v29, %v7629_v10  ;;  %v20118_v46 = vld [vmem:[#allocation26_spill] sm:$0xff]  ;;  %v20119_v48 = vld [vmem:[#allocation27_spill] sm:$0xff] }
 0x2d4   : > { %20110 = vst [vmem:[#allocation12_spill] sm:$0xff] %v18307_v32  ;;  %20111 = vst [vmem:[#allocation18_spill] sm:$0xff] %v18310_v52  ;;  %v18318_v59 = vrot.slane %v7005_v4, %v16253_v17  ;;  %v18322_v23 = vcombine.high %v18307_v32, %v18307_v32  ;;  %v18326_v13 = vmul.f32 %v17478_v16, %v18307_v32  ;;  %vm7317_vm3 = vcmp.ge.f32.partialorder %v20119_v48, 0.0 }
 0x2d5   : > { %v18329_v49 = vrot.slane %v6988_v7, %v16253_v17  ;;  %v18333_v42 = vcombine.high %v18310_v52, %v18310_v52  ;;  %v18337_v53 = vmul.f32 %v17478_v16, %v18310_v52  ;;  %8757 = vst.msk [vmem:[#allocation3 + $0x63] sm:$0xff] %vm2395_vm5, %v8285_v35  ;;  %v7849_v45 = vmul.f32 %v17509_v57, %v7630_v38  ;;  %v8794_v5 = vld [vmem:[#allocation3 + $0x58] sm:$0xff]  ;;  %v20120_v35 = vld [vmem:[#allocation21_spill] sm:$0xff] }
 0x2d6   : > { %20112 = vst [vmem:[#allocation19_spill] sm:$0xff] %v18318_v59  ;;  %20113 = vst [vmem:[#allocation20_spill] sm:$0xff] %v18322_v23  ;;  %v9220_v11 = vld [vmem:[#allocation3 + $0x59] sm:$0xff]  ;;  %v8286_v12 = vcombine.low %v7846_v33, %v7847_v2  ;;  %v6732_v8 = vcombine.high %v20118_v46, %v20118_v46  ;;  %vm7318_vm4 = vcmp.ge.f32.partialorder %v20118_v46, 0.0  ;;  %15425 = vmatmul.mubr.msk.f32.gmra.mrb[158].mxu1 %vm2395_vm5, %v8794_v5  ;;  %vm7320_vm6 = vcmp.ge.f32.partialorder %v20120_v35, 0.0  ;;  %v20121_v2 = vld [vmem:[#allocation28_spill] sm:$0xff] }
 0x2d7   : > { %20114 = vst [vmem:[#allocation15_spill] sm:$0xff] %v18326_v13  ;;  %20115 = vst [vmem:[#allocation14_spill] sm:$0xff] %v18329_v49  ;;  %15481 = vmatmul.mubr.msk.f32.gmra.mrb[186].mxu0 %vm2395_vm5, %v9220_v11  ;;  %v8287_v4 = vcombine.low %v7848_v58, %v7849_v45  ;;  %v7488_v10 = vmul.f32 %v17478_v16, %v20119_v48  ;;  %v7489_v7 = vmul.f32 %v17494_v27, %v20118_v46 }
 0x2d8   : > { %20116 = vst [vmem:[#allocation16_spill] sm:$0xff] %v18333_v42  ;;  %20117 = vst [vmem:[#allocation17_spill] sm:$0xff] %v18337_v53  ;;  %v8294_v38 = vrot.slane %v8286_v12, %v16253_v17  ;;  %vm7319_vm7 = vcmp.ge.f32.partialorder %v6732_v8, 0.0  ;;  %v7490_v33 = vmul.f32 %v17482_v19, %v6732_v8  ;;  %v7631_v5 = vsel %vm7316_vm2, %v20109_v63, %v20121_v2  ;;  %v6471_v45 = vld [vmem:[#allocation4 + $0xf8] sm:$0xff] }
 0x2d9   : > { %v8301_v58 = vrot.slane %v8287_v4, %v16253_v17  ;;  %v6470_v11 = vld [vmem:[#allocation4 + $0xf0] sm:$0xff]  ;;  %v7632_v13 = vsel %vm7317_vm3, %v20119_v48, %v7488_v10  ;;  %v7633_v23 = vsel %vm7318_vm4, %v20118_v46, %v7489_v7  ;;  %v7850_v32 = vmul.f32 %v17512_v47, %v7631_v5  ;;  %v6365_v5 = vld [vmem:[#allocation4 + $0x108] sm:$0xff] }
 0x2da   : > { %v7039_v59 = vcombine.high %v6471_v45, %v6471_v45  ;;  %v18364_v12 = vrot.slane %v6471_v45, %v16253_v17  ;;  %v7022_v53 = vcombine.high %v6470_v11, %v6470_v11  ;;  %v18367_v42 = vrot.slane %v6470_v11, %v16253_v17  ;;  %v20129_v11 = vld [vmem:[#allocation25_spill] sm:$0xff] }
 0x2db   : > { %v8302_v52 = vcombine.low %v8294_v38, %v8301_v58  ;;  %v7634_v63 = vsel %vm7319_vm7, %v6732_v8, %v7490_v33  ;;  %v7851_v4 = vmul.f32 %v17514_v0, %v7632_v13  ;;  %v7852_v2 = vmul.f32 %v17520_v14, %v7633_v23  ;;  %v20127_v8 = vld [vmem:[#allocation24_spill] sm:$0xff]  ;;  %v20128_v33 = vld [vmem:[#allocation23_spill] sm:$0xff] }
 0x2dc   : > { %20122 = vst [vmem:[#allocation22_spill] sm:$0xff] %v18364_v12  ;;  %v8795_v49 = vld [vmem:[#allocation3 + $0x60] sm:$0xff]  ;;  %v18372_v46 = vrot.slane %v7039_v59, %v16253_v17  ;;  %v18376_v10 = vcombine.high %v18364_v12, %v18364_v12  ;;  %v18380_v7 = vmul.f32 %v17498_v37, %v18364_v12  ;;  %v18383_v38 = vrot.slane %v7022_v53, %v16253_v17 }
 0x2dd   : > { %v9221_v48 = vld [vmem:[#allocation3 + $0x61] sm:$0xff]  ;;  %15427 = vmatprep.mubr.msk.f32.mxu1 %vm2395_vm5, %v8795_v49  ;;  %8758 = vst.msk [vmem:[#allocation3 + $0x6b] sm:$0xff] %vm2395_vm5, %v8302_v52  ;;  %v18390_v59 = vcombine.high %v18367_v42, %v18367_v42  ;;  %v18394_v23 = vmul.f32 %v17498_v37, %v18367_v42  ;;  %v7853_v13 = vmul.f32 %v17522_v1, %v7634_v63  ;;  %vm7321_vm8 = vcmp.ge.f32.partialorder %v20127_v8, 0.0 }
 0x2de   : > { %20123 = vst [vmem:[#allocation26_spill] sm:$0xff] %v18372_v46  ;;  %20124 = vst [vmem:[#allocation27_spill] sm:$0xff] %v18376_v10  ;;  %15483 = vmatprep.mubr.msk.f32.mxu0 %vm2395_vm5, %v9221_v48  ;;  %v8303_v53 = vcombine.low %v7850_v32, %v7851_v4  ;;  %v6749_v49 = vcombine.high %v20128_v33, %v20128_v33  ;;  %vm7322_vm9 = vcmp.ge.f32.partialorder %v20128_v33, 0.0 }
 0x2df   : > { %20125 = vst [vmem:[#allocation21_spill] sm:$0xff] %v18380_v7  ;;  %20126 = vst [vmem:[#allocation28_spill] sm:$0xff] %v18394_v23  ;;  %v7492_v52 = vmul.f32 %v17478_v16, %v20127_v8  ;;  %v8304_v58 = vcombine.low %v7852_v2, %v7853_v13  ;;  %v7493_v45 = vmul.f32 %v17478_v16, %v20128_v33  ;;  %v20136_v23 = vld [vmem:[#allocation32_spill] sm:$0xff] }
 0x2e0   : > { %v7635_v63 = vsel %vm7320_vm6, %v20120_v35, %v20129_v11  ;;  %v6401_v32 = vadd.f32 %v17994_v34, %v6365_v5  ;;  %v8311_v4 = vrot.slane %v8303_v53, %v16253_v17  ;;  %vm7323_vm10 = vcmp.ge.f32.partialorder %v6749_v49, 0.0  ;;  %v6364_v35 = vld [vmem:[#allocation4 + $0x100] sm:$0xff]  ;;  %v20130_v5 = vld [vmem:[#allocation34_spill] sm:$0xff] }
 0x2e1   : > { %v7494_v48 = vmul.f32 %v17494_v27, %v6749_v49  ;;  %v7636_v7 = vsel %vm7321_vm8, %v20127_v8, %v7492_v52  ;;  %v8318_v10 = vrot.slane %v8304_v58, %v16253_v17  ;;  %v7637_v2 = vsel %vm7322_vm9, %v20128_v33, %v7493_v45  ;;  %v10739_v8 = vld [vmem:[%s19964_s6 + $0x20] sm:$0xff] }
 0x2e2   : > { %v7854_v13 = vmul.f32 %v17528_v3, %v7635_v63  ;;  %v7855_v12 = vmul.f32 %v17531_v25, %v7636_v7  ;;  %6437 = vst.msk [vmem:[#allocation4 + $0x108] sm:$0xff] %vm2395_vm5, %v6401_v32  ;;  %v7856_v34 = vmul.f32 %v17502_v36, %v7637_v2  ;;  %v6400_v53 = vadd.f32 %v6364_v35, %v18006_v24  ;;  %v20131_v7 = vld [vmem:[#allocation30_spill] sm:$0xff]  ;;  %v20132_v63 = vld [vmem:[#allocation35_spill] sm:$0xff]  ;;  %v20134_v2 = vld [vmem:[#allocation36_spill] sm:$0xff] }
 0x2e3   : > { %v7638_v11 = vsel %vm7323_vm10, %v6749_v49, %v7494_v48  ;;  %v6766_v46 = vcombine.high %v20130_v5, %v20130_v5  ;;  %v8319_v33 = vcombine.low %v8311_v4, %v8318_v10  ;;  %vm7324_vm11 = vcmp.ge.f32.partialorder %v20131_v7, 0.0  ;;  %15631 = vmatprep.subr.mxu1 %v10739_v8  ;;  %v20133_v4 = vld [vmem:[#allocation29_spill] sm:$0xff] }
 0x2e4   : > { %v7857_v52 = vmul.f32 %v17505_v29, %v7638_v11  ;;  %v8320_v58 = vcombine.low %v7854_v13, %v7855_v12  ;;  %v8796_v45 = vld [vmem:[#allocation3 + $0x68] sm:$0xff]  ;;  %6436 = vst.msk [vmem:[#allocation4 + $0x100] sm:$0xff] %vm2395_vm5, %v6400_v53  ;;  %vm7325_vm12 = vcmp.ge.f32.partialorder %v20132_v63, 0.0  ;;  %vm7326_vm13 = vcmp.ge.f32.partialorder %v20130_v5, 0.0  ;;  %v20135_v11 = vld [vmem:[#allocation31_spill] sm:$0xff] }
 0x2e5   : > { %v9222_v49 = vld [vmem:[#allocation3 + $0x69] sm:$0xff]  ;;  %vm7327_vm14 = vcmp.ge.f32.partialorder %v6766_v46, 0.0  ;;  %v7496_v24 = vmul.f32 %v17498_v37, %v20132_v63  ;;  %15428 = vmatmul.mubr.msk.f32.gmra.mrb[160].mxu1 %vm2395_vm5, %v8796_v45  ;;  %8759 = vst.msk [vmem:[#allocation3 + $0x73] sm:$0xff] %vm2395_vm5, %v8319_v33  ;;  %v7497_v32 = vmul.f32 %v17478_v16, %v20130_v5  ;;  %vm7328_vm15 = vcmp.ge.f32.partialorder %v20133_v4, 0.0 }
 0x2e6   : > { %15484 = vmatmul.mubr.msk.f32.gmra.mrb[188].mxu0 %vm2395_vm5, %v9222_v49  ;;  %v8321_v12 = vcombine.low %v7856_v34, %v7857_v52  ;;  %v8328_v10 = vrot.slane %v8320_v58, %v16253_v17  ;;  %v7498_v48 = vmul.f32 %v17494_v27, %v6766_v46  ;;  %v7639_v13 = vsel %vm7324_vm11, %v20131_v7, %v20134_v2 }
 0x2e7   : > { %v7640_v35 = vsel %vm7325_vm12, %v20132_v63, %v7496_v24  ;;  %v6783_v53 = vcombine.high %v20135_v11, %v20135_v11  ;;  %v7641_v8 = vsel %vm7326_vm13, %v20130_v5, %v7497_v32  ;;  %v7858_v33 = vmul.f32 %v17509_v57, %v7639_v13 }
 0x2e8   : > { %v8335_v34 = vrot.slane %v8321_v12, %v16253_v17  ;;  %v7859_v52 = vmul.f32 %v17512_v47, %v7640_v35  ;;  %v7642_v45 = vsel %vm7327_vm14, %v6766_v46, %v7498_v48  ;;  %v7860_v49 = vmul.f32 %v17514_v0, %v7641_v8 }
 0x2e9   : > { %v6473_v58 = vld [vmem:[#allocation4 + $0x108] sm:$0xff]  ;;  %vm7329_vm2 = vcmp.ge.f32.partialorder %v20136_v23, 0.0  ;;  %vm7330_vm3 = vcmp.ge.f32.partialorder %v20135_v11, 0.0  ;;  %v7861_v5 = vmul.f32 %v17520_v14, %v7642_v45  ;;  %vm7331_vm4 = vcmp.ge.f32.partialorder %v6783_v53, 0.0 }
 0x2ea   : > { %v8336_v7 = vcombine.low %v8328_v10, %v8335_v34  ;;  %v7073_v63 = vcombine.high %v6473_v58, %v6473_v58  ;;  %v18456_v24 = vrot.slane %v6473_v58, %v16253_v17  ;;  %v8337_v12 = vcombine.low %v7858_v33, %v7859_v52 }
 0x2eb   : > { %v7500_v32 = vmul.f32 %v17498_v37, %v20136_v23  ;;  %v7501_v46 = vmul.f32 %v17478_v16, %v20135_v11  ;;  %v6472_v13 = vld [vmem:[#allocation4 + $0x100] sm:$0xff]  ;;  %v8338_v35 = vcombine.low %v7860_v49, %v7861_v5  ;;  %v7502_v45 = vmul.f32 %v17478_v16, %v6783_v53 }
 0x2ec   : > { %20137 = vst [vmem:[#allocation24_spill] sm:$0xff] %v18456_v24  ;;  %8760 = vst.msk [vmem:[#allocation3 + $0x7b] sm:$0xff] %vm2395_vm5, %v8336_v7  ;;  %v18465_v48 = vrot.slane %v7073_v63, %v16253_v17  ;;  %v18469_v10 = vcombine.high %v18456_v24, %v18456_v24  ;;  %v18473_v2 = vmul.f32 %v17482_v19, %v18456_v24  ;;  %v8797_v34 = vld [vmem:[#allocation3 + $0x70] sm:$0xff] }
 0x2ed   : > { %v9223_v8 = vld [vmem:[#allocation3 + $0x71] sm:$0xff]  ;;  %v7056_v33 = vcombine.high %v6472_v13, %v6472_v13  ;;  %v18476_v52 = vrot.slane %v6472_v13, %v16253_v17  ;;  %v8345_v58 = vrot.slane %v8337_v12, %v16253_v17  ;;  %15430 = vmatprep.mubr.msk.f32.mxu1 %vm2395_vm5, %v8797_v34  ;;  %v8352_v7 = vrot.slane %v8338_v35, %v16253_v17 }
 0x2ee   : > { %20138 = vst [vmem:[#allocation23_spill] sm:$0xff] %v18465_v48  ;;  %20139 = vst [vmem:[#allocation25_spill] sm:$0xff] %v18469_v10  ;;  %15486 = vmatprep.mubr.msk.f32.mxu0 %vm2395_vm5, %v9223_v8  ;;  %v20141_v63 = vld [vmem:[#allocation33_spill] sm:$0xff]  ;;  %v7644_v5 = vsel %vm7329_vm2, %v20136_v23, %v7500_v32  ;;  %v20142_v13 = vld [vmem:[#allocation38_spill] sm:$0xff]  ;;  %v7646_v23 = vsel %vm7331_vm4, %v6783_v53, %v7502_v45  ;;  %vm7342_vm2 = vcmp.ge.f32.partialorder %v17884_v50, 0.0 }
 0x2ef   : > { %20140 = vst [vmem:[#allocation34_spill] sm:$0xff] %v18473_v2  ;;  %v7643_v49 = vsel %vm7328_vm15, %v20133_v4, %v20141_v63  ;;  %vm7332_vm6 = vcmp.ge.f32.partialorder %v20142_v13, 0.0  ;;  %v18492_v12 = vrot.slane %v7056_v33, %v16253_v17  ;;  %v18496_v34 = vcombine.high %v18476_v52, %v18476_v52  ;;  %v6367_v63 = vld [vmem:[#allocation4 + $0x118] sm:$0xff]  ;;  %v6366_v2 = vld [vmem:[#allocation4 + $0x110] sm:$0xff] }
 0x2f0   : > { %v18500_v35 = vmul.f32 %v17482_v19, %v18476_v52  ;;  %v7645_v4 = vsel %vm7330_vm3, %v20135_v11, %v7501_v46  ;;  %v8353_v8 = vcombine.low %v8345_v58, %v8352_v7  ;;  %v7862_v32 = vmul.f32 %v17522_v1, %v7643_v49  ;;  %v20144_v46 = vld [vmem:[#allocation42_spill] sm:$0xff]  ;;  %v20145_v58 = vld [vmem:[#allocation43_spill] sm:$0xff] }
 0x2f1   : > { %v7863_v33 = vmul.f32 %v17528_v3, %v7644_v5  ;;  %v7864_v10 = vmul.f32 %v17531_v25, %v7645_v4  ;;  %v7865_v24 = vmul.f32 %v17502_v36, %v7646_v23  ;;  %v6403_v48 = vadd.f32 %v18018_v20, %v6367_v63 }
 0x2f2   : > { %20143 = vst [vmem:[#allocation30_spill] sm:$0xff] %v18500_v35  ;;  %v6402_v35 = vadd.f32 %v6366_v2, %v18024_v15  ;;  %8761 = vst.msk [vmem:[#allocation3 + $0x83] sm:$0xff] %vm2395_vm5, %v8353_v8  ;;  %v6800_v53 = vcombine.high %v20144_v46, %v20144_v46  ;;  %vm7333_vm7 = vcmp.ge.f32.partialorder %v20145_v58, 0.0  ;;  %vm7334_vm8 = vcmp.ge.f32.partialorder %v20144_v46, 0.0  ;;  %v20146_v2 = vld [vmem:[#allocation44_spill] sm:$0xff]  ;;  %v20147_v8 = vld [vmem:[#allocation39_spill] sm:$0xff] }
 0x2f3   : > { %v8354_v11 = vcombine.low %v7862_v32, %v7863_v33  ;;  %v8798_v45 = vld [vmem:[#allocation3 + $0x78] sm:$0xff]  ;;  %v8355_v49 = vcombine.low %v7864_v10, %v7865_v24  ;;  %6439 = vst.msk [vmem:[#allocation4 + $0x118] sm:$0xff] %vm2395_vm5, %v6403_v48  ;;  %v7504_v20 = vmul.f32 %v17482_v19, %v20145_v58  ;;  %v7505_v15 = vmul.f32 %v17498_v37, %v20144_v46 }
 0x2f4   : > { %v9224_v7 = vld [vmem:[#allocation3 + $0x79] sm:$0xff]  ;;  %6438 = vst.msk [vmem:[#allocation4 + $0x110] sm:$0xff] %vm2395_vm5, %v6402_v35  ;;  %v7647_v5 = vsel %vm7332_vm6, %v20142_v13, %v20146_v2  ;;  %15431 = vmatmul.mubr.msk.f32.gmra.mrb[162].mxu1 %vm2395_vm5, %v8798_v45  ;;  %vm7335_vm9 = vcmp.ge.f32.partialorder %v6800_v53, 0.0  ;;  %v7506_v48 = vmul.f32 %v17478_v16, %v6800_v53  ;;  %v6817_v23 = vcombine.high %v20147_v8, %v20147_v8 }
 0x2f5   : > { %15487 = vmatmul.mubr.msk.f32.gmra.mrb[190].mxu0 %vm2395_vm5, %v9224_v7  ;;  %v8362_v24 = vrot.slane %v8354_v11, %v16253_v17  ;;  %v7866_v10 = vmul.f32 %v17505_v29, %v7647_v5  ;;  %v8369_v35 = vrot.slane %v8355_v49, %v16253_v17  ;;  %v7648_v4 = vsel %vm7333_vm7, %v20145_v58, %v7504_v20  ;;  %v20148_v11 = vld [vmem:[#allocation37_spill] sm:$0xff]  ;;  %v20149_v49 = vld [vmem:[#allocation40_spill] sm:$0xff] }
 0x2f6   : > { %v7649_v13 = vsel %vm7334_vm8, %v20144_v46, %v7505_v15  ;;  %v7650_v32 = vsel %vm7335_vm9, %v6800_v53, %v7506_v48  ;;  %v7867_v33 = vmul.f32 %v17509_v57, %v7648_v4  ;;  %vm7336_vm10 = vcmp.ge.f32.partialorder %v20148_v11, 0.0 }
 0x2f7   : > { %v7868_v63 = vmul.f32 %v17512_v47, %v7649_v13  ;;  %v8370_v45 = vcombine.low %v8362_v24, %v8369_v35  ;;  %v7869_v7 = vmul.f32 %v17514_v0, %v7650_v32  ;;  %vm7337_vm11 = vcmp.ge.f32.partialorder %v20149_v49, 0.0  ;;  %v20150_v24 = vld [vmem:[#allocation41_spill] sm:$0xff] }
 0x2f8   : > { %vm7338_vm12 = vcmp.ge.f32.partialorder %v20147_v8, 0.0  ;;  %v8371_v58 = vcombine.low %v7866_v10, %v7867_v33  ;;  %vm7339_vm13 = vcmp.ge.f32.partialorder %v6817_v23, 0.0  ;;  %v7508_v46 = vmul.f32 %v17482_v19, %v20149_v49 }
 0x2f9   : > { %v7509_v53 = vmul.f32 %v17498_v37, %v20147_v8  ;;  %v8799_v20 = vld [vmem:[#allocation3 + $0x80] sm:$0xff]  ;;  %8762 = vst.msk [vmem:[#allocation3 + $0x8b] sm:$0xff] %vm2395_vm5, %v8370_v45  ;;  %v8372_v2 = vcombine.low %v7868_v63, %v7869_v7  ;;  %v7510_v5 = vmul.f32 %v17478_v16, %v6817_v23  ;;  %v7651_v48 = vsel %vm7336_vm10, %v20148_v11, %v20150_v24  ;;  %v20151_v63 = vld [vmem:[#allocation46_spill] sm:$0xff] }
 0x2fa   : > { %v9225_v15 = vld [vmem:[#allocation3 + $0x81] sm:$0xff]  ;;  %v6834_v10 = vcombine.high %v17884_v50, %v17884_v50  ;;  %15433 = vmatprep.mubr.msk.f32.mxu1 %vm2395_vm5, %v8799_v20  ;;  %v8379_v13 = vrot.slane %v8371_v58, %v16253_v17  ;;  %v7652_v32 = vsel %vm7337_vm11, %v20149_v49, %v7508_v46  ;;  %vm7340_vm14 = vcmp.ge.f32.partialorder %v20151_v63, 0.0 }
 0x2fb   : > { %15489 = vmatprep.mubr.msk.f32.mxu0 %vm2395_vm5, %v9225_v15  ;;  %v6475_v35 = vld [vmem:[#allocation4 + $0x118] sm:$0xff]  ;;  %v6474_v4 = vld [vmem:[#allocation4 + $0x110] sm:$0xff]  ;;  %v7653_v33 = vsel %vm7338_vm12, %v20147_v8, %v7509_v53  ;;  %v8386_v58 = vrot.slane %v8372_v2, %v16253_v17  ;;  %v7654_v15 = vsel %vm7339_vm13, %v6817_v23, %v7510_v5  ;;  %v7870_v49 = vmul.f32 %v17520_v14, %v7651_v48 }
 0x2fc   : > { %v7107_v11 = vcombine.high %v6475_v35, %v6475_v35  ;;  %v18568_v45 = vrot.slane %v6475_v35, %v16253_v17  ;;  %v7090_v7 = vcombine.high %v6474_v4, %v6474_v4  ;;  %v18571_v20 = vrot.slane %v6474_v4, %v16253_v17 }
 0x2fd   : > { %v7871_v46 = vmul.f32 %v17522_v1, %v7652_v32  ;;  %v8387_v5 = vcombine.low %v8379_v13, %v8386_v58  ;;  %v7872_v48 = vmul.f32 %v17528_v3, %v7653_v33  ;;  %v7873_v4 = vmul.f32 %v17531_v25, %v7654_v15 }
 0x2fe   : > { %20152 = vst [vmem:[#allocation35_spill] sm:$0xff] %v18568_v45  ;;  %v18578_v8 = vrot.slane %v7107_v11, %v16253_v17  ;;  %v18582_v53 = vcombine.high %v18568_v45, %v18568_v45  ;;  %v18586_v24 = vmul.f32 %v17494_v27, %v18568_v45  ;;  %v18589_v35 = vrot.slane %v7090_v7, %v16253_v17  ;;  %v20158_v11 = vld [vmem:[#allocation50_spill] sm:$0xff] }
 0x2ff   : > { %v18593_v23 = vcombine.high %v18571_v20, %v18571_v20  ;;  %v18597_v2 = vmul.f32 %v17494_v27, %v18571_v20  ;;  %v8388_v32 = vcombine.low %v7870_v49, %v7871_v46  ;;  %vm7341_vm15 = vcmp.ge.f32.partialorder %v20158_v11, 0.0  ;;  %8763 = vst.msk [vmem:[#allocation3 + $0x93] sm:$0xff] %vm2395_vm5, %v8387_v5  ;;  %v20159_v49 = vld [vmem:[#allocation51_spill] sm:$0xff]  ;;  %v20160_v5 = vld [vmem:[#allocation45_spill] sm:$0xff] }
 0x300   : > { %20153 = vst [vmem:[#allocation29_spill] sm:$0xff] %v18578_v8  ;;  %20154 = vst [vmem:[#allocation36_spill] sm:$0xff] %v18582_v53  ;;  %v8800_v7 = vld [vmem:[#allocation3 + $0x88] sm:$0xff]  ;;  %vm7343_vm3 = vcmp.ge.f32.partialorder %v6834_v10, 0.0  ;;  %v7512_v53 = vmul.f32 %v17494_v27, %v20158_v11  ;;  %v7513_v13 = vmul.f32 %v17482_v19, %v17884_v50  ;;  %v7514_v33 = vmul.f32 %v17498_v37, %v6834_v10 }
 0x301   : > { %20155 = vst [vmem:[#allocation31_spill] sm:$0xff] %v18586_v24  ;;  %20156 = vst [vmem:[#allocation32_spill] sm:$0xff] %v18593_v23  ;;  %v9226_v24 = vld [vmem:[#allocation3 + $0x89] sm:$0xff]  ;;  %15434 = vmatmul.mubr.msk.f32.gmra.mrb[164].mxu1 %vm2395_vm5, %v8800_v7  ;;  %v8389_v58 = vcombine.low %v7872_v48, %v7873_v4  ;;  %v8396_v15 = vrot.slane %v8388_v32, %v16253_v17  ;;  %v7655_v46 = vsel %vm7340_vm14, %v20151_v63, %v20159_v49  ;;  %v20161_v32 = vld [vmem:[#allocation47_spill] sm:$0xff] }
 0x302   : > { %20157 = vst [vmem:[#allocation33_spill] sm:$0xff] %v18597_v2  ;;  %15490 = vmatmul.mubr.msk.f32.gmra.mrb[192].mxu0 %vm2395_vm5, %v9226_v24  ;;  %vm7344_vm4 = vcmp.ge.f32.partialorder %v20160_v5, 0.0  ;;  %v7656_v45 = vsel %vm7341_vm15, %v20158_v11, %v7512_v53  ;;  %v7657_v8 = vsel %vm7342_vm2, %v17884_v50, %v7513_v13  ;;  %v7658_v2 = vsel %vm7343_vm3, %v6834_v10, %v7514_v33  ;;  %v20162_v49 = vld [vmem:[#allocation48_spill] sm:$0xff] }
 0x303   : > { %v7874_v23 = vmul.f32 %v17502_v36, %v7655_v46  ;;  %v8403_v7 = vrot.slane %v8389_v58, %v16253_v17  ;;  %v7875_v24 = vmul.f32 %v17505_v29, %v7656_v45  ;;  %v7876_v48 = vmul.f32 %v17509_v57, %v7657_v8 }
 0x304   : > { %v7877_v4 = vmul.f32 %v17512_v47, %v7658_v2  ;;  %v6851_v63 = vcombine.high %v20161_v32, %v20161_v32  ;;  %vm7345_vm6 = vcmp.ge.f32.partialorder %v20162_v49, 0.0  ;;  %vm7346_vm7 = vcmp.ge.f32.partialorder %v20161_v32, 0.0  ;;  %v20163_v2 = vld [vmem:[#allocation49_spill] sm:$0xff] }
 0x305   : > { %v7516_v50 = vmul.f32 %v17494_v27, %v20162_v49  ;;  %v8404_v10 = vcombine.low %v8396_v15, %v8403_v7  ;;  %v8405_v53 = vcombine.low %v7874_v23, %v7875_v24  ;;  %v7517_v45 = vmul.f32 %v17482_v19, %v20161_v32 }
 0x306   : > { %v8406_v11 = vcombine.low %v7876_v48, %v7877_v4  ;;  %vm7347_vm8 = vcmp.ge.f32.partialorder %v6851_v63, 0.0  ;;  %v7518_v8 = vmul.f32 %v17498_v37, %v6851_v63  ;;  %v7659_v13 = vsel %vm7344_vm4, %v20160_v5, %v20163_v2  ;;  %v8801_v58 = vld [vmem:[#allocation3 + $0x90] sm:$0xff] }
 0x307   : > { %v7660_v33 = vsel %vm7345_vm6, %v20162_v49, %v7516_v50  ;;  %v9227_v46 = vld [vmem:[#allocation3 + $0x91] sm:$0xff]  ;;  %8764 = vst.msk [vmem:[#allocation3 + $0x9b] sm:$0xff] %vm2395_vm5, %v8404_v10  ;;  %v8413_v23 = vrot.slane %v8405_v53, %v16253_v17  ;;  %v7661_v7 = vsel %vm7346_vm7, %v20161_v32, %v7517_v45  ;;  %v7878_v24 = vmul.f32 %v17514_v0, %v7659_v13  ;;  %v20164_v10 = vld [vmem:[#allocation56_spill] sm:$0xff] }
 0x308   : > { %v8420_v15 = vrot.slane %v8406_v11, %v16253_v17  ;;  %15436 = vmatprep.mubr.msk.f32.mxu1 %vm2395_vm5, %v8801_v58  ;;  %15492 = vmatprep.mubr.msk.f32.mxu0 %vm2395_vm5, %v9227_v46  ;;  %v7662_v48 = vsel %vm7347_vm8, %v6851_v63, %v7518_v8  ;;  %v7879_v5 = vmul.f32 %v17520_v14, %v7660_v33  ;;  %vm7348_vm9 = vcmp.ge.f32.partialorder %v17945_v28, 0.0  ;;  %v20165_v32 = vld [vmem:[#allocation57_spill] sm:$0xff]  ;;  %v20166_v13 = vld [vmem:[#allocation58_spill] sm:$0xff] }
 0x309   : > { %v7880_v4 = vmul.f32 %v17522_v1, %v7661_v7  ;;  %v7881_v50 = vmul.f32 %v17528_v3, %v7662_v48  ;;  %v6868_v53 = vcombine.high %v20164_v10, %v20164_v10  ;;  %vm7349_vm10 = vcmp.ge.f32.partialorder %v20165_v32, 0.0 }
 0x30a   : > { %v8421_v49 = vcombine.low %v8413_v23, %v8420_v15  ;;  %v8422_v11 = vcombine.low %v7878_v24, %v7879_v5  ;;  %vm7350_vm11 = vcmp.ge.f32.partialorder %v20164_v10, 0.0  ;;  %v7520_v63 = vmul.f32 %v17478_v16, %v20165_v32 }
 0x30b   : > { %v7521_v45 = vmul.f32 %v17494_v27, %v20164_v10  ;;  %v8423_v8 = vcombine.low %v7880_v4, %v7881_v50  ;;  %vm7351_vm12 = vcmp.ge.f32.partialorder %v6868_v53, 0.0  ;;  %v7522_v2 = vmul.f32 %v17482_v19, %v6868_v53 }
 0x30c   : > { %8765 = vst.msk [vmem:[#allocation3 + $0xa3] sm:$0xff] %vm2395_vm5, %v8421_v49  ;;  %v7663_v33 = vsel %vm7348_vm9, %v17945_v28, %v20166_v13  ;;  %v8430_v58 = vrot.slane %v8422_v11, %v16253_v17  ;;  %v7664_v46 = vsel %vm7349_vm10, %v20165_v32, %v7520_v63  ;;  %v20167_v28 = vld [vmem:[#allocation53_spill] sm:$0xff]  ;;  %v20168_v13 = vld [vmem:[#allocation52_spill] sm:$0xff]  ;;  %v20169_v32 = vld [vmem:[#allocation54_spill] sm:$0xff]  ;;  %vm7356_vm3 = vcmp.ge.f32.partialorder %v18052_v51, 0.0 }
 0x30d   : > { %v7665_v23 = vsel %vm7350_vm11, %v20164_v10, %v7521_v45  ;;  %v7882_v15 = vmul.f32 %v17531_v25, %v7663_v33  ;;  %v8437_v7 = vrot.slane %v8423_v8, %v16253_v17  ;;  %v7666_v24 = vsel %vm7351_vm12, %v6868_v53, %v7522_v2 }
 0x30e   : > { %v7883_v48 = vmul.f32 %v17502_v36, %v7664_v46  ;;  %v7884_v5 = vmul.f32 %v17505_v29, %v7665_v23  ;;  %v8802_v4 = vld [vmem:[#allocation3 + $0x98] sm:$0xff]  ;;  %v7885_v50 = vmul.f32 %v17509_v57, %v7666_v24  ;;  %v6885_v11 = vcombine.high %v20167_v28, %v20167_v28  ;;  %v20170_v46 = vld [vmem:[#allocation55_spill] sm:$0xff] }
 0x30f   : > { %v9228_v49 = vld [vmem:[#allocation3 + $0x99] sm:$0xff]  ;;  %vm7352_vm13 = vcmp.ge.f32.partialorder %v20168_v13, 0.0  ;;  %vm7353_vm14 = vcmp.ge.f32.partialorder %v20169_v32, 0.0  ;;  %15437 = vmatmul.mubr.msk.f32.gmra.mrb[166].mxu1 %vm2395_vm5, %v8802_v4  ;;  %v8438_v10 = vcombine.low %v8430_v58, %v8437_v7  ;;  %vm7354_vm15 = vcmp.ge.f32.partialorder %v20167_v28, 0.0 }
 0x310   : > { %15493 = vmatmul.mubr.msk.f32.gmra.mrb[194].mxu0 %vm2395_vm5, %v9228_v49  ;;  %v8439_v53 = vcombine.low %v7882_v15, %v7883_v48  ;;  %v7524_v63 = vmul.f32 %v17478_v16, %v20169_v32  ;;  %v8440_v45 = vcombine.low %v7884_v5, %v7885_v50  ;;  %vm7355_vm2 = vcmp.ge.f32.partialorder %v6885_v11, 0.0 }
 0x311   : > { %v7525_v8 = vmul.f32 %v17494_v27, %v20167_v28  ;;  %v7526_v2 = vmul.f32 %v17482_v19, %v6885_v11  ;;  %8766 = vst.msk [vmem:[#allocation3 + $0xab] sm:$0xff] %vm2395_vm5, %v8438_v10  ;;  %v7667_v58 = vsel %vm7352_vm13, %v20168_v13, %v20170_v46  ;;  %v6902_v15 = vcombine.high %v18068_v26, %v18068_v26 }
 0x312   : > { %v8447_v33 = vrot.slane %v8439_v53, %v16253_v17  ;;  %v7668_v23 = vsel %vm7353_vm14, %v20169_v32, %v7524_v63  ;;  %v8454_v48 = vrot.slane %v8440_v45, %v16253_v17  ;;  %v7886_v49 = vmul.f32 %v17512_v47, %v7667_v58 }
 0x313   : > { %v8803_v7 = vld [vmem:[#allocation3 + $0xa0] sm:$0xff]  ;;  %v7669_v5 = vsel %vm7354_vm15, %v20167_v28, %v7525_v8  ;;  %v7670_v4 = vsel %vm7355_vm2, %v6885_v11, %v7526_v2  ;;  %v7887_v50 = vmul.f32 %v17514_v0, %v7668_v23  ;;  %vm7357_vm4 = vcmp.ge.f32.partialorder %v18072_v40, 0.0 }
 0x314   : > { %v9229_v24 = vld [vmem:[#allocation3 + $0xa1] sm:$0xff]  ;;  %15439 = vmatprep.mubr.msk.f32.mxu1 %vm2395_vm5, %v8803_v7  ;;  %v7888_v13 = vmul.f32 %v17520_v14, %v7669_v5  ;;  %v7889_v32 = vmul.f32 %v17522_v1, %v7670_v4  ;;  %v8455_v10 = vcombine.low %v8447_v33, %v8454_v48  ;;  %vm7358_vm6 = vcmp.ge.f32.partialorder %v18068_v26, 0.0 }
 0x315   : > { %15495 = vmatprep.mubr.msk.f32.mxu0 %vm2395_vm5, %v9229_v24  ;;  %vm7359_vm7 = vcmp.ge.f32.partialorder %v6902_v15, 0.0  ;;  %v8456_v28 = vcombine.low %v7886_v49, %v7887_v50  ;;  %v7528_v53 = vmul.f32 %v17478_v16, %v18072_v40  ;;  %v7529_v63 = vmul.f32 %v17478_v16, %v18068_v26 }
 0x316   : > { %v8457_v11 = vcombine.low %v7888_v13, %v7889_v32  ;;  %8767 = vst.msk [vmem:[#allocation3 + $0xb3] sm:$0xff] %vm2395_vm5, %v8455_v10  ;;  %v7530_v45 = vmul.f32 %v17494_v27, %v6902_v15  ;;  %v7671_v8 = vsel %vm7356_vm3, %v18052_v51, %v18076_v9  ;;  %v6919_v2 = vcombine.high %v18057_v39, %v18057_v39 }
 0x317   : > { %vm7360_vm8 = vcmp.ge.f32.partialorder %v18046_v31, 0.0  ;;  %v8464_v33 = vrot.slane %v8456_v28, %v16253_v17  ;;  %v7672_v58 = vsel %vm7357_vm4, %v18072_v40, %v7528_v53  ;;  %v7673_v23 = vsel %vm7358_vm6, %v18068_v26, %v7529_v63 }
 0x318   : > { %v8471_v46 = vrot.slane %v8457_v11, %v16253_v17  ;;  %v8804_v7 = vld [vmem:[#allocation3 + $0xa8] sm:$0xff]  ;;  %v7674_v48 = vsel %vm7359_vm7, %v6902_v15, %v7530_v45  ;;  %v7890_v5 = vmul.f32 %v17528_v3, %v7671_v8  ;;  %v7891_v51 = vmul.f32 %v17531_v25, %v7672_v58 }
 0x319   : > { %v9230_v24 = vld [vmem:[#allocation3 + $0xa9] sm:$0xff]  ;;  %v7892_v9 = vmul.f32 %v17502_v36, %v7673_v23  ;;  %15440 = vmatmul.mubr.msk.f32.gmra.mrb[168].mxu1 %vm2395_vm5, %v8804_v7  ;;  %v7893_v49 = vmul.f32 %v17505_v29, %v7674_v48  ;;  %vm7361_vm9 = vcmp.ge.f32.partialorder %v18061_v55, 0.0  ;;  %vm7362_vm10 = vcmp.ge.f32.partialorder %v18057_v39, 0.0 }
 0x31a   : > { %15496 = vmatmul.mubr.msk.f32.gmra.mrb[196].mxu0 %vm2395_vm5, %v9230_v24  ;;  %v8472_v4 = vcombine.low %v8464_v33, %v8471_v46  ;;  %v8473_v26 = vcombine.low %v7890_v5, %v7891_v51  ;;  %vm7363_vm11 = vcmp.ge.f32.partialorder %v6919_v2, 0.0  ;;  %v7532_v40 = vmul.f32 %v17498_v37, %v18061_v55 }
 0x31b   : > { %v7533_v15 = vmul.f32 %v17478_v16, %v18057_v39  ;;  %v8474_v50 = vcombine.low %v7892_v9, %v7893_v49  ;;  %v7534_v13 = vmul.f32 %v17494_v27, %v6919_v2  ;;  %v7675_v32 = vsel %vm7360_vm8, %v18046_v31, %v18065_v30 }
 0x31c   : > { %8768 = vst.msk [vmem:[#allocation3 + $0xbb] sm:$0xff] %vm2395_vm5, %v8472_v4  ;;  %v6936_v10 = vcombine.high %v18145_v41, %v18145_v41  ;;  %v8481_v28 = vrot.slane %v8473_v26, %v16253_v17  ;;  %v7676_v11 = vsel %vm7361_vm9, %v18061_v55, %v7532_v40  ;;  %v7894_v63 = vmul.f32 %v17509_v57, %v7675_v32 }
 0x31d   : > { %v7677_v53 = vsel %vm7362_vm10, %v18057_v39, %v7533_v15  ;;  %v8805_v45 = vld [vmem:[#allocation3 + $0xb0] sm:$0xff]  ;;  %v8488_v33 = vrot.slane %v8474_v50, %v16253_v17  ;;  %v7678_v46 = vsel %vm7363_vm11, %v6919_v2, %v7534_v13  ;;  %v7895_v58 = vmul.f32 %v17512_v47, %v7676_v11  ;;  %v18775_v13 = vld [vmem:[%s19964_s6 + $0x28] sm:$0xff] }
 0x31e   : > { %v9231_v8 = vld [vmem:[#allocation3 + $0xb1] sm:$0xff]  ;;  %v7896_v31 = vmul.f32 %v17514_v0, %v7677_v53  ;;  %15442 = vmatprep.mubr.msk.f32.mxu1 %vm2395_vm5, %v8805_v45  ;;  %v7897_v30 = vmul.f32 %v17520_v14, %v7678_v46  ;;  %vm7364_vm12 = vcmp.ge.f32.partialorder %v18138_v22, 0.0  ;;  %vm7365_vm13 = vcmp.ge.f32.partialorder %v18149_v61, 0.0  ;;  %15687 = vmatprep.subr.mxu0 %v18775_v13 }
 0x31f   : > { %15498 = vmatprep.mubr.msk.f32.mxu0 %vm2395_vm5, %v9231_v8  ;;  %vm7366_vm14 = vcmp.ge.f32.partialorder %v18145_v41, 0.0  ;;  %v8489_v39 = vcombine.low %v8481_v28, %v8488_v33  ;;  %v8490_v55 = vcombine.low %v7894_v63, %v7895_v58  ;;  %vm7367_vm15 = vcmp.ge.f32.partialorder %v6936_v10, 0.0 }
 0x320   : > { %v7536_v2 = vmul.f32 %v17498_v37, %v18149_v61  ;;  %v8491_v23 = vcombine.low %v7896_v31, %v7897_v30  ;;  %v7537_v7 = vmul.f32 %v17478_v16, %v18145_v41  ;;  %v7538_v24 = vmul.f32 %v17478_v16, %v6936_v10 }
 0x321   : > { %v7679_v48 = vsel %vm7364_vm12, %v18138_v22, %v18153_v6  ;;  %8769 = vst.msk [vmem:[#allocation3 + $0xc3] sm:$0xff] %vm2395_vm5, %v8489_v39  ;;  %v8498_v5 = vrot.slane %v8490_v55, %v16253_v17  ;;  %v6953_v4 = vcombine.high %v18112_v21, %v18112_v21  ;;  %vm7368_vm2 = vcmp.ge.f32.partialorder %v18105_v60, 0.0 }
 0x322   : > { %v7680_v51 = vsel %vm7365_vm13, %v18149_v61, %v7536_v2  ;;  %v7898_v9 = vmul.f32 %v17522_v1, %v7679_v48  ;;  %v8505_v40 = vrot.slane %v8491_v23, %v16253_v17  ;;  %v7681_v15 = vsel %vm7366_vm14, %v18145_v41, %v7537_v7 }
 0x323   : > { %v8806_v49 = vld [vmem:[#allocation3 + $0xb8] sm:$0xff]  ;;  %v7682_v22 = vsel %vm7367_vm15, %v6936_v10, %v7538_v24  ;;  %v7899_v6 = vmul.f32 %v17528_v3, %v7680_v51  ;;  %v7900_v61 = vmul.f32 %v17531_v25, %v7681_v15  ;;  %vm7369_vm3 = vcmp.ge.f32.partialorder %v18116_v62, 0.0 }
 0x324   : > { %v9232_v26 = vld [vmem:[#allocation3 + $0xb9] sm:$0xff]  ;;  %15443 = vmatmul.mubr.msk.f32.gmra.mrb[170].mxu1 %vm2395_vm5, %v8806_v49  ;;  %v7901_v50 = vmul.f32 %v17502_v36, %v7682_v22  ;;  %v8506_v41 = vcombine.low %v8498_v5, %v8505_v40  ;;  %vm7370_vm4 = vcmp.ge.f32.partialorder %v18112_v21, 0.0  ;;  %vm7371_vm6 = vcmp.ge.f32.partialorder %v6953_v4, 0.0 }
 0x325   : > { %15499 = vmatmul.mubr.msk.f32.gmra.mrb[198].mxu0 %vm2395_vm5, %v9232_v26  ;;  %v8507_v32 = vcombine.low %v7898_v9, %v7899_v6  ;;  %v7540_v28 = vmul.f32 %v17482_v19, %v18116_v62  ;;  %v7541_v11 = vmul.f32 %v17498_v37, %v18112_v21  ;;  %v7542_v53 = vmul.f32 %v17478_v16, %v6953_v4  ;;  %v20171_v51 = vld [vmem:[#allocation10_spill] sm:$0xff] }
 0x326   : > { %v8508_v10 = vcombine.low %v7900_v61, %v7901_v50  ;;  %8770 = vst.msk [vmem:[#allocation3 + $0xcb] sm:$0xff] %vm2395_vm5, %v8506_v41  ;;  %v7683_v45 = vsel %vm7368_vm2, %v18105_v60, %v18120_v54  ;;  %v6970_v8 = vcombine.high %v18236_v56, %v18236_v56  ;;  %vm7372_vm7 = vcmp.ge.f32.partialorder %v18218_v44, 0.0 }
 0x327   : > { %v8515_v63 = vrot.slane %v8507_v32, %v16253_v17  ;;  %v7684_v46 = vsel %vm7369_vm3, %v18116_v62, %v7540_v28  ;;  %v7685_v58 = vsel %vm7370_vm4, %v18112_v21, %v7541_v11  ;;  %v7686_v31 = vsel %vm7371_vm6, %v6953_v4, %v7542_v53  ;;  %v20172_v4 = vld [vmem:[#allocation13_spill] sm:$0xff] }
 0x328   : > { %v8522_v33 = vrot.slane %v8508_v10, %v16253_v17  ;;  %v8807_v30 = vld [vmem:[#allocation3 + $0xc0] sm:$0xff]  ;;  %v7902_v55 = vmul.f32 %v17505_v29, %v7683_v45  ;;  %v7903_v60 = vmul.f32 %v17509_v57, %v7684_v46  ;;  %v7904_v54 = vmul.f32 %v17512_v47, %v7685_v58 }
 0x329   : > { %v9233_v39 = vld [vmem:[#allocation3 + $0xc1] sm:$0xff]  ;;  %v7905_v2 = vmul.f32 %v17514_v0, %v7686_v31  ;;  %15445 = vmatprep.mubr.msk.f32.mxu1 %vm2395_vm5, %v8807_v30  ;;  %vm7373_vm8 = vcmp.ge.f32.partialorder %v18240_v43, 0.0  ;;  %vm7374_vm9 = vcmp.ge.f32.partialorder %v18236_v56, 0.0  ;;  %vm7375_vm10 = vcmp.ge.f32.partialorder %v6970_v8, 0.0 }
 0x32a   : > { %15501 = vmatprep.mubr.msk.f32.mxu0 %vm2395_vm5, %v9233_v39  ;;  %v8523_v23 = vcombine.low %v8515_v63, %v8522_v33  ;;  %v8524_v21 = vcombine.low %v7902_v55, %v7903_v60  ;;  %v7544_v7 = vmul.f32 %v17482_v19, %v18240_v43  ;;  %v7545_v24 = vmul.f32 %v17498_v37, %v18236_v56  ;;  %v20174_v63 = vld [vmem:[#allocation11_spill] sm:$0xff] }
 0x32b   : > { %v8525_v62 = vcombine.low %v7904_v54, %v7905_v2  ;;  %v7546_v48 = vmul.f32 %v17478_v16, %v6970_v8  ;;  %v7687_v5 = vsel %vm7372_vm7, %v18218_v44, %v18244_v18  ;;  %v6987_v9 = vcombine.high %v20171_v51, %v20171_v51 }
 0x32c   : > { %8771 = vst.msk [vmem:[#allocation3 + $0xd3] sm:$0xff] %vm2395_vm5, %v8523_v23  ;;  %vm7376_vm11 = vcmp.ge.f32.partialorder %v20172_v4, 0.0  ;;  %v8532_v49 = vrot.slane %v8524_v21, %v16253_v17  ;;  %v7688_v40 = vsel %vm7373_vm8, %v18240_v43, %v7544_v7  ;;  %v7689_v15 = vsel %vm7374_vm9, %v18236_v56, %v7545_v24  ;;  %v20173_v43 = vld [vmem:[#allocation9_spill] sm:$0xff]  ;;  %v20177_v7 = vld [vmem:[#allocation16_spill] sm:$0xff] }
 0x32d   : > { %v8539_v26 = vrot.slane %v8525_v62, %v16253_v17  ;;  %v8808_v22 = vld [vmem:[#allocation3 + $0xc8] sm:$0xff]  ;;  %v7690_v61 = vsel %vm7375_vm10, %v6970_v8, %v7546_v48  ;;  %v7906_v50 = vmul.f32 %v17520_v14, %v7687_v5  ;;  %v7907_v44 = vmul.f32 %v17522_v1, %v7688_v40  ;;  %v20175_v8 = vld [vmem:[#allocation14_spill] sm:$0xff] }
 0x32e   : > { %v9234_v6 = vld [vmem:[#allocation3 + $0xc9] sm:$0xff]  ;;  %v7908_v18 = vmul.f32 %v17528_v3, %v7689_v15  ;;  %15446 = vmatmul.mubr.msk.f32.gmra.mrb[172].mxu1 %vm2395_vm5, %v8808_v22  ;;  %v7909_v32 = vmul.f32 %v17531_v25, %v7690_v61  ;;  %vm7377_vm12 = vcmp.ge.f32.partialorder %v20173_v43, 0.0  ;;  %vm7378_vm13 = vcmp.ge.f32.partialorder %v20171_v51, 0.0  ;;  %v20176_v62 = vld [vmem:[#allocation18_spill] sm:$0xff] }
 0x32f   : > { %15502 = vmatmul.mubr.msk.f32.gmra.mrb[200].mxu0 %vm2395_vm5, %v9234_v6  ;;  %v8540_v41 = vcombine.low %v8532_v49, %v8539_v26  ;;  %v8541_v56 = vcombine.low %v7906_v50, %v7907_v44  ;;  %vm7379_vm14 = vcmp.ge.f32.partialorder %v6987_v9, 0.0  ;;  %v7548_v10 = vmul.f32 %v17494_v27, %v20173_v43  ;;  %v20178_v49 = vld [vmem:[#allocation17_spill] sm:$0xff]  ;;  %v20179_v6 = vld [vmem:[#allocation19_spill] sm:$0xff] }
 0x330   : > { %v7549_v28 = vmul.f32 %v17482_v19, %v20171_v51  ;;  %v8542_v11 = vcombine.low %v7908_v18, %v7909_v32  ;;  %v7550_v53 = vmul.f32 %v17498_v37, %v6987_v9  ;;  %v7691_v45 = vsel %vm7376_vm11, %v20172_v4, %v20174_v63 }
 0x331   : > { %8772 = vst.msk [vmem:[#allocation3 + $0xdb] sm:$0xff] %vm2395_vm5, %v8540_v41  ;;  %v7004_v33 = vcombine.high %v20175_v8, %v20175_v8  ;;  %v8549_v46 = vrot.slane %v8541_v56, %v16253_v17  ;;  %v7692_v58 = vsel %vm7377_vm12, %v20173_v43, %v7548_v10  ;;  %v7910_v30 = vmul.f32 %v17502_v36, %v7691_v45 }
 0x332   : > { %v7693_v31 = vsel %vm7378_vm13, %v20171_v51, %v7549_v28  ;;  %v8556_v60 = vrot.slane %v8542_v11, %v16253_v17  ;;  %v7694_v54 = vsel %vm7379_vm14, %v6987_v9, %v7550_v53  ;;  %v7911_v2 = vmul.f32 %v17505_v29, %v7692_v58  ;;  %v20180_v28 = vld [vmem:[#allocation12_spill] sm:$0xff] }
 0x333   : > { %v8809_v39 = vld [vmem:[#allocation3 + $0xd0] sm:$0xff]  ;;  %v7912_v23 = vmul.f32 %v17509_v57, %v7693_v31  ;;  %v7913_v21 = vmul.f32 %v17512_v47, %v7694_v54  ;;  %vm7380_vm15 = vcmp.ge.f32.partialorder %v20176_v62, 0.0  ;;  %vm7381_vm2 = vcmp.ge.f32.partialorder %v20177_v7, 0.0  ;;  %v20181_v11 = vld [vmem:[#allocation20_spill] sm:$0xff]  ;;  %v20182_v31 = vld [vmem:[#allocation15_spill] sm:$0xff] }
 0x334   : > { %v9235_v55 = vld [vmem:[#allocation3 + $0xd1] sm:$0xff]  ;;  %15448 = vmatprep.mubr.msk.f32.mxu1 %vm2395_vm5, %v8809_v39  ;;  %vm7382_vm3 = vcmp.ge.f32.partialorder %v20175_v8, 0.0  ;;  %v8557_v24 = vcombine.low %v8549_v46, %v8556_v60  ;;  %v8558_v48 = vcombine.low %v7910_v30, %v7911_v2  ;;  %vm7383_vm4 = vcmp.ge.f32.partialorder %v7004_v33, 0.0 }
 0x335   : > { %15504 = vmatprep.mubr.msk.f32.mxu0 %vm2395_vm5, %v9235_v55  ;;  %v7552_v5 = vmul.f32 %v17494_v27, %v20177_v7  ;;  %v8559_v51 = vcombine.low %v7912_v23, %v7913_v21  ;;  %v7553_v9 = vmul.f32 %v17482_v19, %v20175_v8  ;;  %v7554_v4 = vmul.f32 %v17498_v37, %v7004_v33 }
 0x336   : > { %v7695_v26 = vsel %vm7380_vm15, %v20176_v62, %v20178_v49  ;;  %8773 = vst.msk [vmem:[#allocation3 + $0xe3] sm:$0xff] %vm2395_vm5, %v8557_v24  ;;  %v8566_v40 = vrot.slane %v8558_v48, %v16253_v17  ;;  %v7021_v61 = vcombine.high %v20179_v6, %v20179_v6  ;;  %vm7384_vm6 = vcmp.ge.f32.partialorder %v20180_v28, 0.0 }
 0x337   : > { %v7696_v15 = vsel %vm7381_vm2, %v20177_v7, %v7552_v5  ;;  %v7914_v22 = vmul.f32 %v17514_v0, %v7695_v26  ;;  %v8573_v18 = vrot.slane %v8559_v51, %v16253_v17  ;;  %v7697_v41 = vsel %vm7382_vm3, %v20175_v8, %v7553_v9 }
 0x338   : > { %v8810_v50 = vld [vmem:[#allocation3 + $0xd8] sm:$0xff]  ;;  %v7698_v32 = vsel %vm7383_vm4, %v7004_v33, %v7554_v4  ;;  %v7915_v43 = vmul.f32 %v17520_v14, %v7696_v15  ;;  %v7916_v56 = vmul.f32 %v17522_v1, %v7697_v41  ;;  %vm7385_vm7 = vcmp.ge.f32.partialorder %v20181_v11, 0.0 }
 0x339   : > { %v9236_v44 = vld [vmem:[#allocation3 + $0xd9] sm:$0xff]  ;;  %15449 = vmatmul.mubr.msk.f32.gmra.mrb[174].mxu1 %vm2395_vm5, %v8810_v50  ;;  %v7917_v10 = vmul.f32 %v17528_v3, %v7698_v32  ;;  %v8574_v53 = vcombine.low %v8566_v40, %v8573_v18  ;;  %vm7386_vm8 = vcmp.ge.f32.partialorder %v20179_v6, 0.0  ;;  %vm7387_vm9 = vcmp.ge.f32.partialorder %v7021_v61, 0.0  ;;  %v20183_v40 = vld [vmem:[#allocation28_spill] sm:$0xff] }
 0x33a   : > { %15505 = vmatmul.mubr.msk.f32.gmra.mrb[202].mxu0 %vm2395_vm5, %v9236_v44  ;;  %v8575_v63 = vcombine.low %v7914_v22, %v7915_v43  ;;  %v7556_v8 = vmul.f32 %v17478_v16, %v20181_v11  ;;  %v7557_v33 = vmul.f32 %v17494_v27, %v20179_v6  ;;  %v7558_v46 = vmul.f32 %v17482_v19, %v7021_v61  ;;  %v20184_v22 = vld [vmem:[#allocation26_spill] sm:$0xff] }
 0x33b   : > { %v8576_v45 = vcombine.low %v7916_v56, %v7917_v10  ;;  %8774 = vst.msk [vmem:[#allocation3 + $0xeb] sm:$0xff] %vm2395_vm5, %v8574_v53  ;;  %v7699_v30 = vsel %vm7384_vm6, %v20180_v28, %v20182_v31  ;;  %v7038_v39 = vcombine.high %v18383_v38, %v18383_v38  ;;  %vm7388_vm10 = vcmp.ge.f32.partialorder %v18367_v42, 0.0 }
 0x33c   : > { %v8583_v58 = vrot.slane %v8575_v63, %v16253_v17  ;;  %v7700_v60 = vsel %vm7385_vm7, %v20181_v11, %v7556_v8  ;;  %v7701_v54 = vsel %vm7386_vm8, %v20179_v6, %v7557_v33  ;;  %v7702_v2 = vsel %vm7387_vm9, %v7021_v61, %v7558_v46  ;;  %v20185_v61 = vld [vmem:[#allocation22_spill] sm:$0xff]  ;;  %v20187_v46 = vld [vmem:[#allocation21_spill] sm:$0xff] }
 0x33d   : > { %v8590_v55 = vrot.slane %v8576_v45, %v16253_v17  ;;  %v8811_v23 = vld [vmem:[#allocation3 + $0xe0] sm:$0xff]  ;;  %v7918_v62 = vmul.f32 %v17531_v25, %v7699_v30  ;;  %v7919_v7 = vmul.f32 %v17502_v36, %v7700_v60  ;;  %v7920_v24 = vmul.f32 %v17505_v29, %v7701_v54 }
 0x33e   : > { %v9237_v21 = vld [vmem:[#allocation3 + $0xe1] sm:$0xff]  ;;  %v7921_v48 = vmul.f32 %v17509_v57, %v7702_v2  ;;  %15451 = vmatprep.mubr.msk.f32.mxu1 %vm2395_vm5, %v8811_v23  ;;  %vm7389_vm11 = vcmp.ge.f32.partialorder %v18390_v59, 0.0  ;;  %vm7390_vm12 = vcmp.ge.f32.partialorder %v18383_v38, 0.0  ;;  %vm7391_vm13 = vcmp.ge.f32.partialorder %v7038_v39, 0.0 }
 0x33f   : > { %15507 = vmatprep.mubr.msk.f32.mxu0 %vm2395_vm5, %v9237_v21  ;;  %v8591_v5 = vcombine.low %v8583_v58, %v8590_v55  ;;  %v8592_v51 = vcombine.low %v7918_v62, %v7919_v7  ;;  %v7560_v4 = vmul.f32 %v17478_v16, %v18390_v59  ;;  %v7561_v49 = vmul.f32 %v17494_v27, %v18383_v38 }
 0x340   : > { %v8593_v9 = vcombine.low %v7920_v24, %v7921_v48  ;;  %v7562_v26 = vmul.f32 %v17482_v19, %v7038_v39  ;;  %v7703_v15 = vsel %vm7388_vm10, %v18367_v42, %v20183_v40  ;;  %v7055_v6 = vcombine.high %v20184_v22, %v20184_v22 }
 0x341   : > { %8775 = vst.msk [vmem:[#allocation3 + $0xf3] sm:$0xff] %vm2395_vm5, %v8591_v5  ;;  %vm7392_vm14 = vcmp.ge.f32.partialorder %v20185_v61, 0.0  ;;  %v8600_v50 = vrot.slane %v8592_v51, %v16253_v17  ;;  %v7704_v18 = vsel %vm7389_vm11, %v18390_v59, %v7560_v4  ;;  %v7705_v41 = vsel %vm7390_vm12, %v18383_v38, %v7561_v49  ;;  %v20186_v59 = vld [vmem:[#allocation27_spill] sm:$0xff] }
 0x342   : > { %v8607_v44 = vrot.slane %v8593_v9, %v16253_v17  ;;  %v8812_v32 = vld [vmem:[#allocation3 + $0xe8] sm:$0xff]  ;;  %v7706_v56 = vsel %vm7391_vm13, %v7038_v39, %v7562_v26  ;;  %v7922_v10 = vmul.f32 %v17512_v47, %v7703_v15  ;;  %v7923_v42 = vmul.f32 %v17514_v0, %v7704_v18  ;;  %v20188_v26 = vld [vmem:[#allocation30_spill] sm:$0xff] }
 0x343   : > { %v9238_v43 = vld [vmem:[#allocation3 + $0xe9] sm:$0xff]  ;;  %v7924_v28 = vmul.f32 %v17520_v14, %v7705_v41  ;;  %15452 = vmatmul.mubr.msk.f32.gmra.mrb[176].mxu1 %vm2395_vm5, %v8812_v32  ;;  %v7925_v53 = vmul.f32 %v17522_v1, %v7706_v56  ;;  %vm7393_vm15 = vcmp.ge.f32.partialorder %v20186_v59, 0.0  ;;  %vm7394_vm2 = vcmp.ge.f32.partialorder %v20184_v22, 0.0 }
 0x344   : > { %15508 = vmatmul.mubr.msk.f32.gmra.mrb[204].mxu0 %vm2395_vm5, %v9238_v43  ;;  %v8608_v11 = vcombine.low %v8600_v50, %v8607_v44  ;;  %v8609_v38 = vcombine.low %v7922_v10, %v7923_v42  ;;  %vm7395_vm3 = vcmp.ge.f32.partialorder %v7055_v6, 0.0  ;;  %v7564_v63 = vmul.f32 %v17478_v16, %v20186_v59  ;;  %v20190_v56 = vld [vmem:[#allocation24_spill] sm:$0xff]  ;;  %v20191_v10 = vld [vmem:[#allocation25_spill] sm:$0xff] }
 0x345   : > { %v7565_v45 = vmul.f32 %v17478_v16, %v20184_v22  ;;  %v8610_v8 = vcombine.low %v7924_v28, %v7925_v53  ;;  %v7566_v33 = vmul.f32 %v17494_v27, %v7055_v6  ;;  %v7707_v58 = vsel %vm7392_vm14, %v20185_v61, %v20187_v46  ;;  %v20189_v61 = vld [vmem:[#allocation23_spill] sm:$0xff] }
 0x346   : > { %8776 = vst.msk [vmem:[#allocation3 + $0xfb] sm:$0xff] %vm2395_vm5, %v8608_v11  ;;  %v7072_v31 = vcombine.high %v18492_v12, %v18492_v12  ;;  %v8617_v30 = vrot.slane %v8609_v38, %v16253_v17  ;;  %v7708_v39 = vsel %vm7393_vm15, %v20186_v59, %v7564_v63  ;;  %v7926_v60 = vmul.f32 %v17528_v3, %v7707_v58  ;;  %v20192_v63 = vld [vmem:[#allocation34_spill] sm:$0xff] }
 0x347   : > { %v7709_v55 = vsel %vm7394_vm2, %v20184_v22, %v7565_v45  ;;  %v8624_v23 = vrot.slane %v8610_v8, %v16253_v17  ;;  %v7710_v21 = vsel %vm7395_vm3, %v7055_v6, %v7566_v33  ;;  %v7927_v62 = vmul.f32 %v17531_v25, %v7708_v39 }
 0x348   : > { %v8813_v54 = vld [vmem:[#allocation3 + $0xf0] sm:$0xff]  ;;  %v7928_v7 = vmul.f32 %v17502_v36, %v7709_v55  ;;  %v7929_v24 = vmul.f32 %v17505_v29, %v7710_v21  ;;  %vm7396_vm4 = vcmp.ge.f32.partialorder %v18476_v52, 0.0  ;;  %vm7397_vm6 = vcmp.ge.f32.partialorder %v18496_v34, 0.0  ;;  %v20193_v21 = vld [vmem:[#allocation32_spill] sm:$0xff] }
 0x349   : > { %v9239_v2 = vld [vmem:[#allocation3 + $0xf1] sm:$0xff]  ;;  %15454 = vmatprep.mubr.msk.f32.mxu1 %vm2395_vm5, %v8813_v54  ;;  %vm7398_vm7 = vcmp.ge.f32.partialorder %v18492_v12, 0.0  ;;  %v8625_v48 = vcombine.low %v8617_v30, %v8624_v23  ;;  %v8626_v5 = vcombine.low %v7926_v60, %v7927_v62  ;;  %vm7399_vm8 = vcmp.ge.f32.partialorder %v7072_v31, 0.0 }
 0x34a   : > { %15510 = vmatprep.mubr.msk.f32.mxu0 %vm2395_vm5, %v9239_v2  ;;  %v7568_v51 = vmul.f32 %v17498_v37, %v18496_v34  ;;  %v8627_v9 = vcombine.low %v7928_v7, %v7929_v24  ;;  %v7569_v4 = vmul.f32 %v17478_v16, %v18492_v12  ;;  %v7570_v49 = vmul.f32 %v17494_v27, %v7072_v31 }
 0x34b   : > { %v7711_v40 = vsel %vm7396_vm4, %v18476_v52, %v20188_v26  ;;  %8777 = vst.msk [vmem:[#allocation3 + $0x103] sm:$0xff] %vm2395_vm5, %v8625_v48  ;;  %v8634_v15 = vrot.slane %v8626_v5, %v16253_v17  ;;  %v7089_v50 = vcombine.high %v20189_v61, %v20189_v61  ;;  %vm7400_vm9 = vcmp.ge.f32.partialorder %v20190_v56, 0.0  ;;  %v20194_v5 = vld [vmem:[#allocation33_spill] sm:$0xff] }
 0x34c   : > { %v7712_v22 = vsel %vm7397_vm6, %v18496_v34, %v7568_v51  ;;  %v7930_v6 = vmul.f32 %v17509_v57, %v7711_v40  ;;  %v8641_v41 = vrot.slane %v8627_v9, %v16253_v17  ;;  %v7713_v27 = vsel %vm7398_vm7, %v18492_v12, %v7569_v4  ;;  %v20195_v9 = vld [vmem:[#allocation29_spill] sm:$0xff] }
 0x34d   : > { %v8814_v44 = vld [vmem:[#allocation3 + $0xf8] sm:$0xff]  ;;  %v7714_v52 = vsel %vm7399_vm8, %v7072_v31, %v7570_v49  ;;  %v7931_v32 = vmul.f32 %v17512_v47, %v7712_v22  ;;  %v7932_v34 = vmul.f32 %v17514_v0, %v7713_v27  ;;  %vm7401_vm10 = vcmp.ge.f32.partialorder %v20191_v10, 0.0  ;;  %v20196_v49 = vld [vmem:[#allocation35_spill] sm:$0xff] }
 0x34e   : > { %v9240_v18 = vld [vmem:[#allocation3 + $0xf9] sm:$0xff]  ;;  %15455 = vmatmul.mubr.msk.f32.gmra.mrb[178].mxu1 %vm2395_vm5, %v8814_v44  ;;  %v7933_v43 = vmul.f32 %v17520_v14, %v7714_v52  ;;  %v8642_v42 = vcombine.low %v8634_v15, %v8641_v41  ;;  %vm7402_vm11 = vcmp.ge.f32.partialorder %v20189_v61, 0.0  ;;  %vm7403_vm12 = vcmp.ge.f32.partialorder %v7089_v50, 0.0  ;;  %v20197_v52 = vld [vmem:[#allocation36_spill] sm:$0xff] }
 0x34f   : > { %15511 = vmatmul.mubr.msk.f32.gmra.mrb[206].mxu0 %vm2395_vm5, %v9240_v18  ;;  %v8643_v28 = vcombine.low %v7930_v6, %v7931_v32  ;;  %v7572_v11 = vmul.f32 %v17498_v37, %v20191_v10  ;;  %v7573_v53 = vmul.f32 %v17478_v16, %v20189_v61  ;;  %v7574_v59 = vmul.f32 %v17478_v16, %v7089_v50 }
 0x350   : > { %v8644_v12 = vcombine.low %v7932_v34, %v7933_v43  ;;  %8778 = vst.msk [vmem:[#allocation3 + $0x10b] sm:$0xff] %vm2395_vm5, %v8642_v42  ;;  %v7715_v45 = vsel %vm7400_vm9, %v20190_v56, %v20192_v63  ;;  %v7106_v8 = vcombine.high %v18589_v35, %v18589_v35  ;;  %vm7404_vm13 = vcmp.ge.f32.partialorder %v18571_v20, 0.0  ;;  %v20198_v34 = vld [vmem:[#allocation31_spill] sm:$0xff] }
 0x351   : > { %v8651_v38 = vrot.slane %v8643_v28, %v16253_v17  ;;  %v7716_v46 = vsel %vm7401_vm10, %v20191_v10, %v7572_v11  ;;  %v7717_v58 = vsel %vm7402_vm11, %v20189_v61, %v7573_v53  ;;  %v7718_v31 = vsel %vm7403_vm12, %v7089_v50, %v7574_v59 }
 0x352   : > { %v8658_v33 = vrot.slane %v8644_v12, %v16253_v17  ;;  %v8815_v30 = vld [vmem:[#allocation3 + $0x100] sm:$0xff]  ;;  %v7934_v55 = vmul.f32 %v17522_v1, %v7715_v45  ;;  %v7935_v60 = vmul.f32 %v17528_v3, %v7716_v46  ;;  %v7936_v54 = vmul.f32 %v17531_v25, %v7717_v58  ;;  %v10205_v46 = vld [vmem:[#allocation3 + $0x12] sm:$0xff] }
 0x353   : > { %v9241_v39 = vld [vmem:[#allocation3 + $0x101] sm:$0xff]  ;;  %v7937_v2 = vmul.f32 %v17502_v36, %v7718_v31  ;;  %15457 = vmatprep.mubr.msk.f32.mxu1 %vm2395_vm5, %v8815_v30  ;;  %vm7405_vm14 = vcmp.ge.f32.partialorder %v20193_v21, 0.0  ;;  %vm7406_vm15 = vcmp.ge.f32.partialorder %v18589_v35, 0.0  ;;  %vm7407_vm2 = vcmp.ge.f32.partialorder %v7106_v8, 0.0  ;;  %v16015_v31 = vld [vmem:[%s19964_s6 + $0x20] sm:$0xff] }
 0x354   : > { %15513 = vmatprep.mubr.msk.f32.mxu0 %vm2395_vm5, %v9241_v39  ;;  %v8659_v23 = vcombine.low %v8651_v38, %v8658_v33  ;;  %v8660_v62 = vcombine.low %v7934_v55, %v7935_v60  ;;  %v7576_v24 = vmul.f32 %v17482_v19, %v20193_v21  ;;  %v7577_v48 = vmul.f32 %v17498_v37, %v18589_v35  ;;  %v9707_v45 = vld [vmem:[#allocation3 + $0x2] sm:$0xff]  ;;  %v10206_v58 = vld [vmem:[#allocation3 + $0x1a] sm:$0xff]  ;;  %v10208_v39 = vld [vmem:[#allocation3 + $0x2a] sm:$0xff] }
 0x355   : > { %v8661_v7 = vcombine.low %v7936_v54, %v7937_v2  ;;  %v7578_v36 = vmul.f32 %v17478_v16, %v7106_v8  ;;  %v7719_v51 = vsel %vm7404_vm13, %v18571_v20, %v20194_v5  ;;  %v7123_v4 = vcombine.high %v20195_v9, %v20195_v9  ;;  %v10207_v30 = vld [vmem:[#allocation3 + $0x22] sm:$0xff]  ;;  %v10209_v55 = vld [vmem:[#allocation3 + $0x32] sm:$0xff]  ;;  %v15411_v2 = vpop.f32.mrb[148].mxu1 }
 0x356   : > { %8779 = vst.msk [vmem:[#allocation3 + $0x113] sm:$0xff] %vm2395_vm5, %v8659_v23  ;;  %vm7408_vm3 = vcmp.ge.f32.partialorder %v20196_v49, 0.0  ;;  %v8668_v26 = vrot.slane %v8660_v62, %v16253_v17  ;;  %v7720_v15 = vsel %vm7405_vm14, %v20193_v21, %v7576_v24  ;;  %v7721_v22 = vsel %vm7406_vm15, %v18589_v35, %v7577_v48  ;;  %v19077_v60 = vld [vmem:[%s19964_s6 + $0x38] sm:$0xff]  ;;  %9174 = vst.msk [vmem:[#allocation4 + $0x8] sm:$0xff] %vm2395_vm5, %v15411_v2  ;;  %v8994_v23 = vpop.f32.mrb[149].mxu1  ;;  %v10213_v62 = vld [vmem:[#allocation3 + $0x52] sm:$0xff] }
 0x357   : > { %v8675_v40 = vrot.slane %v8661_v7, %v16253_v17  ;;  %v8816_v6 = vld [vmem:[#allocation3 + $0x108] sm:$0xff]  ;;  %v7722_v50 = vsel %vm7407_vm2, %v7106_v8, %v7578_v36  ;;  %v7938_v44 = vmul.f32 %v17505_v29, %v7719_v51  ;;  %v7939_v20 = vmul.f32 %v17509_v57, %v7720_v15  ;;  %9173 = vst.msk [vmem:[#allocation4] sm:$0xff] %vm2395_vm5, %v8994_v23  ;;  %v15467_v7 = vpop.f32.mrb[176].mxu0  ;;  %v10214_v51 = vld [vmem:[#allocation3 + $0x5a] sm:$0xff] }
 0x358   : > { %v9242_v61 = vld [vmem:[#allocation3 + $0x109] sm:$0xff]  ;;  %v7940_v18 = vmul.f32 %v17512_v47, %v7721_v22  ;;  %15458 = vmatmul.mubr.msk.f32.gmra.mrb[180].mxu1 %vm2395_vm5, %v8816_v6  ;;  %v7941_v27 = vmul.f32 %v17514_v0, %v7722_v50  ;;  %vm7409_vm4 = vcmp.ge.f32.partialorder %v20197_v52, 0.0  ;;  %vm7410_vm6 = vcmp.ge.f32.partialorder %v20195_v9, 0.0  ;;  %v9420_v24 = vpop.f32.mrb[177].mxu0  ;;  %v10217_v6 = vld [vmem:[#allocation3 + $0x72] sm:$0xff] }
 0x359   : > { %15514 = vmatmul.mubr.msk.f32.gmra.mrb[208].mxu0 %vm2395_vm5, %v9242_v61  ;;  %v8676_v41 = vcombine.low %v8668_v26, %v8675_v40  ;;  %v8677_v35 = vcombine.low %v7938_v44, %v7939_v20  ;;  %vm7411_vm7 = vcmp.ge.f32.partialorder %v7123_v4, 0.0  ;;  %v7580_v29 = vmul.f32 %v17482_v19, %v20197_v52  ;;  %v10211_v54 = vld [vmem:[#allocation3 + $0x42] sm:$0xff]  ;;  %v10212_v21 = vld [vmem:[#allocation3 + $0x4a] sm:$0xff]  ;;  %v10218_v20 = vld [vmem:[#allocation3 + $0x7a] sm:$0xff] }
 0x35a   : > { %v7581_v57 = vmul.f32 %v17498_v37, %v20195_v9  ;;  %v8678_v47 = vcombine.low %v7940_v18, %v7941_v27  ;;  %v7582_v32 = vmul.f32 %v17478_v16, %v7123_v4  ;;  %v7723_v0 = vsel %vm7408_vm3, %v20196_v49, %v20198_v34  ;;  %v10216_v15 = vld [vmem:[#allocation3 + $0x6a] sm:$0xff]  ;;  %v10223_v34 = vld [vmem:[#allocation3 + $0xa2] sm:$0xff] }
 0x35b   : > { %8780 = vst.msk [vmem:[#allocation3 + $0x11b] sm:$0xff] %vm2395_vm5, %v8676_v41  ;;  %v8685_v43 = vrot.slane %v8677_v35, %v16253_v17  ;;  %v7724_v56 = vsel %vm7409_vm4, %v20197_v52, %v7580_v29  ;;  %v7942_v12 = vmul.f32 %v17520_v14, %v7723_v0  ;;  %v10219_v41 = vld [vmem:[#allocation3 + $0x82] sm:$0xff]  ;;  %v10220_v27 = vld [vmem:[#allocation3 + $0x8a] sm:$0xff]  ;;  %v10221_v52 = vld [vmem:[#allocation3 + $0x92] sm:$0xff] }
 0x35c   : > { %v7725_v10 = vsel %vm7410_vm6, %v20195_v9, %v7581_v57  ;;  %v8692_v37 = vrot.slane %v8678_v47, %v16253_v17  ;;  %v7726_v28 = vsel %vm7411_vm7, %v7123_v4, %v7582_v32  ;;  %v7943_v16 = vmul.f32 %v17522_v1, %v7724_v56  ;;  %v10215_v4 = vld [vmem:[#allocation3 + $0x62] sm:$0xff]  ;;  %v10222_v32 = vld [vmem:[#allocation3 + $0x9a] sm:$0xff]  ;;  %v10224_v0 = vld [vmem:[#allocation3 + $0xaa] sm:$0xff] }
 0x35d   : > { %v8817_v19 = vld [vmem:[#allocation3 + $0x110] sm:$0xff]  ;;  %v7944_v11 = vmul.f32 %v17528_v3, %v7725_v10  ;;  %v7945_v53 = vmul.f32 %v17531_v25, %v7726_v28  ;;  %v9600_v49 = vld [vmem:[#allocation4 + $0x8] sm:$0xff]  ;;  %v10227_v28 = vld [vmem:[#allocation3 + $0xc2] sm:$0xff] }
 0x35e   : > { %v9243_v42 = vld [vmem:[#allocation3 + $0x111] sm:$0xff]  ;;  %15460 = vmatprep.mubr.msk.f32.mxu1 %vm2395_vm5, %v8817_v19  ;;  %v8693_v59 = vcombine.low %v8685_v43, %v8692_v37  ;;  %v8694_v38 = vcombine.low %v7942_v12, %v7943_v16  ;;  %v9636_v26 = vadd.f32 %v15467_v7, %v9600_v49  ;;  %v10226_v37 = vld [vmem:[#allocation3 + $0xba] sm:$0xff] }
 0x35f   : > { %15516 = vmatprep.mubr.msk.f32.mxu0 %vm2395_vm5, %v9243_v42  ;;  %v8695_v63 = vcombine.low %v7944_v11, %v7945_v53  ;;  %v9708_v3 = vld [vmem:[#allocation3 + $0xa] sm:$0xff]  ;;  %v10225_v43 = vld [vmem:[#allocation3 + $0xb2] sm:$0xff] }
 0x360   : > { %8781 = vst.msk [vmem:[#allocation3 + $0x123] sm:$0xff] %vm2395_vm5, %v8693_v59  ;;  %v8702_v14 = vrot.slane %v8694_v38, %v16253_v17  ;;  %v9599_v40 = vld [vmem:[#allocation4] sm:$0xff]  ;;  %9672 = vst.msk [vmem:[#allocation4 + $0x8] sm:$0xff] %vm2395_vm5, %v9636_v26  ;;  %v10704_v26 = vld [vmem:[#allocation3 + $0x1b] sm:$0xff] }
 0x361   : > { %v8709_v1 = vrot.slane %v8695_v63, %v16253_v17  ;;  %v19061_v17 = vld [vmem:[%s19964_s6 + $0x30] sm:$0xff]  ;;  %v9635_v22 = vadd.f32 %v9599_v40, %v9420_v24  ;;  %v10228_v12 = vld [vmem:[#allocation3 + $0xca] sm:$0xff]  ;;  %v10229_v53 = vld [vmem:[#allocation3 + $0xd2] sm:$0xff] }
 0x362   : > { %v8818_v8 = vld [vmem:[#allocation3 + $0x118] sm:$0xff] }
 0x363   : > { %v9244_v33 = vld [vmem:[#allocation3 + $0x119] sm:$0xff]  ;;  %15461 = vmatmul.mubr.msk.f32.gmra.mrb[182].mxu1 %vm2395_vm5, %v8818_v8  ;;  %v8710_v25 = vcombine.low %v8702_v14, %v8709_v1  ;;  %9671 = vst.msk [vmem:[#allocation4] sm:$0xff] %vm2395_vm5, %v9635_v22  ;;  %v10232_v8 = vld [vmem:[#allocation3 + $0xea] sm:$0xff] }
 0x364   : > { %15517 = vmatmul.mubr.msk.f32.gmra.mrb[210].mxu0 %vm2395_vm5, %v9244_v33  ;;  %15521 = vmatprep.mubr.msk.f32.mxu1 %vm2395_vm5, %v9707_v45  ;;  %v10230_v63 = vld [vmem:[#allocation3 + $0xda] sm:$0xff]  ;;  %v10231_v45 = vld [vmem:[#allocation3 + $0xe2] sm:$0xff]  ;;  %v10233_v14 = vld [vmem:[#allocation3 + $0xf2] sm:$0xff] }
 0x365   : > { %15577 = vmatprep.mubr.msk.f32.mxu0 %vm2395_vm5, %v10205_v46  ;;  %8782 = vst.msk [vmem:[#allocation3 + $0x12b] sm:$0xff] %vm2395_vm5, %v8710_v25  ;;  %v10234_v25 = vld [vmem:[#allocation3 + $0xfa] sm:$0xff]  ;;  %v19171_v22 = vld [vmem:[%s19964_s6 + $0x40] sm:$0xff] }
 0x366   : > { %v10238_v2 = vld [vmem:[#allocation3 + $0x11a] sm:$0xff] }
 0x367   : > { %15522 = vmatmul.mubr.msk.f32.vlgmr.msra.gmra.mrb[184].mxu1 %vm2395_vm5, %v9708_v3  ;;  %v10239_v23 = vld [vmem:[#allocation3 + $0x122] sm:$0xff] }
 0x368   : > { %15578 = vmatmul.mubr.msk.f32.vlgmr.msra.gmra.mrb[212].mxu0 %vm2395_vm5, %v10206_v58  ;;  %15632 = vmatpush3.msra.mxu1 %v16015_v31  ;;  %v11202_v40 = vld [vmem:[#allocation3 + $0x1c] sm:$0xff] }
 0x369   : > { %15524 = vmatprep.mubr.msk.f32.mxu1 %vm2395_vm5, %v10205_v46  ;;  %15580 = vmatprep.mubr.msk.f32.mxu0 %vm2395_vm5, %v10207_v30 }
 0x36a   : > { %15688 = vmatpush3.msra.mxu0 %v18775_v13  ;;  %15743 = vmatprep.subr.mxu1 %v19061_v17  ;;  %v10210_v13 = vld [vmem:[#allocation3 + $0x3a] sm:$0xff] }
 0x36b   : > { %15525 = vmatmul.mubr.msk.f32.gmra.mrb[186].mxu1 %vm2395_vm5, %v10206_v58  ;;  %15799 = vmatprep.subr.mxu0 %v19077_v60  ;;  %v10235_v58 = vld [vmem:[#allocation3 + $0x102] sm:$0xff] }
 0x36c   : > { %15581 = vmatmul.mubr.msk.f32.gmra.mrb[214].mxu0 %vm2395_vm5, %v10208_v39  ;;  %15527 = vmatprep.mubr.msk.f32.mxu1 %vm2395_vm5, %v10207_v30 }
 0x36d   : > { %15583 = vmatprep.mubr.msk.f32.mxu0 %vm2395_vm5, %v10209_v55 }
 0x36f   : > { %15528 = vmatmul.mubr.msk.f32.gmra.mrb[188].mxu1 %vm2395_vm5, %v10208_v39 }
 0x370   : > { %15584 = vmatmul.mubr.msk.f32.gmra.mrb[216].mxu0 %vm2395_vm5, %v10210_v13  ;;  %15530 = vmatprep.mubr.msk.f32.mxu1 %vm2395_vm5, %v10209_v55 }
 0x371   : > { %15586 = vmatprep.mubr.msk.f32.mxu0 %vm2395_vm5, %v10211_v54 }
 0x372   : > { %v15470_v36 = vpop.f32.mrb[178].mxu0 }
 0x373   : > { %15531 = vmatmul.mubr.msk.f32.gmra.mrb[190].mxu1 %vm2395_vm5, %v10210_v13  ;;  %v9430_v9 = vpop.f32.mrb[179].mxu0  ;;  %v10236_v13 = vld [vmem:[#allocation3 + $0x10a] sm:$0xff] }
 0x374   : > { %15587 = vmatmul.mubr.msk.f32.gmra.mrb[218].mxu0 %vm2395_vm5, %v10212_v21  ;;  %15533 = vmatprep.mubr.msk.f32.mxu1 %vm2395_vm5, %v10211_v54  ;;  %v15414_v48 = vpop.f32.mrb[150].mxu1  ;;  %v10237_v54 = vld [vmem:[#allocation3 + $0x112] sm:$0xff] }
 0x375   : > { %15589 = vmatprep.mubr.msk.f32.mxu0 %vm2395_vm5, %v10213_v62  ;;  %9176 = vst.msk [vmem:[#allocation4 + $0x18] sm:$0xff] %vm2395_vm5, %v15414_v48  ;;  %v9004_v5 = vpop.f32.mrb[151].mxu1  ;;  %v10240_v48 = vld [vmem:[#allocation3 + $0x12a] sm:$0xff] }
 0x376   : > { %9175 = vst.msk [vmem:[#allocation4 + $0x10] sm:$0xff] %vm2395_vm5, %v9004_v5  ;;  %v11201_v5 = vld [vmem:[#allocation3 + $0x14] sm:$0xff] }
 0x377   : > { %15534 = vmatmul.mubr.msk.f32.gmra.mrb[192].mxu1 %vm2395_vm5, %v10212_v21 }
 0x378   : > { %15590 = vmatmul.mubr.msk.f32.gmra.mrb[220].mxu0 %vm2395_vm5, %v10214_v51  ;;  %15536 = vmatprep.mubr.msk.f32.mxu1 %vm2395_vm5, %v10213_v62 }
 0x379   : > { %15592 = vmatprep.mubr.msk.f32.mxu0 %vm2395_vm5, %v10215_v4 }
 0x37b   : > { %15537 = vmatmul.mubr.msk.f32.gmra.mrb[194].mxu1 %vm2395_vm5, %v10214_v51 }
 0x37c   : > { %15593 = vmatmul.mubr.msk.f32.gmra.mrb[222].mxu0 %vm2395_vm5, %v10216_v15  ;;  %15539 = vmatprep.mubr.msk.f32.mxu1 %vm2395_vm5, %v10215_v4  ;;  %v9602_v61 = vld [vmem:[#allocation4 + $0x18] sm:$0xff] }
 0x37d   : > { %15595 = vmatprep.mubr.msk.f32.mxu0 %vm2395_vm5, %v10217_v6  ;;  %v9638_v50 = vadd.f32 %v15470_v36, %v9602_v61  ;;  %v9601_v44 = vld [vmem:[#allocation4 + $0x10] sm:$0xff]  ;;  %v10703_v36 = vld [vmem:[#allocation3 + $0x13] sm:$0xff]  ;;  %v10706_v61 = vld [vmem:[#allocation3 + $0x2b] sm:$0xff] }
 0x37e   : > { %v9637_v18 = vadd.f32 %v9601_v44, %v9430_v9  ;;  %v19186_v44 = vld [vmem:[#allocation3 + $0x34] sm:$0xff] }
 0x37f   : > { %15540 = vmatmul.mubr.msk.f32.gmra.mrb[196].mxu1 %vm2395_vm5, %v10216_v15  ;;  %9674 = vst.msk [vmem:[#allocation4 + $0x18] sm:$0xff] %vm2395_vm5, %v9638_v50  ;;  %v10705_v15 = vld [vmem:[#allocation3 + $0x23] sm:$0xff]  ;;  %v19180_v50 = vld [vmem:[#allocation3 + $0x2c] sm:$0xff] }
 0x380   : > { %15596 = vmatmul.mubr.msk.f32.gmra.mrb[224].mxu0 %vm2395_vm5, %v10218_v20  ;;  %15542 = vmatprep.mubr.msk.f32.mxu1 %vm2395_vm5, %v10217_v6  ;;  %9673 = vst.msk [vmem:[#allocation4 + $0x10] sm:$0xff] %vm2395_vm5, %v9637_v18  ;;  %v19175_v6 = vld [vmem:[#allocation3 + $0x24] sm:$0xff] }
 0x381   : > { %15598 = vmatprep.mubr.msk.f32.mxu0 %vm2395_vm5, %v10219_v41 }
 0x383   : > { %15543 = vmatmul.mubr.msk.f32.gmra.mrb[198].mxu1 %vm2395_vm5, %v10218_v20 }
 0x384   : > { %15599 = vmatmul.mubr.msk.f32.gmra.mrb[226].mxu0 %vm2395_vm5, %v10220_v27  ;;  %v15417_v35 = vpop.f32.mrb[152].mxu1  ;;  %15545 = vmatprep.mubr.msk.f32.mxu1 %vm2395_vm5, %v10219_v41  ;;  %v10708_v41 = vld [vmem:[#allocation3 + $0x3b] sm:$0xff] }
 0x385   : > { %v15473_v29 = vpop.f32.mrb[180].mxu0  ;;  %15601 = vmatprep.mubr.msk.f32.mxu0 %vm2395_vm5, %v10221_v52  ;;  %9178 = vst.msk [vmem:[#allocation4 + $0x28] sm:$0xff] %vm2395_vm5, %v15417_v35  ;;  %v9014_v57 = vpop.f32.mrb[153].mxu1  ;;  %v10709_v35 = vld [vmem:[#allocation3 + $0x43] sm:$0xff] }
 0x386   : > { %v9440_v47 = vpop.f32.mrb[181].mxu0  ;;  %9177 = vst.msk [vmem:[#allocation4 + $0x20] sm:$0xff] %vm2395_vm5, %v9014_v57  ;;  %v10710_v57 = vld [vmem:[#allocation3 + $0x4b] sm:$0xff] }
 0x387   : > { %15546 = vmatmul.mubr.msk.f32.gmra.mrb[200].mxu1 %vm2395_vm5, %v10220_v27  ;;  %v19191_v27 = vld [vmem:[#allocation3 + $0x3c] sm:$0xff] }
 0x388   : > { %15602 = vmatmul.mubr.msk.f32.gmra.mrb[228].mxu0 %vm2395_vm5, %v10222_v32  ;;  %15548 = vmatprep.mubr.msk.f32.mxu1 %vm2395_vm5, %v10221_v52 }
 0x389   : > { %15604 = vmatprep.mubr.msk.f32.mxu0 %vm2395_vm5, %v10223_v34 }
 0x38b   : > { %15549 = vmatmul.mubr.msk.f32.gmra.mrb[202].mxu1 %vm2395_vm5, %v10222_v32 }
 0x38c   : > { %15605 = vmatmul.mubr.msk.f32.gmra.mrb[230].mxu0 %vm2395_vm5, %v10224_v0  ;;  %v9604_v56 = vld [vmem:[#allocation4 + $0x28] sm:$0xff]  ;;  %15551 = vmatprep.mubr.msk.f32.mxu1 %vm2395_vm5, %v10223_v34 }
 0x38d   : > { %15607 = vmatprep.mubr.msk.f32.mxu0 %vm2395_vm5, %v10225_v43  ;;  %v9640_v10 = vadd.f32 %v15473_v29, %v9604_v56  ;;  %v9603_v19 = vld [vmem:[#allocation4 + $0x20] sm:$0xff]  ;;  %v19196_v29 = vld [vmem:[#allocation3 + $0x44] sm:$0xff] }
 0x38e   : > { %v9639_v42 = vadd.f32 %v9603_v19, %v9440_v47  ;;  %v19203_v47 = vld [vmem:[#allocation3 + $0x4c] sm:$0xff]  ;;  %v10712_v19 = vld [vmem:[#allocation3 + $0x5b] sm:$0xff] }
 0x38f   : > { %9676 = vst.msk [vmem:[#allocation4 + $0x28] sm:$0xff] %vm2395_vm5, %v9640_v10  ;;  %15552 = vmatmul.mubr.msk.f32.gmra.mrb[204].mxu1 %vm2395_vm5, %v10224_v0  ;;  %v15420_v16 = vpop.f32.mrb[154].mxu1  ;;  %v10711_v0 = vld [vmem:[#allocation3 + $0x53] sm:$0xff] }
 0x390   : > { %15608 = vmatmul.mubr.msk.f32.gmra.mrb[232].mxu0 %vm2395_vm5, %v10226_v37  ;;  %9675 = vst.msk [vmem:[#allocation4 + $0x20] sm:$0xff] %vm2395_vm5, %v9639_v42  ;;  %15554 = vmatprep.mubr.msk.f32.mxu1 %vm2395_vm5, %v10225_v43  ;;  %v15476_v11 = vpop.f32.mrb[182].mxu0  ;;  %9180 = vst.msk [vmem:[#allocation4 + $0x38] sm:$0xff] %vm2395_vm5, %v15420_v16  ;;  %v9024_v59 = vpop.f32.mrb[155].mxu1  ;;  %v19208_v43 = vld [vmem:[#allocation3 + $0x54] sm:$0xff]  ;;  %v19215_v42 = vld [vmem:[#allocation3 + $0x5c] sm:$0xff] }
 0x391   : > { %15610 = vmatprep.mubr.msk.f32.mxu0 %vm2395_vm5, %v10227_v28  ;;  %v9450_v38 = vpop.f32.mrb[183].mxu0  ;;  %9179 = vst.msk [vmem:[#allocation4 + $0x30] sm:$0xff] %vm2395_vm5, %v9024_v59  ;;  %v19225_v16 = vld [vmem:[#allocation3 + $0x6c] sm:$0xff]  ;;  %v19230_v59 = vld [vmem:[#allocation3 + $0x74] sm:$0xff] }
 0x393   : > { %15555 = vmatmul.mubr.msk.f32.gmra.mrb[206].mxu1 %vm2395_vm5, %v10226_v37  ;;  %v10713_v37 = vld [vmem:[#allocation3 + $0x63] sm:$0xff] }
 0x394   : > { %15611 = vmatmul.mubr.msk.f32.gmra.mrb[234].mxu0 %vm2395_vm5, %v10228_v12  ;;  %15557 = vmatprep.mubr.msk.f32.mxu1 %vm2395_vm5, %v10227_v28  ;;  %v19220_v28 = vld [vmem:[#allocation3 + $0x64] sm:$0xff] }
 0x395   : > { %15613 = vmatprep.mubr.msk.f32.mxu0 %vm2395_vm5, %v10229_v53 }
 0x397   : > { %15558 = vmatmul.mubr.msk.f32.gmra.mrb[208].mxu1 %vm2395_vm5, %v10228_v12  ;;  %v9606_v33 = vld [vmem:[#allocation4 + $0x38] sm:$0xff] }
 0x398   : > { %15614 = vmatmul.mubr.msk.f32.gmra.mrb[236].mxu0 %vm2395_vm5, %v10230_v63  ;;  %15560 = vmatprep.mubr.msk.f32.mxu1 %vm2395_vm5, %v10229_v53  ;;  %v9642_v1 = vadd.f32 %v15476_v11, %v9606_v33  ;;  %v9605_v46 = vld [vmem:[#allocation4 + $0x30] sm:$0xff]  ;;  %v10714_v12 = vld [vmem:[#allocation3 + $0x6b] sm:$0xff]  ;;  %v10715_v53 = vld [vmem:[#allocation3 + $0x73] sm:$0xff] }
 0x399   : > { %15616 = vmatprep.mubr.msk.f32.mxu0 %vm2395_vm5, %v10231_v45  ;;  %v9641_v3 = vadd.f32 %v9605_v46, %v9450_v38  ;;  %v19236_v33 = vld [vmem:[#allocation3 + $0x7c] sm:$0xff] }
 0x39a   : > { %9678 = vst.msk [vmem:[#allocation4 + $0x38] sm:$0xff] %vm2395_vm5, %v9642_v1  ;;  %v19242_v1 = vld [vmem:[#allocation3 + $0x84] sm:$0xff] }
 0x39b   : > { %15561 = vmatmul.mubr.msk.f32.gmra.mrb[210].mxu1 %vm2395_vm5, %v10230_v63  ;;  %9677 = vst.msk [vmem:[#allocation4 + $0x30] sm:$0xff] %vm2395_vm5, %v9641_v3 }
 0x39c   : > { %15617 = vmatmul.mubr.msk.f32.gmra.mrb[238].mxu0 %vm2395_vm5, %v10232_v8  ;;  %15563 = vmatprep.mubr.msk.f32.mxu1 %vm2395_vm5, %v10231_v45  ;;  %v15423_v31 = vpop.f32.mrb[156].mxu1  ;;  %v15479_v30 = vpop.f32.mrb[184].mxu0 }
 0x39d   : > { %15619 = vmatprep.mubr.msk.f32.mxu0 %vm2395_vm5, %v10233_v14  ;;  %9182 = vst.msk [vmem:[#allocation4 + $0x48] sm:$0xff] %vm2395_vm5, %v15423_v31  ;;  %v9034_v39 = vpop.f32.mrb[157].mxu1  ;;  %v9460_v55 = vpop.f32.mrb[185].mxu0 }
 0x39e   : > { %9181 = vst.msk [vmem:[#allocation4 + $0x40] sm:$0xff] %vm2395_vm5, %v9034_v39  ;;  %v19255_v39 = vld [vmem:[#allocation3 + $0x8c] sm:$0xff] }
 0x39f   : > { %15564 = vmatmul.mubr.msk.f32.gmra.mrb[212].mxu1 %vm2395_vm5, %v10232_v8  ;;  %v10716_v8 = vld [vmem:[#allocation3 + $0x7b] sm:$0xff] }
 0x3a0   : > { %15620 = vmatmul.mubr.msk.f32.gmra.mrb[240].mxu0 %vm2395_vm5, %v10234_v25  ;;  %15566 = vmatprep.mubr.msk.f32.mxu1 %vm2395_vm5, %v10233_v14  ;;  %v10717_v14 = vld [vmem:[#allocation3 + $0x83] sm:$0xff] }
 0x3a1   : > { %15622 = vmatprep.mubr.msk.f32.mxu0 %vm2395_vm5, %v10235_v58 }
 0x3a3   : > { %15567 = vmatmul.mubr.msk.f32.gmra.mrb[214].mxu1 %vm2395_vm5, %v10234_v25  ;;  %v19250_v25 = vld [vmem:[%s19966_s8] sm:$0xf] }
 0x3a4   : > { %15623 = vmatmul.mubr.msk.f32.gmra.mrb[242].mxu0 %vm2395_vm5, %v10236_v13  ;;  %15569 = vmatprep.mubr.msk.f32.mxu1 %vm2395_vm5, %v10235_v58  ;;  %v9608_v21 = vld [vmem:[#allocation4 + $0x48] sm:$0xff] }
 0x3a5   : > { %15625 = vmatprep.mubr.msk.f32.mxu0 %vm2395_vm5, %v10237_v54  ;;  %v9644_v62 = vadd.f32 %v15479_v30, %v9608_v21  ;;  %v9607_v7 = vld [vmem:[#allocation4 + $0x40] sm:$0xff]  ;;  %v19271_v21 = vld [vmem:[#allocation3 + $0xa4] sm:$0xff] }
 0x3a6   : > { %v9643_v24 = vadd.f32 %v9607_v7, %v9460_v55  ;;  %v10718_v30 = vld [vmem:[#allocation3 + $0x8b] sm:$0xff]  ;;  %v10719_v55 = vld [vmem:[#allocation3 + $0x93] sm:$0xff] }
 0x3a7   : > { %15570 = vmatmul.mubr.msk.f32.gmra.mrb[216].mxu1 %vm2395_vm5, %v10236_v13  ;;  %9680 = vst.msk [vmem:[#allocation4 + $0x48] sm:$0xff] %vm2395_vm5, %v9644_v62  ;;  %v19261_v13 = vld [vmem:[#allocation3 + $0x94] sm:$0xff] }
 0x3a8   : > { %15626 = vmatmul.mubr.msk.f32.gmra.mrb[244].mxu0 %vm2395_vm5, %v10238_v2  ;;  %15572 = vmatprep.mubr.msk.f32.mxu1 %vm2395_vm5, %v10237_v54  ;;  %9679 = vst.msk [vmem:[#allocation4 + $0x40] sm:$0xff] %vm2395_vm5, %v9643_v24  ;;  %v10720_v54 = vld [vmem:[#allocation3 + $0x9b] sm:$0xff] }
 0x3a9   : > { %15628 = vmatprep.mubr.msk.f32.mxu0 %vm2395_vm5, %v10239_v23  ;;  %v15426_v51 = vpop.f32.mrb[158].mxu1  ;;  %v10721_v23 = vld [vmem:[#allocation3 + $0xa3] sm:$0xff] }
 0x3aa   : > { %v15482_v9 = vpop.f32.mrb[186].mxu0  ;;  %9184 = vst.msk [vmem:[#allocation4 + $0x58] sm:$0xff] %vm2395_vm5, %v15426_v51  ;;  %v9044_v4 = vpop.f32.mrb[159].mxu1  ;;  %v10723_v51 = vld [vmem:[#allocation3 + $0xb3] sm:$0xff] }
 0x3ab   : > { %15573 = vmatmul.mubr.msk.f32.gmra.mrb[218].mxu1 %vm2395_vm5, %v10238_v2  ;;  %v9470_v49 = vpop.f32.mrb[187].mxu0  ;;  %9183 = vst.msk [vmem:[#allocation4 + $0x50] sm:$0xff] %vm2395_vm5, %v9044_v4  ;;  %v19266_v2 = vld [vmem:[#allocation3 + $0x9c] sm:$0xff] }
 0x3ac   : > { %15629 = vmatmul.mubr.msk.f32.gmra.mrb[246].mxu0 %vm2395_vm5, %v10240_v48  ;;  %15633 = vmatprep.mubr.msk.f32.mxu1 %vm2395_vm5, %v10703_v36  ;;  %v10722_v48 = vld [vmem:[#allocation3 + $0xab] sm:$0xff] }
 0x3ad   : > { %15689 = vmatprep.mubr.msk.f32.mxu0 %vm2395_vm5, %v11201_v5  ;;  %v19276_v36 = vld [vmem:[#allocation3 + $0xac] sm:$0xff] }
 0x3af   : > { %15634 = vmatmul.mubr.msk.f32.vlgmr.msra.gmra.mrb[220].mxu1 %vm2395_vm5, %v10704_v26  ;;  %v10724_v26 = vld [vmem:[#allocation3 + $0xbb] sm:$0xff] }
 0x3b0   : > { %15690 = vmatmul.mubr.msk.f32.vlgmr.msra.gmra.mrb[248].mxu0 %vm2395_vm5, %v11202_v40  ;;  %15744 = vmatpush3.msra.mxu1 %v19061_v17  ;;  %v10707_v17 = vld [vmem:[#allocation3 + $0x33] sm:$0xff]  ;;  %v19288_v40 = vld [vmem:[#allocation3 + $0xbc] sm:$0xff] }
 0x3b1   : > { %15636 = vmatprep.mubr.msk.f32.mxu1 %vm2395_vm5, %v10705_v15  ;;  %15692 = vmatprep.mubr.msk.f32.mxu0 %vm2395_vm5, %v19175_v6  ;;  %v9610_v20 = vld [vmem:[#allocation4 + $0x58] sm:$0xff] }
 0x3b2   : > { %15800 = vmatpush3.msra.mxu0 %v19077_v60  ;;  %15855 = vmatprep.subr.mxu1 %v19171_v22  ;;  %v9646_v60 = vadd.f32 %v15482_v9, %v9610_v20  ;;  %v9609_v18 = vld [vmem:[#allocation4 + $0x50] sm:$0xff]  ;;  %v19281_v9 = vld [vmem:[#allocation3 + $0xb4] sm:$0xff] }
 0x3b3   : > { %15637 = vmatmul.mubr.msk.f32.gmra.mrb[222].mxu1 %vm2395_vm5, %v10706_v61  ;;  %v9645_v52 = vadd.f32 %v9609_v18, %v9470_v49  ;;  %15911 = vmatprep.subr.msk.mxu0 %vm2146_vm0, %v19250_v25  ;;  %v19294_v20 = vld [vmem:[#allocation3 + $0xc4] sm:$0xff]  ;;  %v19300_v18 = vld [vmem:[#allocation3 + $0xcc] sm:$0xff] }
 0x3b4   : > { %15693 = vmatmul.mubr.msk.f32.gmra.mrb[250].mxu0 %vm2395_vm5, %v19180_v50  ;;  %15639 = vmatprep.mubr.msk.f32.mxu1 %vm2395_vm5, %v10707_v17  ;;  %9682 = vst.msk [vmem:[#allocation4 + $0x58] sm:$0xff] %vm2395_vm5, %v9646_v60  ;;  %v10725_v17 = vld [vmem:[#allocation3 + $0xc3] sm:$0xff]  ;;  %v10726_v60 = vld [vmem:[#allocation3 + $0xcb] sm:$0xff] }
 0x3b5   : > { %15695 = vmatprep.mubr.msk.f32.mxu0 %vm2395_vm5, %v19186_v44  ;;  %9681 = vst.msk [vmem:[#allocation4 + $0x50] sm:$0xff] %vm2395_vm5, %v9645_v52  ;;  %v19305_v52 = vld [vmem:[#allocation3 + $0xd4] sm:$0xff] }
 0x3b7   : > { %15640 = vmatmul.mubr.msk.f32.gmra.mrb[224].mxu1 %vm2395_vm5, %v10708_v41  ;;  %v10727_v41 = vld [vmem:[#allocation3 + $0xd3] sm:$0xff] }
 0x3b8   : > { %15696 = vmatmul.mubr.msk.f32.gmra.mrb[252].mxu0 %vm2395_vm5, %v19191_v27  ;;  %15642 = vmatprep.mubr.msk.f32.mxu1 %vm2395_vm5, %v10709_v35  ;;  %v15429_v32 = vpop.f32.mrb[160].mxu1 }
 0x3b9   : > { %15698 = vmatprep.mubr.msk.f32.mxu0 %vm2395_vm5, %v19196_v29  ;;  %v15485_v34 = vpop.f32.mrb[188].mxu0  ;;  %9186 = vst.msk [vmem:[#allocation4 + $0x68] sm:$0xff] %vm2395_vm5, %v15429_v32  ;;  %v9054_v56 = vpop.f32.mrb[161].mxu1  ;;  %v19310_v32 = vld [vmem:[#allocation3 + $0xdc] sm:$0xff] }
 0x3ba   : > { %v9480_v10 = vpop.f32.mrb[189].mxu0  ;;  %9185 = vst.msk [vmem:[#allocation4 + $0x60] sm:$0xff] %vm2395_vm5, %v9054_v56  ;;  %v10729_v56 = vld [vmem:[#allocation3 + $0xe3] sm:$0xff] }
 0x3bb   : > { %15643 = vmatmul.mubr.msk.f32.gmra.mrb[226].mxu1 %vm2395_vm5, %v10710_v57  ;;  %v10728_v57 = vld [vmem:[#allocation3 + $0xdb] sm:$0xff] }
 0x3bc   : > { %15699 = vmatmul.mubr.msk.f32.gmra.mrb[254].mxu0 %vm2395_vm5, %v19203_v47  ;;  %15645 = vmatprep.mubr.msk.f32.mxu1 %vm2395_vm5, %v10711_v0 }
 0x3bd   : > { %15701 = vmatprep.mubr.msk.f32.mxu0 %vm2395_vm5, %v19208_v43 }
 0x3bf   : > { %15646 = vmatmul.mubr.msk.f32.gmra.mrb[228].mxu1 %vm2395_vm5, %v10712_v19 }
 0x3c0   : > { %15702 = vmatmul.mubr.msk.f32.gmra.mrb[0].mxu0 %vm2395_vm5, %v19215_v42  ;;  %15648 = vmatprep.mubr.msk.f32.mxu1 %vm2395_vm5, %v10713_v37  ;;  %v9612_v11 = vld [vmem:[#allocation4 + $0x68] sm:$0xff]  ;;  %v10730_v37 = vld [vmem:[#allocation3 + $0xeb] sm:$0xff] }
 0x3c1   : > { %15704 = vmatprep.mubr.msk.f32.mxu0 %vm2395_vm5, %v19220_v28  ;;  %v9648_v38 = vadd.f32 %v15485_v34, %v9612_v11  ;;  %v9611_v63 = vld [vmem:[#allocation4 + $0x60] sm:$0xff] }
 0x3c2   : > { %v9647_v45 = vadd.f32 %v9611_v63, %v9480_v10  ;;  %v19315_v10 = vld [vmem:[#allocation3 + $0xe4] sm:$0xff]  ;;  %v10731_v11 = vld [vmem:[#allocation3 + $0xf3] sm:$0xff] }
 0x3c3   : > { %15649 = vmatmul.mubr.msk.f32.gmra.mrb[230].mxu1 %vm2395_vm5, %v10714_v12  ;;  %9684 = vst.msk [vmem:[#allocation4 + $0x68] sm:$0xff] %vm2395_vm5, %v9648_v38  ;;  %v19322_v12 = vld [vmem:[#allocation3 + $0xec] sm:$0xff] }
 0x3c4   : > { %15705 = vmatmul.mubr.msk.f32.gmra.mrb[2].mxu0 %vm2395_vm5, %v19225_v16  ;;  %15651 = vmatprep.mubr.msk.f32.mxu1 %vm2395_vm5, %v10715_v53  ;;  %9683 = vst.msk [vmem:[#allocation4 + $0x60] sm:$0xff] %vm2395_vm5, %v9647_v45  ;;  %v19327_v53 = vld [vmem:[#allocation3 + $0xf4] sm:$0xff] }
 0x3c5   : > { %15707 = vmatprep.mubr.msk.f32.mxu0 %vm2395_vm5, %v19230_v59 }
 0x3c7   : > { %15652 = vmatmul.mubr.msk.f32.gmra.mrb[232].mxu1 %vm2395_vm5, %v10716_v8  ;;  %v15432_v46 = vpop.f32.mrb[162].mxu1 }
 0x3c8   : > { %15708 = vmatmul.mubr.msk.f32.gmra.mrb[4].mxu0 %vm2395_vm5, %v19236_v33  ;;  %15654 = vmatprep.mubr.msk.f32.mxu1 %vm2395_vm5, %v10717_v14  ;;  %v15488_v3 = vpop.f32.mrb[190].mxu0  ;;  %9188 = vst.msk [vmem:[#allocation4 + $0x78] sm:$0xff] %vm2395_vm5, %v15432_v46  ;;  %v9064_v58 = vpop.f32.mrb[163].mxu1  ;;  %v10732_v14 = vld [vmem:[#allocation3 + $0xfb] sm:$0xff] }
 0x3c9   : > { %15710 = vmatprep.mubr.msk.f32.mxu0 %vm2395_vm5, %v19242_v1  ;;  %v9490_v31 = vpop.f32.mrb[191].mxu0  ;;  %9187 = vst.msk [vmem:[#allocation4 + $0x70] sm:$0xff] %vm2395_vm5, %v9064_v58  ;;  %v19334_v46 = vld [vmem:[#allocation3 + $0xfc] sm:$0xff]  ;;  %v19339_v58 = vld [vmem:[#allocation3 + $0x104] sm:$0xff] }
 0x3cb   : > { %15655 = vmatmul.mubr.msk.f32.gmra.mrb[234].mxu1 %vm2395_vm5, %v10718_v30  ;;  %v19344_v30 = vld [vmem:[#allocation3 + $0x10c] sm:$0xff] }
 0x3cc   : > { %15711 = vmatmul.mubr.msk.f32.gmra.mrb[6].mxu0 %vm2395_vm5, %v19255_v39  ;;  %15657 = vmatprep.mubr.msk.f32.mxu1 %vm2395_vm5, %v10719_v55  ;;  %v10735_v55 = vld [vmem:[#allocation3 + $0x113] sm:$0xff] }
 0x3cd   : > { %15713 = vmatprep.mubr.msk.f32.mxu0 %vm2395_vm5, %v19261_v13 }
 0x3cf   : > { %15658 = vmatmul.mubr.msk.f32.gmra.mrb[236].mxu1 %vm2395_vm5, %v10720_v54  ;;  %v9614_v62 = vld [vmem:[#allocation4 + $0x78] sm:$0xff]  ;;  %v19349_v54 = vld [vmem:[#allocation3 + $0x114] sm:$0xff] }
 0x3d0   : > { %15714 = vmatmul.mubr.msk.f32.gmra.mrb[8].mxu0 %vm2395_vm5, %v19266_v2  ;;  %15660 = vmatprep.mubr.msk.f32.mxu1 %vm2395_vm5, %v10721_v23  ;;  %v9650_v7 = vadd.f32 %v15488_v3, %v9614_v62  ;;  %v9613_v24 = vld [vmem:[#allocation4 + $0x70] sm:$0xff] }
 0x3d1   : > { %15716 = vmatprep.mubr.msk.f32.mxu0 %vm2395_vm5, %v19271_v21  ;;  %v9649_v5 = vadd.f32 %v9613_v24, %v9490_v31  ;;  %v10733_v3 = vld [vmem:[#allocation3 + $0x103] sm:$0xff]  ;;  %v10734_v31 = vld [vmem:[#allocation3 + $0x10b] sm:$0xff] }
 0x3d2   : > { %9686 = vst.msk [vmem:[#allocation4 + $0x78] sm:$0xff] %vm2395_vm5, %v9650_v7 }
 0x3d3   : > { %15661 = vmatmul.mubr.msk.f32.gmra.mrb[238].mxu1 %vm2395_vm5, %v10722_v48  ;;  %9685 = vst.msk [vmem:[#allocation4 + $0x70] sm:$0xff] %vm2395_vm5, %v9649_v5 }
 0x3d4   : > { %15717 = vmatmul.mubr.msk.f32.gmra.mrb[10].mxu0 %vm2395_vm5, %v19276_v36  ;;  %15663 = vmatprep.mubr.msk.f32.mxu1 %vm2395_vm5, %v10723_v51  ;;  %v15435_v4 = vpop.f32.mrb[164].mxu1  ;;  %v10736_v51 = vld [vmem:[#allocation3 + $0x11b] sm:$0xff] }
 0x3d5   : > { %15719 = vmatprep.mubr.msk.f32.mxu0 %vm2395_vm5, %v19281_v9  ;;  %v15491_v49 = vpop.f32.mrb[192].mxu0  ;;  %9190 = vst.msk [vmem:[#allocation4 + $0x88] sm:$0xff] %vm2395_vm5, %v15435_v4  ;;  %v9074_v15 = vpop.f32.mrb[165].mxu1  ;;  %v19354_v4 = vld [vmem:[#allocation3 + $0x11c] sm:$0xff] }
 0x3d6   : > { %v9500_v61 = vpop.f32.mrb[193].mxu0  ;;  %9189 = vst.msk [vmem:[#allocation4 + $0x80] sm:$0xff] %vm2395_vm5, %v9074_v15  ;;  %v10737_v15 = vld [vmem:[#allocation3 + $0x123] sm:$0xff] }
 0x3d7   : > { %15664 = vmatmul.mubr.msk.f32.gmra.mrb[240].mxu1 %vm2395_vm5, %v10724_v26 }
 0x3d8   : > { %15720 = vmatmul.mubr.msk.f32.gmra.mrb[12].mxu0 %vm2395_vm5, %v19288_v40  ;;  %15666 = vmatprep.mubr.msk.f32.mxu1 %vm2395_vm5, %v10725_v17  ;;  %v10738_v17 = vld [vmem:[#allocation3 + $0x12b] sm:$0xff] }
 0x3d9   : > { %15722 = vmatprep.mubr.msk.f32.mxu0 %vm2395_vm5, %v19294_v20 }
 0x3db   : > { %15667 = vmatmul.mubr.msk.f32.gmra.mrb[242].mxu1 %vm2395_vm5, %v10726_v60  ;;  %v19368_v60 = vld [vmem:[#allocation3 + $0x12c] sm:$0xff] }
 0x3dc   : > { %15723 = vmatmul.mubr.msk.f32.gmra.mrb[14].mxu0 %vm2395_vm5, %v19300_v18  ;;  %15669 = vmatprep.mubr.msk.f32.mxu1 %vm2395_vm5, %v10727_v41  ;;  %v9616_v35 = vld [vmem:[#allocation4 + $0x88] sm:$0xff]  ;;  %v12197_v41 = vld [vmem:[#allocation3 + $0x25] sm:$0xff] }
 0x3dd   : > { %15725 = vmatprep.mubr.msk.f32.mxu0 %vm2395_vm5, %v19305_v52  ;;  %v9652_v34 = vadd.f32 %v15491_v49, %v9616_v35  ;;  %v9615_v0 = vld [vmem:[#allocation4 + $0x80] sm:$0xff] }
 0x3de   : > { %v9651_v19 = vadd.f32 %v9615_v0, %v9500_v61  ;;  %v19361_v61 = vld [vmem:[#allocation3 + $0x124] sm:$0xff] }
 0x3df   : > { %15670 = vmatmul.mubr.msk.f32.gmra.mrb[244].mxu1 %vm2395_vm5, %v10728_v57  ;;  %9688 = vst.msk [vmem:[#allocation4 + $0x88] sm:$0xff] %vm2395_vm5, %v9652_v34  ;;  %v12198_v57 = vld [vmem:[#allocation3 + $0x2d] sm:$0xff] }
 0x3e0   : > { %15726 = vmatmul.mubr.msk.f32.gmra.mrb[16].mxu0 %vm2395_vm5, %v19310_v32  ;;  %15672 = vmatprep.mubr.msk.f32.mxu1 %vm2395_vm5, %v10729_v56  ;;  %9687 = vst.msk [vmem:[#allocation4 + $0x80] sm:$0xff] %vm2395_vm5, %v9651_v19 }
 0x3e1   : > { %15728 = vmatprep.mubr.msk.f32.mxu0 %vm2395_vm5, %v19315_v10 }
 0x3e2   : > { %v15438_v38 = vpop.f32.mrb[166].mxu1 }
 0x3e3   : > { %15673 = vmatmul.mubr.msk.f32.gmra.mrb[246].mxu1 %vm2395_vm5, %v10730_v37  ;;  %v15494_v63 = vpop.f32.mrb[194].mxu0  ;;  %9192 = vst.msk [vmem:[#allocation4 + $0x98] sm:$0xff] %vm2395_vm5, %v15438_v38  ;;  %v9084_v45 = vpop.f32.mrb[167].mxu1 }
 0x3e4   : > { %15729 = vmatmul.mubr.msk.f32.gmra.mrb[18].mxu0 %vm2395_vm5, %v19322_v12  ;;  %15675 = vmatprep.mubr.msk.f32.mxu1 %vm2395_vm5, %v10731_v11  ;;  %v9510_v8 = vpop.f32.mrb[195].mxu0  ;;  %9191 = vst.msk [vmem:[#allocation4 + $0x90] sm:$0xff] %vm2395_vm5, %v9084_v45 }
 0x3e5   : > { %15731 = vmatprep.mubr.msk.f32.mxu0 %vm2395_vm5, %v19327_v53 }
 0x3e7   : > { %15676 = vmatmul.mubr.msk.f32.gmra.mrb[248].mxu1 %vm2395_vm5, %v10732_v14  ;;  %v12204_v14 = vld [vmem:[#allocation3 + $0x5d] sm:$0xff] }
 0x3e8   : > { %15732 = vmatmul.mubr.msk.f32.gmra.mrb[20].mxu0 %vm2395_vm5, %v19334_v46  ;;  %15678 = vmatprep.mubr.msk.f32.mxu1 %vm2395_vm5, %v10733_v3 }
 0x3e9   : > { %15734 = vmatprep.mubr.msk.f32.mxu0 %vm2395_vm5, %v19339_v58 }
 0x3ea   : > { %v9618_v23 = vld [vmem:[#allocation4 + $0x98] sm:$0xff] }
 0x3eb   : > { %15679 = vmatmul.mubr.msk.f32.gmra.mrb[250].mxu1 %vm2395_vm5, %v10734_v31  ;;  %v9654_v62 = vadd.f32 %v15494_v63, %v9618_v23  ;;  %v9617_v7 = vld [vmem:[#allocation4 + $0x90] sm:$0xff]  ;;  %v12203_v63 = vld [vmem:[#allocation3 + $0x55] sm:$0xff] }
 0x3ec   : > { %15735 = vmatmul.mubr.msk.f32.gmra.mrb[22].mxu0 %vm2395_vm5, %v19344_v30  ;;  %15681 = vmatprep.mubr.msk.f32.mxu1 %vm2395_vm5, %v10735_v55  ;;  %v9653_v24 = vadd.f32 %v9617_v7, %v9510_v8  ;;  %v15441_v48 = vpop.f32.mrb[168].mxu1  ;;  %v12206_v55 = vld [vmem:[#allocation3 + $0x6d] sm:$0xff]  ;;  %v12208_v23 = vld [vmem:[#allocation3 + $0x7d] sm:$0xff] }
 0x3ed   : > { %15737 = vmatprep.mubr.msk.f32.mxu0 %vm2395_vm5, %v19349_v54  ;;  %v15497_v5 = vpop.f32.mrb[196].mxu0  ;;  %9690 = vst.msk [vmem:[#allocation4 + $0x98] sm:$0xff] %vm2395_vm5, %v9654_v62  ;;  %9194 = vst.msk [vmem:[#allocation4 + $0xa8] sm:$0xff] %vm2395_vm5, %v15441_v48  ;;  %v9094_v49 = vpop.f32.mrb[169].mxu1 }
 0x3ee   : > { %v9520_v26 = vpop.f32.mrb[197].mxu0  ;;  %9689 = vst.msk [vmem:[#allocation4 + $0x90] sm:$0xff] %vm2395_vm5, %v9653_v24  ;;  %9193 = vst.msk [vmem:[#allocation4 + $0xa0] sm:$0xff] %vm2395_vm5, %v9094_v49  ;;  %v12212_v49 = vld [vmem:[#allocation3 + $0x9d] sm:$0xff] }
 0x3ef   : > { %15682 = vmatmul.mubr.msk.f32.gmra.mrb[252].mxu1 %vm2395_vm5, %v10736_v51 }
 0x3f0   : > { %15738 = vmatmul.mubr.msk.f32.gmra.mrb[24].mxu0 %vm2395_vm5, %v19354_v4  ;;  %15684 = vmatprep.mubr.msk.f32.mxu1 %vm2395_vm5, %v10737_v15 }
 0x3f1   : > { %15740 = vmatprep.mubr.msk.f32.mxu0 %vm2395_vm5, %v19361_v61 }
 0x3f3   : > { %15685 = vmatmul.mubr.msk.f32.gmra.mrb[254].mxu1 %vm2395_vm5, %v10738_v17 }
 0x3f4   : > { %15741 = vmatmul.mubr.msk.f32.gmra.mrb[26].mxu0 %vm2395_vm5, %v19368_v60  ;;  %15745 = vmatprep.mubr.msk.f32.mxu1 %vm2395_vm5, %v19175_v6  ;;  %v9620_v35 = vld [vmem:[#allocation4 + $0xa8] sm:$0xff] }
 0x3f5   : > { %15801 = vmatprep.mubr.msk.f32.mxu0 %vm2395_vm5, %v12197_v41  ;;  %v9656_v34 = vadd.f32 %v15497_v5, %v9620_v35  ;;  %v9619_v0 = vld [vmem:[#allocation4 + $0xa0] sm:$0xff] }
 0x3f6   : > { %v9655_v56 = vadd.f32 %v9619_v0, %v9520_v26  ;;  %v12199_v6 = vld [vmem:[#allocation3 + $0x35] sm:$0xff]  ;;  %v12213_v26 = vld [vmem:[#allocation3 + $0xa5] sm:$0xff]  ;;  %v12214_v41 = vld [vmem:[#allocation3 + $0xad] sm:$0xff] }
 0x3f7   : > { %15746 = vmatmul.mubr.msk.f32.vlgmr.msra.gmra.mrb[0].mxu1 %vm2395_vm5, %v19180_v50  ;;  %v15444_v19 = vpop.f32.mrb[170].mxu1  ;;  %9692 = vst.msk [vmem:[#allocation4 + $0xa8] sm:$0xff] %vm2395_vm5, %v9656_v34  ;;  %v12201_v50 = vld [vmem:[#allocation3 + $0x45] sm:$0xff] }
 0x3f8   : > { %15802 = vmatmul.mubr.msk.f32.vlgmr.msra.gmra.mrb[28].mxu0 %vm2395_vm5, %v12198_v57  ;;  %v15500_v37 = vpop.f32.mrb[198].mxu0  ;;  %15856 = vmatpush3.msra.mxu1 %v19171_v22  ;;  %9196 = vst.msk [vmem:[#allocation4 + $0xb8] sm:$0xff] %vm2395_vm5, %v15444_v19  ;;  %v9104_v11 = vpop.f32.mrb[171].mxu1  ;;  %9691 = vst.msk [vmem:[#allocation4 + $0xa0] sm:$0xff] %vm2395_vm5, %v9655_v56  ;;  %v12200_v22 = vld [vmem:[#allocation3 + $0x3d] sm:$0xff]  ;;  %v12217_v0 = vld [vmem:[#allocation3 + $0xc5] sm:$0xff] }
 0x3f9   : > { %15748 = vmatprep.mubr.msk.f32.mxu1 %vm2395_vm5, %v19186_v44  ;;  %v9530_v38 = vpop.f32.mrb[199].mxu0  ;;  %15804 = vmatprep.mubr.msk.f32.mxu0 %vm2395_vm5, %v12199_v6  ;;  %9195 = vst.msk [vmem:[#allocation4 + $0xb0] sm:$0xff] %vm2395_vm5, %v9104_v11  ;;  %v12202_v44 = vld [vmem:[#allocation3 + $0x4d] sm:$0xff]  ;;  %v12219_v56 = vld [vmem:[#allocation3 + $0xd5] sm:$0xff] }
 0x3fa   : > { %15912 = vmatpush3.msk.msra.mxu0 %vm2146_vm0, %v19250_v25 }
 0x3fb   : > { %15749 = vmatmul.mubr.msk.f32.gmra.mrb[2].mxu1 %vm2395_vm5, %v19191_v27 }
 0x3fc   : > { %15805 = vmatmul.mubr.msk.f32.gmra.mrb[30].mxu0 %vm2395_vm5, %v12200_v22  ;;  %15751 = vmatprep.mubr.msk.f32.mxu1 %vm2395_vm5, %v19196_v29 }
 0x3fd   : > { %15807 = vmatprep.mubr.msk.f32.mxu0 %vm2395_vm5, %v12201_v50  ;;  %v12222_v50 = vld [vmem:[#allocation3 + $0xed] sm:$0xff] }
 0x3ff   : > { %15752 = vmatmul.mubr.msk.f32.gmra.mrb[4].mxu1 %vm2395_vm5, %v19203_v47  ;;  %v9622_v25 = vld [vmem:[#allocation4 + $0xb8] sm:$0xff] }
 0x400   : > { %15808 = vmatmul.mubr.msk.f32.gmra.mrb[32].mxu0 %vm2395_vm5, %v12202_v44  ;;  %15754 = vmatprep.mubr.msk.f32.mxu1 %vm2395_vm5, %v19208_v43  ;;  %v9658_v27 = vadd.f32 %v15500_v37, %v9622_v25  ;;  %v9621_v45 = vld [vmem:[#allocation4 + $0xb0] sm:$0xff]  ;;  %v12223_v44 = vld [vmem:[#allocation3 + $0xf5] sm:$0xff] }
 0x401   : > { %15810 = vmatprep.mubr.msk.f32.mxu0 %vm2395_vm5, %v12203_v63  ;;  %v9657_v8 = vadd.f32 %v9621_v45, %v9530_v38  ;;  %v15447_v29 = vpop.f32.mrb[172].mxu1  ;;  %v12205_v47 = vld [vmem:[#allocation3 + $0x65] sm:$0xff]  ;;  %v12220_v38 = vld [vmem:[#allocation3 + $0xdd] sm:$0xff] }
 0x402   : > { %9694 = vst.msk [vmem:[#allocation4 + $0xb8] sm:$0xff] %vm2395_vm5, %v9658_v27  ;;  %v15503_v3 = vpop.f32.mrb[200].mxu0  ;;  %9198 = vst.msk [vmem:[#allocation4 + $0xc8] sm:$0xff] %vm2395_vm5, %v15447_v29  ;;  %v9114_v43 = vpop.f32.mrb[173].mxu1  ;;  %v12224_v63 = vld [vmem:[#allocation3 + $0xfd] sm:$0xff] }
 0x403   : > { %15755 = vmatmul.mubr.msk.f32.gmra.mrb[6].mxu1 %vm2395_vm5, %v19215_v42  ;;  %9693 = vst.msk [vmem:[#allocation4 + $0xb0] sm:$0xff] %vm2395_vm5, %v9657_v8  ;;  %v9540_v31 = vpop.f32.mrb[201].mxu0  ;;  %9197 = vst.msk [vmem:[#allocation4 + $0xc0] sm:$0xff] %vm2395_vm5, %v9114_v43  ;;  %v12207_v42 = vld [vmem:[#allocation3 + $0x75] sm:$0xff]  ;;  %v12228_v29 = vld [vmem:[#allocation3 + $0x11d] sm:$0xff] }
 0x404   : > { %15811 = vmatmul.mubr.msk.f32.gmra.mrb[34].mxu0 %vm2395_vm5, %v12204_v14  ;;  %15757 = vmatprep.mubr.msk.f32.mxu1 %vm2395_vm5, %v19220_v28  ;;  %v12209_v28 = vld [vmem:[#allocation3 + $0x85] sm:$0xff]  ;;  %v12226_v14 = vld [vmem:[#allocation3 + $0x10d] sm:$0xff] }
 0x405   : > { %15813 = vmatprep.mubr.msk.f32.mxu0 %vm2395_vm5, %v12205_v47 }
 0x407   : > { %15758 = vmatmul.mubr.msk.f32.gmra.mrb[8].mxu1 %vm2395_vm5, %v19225_v16 }
 0x408   : > { %15814 = vmatmul.mubr.msk.f32.gmra.mrb[36].mxu0 %vm2395_vm5, %v12206_v55  ;;  %15760 = vmatprep.mubr.msk.f32.mxu1 %vm2395_vm5, %v19230_v59 }
 0x409   : > { %15816 = vmatprep.mubr.msk.f32.mxu0 %vm2395_vm5, %v12207_v42  ;;  %v9624_v62 = vld [vmem:[#allocation4 + $0xc8] sm:$0xff] }
 0x40a   : > { %v9660_v7 = vadd.f32 %v15503_v3, %v9624_v62  ;;  %v9623_v24 = vld [vmem:[#allocation4 + $0xc0] sm:$0xff]  ;;  %v12229_v3 = vld [vmem:[#allocation3 + $0x125] sm:$0xff] }
 0x40b   : > { %15761 = vmatmul.mubr.msk.f32.gmra.mrb[10].mxu1 %vm2395_vm5, %v19236_v33  ;;  %v9659_v16 = vadd.f32 %v9623_v24, %v9540_v31  ;;  %v12210_v33 = vld [vmem:[#allocation3 + $0x8d] sm:$0xff] }
 0x40c   : > { %15817 = vmatmul.mubr.msk.f32.gmra.mrb[38].mxu0 %vm2395_vm5, %v12208_v23  ;;  %15763 = vmatprep.mubr.msk.f32.mxu1 %vm2395_vm5, %v19242_v1  ;;  %v15450_v48 = vpop.f32.mrb[174].mxu1  ;;  %9696 = vst.msk [vmem:[#allocation4 + $0xc8] sm:$0xff] %vm2395_vm5, %v9660_v7  ;;  %v12211_v1 = vld [vmem:[#allocation3 + $0x95] sm:$0xff]  ;;  %v12230_v62 = vld [vmem:[#allocation3 + $0x12d] sm:$0xff]  ;;  %v12232_v7 = vld [vmem:[#allocation3 + $0x13d] sm:$0xff] }
 0x40d   : > { %15819 = vmatprep.mubr.msk.f32.mxu0 %vm2395_vm5, %v12209_v28  ;;  %v15506_v59 = vpop.f32.mrb[202].mxu0  ;;  %9200 = vst.msk [vmem:[#allocation4 + $0xd8] sm:$0xff] %vm2395_vm5, %v15450_v48  ;;  %v9124_v5 = vpop.f32.mrb[175].mxu1  ;;  %9695 = vst.msk [vmem:[#allocation4 + $0xc0] sm:$0xff] %vm2395_vm5, %v9659_v16  ;;  %v11733_v31 = vld [vmem:[#allocation3 + $0x134] sm:$0xff]  ;;  %v11734_v28 = vld [vmem:[#allocation3 + $0x13c] sm:$0xff] }
 0x40e   : > { %v9550_v51 = vpop.f32.mrb[203].mxu0  ;;  %9199 = vst.msk [vmem:[#allocation4 + $0xd0] sm:$0xff] %vm2395_vm5, %v9124_v5  ;;  %v13280_v24 = vld [vmem:[%s19503_s21] sm:$0xff]  ;;  %v10098_v48 = vld [vmem:[#allocation4 + $0x8] sm:$0xff] }
 0x40f   : > { %15764 = vmatmul.mubr.msk.f32.gmra.mrb[12].mxu1 %vm2395_vm5, %v19255_v39 }
 0x410   : > { %15820 = vmatmul.mubr.msk.f32.gmra.mrb[40].mxu0 %vm2395_vm5, %v12210_v33  ;;  %15766 = vmatprep.mubr.msk.f32.mxu1 %vm2395_vm5, %v19261_v13  ;;  %v12215_v13 = vld [vmem:[#allocation3 + $0xb5] sm:$0xff] }
 0x411   : > { %15822 = vmatprep.mubr.msk.f32.mxu0 %vm2395_vm5, %v12211_v1  ;;  %v12695_v1 = vld [vmem:[#allocation3 + $0x26] sm:$0xff] }
 0x413   : > { %15767 = vmatmul.mubr.msk.f32.gmra.mrb[14].mxu1 %vm2395_vm5, %v19266_v2 }
 0x414   : > { %15823 = vmatmul.mubr.msk.f32.gmra.mrb[42].mxu0 %vm2395_vm5, %v12212_v49  ;;  %15769 = vmatprep.mubr.msk.f32.mxu1 %vm2395_vm5, %v19271_v21  ;;  %v9626_v39 = vld [vmem:[#allocation4 + $0xd8] sm:$0xff] }
 0x415   : > { %15825 = vmatprep.mubr.msk.f32.mxu0 %vm2395_vm5, %v12213_v26  ;;  %v9662_v15 = vadd.f32 %v15506_v59, %v9626_v39  ;;  %v9625_v17 = vld [vmem:[#allocation4 + $0xd0] sm:$0xff]  ;;  %v13281_v26 = vld [vmem:[%s19503_s21 + $0x8] sm:$0xff] }
 0x416   : > { %v9661_v35 = vadd.f32 %v9625_v17, %v9550_v51  ;;  %v15453_v2 = vpop.f32.mrb[176].mxu1  ;;  %v10097_v51 = vld [vmem:[#allocation4] sm:$0xff]  ;;  %v13282_v39 = vld [vmem:[%s19503_s21 + $0x10] sm:$0xff] }
 0x417   : > { %15770 = vmatmul.mubr.msk.f32.gmra.mrb[16].mxu1 %vm2395_vm5, %v19276_v36  ;;  %9698 = vst.msk [vmem:[#allocation4 + $0xd8] sm:$0xff] %vm2395_vm5, %v9662_v15  ;;  %v15509_v57 = vpop.f32.mrb[204].mxu0  ;;  %9202 = vst.msk [vmem:[#allocation4 + $0xe8] sm:$0xff] %vm2395_vm5, %v15453_v2  ;;  %v9134_v21 = vpop.f32.mrb[177].mxu1  ;;  %v12216_v36 = vld [vmem:[#allocation3 + $0xbd] sm:$0xff] }
 0x418   : > { %15826 = vmatmul.mubr.msk.f32.gmra.mrb[44].mxu0 %vm2395_vm5, %v12214_v41  ;;  %15772 = vmatprep.mubr.msk.f32.mxu1 %vm2395_vm5, %v19281_v9  ;;  %9697 = vst.msk [vmem:[#allocation4 + $0xd0] sm:$0xff] %vm2395_vm5, %v9661_v35  ;;  %v9560_v34 = vpop.f32.mrb[205].mxu0  ;;  %9201 = vst.msk [vmem:[#allocation4 + $0xe0] sm:$0xff] %vm2395_vm5, %v9134_v21  ;;  %v12218_v9 = vld [vmem:[#allocation3 + $0xcd] sm:$0xff] }
 0x419   : > { %15828 = vmatprep.mubr.msk.f32.mxu0 %vm2395_vm5, %v12215_v13  ;;  %v10100_v41 = vld [vmem:[#allocation4 + $0x18] sm:$0xff] }
 0x41a   : > { %v12696_v13 = vld [vmem:[#allocation3 + $0x2e] sm:$0xff] }
 0x41b   : > { %15773 = vmatmul.mubr.msk.f32.gmra.mrb[18].mxu1 %vm2395_vm5, %v19288_v40 }
 0x41c   : > { %15829 = vmatmul.mubr.msk.f32.gmra.mrb[46].mxu0 %vm2395_vm5, %v12216_v36  ;;  %15775 = vmatprep.mubr.msk.f32.mxu1 %vm2395_vm5, %v19294_v20  ;;  %v10099_v36 = vld [vmem:[#allocation4 + $0x10] sm:$0xff] }
 0x41d   : > { %15831 = vmatprep.mubr.msk.f32.mxu0 %vm2395_vm5, %v12217_v0 }
 0x41e   : > { %v9628_v19 = vld [vmem:[#allocation4 + $0xe8] sm:$0xff] }
 0x41f   : > { %15776 = vmatmul.mubr.msk.f32.gmra.mrb[20].mxu1 %vm2395_vm5, %v19300_v18  ;;  %v9664_v40 = vadd.f32 %v15509_v57, %v9628_v19  ;;  %v9627_v37 = vld [vmem:[#allocation4 + $0xe0] sm:$0xff] }
 0x420   : > { %15832 = vmatmul.mubr.msk.f32.gmra.mrb[48].mxu0 %vm2395_vm5, %v12218_v9  ;;  %15778 = vmatprep.mubr.msk.f32.mxu1 %vm2395_vm5, %v19305_v52  ;;  %v9663_v6 = vadd.f32 %v9627_v37, %v9560_v34  ;;  %v12221_v52 = vld [vmem:[#allocation3 + $0xe5] sm:$0xff]  ;;  %v12697_v9 = vld [vmem:[#allocation3 + $0x36] sm:$0xff] }
 0x421   : > { %15834 = vmatprep.mubr.msk.f32.mxu0 %vm2395_vm5, %v12219_v56  ;;  %v15456_v11 = vpop.f32.mrb[178].mxu1  ;;  %9700 = vst.msk [vmem:[#allocation4 + $0xe8] sm:$0xff] %vm2395_vm5, %v9664_v40  ;;  %v13283_v40 = vld [vmem:[%s19503_s21 + $0x18] sm:$0xff]  ;;  %v13284_v37 = vld [vmem:[%s19503_s21 + $0x20] sm:$0xff] }
 0x422   : > { %v15512_v20 = vpop.f32.mrb[206].mxu0  ;;  %9204 = vst.msk [vmem:[#allocation4 + $0xf8] sm:$0xff] %vm2395_vm5, %v15456_v11  ;;  %v9144_v18 = vpop.f32.mrb[179].mxu1  ;;  %9699 = vst.msk [vmem:[#allocation4 + $0xe0] sm:$0xff] %vm2395_vm5, %v9663_v6  ;;  %v10102_v11 = vld [vmem:[#allocation4 + $0x28] sm:$0xff] }
 0x423   : > { %v9570_v22 = vpop.f32.mrb[207].mxu0  ;;  %15779 = vmatmul.mubr.msk.f32.gmra.mrb[22].mxu1 %vm2395_vm5, %v19310_v32  ;;  %9203 = vst.msk [vmem:[#allocation4 + $0xf0] sm:$0xff] %vm2395_vm5, %v9144_v18 }
 0x424   : > { %15835 = vmatmul.mubr.msk.f32.gmra.mrb[50].mxu0 %vm2395_vm5, %v12220_v38  ;;  %15781 = vmatprep.mubr.msk.f32.mxu1 %vm2395_vm5, %v19315_v10  ;;  %v12225_v10 = vld [vmem:[#allocation3 + $0x105] sm:$0xff] }
 0x425   : > { %15837 = vmatprep.mubr.msk.f32.mxu0 %vm2395_vm5, %v12221_v52  ;;  %v12698_v38 = vld [vmem:[#allocation3 + $0x3e] sm:$0xff]  ;;  %v10101_v52 = vld [vmem:[#allocation4 + $0x20] sm:$0xff] }
 0x427   : > { %15782 = vmatmul.mubr.msk.f32.gmra.mrb[24].mxu1 %vm2395_vm5, %v19322_v12 }
 0x428   : > { %15838 = vmatmul.mubr.msk.f32.gmra.mrb[52].mxu0 %vm2395_vm5, %v12222_v50  ;;  %15784 = vmatprep.mubr.msk.f32.mxu1 %vm2395_vm5, %v19327_v53 }
 0x429   : > { %15840 = vmatprep.mubr.msk.f32.mxu0 %vm2395_vm5, %v12223_v44  ;;  %v9630_v32 = vld [vmem:[#allocation4 + $0xf8] sm:$0xff] }
 0x42a   : > { %v9666_v25 = vadd.f32 %v15512_v20, %v9630_v32  ;;  %v9629_v27 = vld [vmem:[#allocation4 + $0xf0] sm:$0xff] }
 0x42b   : > { %15785 = vmatmul.mubr.msk.f32.gmra.mrb[26].mxu1 %vm2395_vm5, %v19334_v46  ;;  %v9665_v45 = vadd.f32 %v9629_v27, %v9570_v22  ;;  %v15459_v12 = vpop.f32.mrb[180].mxu1  ;;  %v12699_v44 = vld [vmem:[#allocation3 + $0x46] sm:$0xff] }
 0x42c   : > { %15841 = vmatmul.mubr.msk.f32.gmra.mrb[54].mxu0 %vm2395_vm5, %v12224_v63  ;;  %15787 = vmatprep.mubr.msk.f32.mxu1 %vm2395_vm5, %v19339_v58  ;;  %9702 = vst.msk [vmem:[#allocation4 + $0xf8] sm:$0xff] %vm2395_vm5, %v9666_v25  ;;  %v15515_v53 = vpop.f32.mrb[208].mxu0  ;;  %9206 = vst.msk [vmem:[#allocation4 + $0x108] sm:$0xff] %vm2395_vm5, %v15459_v12  ;;  %v9154_v8 = vpop.f32.mrb[181].mxu1  ;;  %v12227_v58 = vld [vmem:[#allocation3 + $0x115] sm:$0xff] }
 0x42d   : > { %15843 = vmatprep.mubr.msk.f32.mxu0 %vm2395_vm5, %v12225_v10  ;;  %9701 = vst.msk [vmem:[#allocation4 + $0xf0] sm:$0xff] %vm2395_vm5, %v9665_v45  ;;  %v9580_v46 = vpop.f32.mrb[209].mxu0  ;;  %9205 = vst.msk [vmem:[#allocation4 + $0x100] sm:$0xff] %vm2395_vm5, %v9154_v8  ;;  %v13285_v25 = vld [vmem:[%s19503_s21 + $0x28] sm:$0xff]  ;;  %v13286_v45 = vld [vmem:[%s19503_s21 + $0x30] sm:$0xff] }
 0x42e   : > { %v10104_v8 = vld [vmem:[#allocation4 + $0x38] sm:$0xff] }
 0x42f   : > { %15788 = vmatmul.mubr.msk.f32.gmra.mrb[28].mxu1 %vm2395_vm5, %v19344_v30 }
 0x430   : > { %15844 = vmatmul.mubr.msk.f32.gmra.mrb[56].mxu0 %vm2395_vm5, %v12226_v14  ;;  %15790 = vmatprep.mubr.msk.f32.mxu1 %vm2395_vm5, %v19349_v54  ;;  %v12231_v54 = vld [vmem:[#allocation3 + $0x135] sm:$0xff] }
 0x431   : > { %15846 = vmatprep.mubr.msk.f32.mxu0 %vm2395_vm5, %v12227_v58  ;;  %v12700_v14 = vld [vmem:[#allocation3 + $0x4e] sm:$0xff] }
 0x433   : > { %15791 = vmatmul.mubr.msk.f32.gmra.mrb[30].mxu1 %vm2395_vm5, %v19354_v4  ;;  %v9632_v47 = vld [vmem:[#allocation4 + $0x108] sm:$0xff] }
 0x434   : > { %15847 = vmatmul.mubr.msk.f32.gmra.mrb[58].mxu0 %vm2395_vm5, %v12228_v29  ;;  %15793 = vmatprep.mubr.msk.f32.mxu1 %vm2395_vm5, %v19361_v61  ;;  %v9668_v30 = vadd.f32 %v15515_v53, %v9632_v47  ;;  %v9631_v43 = vld [vmem:[#allocation4 + $0x100] sm:$0xff] }
 0x435   : > { %15849 = vmatprep.mubr.msk.f32.mxu0 %vm2395_vm5, %v12229_v3  ;;  %v9667_v55 = vadd.f32 %v9631_v43, %v9580_v46  ;;  %v10103_v3 = vld [vmem:[#allocation4 + $0x30] sm:$0xff] }
 0x436   : > { %v15462_v42 = vpop.f32.mrb[182].mxu1  ;;  %9704 = vst.msk [vmem:[#allocation4 + $0x108] sm:$0xff] %vm2395_vm5, %v9668_v30  ;;  %v12701_v30 = vld [vmem:[#allocation3 + $0x56] sm:$0xff] }
 0x437   : > { %v15518_v23 = vpop.f32.mrb[210].mxu0  ;;  %9208 = vst.msk [vmem:[#allocation4 + $0x118] sm:$0xff] %vm2395_vm5, %v15462_v42  ;;  %v9164_v4 = vpop.f32.mrb[183].mxu1  ;;  %15794 = vmatmul.mubr.msk.f32.gmra.mrb[32].mxu1 %vm2395_vm5, %v19368_v60  ;;  %9703 = vst.msk [vmem:[#allocation4 + $0x100] sm:$0xff] %vm2395_vm5, %v9667_v55 }
 0x438   : > { %v9590_v61 = vpop.f32.mrb[211].mxu0  ;;  %15850 = vmatmul.mubr.msk.f32.gmra.mrb[60].mxu0 %vm2395_vm5, %v12230_v62  ;;  %9207 = vst.msk [vmem:[#allocation4 + $0x110] sm:$0xff] %vm2395_vm5, %v9164_v4  ;;  %15796 = vmatprep.mubr.msk.f32.mxu1 %vm2395_vm5, %v11733_v31  ;;  %v10106_v4 = vld [vmem:[#allocation4 + $0x48] sm:$0xff] }
 0x439   : > { %15852 = vmatprep.mubr.msk.f32.mxu0 %vm2395_vm5, %v12231_v54  ;;  %v13287_v54 = vld [vmem:[%s19503_s21 + $0x38] sm:$0xff] }
 0x43a   : > { %v15523_v16 = vpop.f32.mrb[184].mxu1 }
 0x43b   : > { %v15579_v59 = vpop.f32.mrb[212].mxu0  ;;  %v10134_v5 = vadd.f32 %v15523_v16, %v10098_v48  ;;  %v9918_v60 = vpop.f32.mrb[185].mxu1  ;;  %15797 = vmatmul.mubr.msk.f32.gmra.mrb[34].mxu1 %vm2395_vm5, %v11734_v28  ;;  %v12702_v28 = vld [vmem:[#allocation3 + $0x5e] sm:$0xff]  ;;  %v10105_v16 = vld [vmem:[#allocation4 + $0x40] sm:$0xff] }
 0x43c   : > { %v10416_v33 = vpop.f32.mrb[213].mxu0  ;;  %15853 = vmatmul.mubr.msk.f32.gmra.mrb[62].mxu0 %vm2395_vm5, %v12232_v7  ;;  %v10133_v49 = vadd.f32 %v10097_v51, %v9918_v60  ;;  %15857 = vmatprep.mubr.msk.f32.mxu1 %vm2395_vm5, %v12695_v1 }
 0x43d   : > { %15913 = vmatprep.mubr.msk.f32.mxu0 %vm603_vm1, %v13280_v24  ;;  %10170 = vst.msk [vmem:[#allocation4 + $0x8] sm:$0xff] %vm2395_vm5, %v10134_v5 }
 0x43e   : > { %v9634_v15 = vld [vmem:[#allocation4 + $0x118] sm:$0xff]  ;;  %10169 = vst.msk [vmem:[#allocation4] sm:$0xff] %vm2395_vm5, %v10133_v49  ;;  %v15526_v17 = vpop.f32.mrb[186].mxu1 }
 0x43f   : > { %v15582_v35 = vpop.f32.mrb[214].mxu0  ;;  %v9670_v2 = vadd.f32 %v15518_v23, %v9634_v15  ;;  %v9633_v57 = vld [vmem:[#allocation4 + $0x110] sm:$0xff]  ;;  %v10136_v21 = vadd.f32 %v15526_v17, %v10100_v41  ;;  %v9928_v34 = vpop.f32.mrb[187].mxu1  ;;  %15858 = vmatmul.mubr.msk.f32.vlgmr.msra.gmra.mrb[36].mxu1 %vm2395_vm5, %v12696_v13  ;;  %v12704_v15 = vld [vmem:[#allocation3 + $0x6e] sm:$0xff] }
 0x440   : > { %v10426_v0 = vpop.f32.mrb[215].mxu0  ;;  %15914 = vmatmul.mubr.msk.f32.vlgmr.msra.gmra.mrb[64].mxu0 %vm603_vm1, %v13281_v26  ;;  %v9669_v56 = vadd.f32 %v9633_v57, %v9590_v61  ;;  %v10135_v19 = vadd.f32 %v10099_v36, %v9928_v34  ;;  %15860 = vmatprep.mubr.msk.f32.mxu1 %vm2395_vm5, %v12697_v9  ;;  %v10108_v26 = vld [vmem:[#allocation4 + $0x58] sm:$0xff] }
 0x441   : > { %15916 = vmatprep.mubr.msk.f32.mxu0 %vm603_vm1, %v13282_v39  ;;  %9706 = vst.msk [vmem:[#allocation4 + $0x118] sm:$0xff] %vm2395_vm5, %v9670_v2  ;;  %10172 = vst.msk [vmem:[#allocation4 + $0x18] sm:$0xff] %vm2395_vm5, %v10136_v21  ;;  %v12705_v2 = vld [vmem:[#allocation3 + $0x76] sm:$0xff] }
 0x442   : > { %9705 = vst.msk [vmem:[#allocation4 + $0x110] sm:$0xff] %vm2395_vm5, %v9669_v56  ;;  %10171 = vst.msk [vmem:[#allocation4 + $0x10] sm:$0xff] %vm2395_vm5, %v10135_v19  ;;  %v15529_v6 = vpop.f32.mrb[188].mxu1  ;;  %v10110_v56 = vld [vmem:[#allocation4 + $0x68] sm:$0xff] }
 0x443   : > { %v15585_v20 = vpop.f32.mrb[216].mxu0  ;;  %v10138_v18 = vadd.f32 %v15529_v6, %v10102_v11  ;;  %v9938_v22 = vpop.f32.mrb[189].mxu1  ;;  %15861 = vmatmul.mubr.msk.f32.gmra.mrb[38].mxu1 %vm2395_vm5, %v12698_v38  ;;  %v10109_v11 = vld [vmem:[#allocation4 + $0x60] sm:$0xff]  ;;  %v12707_v38 = vld [vmem:[#allocation3 + $0x86] sm:$0xff] }
 0x444   : > { %v10436_v50 = vpop.f32.mrb[217].mxu0  ;;  %15917 = vmatmul.mubr.msk.f32.gmra.mrb[66].mxu0 %vm603_vm1, %v13283_v40  ;;  %v10596_v32 = vld [vmem:[#allocation4 + $0x8] sm:$0xff]  ;;  %v10137_v63 = vadd.f32 %v10101_v52, %v9938_v22  ;;  %15863 = vmatprep.mubr.msk.f32.mxu1 %vm2395_vm5, %v12699_v44 }
 0x445   : > { %15919 = vmatprep.mubr.msk.f32.mxu0 %vm603_vm1, %v13284_v37  ;;  %v10632_v27 = vadd.f32 %v15579_v59, %v10596_v32  ;;  %v10595_v10 = vld [vmem:[#allocation4] sm:$0xff]  ;;  %10174 = vst.msk [vmem:[#allocation4 + $0x28] sm:$0xff] %vm2395_vm5, %v10138_v18  ;;  %v12703_v59 = vld [vmem:[#allocation3 + $0x66] sm:$0xff]  ;;  %v12706_v40 = vld [vmem:[#allocation3 + $0x7e] sm:$0xff] }
 0x446   : > { %v10631_v12 = vadd.f32 %v10595_v10, %v10416_v33  ;;  %10173 = vst.msk [vmem:[#allocation4 + $0x20] sm:$0xff] %vm2395_vm5, %v10137_v63  ;;  %v15532_v53 = vpop.f32.mrb[190].mxu1  ;;  %v10112_v63 = vld [vmem:[#allocation4 + $0x78] sm:$0xff] }
 0x447   : > { %v15588_v46 = vpop.f32.mrb[218].mxu0  ;;  %10668 = vst.msk [vmem:[#allocation4 + $0x8] sm:$0xff] %vm2395_vm5, %v10632_v27  ;;  %v10140_v58 = vadd.f32 %v15532_v53, %v10104_v8  ;;  %v9948_v29 = vpop.f32.mrb[191].mxu1  ;;  %15864 = vmatmul.mubr.msk.f32.gmra.mrb[40].mxu1 %vm2395_vm5, %v12700_v14  ;;  %v12708_v27 = vld [vmem:[#allocation3 + $0x8e] sm:$0xff]  ;;  %v12709_v8 = vld [vmem:[#allocation3 + $0x96] sm:$0xff] }
 0x448   : > { %v10446_v47 = vpop.f32.mrb[219].mxu0  ;;  %15920 = vmatmul.mubr.msk.f32.gmra.mrb[68].mxu0 %vm603_vm1, %v13285_v25  ;;  %10667 = vst.msk [vmem:[#allocation4] sm:$0xff] %vm2395_vm5, %v10631_v12  ;;  %v10598_v43 = vld [vmem:[#allocation4 + $0x18] sm:$0xff]  ;;  %v10139_v31 = vadd.f32 %v10103_v3, %v9948_v29  ;;  %15866 = vmatprep.mubr.msk.f32.mxu1 %vm2395_vm5, %v12701_v30  ;;  %v10111_v12 = vld [vmem:[#allocation4 + $0x70] sm:$0xff]  ;;  %v10114_v30 = vld [vmem:[#allocation4 + $0x88] sm:$0xff] }
 0x449   : > { %15922 = vmatprep.mubr.msk.f32.mxu0 %vm603_vm1, %v13286_v45  ;;  %v10634_v55 = vadd.f32 %v15582_v35, %v10598_v43  ;;  %v10597_v42 = vld [vmem:[#allocation4 + $0x10] sm:$0xff]  ;;  %10176 = vst.msk [vmem:[#allocation4 + $0x38] sm:$0xff] %vm2395_vm5, %v10140_v58 }
 0x44a   : > { %v10633_v23 = vadd.f32 %v10597_v42, %v10426_v0  ;;  %10175 = vst.msk [vmem:[#allocation4 + $0x30] sm:$0xff] %vm2395_vm5, %v10139_v31  ;;  %v15535_v62 = vpop.f32.mrb[192].mxu1  ;;  %v10107_v35 = vld [vmem:[#allocation4 + $0x50] sm:$0xff]  ;;  %v10113_v42 = vld [vmem:[#allocation4 + $0x80] sm:$0xff] }
 0x44b   : > { %v15591_v61 = vpop.f32.mrb[220].mxu0  ;;  %10670 = vst.msk [vmem:[#allocation4 + $0x18] sm:$0xff] %vm2395_vm5, %v10634_v55  ;;  %v10142_v7 = vadd.f32 %v15535_v62, %v10106_v4  ;;  %v9958_v24 = vpop.f32.mrb[193].mxu1  ;;  %15867 = vmatmul.mubr.msk.f32.gmra.mrb[42].mxu1 %vm2395_vm5, %v12702_v28  ;;  %v12710_v31 = vld [vmem:[#allocation3 + $0x9e] sm:$0xff]  ;;  %v12711_v62 = vld [vmem:[#allocation3 + $0xa6] sm:$0xff] }
 0x44c   : > { %v10456_v48 = vpop.f32.mrb[221].mxu0  ;;  %15923 = vmatmul.mubr.msk.f32.gmra.mrb[70].mxu0 %vm603_vm1, %v13287_v54  ;;  %10669 = vst.msk [vmem:[#allocation4 + $0x10] sm:$0xff] %vm2395_vm5, %v10633_v23  ;;  %v10600_v5 = vld [vmem:[#allocation4 + $0x28] sm:$0xff]  ;;  %v10141_v60 = vadd.f32 %v10105_v16, %v9958_v24  ;;  %15869 = vmatprep.mubr.msk.f32.mxu1 %vm2395_vm5, %v12703_v59 }
 0x44d   : > { %v10636_v51 = vadd.f32 %v15585_v20, %v10600_v5  ;;  %v10599_v33 = vld [vmem:[#allocation4 + $0x20] sm:$0xff]  ;;  %10178 = vst.msk [vmem:[#allocation4 + $0x48] sm:$0xff] %vm2395_vm5, %v10142_v7 }
 0x44e   : > { %v10635_v1 = vadd.f32 %v10599_v33, %v10436_v50  ;;  %10177 = vst.msk [vmem:[#allocation4 + $0x40] sm:$0xff] %vm2395_vm5, %v10141_v60  ;;  %v15538_v49 = vpop.f32.mrb[194].mxu1  ;;  %v12712_v5 = vld [vmem:[#allocation3 + $0xae] sm:$0xff]  ;;  %v10115_v33 = vld [vmem:[#allocation4 + $0x90] sm:$0xff] }
 0x44f   : > { %v15594_v39 = vpop.f32.mrb[222].mxu0  ;;  %10672 = vst.msk [vmem:[#allocation4 + $0x28] sm:$0xff] %vm2395_vm5, %v10636_v51  ;;  %v10144_v17 = vadd.f32 %v15538_v49, %v10108_v26  ;;  %v9968_v41 = vpop.f32.mrb[195].mxu1  ;;  %15870 = vmatmul.mubr.msk.f32.gmra.mrb[44].mxu1 %vm2395_vm5, %v12704_v15  ;;  %v12713_v49 = vld [vmem:[#allocation3 + $0xb6] sm:$0xff] }
 0x450   : > { %v10466_v13 = vpop.f32.mrb[223].mxu0  ;;  %10671 = vst.msk [vmem:[#allocation4 + $0x20] sm:$0xff] %vm2395_vm5, %v10635_v1  ;;  %v10602_v57 = vld [vmem:[#allocation4 + $0x38] sm:$0xff]  ;;  %v10143_v21 = vadd.f32 %v10107_v35, %v9968_v41  ;;  %15872 = vmatprep.mubr.msk.f32.mxu1 %vm2395_vm5, %v12705_v2 }
 0x451   : > { %v10638_v34 = vadd.f32 %v15588_v46, %v10602_v57  ;;  %v10601_v36 = vld [vmem:[#allocation4 + $0x30] sm:$0xff]  ;;  %10180 = vst.msk [vmem:[#allocation4 + $0x58] sm:$0xff] %vm2395_vm5, %v10144_v17 }
 0x452   : > { %v10637_v0 = vadd.f32 %v10601_v36, %v10446_v47  ;;  %10179 = vst.msk [vmem:[#allocation4 + $0x50] sm:$0xff] %vm2395_vm5, %v10143_v21  ;;  %v15541_v9 = vpop.f32.mrb[196].mxu1  ;;  %v12714_v57 = vld [vmem:[#allocation3 + $0xbe] sm:$0xff]  ;;  %v10117_v36 = vld [vmem:[#allocation4 + $0xa0] sm:$0xff] }
 0x453   : > { %v15597_v19 = vpop.f32.mrb[224].mxu0  ;;  %10674 = vst.msk [vmem:[#allocation4 + $0x38] sm:$0xff] %vm2395_vm5, %v10638_v34  ;;  %v10146_v37 = vadd.f32 %v15541_v9, %v10110_v56  ;;  %v9978_v6 = vpop.f32.mrb[197].mxu1  ;;  %15873 = vmatmul.mubr.msk.f32.gmra.mrb[46].mxu1 %vm2395_vm5, %v12706_v40  ;;  %v12715_v9 = vld [vmem:[#allocation3 + $0xc6] sm:$0xff] }
 0x454   : > { %v10476_v20 = vpop.f32.mrb[225].mxu0  ;;  %10673 = vst.msk [vmem:[#allocation4 + $0x30] sm:$0xff] %vm2395_vm5, %v10637_v0  ;;  %v10604_v18 = vld [vmem:[#allocation4 + $0x48] sm:$0xff]  ;;  %v10145_v22 = vadd.f32 %v10109_v11, %v9978_v6  ;;  %15875 = vmatprep.mubr.msk.f32.mxu1 %vm2395_vm5, %v12707_v38 }
 0x455   : > { %v10640_v52 = vadd.f32 %v15591_v61, %v10604_v18  ;;  %v10603_v50 = vld [vmem:[#allocation4 + $0x40] sm:$0xff]  ;;  %10182 = vst.msk [vmem:[#allocation4 + $0x68] sm:$0xff] %vm2395_vm5, %v10146_v37 }
 0x456   : > { %v10639_v44 = vadd.f32 %v10603_v50, %v10456_v48  ;;  %10181 = vst.msk [vmem:[#allocation4 + $0x60] sm:$0xff] %vm2395_vm5, %v10145_v22  ;;  %v15544_v32 = vpop.f32.mrb[198].mxu1  ;;  %v10116_v48 = vld [vmem:[#allocation4 + $0x98] sm:$0xff]  ;;  %v10119_v50 = vld [vmem:[#allocation4 + $0xb0] sm:$0xff] }
 0x457   : > { %v15600_v25 = vpop.f32.mrb[226].mxu0  ;;  %10676 = vst.msk [vmem:[#allocation4 + $0x48] sm:$0xff] %vm2395_vm5, %v10640_v52  ;;  %v10148_v10 = vadd.f32 %v15544_v32, %v10112_v63  ;;  %v9988_v45 = vpop.f32.mrb[199].mxu1  ;;  %15876 = vmatmul.mubr.msk.f32.gmra.mrb[48].mxu1 %vm2395_vm5, %v12708_v27  ;;  %v12716_v18 = vld [vmem:[#allocation3 + $0xce] sm:$0xff]  ;;  %v12717_v32 = vld [vmem:[#allocation3 + $0xd6] sm:$0xff] }
 0x458   : > { %v10486_v53 = vpop.f32.mrb[227].mxu0  ;;  %10675 = vst.msk [vmem:[#allocation4 + $0x40] sm:$0xff] %vm2395_vm5, %v10639_v44  ;;  %v10606_v46 = vld [vmem:[#allocation4 + $0x58] sm:$0xff]  ;;  %v10147_v14 = vadd.f32 %v10111_v12, %v9988_v45  ;;  %15878 = vmatprep.mubr.msk.f32.mxu1 %vm2395_vm5, %v12709_v8 }
 0x459   : > { %v10642_v58 = vadd.f32 %v15594_v39, %v10606_v46  ;;  %v10605_v29 = vld [vmem:[#allocation4 + $0x50] sm:$0xff]  ;;  %10184 = vst.msk [vmem:[#allocation4 + $0x78] sm:$0xff] %vm2395_vm5, %v10148_v10 }
 0x45a   : > { %v10641_v3 = vadd.f32 %v10605_v29, %v10466_v13  ;;  %10183 = vst.msk [vmem:[#allocation4 + $0x70] sm:$0xff] %vm2395_vm5, %v10147_v14  ;;  %v15547_v47 = vpop.f32.mrb[200].mxu1  ;;  %v10118_v13 = vld [vmem:[#allocation4 + $0xa8] sm:$0xff]  ;;  %v10121_v29 = vld [vmem:[#allocation4 + $0xc0] sm:$0xff] }
 0x45b   : > { %v15603_v43 = vpop.f32.mrb[228].mxu0  ;;  %10678 = vst.msk [vmem:[#allocation4 + $0x58] sm:$0xff] %vm2395_vm5, %v10642_v58  ;;  %v10150_v54 = vadd.f32 %v15547_v47, %v10114_v30  ;;  %v9998_v55 = vpop.f32.mrb[201].mxu1  ;;  %15879 = vmatmul.mubr.msk.f32.gmra.mrb[50].mxu1 %vm2395_vm5, %v12710_v31  ;;  %v12718_v46 = vld [vmem:[#allocation3 + $0xde] sm:$0xff]  ;;  %v12719_v47 = vld [vmem:[#allocation3 + $0xe6] sm:$0xff] }
 0x45c   : > { %v10496_v23 = vpop.f32.mrb[229].mxu0  ;;  %10677 = vst.msk [vmem:[#allocation4 + $0x50] sm:$0xff] %vm2395_vm5, %v10641_v3  ;;  %v10608_v4 = vld [vmem:[#allocation4 + $0x68] sm:$0xff]  ;;  %v10149_v61 = vadd.f32 %v10113_v42, %v9998_v55  ;;  %15881 = vmatprep.mubr.msk.f32.mxu1 %vm2395_vm5, %v12711_v62 }
 0x45d   : > { %v10644_v28 = vadd.f32 %v15597_v19, %v10608_v4  ;;  %v10607_v7 = vld [vmem:[#allocation4 + $0x60] sm:$0xff]  ;;  %10186 = vst.msk [vmem:[#allocation4 + $0x88] sm:$0xff] %vm2395_vm5, %v10150_v54 }
 0x45e   : > { %v10643_v24 = vadd.f32 %v10607_v7, %v10476_v20  ;;  %10185 = vst.msk [vmem:[#allocation4 + $0x80] sm:$0xff] %vm2395_vm5, %v10149_v61  ;;  %v15550_v16 = vpop.f32.mrb[202].mxu1  ;;  %v10120_v20 = vld [vmem:[#allocation4 + $0xb8] sm:$0xff]  ;;  %v10123_v7 = vld [vmem:[#allocation4 + $0xd0] sm:$0xff] }
 0x45f   : > { %v15606_v59 = vpop.f32.mrb[230].mxu0  ;;  %10680 = vst.msk [vmem:[#allocation4 + $0x68] sm:$0xff] %vm2395_vm5, %v10644_v28  ;;  %v10152_v60 = vadd.f32 %v15550_v16, %v10116_v48  ;;  %v10008_v51 = vpop.f32.mrb[203].mxu1  ;;  %15882 = vmatmul.mubr.msk.f32.gmra.mrb[52].mxu1 %vm2395_vm5, %v12712_v5  ;;  %v12720_v4 = vld [vmem:[#allocation3 + $0xee] sm:$0xff]  ;;  %v12721_v16 = vld [vmem:[#allocation3 + $0xf6] sm:$0xff] }
 0x460   : > { %v10506_v1 = vpop.f32.mrb[231].mxu0  ;;  %10679 = vst.msk [vmem:[#allocation4 + $0x60] sm:$0xff] %vm2395_vm5, %v10643_v24  ;;  %v10610_v26 = vld [vmem:[#allocation4 + $0x78] sm:$0xff]  ;;  %v10151_v39 = vadd.f32 %v10115_v33, %v10008_v51  ;;  %15884 = vmatprep.mubr.msk.f32.mxu1 %vm2395_vm5, %v12713_v49 }
 0x461   : > { %v10646_v15 = vadd.f32 %v15600_v25, %v10610_v26  ;;  %v10609_v17 = vld [vmem:[#allocation4 + $0x70] sm:$0xff]  ;;  %10188 = vst.msk [vmem:[#allocation4 + $0x98] sm:$0xff] %vm2395_vm5, %v10152_v60 }
 0x462   : > { %v10645_v41 = vadd.f32 %v10609_v17, %v10486_v53  ;;  %10187 = vst.msk [vmem:[#allocation4 + $0x90] sm:$0xff] %vm2395_vm5, %v10151_v39  ;;  %v15553_v35 = vpop.f32.mrb[204].mxu1  ;;  %v10122_v53 = vld [vmem:[#allocation4 + $0xc8] sm:$0xff]  ;;  %v10125_v17 = vld [vmem:[#allocation4 + $0xe0] sm:$0xff] }
 0x463   : > { %v15609_v2 = vpop.f32.mrb[232].mxu0  ;;  %10682 = vst.msk [vmem:[#allocation4 + $0x78] sm:$0xff] %vm2395_vm5, %v10646_v15  ;;  %v10154_v21 = vadd.f32 %v15553_v35, %v10118_v13  ;;  %v10018_v34 = vpop.f32.mrb[205].mxu1  ;;  %15885 = vmatmul.mubr.msk.f32.gmra.mrb[54].mxu1 %vm2395_vm5, %v12714_v57  ;;  %v12722_v26 = vld [vmem:[#allocation3 + $0xfe] sm:$0xff]  ;;  %v12723_v35 = vld [vmem:[#allocation3 + $0x106] sm:$0xff] }
 0x464   : > { %v10516_v0 = vpop.f32.mrb[233].mxu0  ;;  %10681 = vst.msk [vmem:[#allocation4 + $0x70] sm:$0xff] %vm2395_vm5, %v10645_v41  ;;  %v10612_v56 = vld [vmem:[#allocation4 + $0x88] sm:$0xff]  ;;  %v10153_v19 = vadd.f32 %v10117_v36, %v10018_v34  ;;  %15887 = vmatprep.mubr.msk.f32.mxu1 %vm2395_vm5, %v12715_v9 }
 0x465   : > { %v10648_v40 = vadd.f32 %v15603_v43, %v10612_v56  ;;  %v10611_v37 = vld [vmem:[#allocation4 + $0x80] sm:$0xff]  ;;  %10190 = vst.msk [vmem:[#allocation4 + $0xa8] sm:$0xff] %vm2395_vm5, %v10154_v21 }
 0x466   : > { %v10647_v6 = vadd.f32 %v10611_v37, %v10496_v23  ;;  %10189 = vst.msk [vmem:[#allocation4 + $0xa0] sm:$0xff] %vm2395_vm5, %v10153_v19  ;;  %v15556_v11 = vpop.f32.mrb[206].mxu1  ;;  %v10124_v23 = vld [vmem:[#allocation4 + $0xd8] sm:$0xff]  ;;  %v10127_v37 = vld [vmem:[#allocation4 + $0xf0] sm:$0xff] }
 0x467   : > { %v15612_v38 = vpop.f32.mrb[234].mxu0  ;;  %10684 = vst.msk [vmem:[#allocation4 + $0x88] sm:$0xff] %vm2395_vm5, %v10648_v40  ;;  %v10156_v22 = vadd.f32 %v15556_v11, %v10120_v20  ;;  %v10028_v52 = vpop.f32.mrb[207].mxu1  ;;  %15888 = vmatmul.mubr.msk.f32.gmra.mrb[56].mxu1 %vm2395_vm5, %v12716_v18  ;;  %v12724_v56 = vld [vmem:[#allocation3 + $0x10e] sm:$0xff]  ;;  %v12725_v11 = vld [vmem:[#allocation3 + $0x116] sm:$0xff] }
 0x468   : > { %v10526_v44 = vpop.f32.mrb[235].mxu0  ;;  %10683 = vst.msk [vmem:[#allocation4 + $0x80] sm:$0xff] %vm2395_vm5, %v10647_v6  ;;  %v10614_v63 = vld [vmem:[#allocation4 + $0x98] sm:$0xff]  ;;  %v10155_v25 = vadd.f32 %v10119_v50, %v10028_v52  ;;  %15890 = vmatprep.mubr.msk.f32.mxu1 %vm2395_vm5, %v12717_v32 }
 0x469   : > { %v10650_v27 = vadd.f32 %v15606_v59, %v10614_v63  ;;  %v10613_v10 = vld [vmem:[#allocation4 + $0x90] sm:$0xff]  ;;  %10192 = vst.msk [vmem:[#allocation4 + $0xb8] sm:$0xff] %vm2395_vm5, %v10156_v22 }
 0x46a   : > { %v10649_v45 = vadd.f32 %v10613_v10, %v10506_v1  ;;  %10191 = vst.msk [vmem:[#allocation4 + $0xb0] sm:$0xff] %vm2395_vm5, %v10155_v25  ;;  %v15559_v12 = vpop.f32.mrb[208].mxu1  ;;  %v10126_v1 = vld [vmem:[#allocation4 + $0xe8] sm:$0xff]  ;;  %v10129_v10 = vld [vmem:[#allocation4 + $0x100] sm:$0xff] }
 0x46b   : > { %v15615_v8 = vpop.f32.mrb[236].mxu0  ;;  %10686 = vst.msk [vmem:[#allocation4 + $0x98] sm:$0xff] %vm2395_vm5, %v10650_v27  ;;  %v10158_v14 = vadd.f32 %v15559_v12, %v10122_v53  ;;  %v10038_v58 = vpop.f32.mrb[209].mxu1  ;;  %15891 = vmatmul.mubr.msk.f32.gmra.mrb[58].mxu1 %vm2395_vm5, %v12718_v46  ;;  %v12726_v63 = vld [vmem:[#allocation3 + $0x11e] sm:$0xff]  ;;  %v12727_v12 = vld [vmem:[#allocation3 + $0x126] sm:$0xff] }
 0x46c   : > { %v10536_v3 = vpop.f32.mrb[237].mxu0  ;;  %10685 = vst.msk [vmem:[#allocation4 + $0x90] sm:$0xff] %vm2395_vm5, %v10649_v45  ;;  %v10616_v30 = vld [vmem:[#allocation4 + $0xa8] sm:$0xff]  ;;  %v10157_v43 = vadd.f32 %v10121_v29, %v10038_v58  ;;  %15893 = vmatprep.mubr.msk.f32.mxu1 %vm2395_vm5, %v12719_v47  ;;  %v10132_v47 = vld [vmem:[#allocation4 + $0x118] sm:$0xff] }
 0x46d   : > { %v10652_v31 = vadd.f32 %v15609_v2, %v10616_v30  ;;  %v10615_v54 = vld [vmem:[#allocation4 + $0xa0] sm:$0xff]  ;;  %10194 = vst.msk [vmem:[#allocation4 + $0xc8] sm:$0xff] %vm2395_vm5, %v10158_v14 }
 0x46e   : > { %v10651_v55 = vadd.f32 %v10615_v54, %v10516_v0  ;;  %10193 = vst.msk [vmem:[#allocation4 + $0xc0] sm:$0xff] %vm2395_vm5, %v10157_v43  ;;  %v15562_v42 = vpop.f32.mrb[210].mxu1  ;;  %v10128_v0 = vld [vmem:[#allocation4 + $0xf8] sm:$0xff]  ;;  %v12729_v58 = vld [vmem:[#allocation3 + $0x136] sm:$0xff] }
 0x46f   : > { %v15618_v62 = vpop.f32.mrb[238].mxu0  ;;  %10688 = vst.msk [vmem:[#allocation4 + $0xa8] sm:$0xff] %vm2395_vm5, %v10652_v31  ;;  %v10160_v61 = vadd.f32 %v15562_v42, %v10124_v23  ;;  %v10048_v28 = vpop.f32.mrb[211].mxu1  ;;  %15894 = vmatmul.mubr.msk.f32.gmra.mrb[60].mxu1 %vm2395_vm5, %v12720_v4  ;;  %v12728_v43 = vld [vmem:[#allocation3 + $0x12e] sm:$0xff]  ;;  %v12730_v4 = vld [vmem:[#allocation3 + $0x13e] sm:$0xff] }
 0x470   : > { %v10546_v24 = vpop.f32.mrb[239].mxu0  ;;  %10687 = vst.msk [vmem:[#allocation4 + $0xa0] sm:$0xff] %vm2395_vm5, %v10651_v55  ;;  %v10618_v48 = vld [vmem:[#allocation4 + $0xb8] sm:$0xff]  ;;  %v10159_v59 = vadd.f32 %v10123_v7, %v10048_v28  ;;  %15896 = vmatprep.mubr.msk.f32.mxu1 %vm2395_vm5, %v12721_v16  ;;  %v10131_v55 = vld [vmem:[#allocation4 + $0x110] sm:$0xff]  ;;  %v11094_v16 = vld [vmem:[#allocation4 + $0x8] sm:$0xff] }
 0x471   : > { %v10654_v5 = vadd.f32 %v15612_v38, %v10618_v48  ;;  %v10617_v60 = vld [vmem:[#allocation4 + $0xb0] sm:$0xff]  ;;  %10196 = vst.msk [vmem:[#allocation4 + $0xd8] sm:$0xff] %vm2395_vm5, %v10160_v61 }
 0x472   : > { %v10653_v51 = vadd.f32 %v10617_v60, %v10526_v44  ;;  %10195 = vst.msk [vmem:[#allocation4 + $0xd0] sm:$0xff] %vm2395_vm5, %v10159_v59  ;;  %v15565_v33 = vpop.f32.mrb[212].mxu1  ;;  %v10130_v44 = vld [vmem:[#allocation4 + $0x108] sm:$0xff]  ;;  %v11093_v60 = vld [vmem:[#allocation4] sm:$0xff] }
 0x473   : > { %v15621_v49 = vpop.f32.mrb[240].mxu0  ;;  %10690 = vst.msk [vmem:[#allocation4 + $0xb8] sm:$0xff] %vm2395_vm5, %v10654_v5  ;;  %v10162_v39 = vadd.f32 %v15565_v33, %v10126_v1  ;;  %v10058_v15 = vpop.f32.mrb[213].mxu1  ;;  %15897 = vmatmul.mubr.msk.f32.gmra.mrb[62].mxu1 %vm2395_vm5, %v12722_v26 }
 0x474   : > { %v10556_v41 = vpop.f32.mrb[241].mxu0  ;;  %10689 = vst.msk [vmem:[#allocation4 + $0xb0] sm:$0xff] %vm2395_vm5, %v10653_v51  ;;  %v10620_v13 = vld [vmem:[#allocation4 + $0xc8] sm:$0xff]  ;;  %v10161_v2 = vadd.f32 %v10125_v17, %v10058_v15  ;;  %15899 = vmatprep.mubr.msk.f32.mxu1 %vm2395_vm5, %v12723_v35  ;;  %v11096_v17 = vld [vmem:[#allocation4 + $0x18] sm:$0xff] }
 0x475   : > { %v10656_v57 = vadd.f32 %v15615_v8, %v10620_v13  ;;  %v10619_v21 = vld [vmem:[#allocation4 + $0xc0] sm:$0xff]  ;;  %10198 = vst.msk [vmem:[#allocation4 + $0xe8] sm:$0xff] %vm2395_vm5, %v10162_v39 }
 0x476   : > { %v10655_v34 = vadd.f32 %v10619_v21, %v10536_v3  ;;  %10197 = vst.msk [vmem:[#allocation4 + $0xe0] sm:$0xff] %vm2395_vm5, %v10161_v2  ;;  %v15568_v36 = vpop.f32.mrb[214].mxu1  ;;  %v11095_v2 = vld [vmem:[#allocation4 + $0x10] sm:$0xff] }
 0x477   : > { %v15624_v9 = vpop.f32.mrb[242].mxu0  ;;  %10692 = vst.msk [vmem:[#allocation4 + $0xc8] sm:$0xff] %vm2395_vm5, %v10656_v57  ;;  %v10164_v19 = vadd.f32 %v15568_v36, %v10128_v0  ;;  %v10068_v40 = vpop.f32.mrb[215].mxu1  ;;  %15900 = vmatmul.mubr.msk.f32.gmra.mrb[64].mxu1 %vm2395_vm5, %v12724_v56 }
 0x478   : > { %v10566_v6 = vpop.f32.mrb[243].mxu0  ;;  %10691 = vst.msk [vmem:[#allocation4 + $0xc0] sm:$0xff] %vm2395_vm5, %v10655_v34  ;;  %v10622_v20 = vld [vmem:[#allocation4 + $0xd8] sm:$0xff]  ;;  %v10163_v38 = vadd.f32 %v10127_v37, %v10068_v40  ;;  %15902 = vmatprep.mubr.msk.f32.mxu1 %vm2395_vm5, %v12725_v11  ;;  %v11097_v11 = vld [vmem:[#allocation4 + $0x20] sm:$0xff] }
 0x479   : > { %v10658_v18 = vadd.f32 %v15618_v62, %v10622_v20  ;;  %v10621_v22 = vld [vmem:[#allocation4 + $0xd0] sm:$0xff]  ;;  %10200 = vst.msk [vmem:[#allocation4 + $0xf8] sm:$0xff] %vm2395_vm5, %v10164_v19  ;;  %v11098_v19 = vld [vmem:[#allocation4 + $0x28] sm:$0xff] }
 0x47a   : > { %v10657_v52 = vadd.f32 %v10621_v22, %v10546_v24  ;;  %10199 = vst.msk [vmem:[#allocation4 + $0xf0] sm:$0xff] %vm2395_vm5, %v10163_v38  ;;  %v15571_v50 = vpop.f32.mrb[216].mxu1 }
 0x47b   : > { %v15627_v32 = vpop.f32.mrb[244].mxu0  ;;  %10694 = vst.msk [vmem:[#allocation4 + $0xd8] sm:$0xff] %vm2395_vm5, %v10658_v18  ;;  %v10166_v25 = vadd.f32 %v15571_v50, %v10130_v44  ;;  %v10078_v27 = vpop.f32.mrb[217].mxu1  ;;  %15903 = vmatmul.mubr.msk.f32.gmra.mrb[66].mxu1 %vm2395_vm5, %v12726_v63 }
 0x47c   : > { %v10576_v45 = vpop.f32.mrb[245].mxu0  ;;  %10693 = vst.msk [vmem:[#allocation4 + $0xd0] sm:$0xff] %vm2395_vm5, %v10657_v52  ;;  %v10624_v53 = vld [vmem:[#allocation4 + $0xe8] sm:$0xff]  ;;  %v10165_v8 = vadd.f32 %v10129_v10, %v10078_v27  ;;  %15905 = vmatprep.mubr.msk.f32.mxu1 %vm2395_vm5, %v12727_v12  ;;  %v11099_v10 = vld [vmem:[#allocation4 + $0x30] sm:$0xff] }
 0x47d   : > { %v10660_v46 = vadd.f32 %v15621_v49, %v10624_v53  ;;  %v10623_v14 = vld [vmem:[#allocation4 + $0xe0] sm:$0xff]  ;;  %10202 = vst.msk [vmem:[#allocation4 + $0x108] sm:$0xff] %vm2395_vm5, %v10166_v25 }
 0x47e   : > { %v10659_v29 = vadd.f32 %v10623_v14, %v10556_v41  ;;  %10201 = vst.msk [vmem:[#allocation4 + $0x100] sm:$0xff] %vm2395_vm5, %v10165_v8  ;;  %v15574_v3 = vpop.f32.mrb[218].mxu1 }
 0x47f   : > { %v15630_v30 = vpop.f32.mrb[246].mxu0  ;;  %10696 = vst.msk [vmem:[#allocation4 + $0xe8] sm:$0xff] %vm2395_vm5, %v10660_v46  ;;  %v10168_v31 = vadd.f32 %v15574_v3, %v10132_v47  ;;  %v10088_v54 = vpop.f32.mrb[219].mxu1  ;;  %15906 = vmatmul.mubr.msk.f32.gmra.mrb[68].mxu1 %vm2395_vm5, %v12728_v43  ;;  %v11101_v43 = vld [vmem:[#allocation4 + $0x40] sm:$0xff] }
 0x480   : > { %v10586_v42 = vpop.f32.mrb[247].mxu0  ;;  %10695 = vst.msk [vmem:[#allocation4 + $0xe0] sm:$0xff] %vm2395_vm5, %v10659_v29  ;;  %v10626_v23 = vld [vmem:[#allocation4 + $0xf8] sm:$0xff]  ;;  %v10167_v62 = vadd.f32 %v10131_v55, %v10088_v54  ;;  %15908 = vmatprep.mubr.msk.f32.mxu1 %vm2395_vm5, %v12729_v58  ;;  %v11102_v29 = vld [vmem:[#allocation4 + $0x48] sm:$0xff] }
 0x481   : > { %v10662_v61 = vadd.f32 %v15624_v9, %v10626_v23  ;;  %v10625_v28 = vld [vmem:[#allocation4 + $0xf0] sm:$0xff]  ;;  %10204 = vst.msk [vmem:[#allocation4 + $0x118] sm:$0xff] %vm2395_vm5, %v10168_v31 }
 0x482   : > { %v10661_v7 = vadd.f32 %v10625_v28, %v10566_v6  ;;  %10203 = vst.msk [vmem:[#allocation4 + $0x110] sm:$0xff] %vm2395_vm5, %v10167_v62  ;;  %v15635_v24 = vpop.f32.mrb[220].mxu1 }
 0x483   : > { %v15691_v48 = vpop.f32.mrb[248].mxu0  ;;  %10698 = vst.msk [vmem:[#allocation4 + $0xf8] sm:$0xff] %vm2395_vm5, %v10662_v61  ;;  %v11130_v59 = vadd.f32 %v15635_v24, %v11094_v16  ;;  %v10914_v5 = vpop.f32.mrb[221].mxu1  ;;  %15909 = vmatmul.mubr.msk.f32.gmra.mrb[70].mxu1 %vm2395_vm5, %v12730_v4  ;;  %v11104_v61 = vld [vmem:[#allocation4 + $0x58] sm:$0xff]  ;;  %v11103_v16 = vld [vmem:[#allocation4 + $0x50] sm:$0xff] }
 0x484   : > { %v11412_v51 = vpop.f32.mrb[249].mxu0  ;;  %10697 = vst.msk [vmem:[#allocation4 + $0xf0] sm:$0xff] %vm2395_vm5, %v10661_v7  ;;  %v10628_v33 = vld [vmem:[#allocation4 + $0x108] sm:$0xff]  ;;  %v11129_v1 = vadd.f32 %v11093_v60, %v10914_v5 }
 0x485   : > { %v10664_v49 = vadd.f32 %v15627_v32, %v10628_v33  ;;  %v10627_v26 = vld [vmem:[#allocation4 + $0x100] sm:$0xff]  ;;  %11166 = vst.msk [vmem:[#allocation4 + $0x8] sm:$0xff] %vm2395_vm5, %v11130_v59  ;;  %v11100_v32 = vld [vmem:[#allocation4 + $0x38] sm:$0xff] }
 0x486   : > { %v10663_v39 = vadd.f32 %v10627_v26, %v10576_v45  ;;  %11165 = vst.msk [vmem:[#allocation4] sm:$0xff] %vm2395_vm5, %v11129_v1  ;;  %v15638_v15 = vpop.f32.mrb[222].mxu1 }
 0x487   : > { %v15694_v41 = vpop.f32.mrb[250].mxu0  ;;  %10700 = vst.msk [vmem:[#allocation4 + $0x108] sm:$0xff] %vm2395_vm5, %v10664_v49  ;;  %v11132_v35 = vadd.f32 %v15638_v15, %v11096_v17  ;;  %v10924_v13 = vpop.f32.mrb[223].mxu1  ;;  %v11106_v49 = vld [vmem:[#allocation4 + $0x68] sm:$0xff]  ;;  %v11105_v17 = vld [vmem:[#allocation4 + $0x60] sm:$0xff] }
 0x488   : > { %v11422_v57 = vpop.f32.mrb[251].mxu0  ;;  %10699 = vst.msk [vmem:[#allocation4 + $0x100] sm:$0xff] %vm2395_vm5, %v10663_v39  ;;  %v10630_v21 = vld [vmem:[#allocation4 + $0x118] sm:$0xff]  ;;  %v11131_v34 = vadd.f32 %v11095_v2, %v10924_v13 }
 0x489   : > { %v10666_v36 = vadd.f32 %v15630_v30, %v10630_v21  ;;  %v10629_v0 = vld [vmem:[#allocation4 + $0x110] sm:$0xff]  ;;  %11168 = vst.msk [vmem:[#allocation4 + $0x18] sm:$0xff] %vm2395_vm5, %v11132_v35 }
 0x48a   : > { %v10665_v9 = vadd.f32 %v10629_v0, %v10586_v42  ;;  %11167 = vst.msk [vmem:[#allocation4 + $0x10] sm:$0xff] %vm2395_vm5, %v11131_v34  ;;  %v15641_v56 = vpop.f32.mrb[224].mxu1 }
 0x48b   : > { %v15697_v40 = vpop.f32.mrb[252].mxu0  ;;  %10702 = vst.msk [vmem:[#allocation4 + $0x118] sm:$0xff] %vm2395_vm5, %v10666_v36  ;;  %v11134_v37 = vadd.f32 %v15641_v56, %v11098_v19  ;;  %v10934_v6 = vpop.f32.mrb[225].mxu1  ;;  %v11108_v36 = vld [vmem:[#allocation4 + $0x78] sm:$0xff]  ;;  %v11107_v19 = vld [vmem:[#allocation4 + $0x70] sm:$0xff] }
 0x48c   : > { %v11432_v20 = vpop.f32.mrb[253].mxu0  ;;  %10701 = vst.msk [vmem:[#allocation4 + $0x110] sm:$0xff] %vm2395_vm5, %v10665_v9  ;;  %v11592_v38 = vld [vmem:[#allocation4 + $0x8] sm:$0xff]  ;;  %v11133_v18 = vadd.f32 %v11097_v11, %v10934_v6 }
 0x48d   : > { %v11628_v22 = vadd.f32 %v15691_v48, %v11592_v38  ;;  %v11591_v52 = vld [vmem:[#allocation4] sm:$0xff]  ;;  %11170 = vst.msk [vmem:[#allocation4 + $0x28] sm:$0xff] %vm2395_vm5, %v11134_v37 }
 0x48e   : > { %v11627_v50 = vadd.f32 %v11591_v52, %v11412_v51  ;;  %11169 = vst.msk [vmem:[#allocation4 + $0x20] sm:$0xff] %vm2395_vm5, %v11133_v18  ;;  %v15644_v44 = vpop.f32.mrb[226].mxu1 }
 0x48f   : > { %v15700_v63 = vpop.f32.mrb[254].mxu0  ;;  %11664 = vst.msk [vmem:[#allocation4 + $0x8] sm:$0xff] %vm2395_vm5, %v11628_v22  ;;  %v11136_v25 = vadd.f32 %v15644_v44, %v11100_v32  ;;  %v10944_v27 = vpop.f32.mrb[227].mxu1  ;;  %v11110_v22 = vld [vmem:[#allocation4 + $0x88] sm:$0xff]  ;;  %v11109_v32 = vld [vmem:[#allocation4 + $0x80] sm:$0xff] }
 0x490   : > { %v11442_v45 = vpop.f32.mrb[255].mxu0  ;;  %11663 = vst.msk [vmem:[#allocation4] sm:$0xff] %vm2395_vm5, %v11627_v50  ;;  %v11594_v12 = vld [vmem:[#allocation4 + $0x18] sm:$0xff]  ;;  %v11135_v53 = vadd.f32 %v11099_v10, %v10944_v27 }
 0x491   : > { %v11630_v8 = vadd.f32 %v15694_v41, %v11594_v12  ;;  %v11593_v46 = vld [vmem:[#allocation4 + $0x10] sm:$0xff]  ;;  %11172 = vst.msk [vmem:[#allocation4 + $0x38] sm:$0xff] %vm2395_vm5, %v11136_v25 }
 0x492   : > { %v11629_v14 = vadd.f32 %v11593_v46, %v11422_v57  ;;  %11171 = vst.msk [vmem:[#allocation4 + $0x30] sm:$0xff] %vm2395_vm5, %v11135_v53  ;;  %v15647_v58 = vpop.f32.mrb[228].mxu1 }
 0x493   : > { %v15703_v3 = vpop.f32.mrb[0].mxu0  ;;  %11666 = vst.msk [vmem:[#allocation4 + $0x18] sm:$0xff] %vm2395_vm5, %v11630_v8  ;;  %v11138_v47 = vadd.f32 %v15647_v58, %v11102_v29  ;;  %v10954_v30 = vpop.f32.mrb[229].mxu1  ;;  %v11112_v8 = vld [vmem:[#allocation4 + $0x98] sm:$0xff]  ;;  %v11111_v29 = vld [vmem:[#allocation4 + $0x90] sm:$0xff] }
 0x494   : > { %v11452_v31 = vpop.f32.mrb[1].mxu0  ;;  %11665 = vst.msk [vmem:[#allocation4 + $0x10] sm:$0xff] %vm2395_vm5, %v11629_v14  ;;  %v11596_v54 = vld [vmem:[#allocation4 + $0x28] sm:$0xff]  ;;  %v11137_v55 = vadd.f32 %v11101_v43, %v10954_v30 }
 0x495   : > { %v11632_v42 = vadd.f32 %v15697_v40, %v11596_v54  ;;  %v11595_v23 = vld [vmem:[#allocation4 + $0x20] sm:$0xff]  ;;  %11174 = vst.msk [vmem:[#allocation4 + $0x48] sm:$0xff] %vm2395_vm5, %v11138_v47 }
 0x496   : > { %v11631_v62 = vadd.f32 %v11595_v23, %v11432_v20  ;;  %11173 = vst.msk [vmem:[#allocation4 + $0x40] sm:$0xff] %vm2395_vm5, %v11137_v55  ;;  %v15650_v4 = vpop.f32.mrb[230].mxu1 }
 0x497   : > { %v15706_v28 = vpop.f32.mrb[2].mxu0  ;;  %11668 = vst.msk [vmem:[#allocation4 + $0x28] sm:$0xff] %vm2395_vm5, %v11632_v42  ;;  %v11140_v7 = vadd.f32 %v15650_v4, %v11104_v61  ;;  %v10964_v24 = vpop.f32.mrb[231].mxu1  ;;  %v11114_v42 = vld [vmem:[#allocation4 + $0xa8] sm:$0xff]  ;;  %v11113_v61 = vld [vmem:[#allocation4 + $0xa0] sm:$0xff] }
 0x498   : > { %v11462_v48 = vpop.f32.mrb[3].mxu0  ;;  %11667 = vst.msk [vmem:[#allocation4 + $0x20] sm:$0xff] %vm2395_vm5, %v11631_v62  ;;  %v11598_v59 = vld [vmem:[#allocation4 + $0x38] sm:$0xff]  ;;  %v11139_v5 = vadd.f32 %v11103_v16, %v10964_v24 }
 0x499   : > { %v11634_v60 = vadd.f32 %v15700_v63, %v11598_v59  ;;  %v11597_v51 = vld [vmem:[#allocation4 + $0x30] sm:$0xff]  ;;  %11176 = vst.msk [vmem:[#allocation4 + $0x58] sm:$0xff] %vm2395_vm5, %v11140_v7 }
 0x49a   : > { %v11633_v33 = vadd.f32 %v11597_v51, %v11442_v45  ;;  %11175 = vst.msk [vmem:[#allocation4 + $0x50] sm:$0xff] %vm2395_vm5, %v11139_v5  ;;  %v15653_v1 = vpop.f32.mrb[232].mxu1 }
 0x49b   : > { %v15709_v26 = vpop.f32.mrb[4].mxu0  ;;  %11670 = vst.msk [vmem:[#allocation4 + $0x38] sm:$0xff] %vm2395_vm5, %v11634_v60  ;;  %v11142_v39 = vadd.f32 %v15653_v1, %v11106_v49  ;;  %v10974_v15 = vpop.f32.mrb[233].mxu1  ;;  %v11116_v60 = vld [vmem:[#allocation4 + $0xb8] sm:$0xff]  ;;  %v11115_v49 = vld [vmem:[#allocation4 + $0xb0] sm:$0xff] }
 0x49c   : > { %v11472_v41 = vpop.f32.mrb[5].mxu0  ;;  %11669 = vst.msk [vmem:[#allocation4 + $0x30] sm:$0xff] %vm2395_vm5, %v11633_v33  ;;  %v11600_v35 = vld [vmem:[#allocation4 + $0x48] sm:$0xff]  ;;  %v11141_v13 = vadd.f32 %v11105_v17, %v10974_v15 }
 0x49d   : > { %v11636_v2 = vadd.f32 %v15703_v3, %v11600_v35  ;;  %v11599_v57 = vld [vmem:[#allocation4 + $0x40] sm:$0xff]  ;;  %11178 = vst.msk [vmem:[#allocation4 + $0x68] sm:$0xff] %vm2395_vm5, %v11142_v39 }
 0x49e   : > { %v11635_v21 = vadd.f32 %v11599_v57, %v11452_v31  ;;  %11177 = vst.msk [vmem:[#allocation4 + $0x60] sm:$0xff] %vm2395_vm5, %v11141_v13  ;;  %v15656_v34 = vpop.f32.mrb[234].mxu1 }
 0x49f   : > { %v15712_v0 = vpop.f32.mrb[6].mxu0  ;;  %11672 = vst.msk [vmem:[#allocation4 + $0x48] sm:$0xff] %vm2395_vm5, %v11636_v2  ;;  %v11144_v9 = vadd.f32 %v15656_v34, %v11108_v36  ;;  %v10984_v56 = vpop.f32.mrb[235].mxu1  ;;  %v11118_v2 = vld [vmem:[#allocation4 + $0xc8] sm:$0xff]  ;;  %v11117_v36 = vld [vmem:[#allocation4 + $0xc0] sm:$0xff] }
 0x4a0   : > { %v11482_v40 = vpop.f32.mrb[7].mxu0  ;;  %11671 = vst.msk [vmem:[#allocation4 + $0x40] sm:$0xff] %vm2395_vm5, %v11635_v21  ;;  %v11602_v37 = vld [vmem:[#allocation4 + $0x58] sm:$0xff]  ;;  %v11143_v6 = vadd.f32 %v11107_v19, %v10984_v56 }
 0x4a1   : > { %v11638_v11 = vadd.f32 %v15706_v28, %v11602_v37  ;;  %v11601_v20 = vld [vmem:[#allocation4 + $0x50] sm:$0xff]  ;;  %11180 = vst.msk [vmem:[#allocation4 + $0x78] sm:$0xff] %vm2395_vm5, %v11144_v9 }
 0x4a2   : > { %v11637_v38 = vadd.f32 %v11601_v20, %v11462_v48  ;;  %11179 = vst.msk [vmem:[#allocation4 + $0x70] sm:$0xff] %vm2395_vm5, %v11143_v6  ;;  %v15659_v18 = vpop.f32.mrb[236].mxu1 }
 0x4a3   : > { %v15715_v52 = vpop.f32.mrb[8].mxu0  ;;  %11674 = vst.msk [vmem:[#allocation4 + $0x58] sm:$0xff] %vm2395_vm5, %v11638_v11  ;;  %v11146_v50 = vadd.f32 %v15659_v18, %v11110_v22  ;;  %v10994_v44 = vpop.f32.mrb[237].mxu1  ;;  %v11120_v11 = vld [vmem:[#allocation4 + $0xd8] sm:$0xff]  ;;  %v11119_v22 = vld [vmem:[#allocation4 + $0xd0] sm:$0xff] }
 0x4a4   : > { %v11492_v63 = vpop.f32.mrb[9].mxu0  ;;  %11673 = vst.msk [vmem:[#allocation4 + $0x50] sm:$0xff] %vm2395_vm5, %v11637_v38  ;;  %v11604_v25 = vld [vmem:[#allocation4 + $0x68] sm:$0xff]  ;;  %v11145_v27 = vadd.f32 %v11109_v32, %v10994_v44 }
 0x4a5   : > { %v11640_v10 = vadd.f32 %v15709_v26, %v11604_v25  ;;  %v11603_v45 = vld [vmem:[#allocation4 + $0x60] sm:$0xff]  ;;  %11182 = vst.msk [vmem:[#allocation4 + $0x88] sm:$0xff] %vm2395_vm5, %v11146_v50 }
 0x4a6   : > { %v11639_v12 = vadd.f32 %v11603_v45, %v11472_v41  ;;  %11181 = vst.msk [vmem:[#allocation4 + $0x80] sm:$0xff] %vm2395_vm5, %v11145_v27  ;;  %v15662_v53 = vpop.f32.mrb[238].mxu1 }
 0x4a7   : > { %v15718_v46 = vpop.f32.mrb[10].mxu0  ;;  %11676 = vst.msk [vmem:[#allocation4 + $0x68] sm:$0xff] %vm2395_vm5, %v11640_v10  ;;  %v11148_v14 = vadd.f32 %v15662_v53, %v11112_v8  ;;  %v11004_v58 = vpop.f32.mrb[239].mxu1  ;;  %v11122_v10 = vld [vmem:[#allocation4 + $0xe8] sm:$0xff]  ;;  %v11121_v8 = vld [vmem:[#allocation4 + $0xe0] sm:$0xff] }
 0x4a8   : > { %v11502_v3 = vpop.f32.mrb[11].mxu0  ;;  %11675 = vst.msk [vmem:[#allocation4 + $0x60] sm:$0xff] %vm2395_vm5, %v11639_v12  ;;  %v11606_v47 = vld [vmem:[#allocation4 + $0x78] sm:$0xff]  ;;  %v11147_v30 = vadd.f32 %v11111_v29, %v11004_v58 }
 0x4a9   : > { %v11642_v43 = vadd.f32 %v15712_v0, %v11606_v47  ;;  %v11605_v31 = vld [vmem:[#allocation4 + $0x70] sm:$0xff]  ;;  %11184 = vst.msk [vmem:[#allocation4 + $0x98] sm:$0xff] %vm2395_vm5, %v11148_v14 }
 0x4aa   : > { %v11641_v54 = vadd.f32 %v11605_v31, %v11482_v40  ;;  %11183 = vst.msk [vmem:[#allocation4 + $0x90] sm:$0xff] %vm2395_vm5, %v11147_v30  ;;  %v15665_v55 = vpop.f32.mrb[240].mxu1 }
 0x4ab   : > { %v15721_v23 = vpop.f32.mrb[12].mxu0  ;;  %11678 = vst.msk [vmem:[#allocation4 + $0x78] sm:$0xff] %vm2395_vm5, %v11642_v43  ;;  %v11150_v62 = vadd.f32 %v15665_v55, %v11114_v42  ;;  %v11014_v4 = vpop.f32.mrb[241].mxu1  ;;  %v11124_v43 = vld [vmem:[#allocation4 + $0xf8] sm:$0xff]  ;;  %v11123_v42 = vld [vmem:[#allocation4 + $0xf0] sm:$0xff] }
 0x4ac   : > { %v11512_v28 = vpop.f32.mrb[13].mxu0  ;;  %11677 = vst.msk [vmem:[#allocation4 + $0x70] sm:$0xff] %vm2395_vm5, %v11641_v54  ;;  %v11608_v7 = vld [vmem:[#allocation4 + $0x88] sm:$0xff]  ;;  %v11149_v24 = vadd.f32 %v11113_v61, %v11014_v4 }
 0x4ad   : > { %v11644_v16 = vadd.f32 %v15715_v52, %v11608_v7  ;;  %v11607_v48 = vld [vmem:[#allocation4 + $0x80] sm:$0xff]  ;;  %11186 = vst.msk [vmem:[#allocation4 + $0xa8] sm:$0xff] %vm2395_vm5, %v11150_v62 }
 0x4ae   : > { %v11643_v59 = vadd.f32 %v11607_v48, %v11492_v63  ;;  %11185 = vst.msk [vmem:[#allocation4 + $0xa0] sm:$0xff] %vm2395_vm5, %v11149_v24  ;;  %v15668_v5 = vpop.f32.mrb[242].mxu1 }
 0x4af   : > { %v15724_v51 = vpop.f32.mrb[14].mxu0  ;;  %11680 = vst.msk [vmem:[#allocation4 + $0x88] sm:$0xff] %vm2395_vm5, %v11644_v16  ;;  %v11152_v33 = vadd.f32 %v15668_v5, %v11116_v60  ;;  %v11024_v1 = vpop.f32.mrb[243].mxu1  ;;  %v11126_v16 = vld [vmem:[#allocation4 + $0x108] sm:$0xff]  ;;  %v11125_v60 = vld [vmem:[#allocation4 + $0x100] sm:$0xff] }
 0x4b0   : > { %v11522_v26 = vpop.f32.mrb[15].mxu0  ;;  %11679 = vst.msk [vmem:[#allocation4 + $0x80] sm:$0xff] %vm2395_vm5, %v11643_v59  ;;  %v11610_v39 = vld [vmem:[#allocation4 + $0x98] sm:$0xff]  ;;  %v11151_v15 = vadd.f32 %v11115_v49, %v11024_v1 }
 0x4b1   : > { %v11646_v17 = vadd.f32 %v15718_v46, %v11610_v39  ;;  %v11609_v41 = vld [vmem:[#allocation4 + $0x90] sm:$0xff]  ;;  %11188 = vst.msk [vmem:[#allocation4 + $0xb8] sm:$0xff] %vm2395_vm5, %v11152_v33 }
 0x4b2   : > { %v11645_v35 = vadd.f32 %v11609_v41, %v11502_v3  ;;  %11187 = vst.msk [vmem:[#allocation4 + $0xb0] sm:$0xff] %vm2395_vm5, %v11151_v15  ;;  %v15671_v13 = vpop.f32.mrb[244].mxu1 }
 0x4b3   : > { %v15727_v57 = vpop.f32.mrb[16].mxu0  ;;  %11682 = vst.msk [vmem:[#allocation4 + $0x98] sm:$0xff] %vm2395_vm5, %v11646_v17  ;;  %v11154_v21 = vadd.f32 %v15671_v13, %v11118_v2  ;;  %v11034_v34 = vpop.f32.mrb[245].mxu1  ;;  %v11128_v17 = vld [vmem:[#allocation4 + $0x118] sm:$0xff]  ;;  %v11127_v2 = vld [vmem:[#allocation4 + $0x110] sm:$0xff] }
 0x4b4   : > { %v11532_v0 = vpop.f32.mrb[17].mxu0  ;;  %11681 = vst.msk [vmem:[#allocation4 + $0x90] sm:$0xff] %vm2395_vm5, %v11645_v35  ;;  %v11612_v9 = vld [vmem:[#allocation4 + $0xa8] sm:$0xff]  ;;  %v11153_v56 = vadd.f32 %v11117_v36, %v11034_v34 }
 0x4b5   : > { %v11648_v19 = vadd.f32 %v15721_v23, %v11612_v9  ;;  %v11611_v40 = vld [vmem:[#allocation4 + $0xa0] sm:$0xff]  ;;  %11190 = vst.msk [vmem:[#allocation4 + $0xc8] sm:$0xff] %vm2395_vm5, %v11154_v21 }
 0x4b6   : > { %v11647_v37 = vadd.f32 %v11611_v40, %v11512_v28  ;;  %11189 = vst.msk [vmem:[#allocation4 + $0xc0] sm:$0xff] %vm2395_vm5, %v11153_v56  ;;  %v15674_v6 = vpop.f32.mrb[246].mxu1 }
 0x4b7   : > { %v15730_v20 = vpop.f32.mrb[18].mxu0  ;;  %11684 = vst.msk [vmem:[#allocation4 + $0xa8] sm:$0xff] %vm2395_vm5, %v11648_v19  ;;  %v11156_v38 = vadd.f32 %v15674_v6, %v11120_v11  ;;  %v11044_v18 = vpop.f32.mrb[247].mxu1  ;;  %v12090_v19 = vld [vmem:[#allocation4 + $0x8] sm:$0xff]  ;;  %v12089_v11 = vld [vmem:[#allocation4] sm:$0xff] }
 0x4b8   : > { %v11542_v52 = vpop.f32.mrb[19].mxu0  ;;  %11683 = vst.msk [vmem:[#allocation4 + $0xa0] sm:$0xff] %vm2395_vm5, %v11647_v37  ;;  %v11614_v50 = vld [vmem:[#allocation4 + $0xb8] sm:$0xff]  ;;  %v11155_v44 = vadd.f32 %v11119_v22, %v11044_v18 }
 0x4b9   : > { %v11650_v32 = vadd.f32 %v15724_v51, %v11614_v50  ;;  %v11613_v63 = vld [vmem:[#allocation4 + $0xb0] sm:$0xff]  ;;  %11192 = vst.msk [vmem:[#allocation4 + $0xd8] sm:$0xff] %vm2395_vm5, %v11156_v38 }
 0x4ba   : > { %v11649_v25 = vadd.f32 %v11613_v63, %v11522_v26  ;;  %11191 = vst.msk [vmem:[#allocation4 + $0xd0] sm:$0xff] %vm2395_vm5, %v11155_v44  ;;  %v15677_v27 = vpop.f32.mrb[248].mxu1 }
 0x4bb   : > { %v15733_v45 = vpop.f32.mrb[20].mxu0  ;;  %11686 = vst.msk [vmem:[#allocation4 + $0xb8] sm:$0xff] %vm2395_vm5, %v11650_v32  ;;  %v11158_v12 = vadd.f32 %v15677_v27, %v11122_v10  ;;  %v11054_v53 = vpop.f32.mrb[249].mxu1  ;;  %v12092_v32 = vld [vmem:[#allocation4 + $0x18] sm:$0xff]  ;;  %v12091_v10 = vld [vmem:[#allocation4 + $0x10] sm:$0xff] }
 0x4bc   : > { %v11552_v46 = vpop.f32.mrb[21].mxu0  ;;  %11685 = vst.msk [vmem:[#allocation4 + $0xb0] sm:$0xff] %vm2395_vm5, %v11649_v25  ;;  %v11616_v14 = vld [vmem:[#allocation4 + $0xc8] sm:$0xff]  ;;  %v11157_v58 = vadd.f32 %v11121_v8, %v11054_v53 }
 0x4bd   : > { %v11652_v29 = vadd.f32 %v15727_v57, %v11616_v14  ;;  %v11615_v3 = vld [vmem:[#allocation4 + $0xc0] sm:$0xff]  ;;  %11194 = vst.msk [vmem:[#allocation4 + $0xe8] sm:$0xff] %vm2395_vm5, %v11158_v12 }
 0x4be   : > { %v11651_v47 = vadd.f32 %v11615_v3, %v11532_v0  ;;  %11193 = vst.msk [vmem:[#allocation4 + $0xe0] sm:$0xff] %vm2395_vm5, %v11157_v58  ;;  %v15680_v30 = vpop.f32.mrb[250].mxu1 }
 0x4bf   : > { %v15736_v31 = vpop.f32.mrb[22].mxu0  ;;  %11688 = vst.msk [vmem:[#allocation4 + $0xc8] sm:$0xff] %vm2395_vm5, %v11652_v29  ;;  %v11160_v54 = vadd.f32 %v15680_v30, %v11124_v43  ;;  %v11064_v55 = vpop.f32.mrb[251].mxu1  ;;  %v12094_v29 = vld [vmem:[#allocation4 + $0x28] sm:$0xff]  ;;  %v12093_v43 = vld [vmem:[#allocation4 + $0x20] sm:$0xff] }
 0x4c0   : > { %v11562_v23 = vpop.f32.mrb[23].mxu0  ;;  %11687 = vst.msk [vmem:[#allocation4 + $0xc0] sm:$0xff] %vm2395_vm5, %v11651_v47  ;;  %v11618_v62 = vld [vmem:[#allocation4 + $0xd8] sm:$0xff]  ;;  %v11159_v4 = vadd.f32 %v11123_v42, %v11064_v55 }
 0x4c1   : > { %v11654_v61 = vadd.f32 %v15730_v20, %v11618_v62  ;;  %v11617_v28 = vld [vmem:[#allocation4 + $0xd0] sm:$0xff]  ;;  %11196 = vst.msk [vmem:[#allocation4 + $0xf8] sm:$0xff] %vm2395_vm5, %v11160_v54 }
 0x4c2   : > { %v11653_v7 = vadd.f32 %v11617_v28, %v11542_v52  ;;  %11195 = vst.msk [vmem:[#allocation4 + $0xf0] sm:$0xff] %vm2395_vm5, %v11159_v4  ;;  %v15683_v24 = vpop.f32.mrb[252].mxu1 }
 0x4c3   : > { %v15739_v48 = vpop.f32.mrb[24].mxu0  ;;  %11690 = vst.msk [vmem:[#allocation4 + $0xd8] sm:$0xff] %vm2395_vm5, %v11654_v61  ;;  %v11162_v59 = vadd.f32 %v15683_v24, %v11126_v16  ;;  %v11074_v5 = vpop.f32.mrb[253].mxu1  ;;  %v12096_v61 = vld [vmem:[#allocation4 + $0x38] sm:$0xff]  ;;  %v12095_v16 = vld [vmem:[#allocation4 + $0x30] sm:$0xff] }
 0x4c4   : > { %v11572_v51 = vpop.f32.mrb[25].mxu0  ;;  %11689 = vst.msk [vmem:[#allocation4 + $0xd0] sm:$0xff] %vm2395_vm5, %v11653_v7  ;;  %v11620_v33 = vld [vmem:[#allocation4 + $0xe8] sm:$0xff]  ;;  %v11161_v1 = vadd.f32 %v11125_v60, %v11074_v5 }
 0x4c5   : > { %v11656_v49 = vadd.f32 %v15733_v45, %v11620_v33  ;;  %v11619_v26 = vld [vmem:[#allocation4 + $0xe0] sm:$0xff]  ;;  %11198 = vst.msk [vmem:[#allocation4 + $0x108] sm:$0xff] %vm2395_vm5, %v11162_v59 }
 0x4c6   : > { %v11655_v39 = vadd.f32 %v11619_v26, %v11552_v46  ;;  %11197 = vst.msk [vmem:[#allocation4 + $0x100] sm:$0xff] %vm2395_vm5, %v11161_v1  ;;  %v15686_v15 = vpop.f32.mrb[254].mxu1 }
 0x4c7   : > { %v15742_v41 = vpop.f32.mrb[26].mxu0  ;;  %11692 = vst.msk [vmem:[#allocation4 + $0xe8] sm:$0xff] %vm2395_vm5, %v11656_v49  ;;  %v11164_v35 = vadd.f32 %v15686_v15, %v11128_v17  ;;  %v11084_v13 = vpop.f32.mrb[255].mxu1  ;;  %v12098_v49 = vld [vmem:[#allocation4 + $0x48] sm:$0xff]  ;;  %v12097_v17 = vld [vmem:[#allocation4 + $0x40] sm:$0xff] }
 0x4c8   : > { %v11582_v57 = vpop.f32.mrb[27].mxu0  ;;  %11691 = vst.msk [vmem:[#allocation4 + $0xe0] sm:$0xff] %vm2395_vm5, %v11655_v39  ;;  %v11622_v21 = vld [vmem:[#allocation4 + $0xf8] sm:$0xff]  ;;  %v11163_v34 = vadd.f32 %v11127_v2, %v11084_v13 }
 0x4c9   : > { %v11658_v36 = vadd.f32 %v15736_v31, %v11622_v21  ;;  %v11621_v0 = vld [vmem:[#allocation4 + $0xf0] sm:$0xff]  ;;  %11200 = vst.msk [vmem:[#allocation4 + $0x118] sm:$0xff] %vm2395_vm5, %v11164_v35 }
 0x4ca   : > { %v11657_v9 = vadd.f32 %v11621_v0, %v11562_v23  ;;  %11199 = vst.msk [vmem:[#allocation4 + $0x110] sm:$0xff] %vm2395_vm5, %v11163_v34  ;;  %v15747_v56 = vpop.f32.mrb[0].mxu1 }
 0x4cb   : > { %v15803_v40 = vpop.f32.mrb[28].mxu0  ;;  %11694 = vst.msk [vmem:[#allocation4 + $0xf8] sm:$0xff] %vm2395_vm5, %v11658_v36  ;;  %v12126_v37 = vadd.f32 %v15747_v56, %v12090_v19  ;;  %v11910_v6 = vpop.f32.mrb[1].mxu1  ;;  %v12100_v36 = vld [vmem:[#allocation4 + $0x58] sm:$0xff]  ;;  %v12099_v19 = vld [vmem:[#allocation4 + $0x50] sm:$0xff] }
 0x4cc   : > { %v12408_v20 = vpop.f32.mrb[29].mxu0  ;;  %11693 = vst.msk [vmem:[#allocation4 + $0xf0] sm:$0xff] %vm2395_vm5, %v11657_v9  ;;  %v11624_v38 = vld [vmem:[#allocation4 + $0x108] sm:$0xff]  ;;  %v12125_v18 = vadd.f32 %v12089_v11, %v11910_v6 }
 0x4cd   : > { %v11660_v22 = vadd.f32 %v15739_v48, %v11624_v38  ;;  %v11623_v52 = vld [vmem:[#allocation4 + $0x100] sm:$0xff]  ;;  %12162 = vst.msk [vmem:[#allocation4 + $0x8] sm:$0xff] %vm2395_vm5, %v12126_v37 }
 0x4ce   : > { %v11659_v50 = vadd.f32 %v11623_v52, %v11572_v51  ;;  %12161 = vst.msk [vmem:[#allocation4] sm:$0xff] %vm2395_vm5, %v12125_v18  ;;  %v15750_v44 = vpop.f32.mrb[2].mxu1 }
 0x4cf   : > { %v15806_v63 = vpop.f32.mrb[30].mxu0  ;;  %11696 = vst.msk [vmem:[#allocation4 + $0x108] sm:$0xff] %vm2395_vm5, %v11660_v22  ;;  %v12128_v25 = vadd.f32 %v15750_v44, %v12092_v32  ;;  %v11920_v27 = vpop.f32.mrb[3].mxu1  ;;  %v12102_v22 = vld [vmem:[#allocation4 + $0x68] sm:$0xff]  ;;  %v12101_v32 = vld [vmem:[#allocation4 + $0x60] sm:$0xff] }
 0x4d0   : > { %v12418_v45 = vpop.f32.mrb[31].mxu0  ;;  %11695 = vst.msk [vmem:[#allocation4 + $0x100] sm:$0xff] %vm2395_vm5, %v11659_v50  ;;  %v11626_v12 = vld [vmem:[#allocation4 + $0x118] sm:$0xff]  ;;  %v12127_v53 = vadd.f32 %v12091_v10, %v11920_v27 }
 0x4d1   : > { %v11662_v8 = vadd.f32 %v15742_v41, %v11626_v12  ;;  %v11625_v46 = vld [vmem:[#allocation4 + $0x110] sm:$0xff]  ;;  %12164 = vst.msk [vmem:[#allocation4 + $0x18] sm:$0xff] %vm2395_vm5, %v12128_v25 }
 0x4d2   : > { %v11661_v14 = vadd.f32 %v11625_v46, %v11582_v57  ;;  %12163 = vst.msk [vmem:[#allocation4 + $0x10] sm:$0xff] %vm2395_vm5, %v12127_v53  ;;  %v15753_v58 = vpop.f32.mrb[4].mxu1 }
 0x4d3   : > { %v15809_v3 = vpop.f32.mrb[32].mxu0  ;;  %11698 = vst.msk [vmem:[#allocation4 + $0x118] sm:$0xff] %vm2395_vm5, %v11662_v8  ;;  %v12130_v47 = vadd.f32 %v15753_v58, %v12094_v29  ;;  %v11930_v30 = vpop.f32.mrb[5].mxu1  ;;  %v12104_v8 = vld [vmem:[#allocation4 + $0x78] sm:$0xff]  ;;  %v12103_v29 = vld [vmem:[#allocation4 + $0x70] sm:$0xff] }
 0x4d4   : > { %v12428_v31 = vpop.f32.mrb[33].mxu0  ;;  %11697 = vst.msk [vmem:[#allocation4 + $0x110] sm:$0xff] %vm2395_vm5, %v11661_v14  ;;  %v12588_v54 = vld [vmem:[#allocation4 + $0x8] sm:$0xff]  ;;  %v12129_v55 = vadd.f32 %v12093_v43, %v11930_v30 }
 0x4d5   : > { %v12624_v42 = vadd.f32 %v15803_v40, %v12588_v54  ;;  %v12587_v23 = vld [vmem:[#allocation4] sm:$0xff]  ;;  %12166 = vst.msk [vmem:[#allocation4 + $0x28] sm:$0xff] %vm2395_vm5, %v12130_v47 }
 0x4d6   : > { %v12623_v62 = vadd.f32 %v12587_v23, %v12408_v20  ;;  %12165 = vst.msk [vmem:[#allocation4 + $0x20] sm:$0xff] %vm2395_vm5, %v12129_v55  ;;  %v15756_v4 = vpop.f32.mrb[6].mxu1 }
 0x4d7   : > { %v15812_v28 = vpop.f32.mrb[34].mxu0  ;;  %12660 = vst.msk [vmem:[#allocation4 + $0x8] sm:$0xff] %vm2395_vm5, %v12624_v42  ;;  %v12132_v7 = vadd.f32 %v15756_v4, %v12096_v61  ;;  %v11940_v24 = vpop.f32.mrb[7].mxu1  ;;  %v12106_v42 = vld [vmem:[#allocation4 + $0x88] sm:$0xff]  ;;  %v12105_v61 = vld [vmem:[#allocation4 + $0x80] sm:$0xff] }
 0x4d8   : > { %v12438_v48 = vpop.f32.mrb[35].mxu0  ;;  %12659 = vst.msk [vmem:[#allocation4] sm:$0xff] %vm2395_vm5, %v12623_v62  ;;  %v12590_v59 = vld [vmem:[#allocation4 + $0x18] sm:$0xff]  ;;  %v12131_v5 = vadd.f32 %v12095_v16, %v11940_v24 }
 0x4d9   : > { %v12626_v60 = vadd.f32 %v15806_v63, %v12590_v59  ;;  %v12589_v51 = vld [vmem:[#allocation4 + $0x10] sm:$0xff]  ;;  %12168 = vst.msk [vmem:[#allocation4 + $0x38] sm:$0xff] %vm2395_vm5, %v12132_v7 }
 0x4da   : > { %v12625_v33 = vadd.f32 %v12589_v51, %v12418_v45  ;;  %12167 = vst.msk [vmem:[#allocation4 + $0x30] sm:$0xff] %vm2395_vm5, %v12131_v5  ;;  %v15759_v1 = vpop.f32.mrb[8].mxu1 }
 0x4db   : > { %v15815_v26 = vpop.f32.mrb[36].mxu0  ;;  %12662 = vst.msk [vmem:[#allocation4 + $0x18] sm:$0xff] %vm2395_vm5, %v12626_v60  ;;  %v12134_v39 = vadd.f32 %v15759_v1, %v12098_v49  ;;  %v11950_v15 = vpop.f32.mrb[9].mxu1  ;;  %v12108_v60 = vld [vmem:[#allocation4 + $0x98] sm:$0xff]  ;;  %v12107_v49 = vld [vmem:[#allocation4 + $0x90] sm:$0xff] }
 0x4dc   : > { %v12448_v41 = vpop.f32.mrb[37].mxu0  ;;  %12661 = vst.msk [vmem:[#allocation4 + $0x10] sm:$0xff] %vm2395_vm5, %v12625_v33  ;;  %v12592_v35 = vld [vmem:[#allocation4 + $0x28] sm:$0xff]  ;;  %v12133_v13 = vadd.f32 %v12097_v17, %v11950_v15 }
 0x4dd   : > { %v12628_v2 = vadd.f32 %v15809_v3, %v12592_v35  ;;  %v12591_v57 = vld [vmem:[#allocation4 + $0x20] sm:$0xff]  ;;  %12170 = vst.msk [vmem:[#allocation4 + $0x48] sm:$0xff] %vm2395_vm5, %v12134_v39 }
 0x4de   : > { %v12627_v21 = vadd.f32 %v12591_v57, %v12428_v31  ;;  %12169 = vst.msk [vmem:[#allocation4 + $0x40] sm:$0xff] %vm2395_vm5, %v12133_v13  ;;  %v15762_v34 = vpop.f32.mrb[10].mxu1 }
 0x4df   : > { %v15818_v0 = vpop.f32.mrb[38].mxu0  ;;  %12664 = vst.msk [vmem:[#allocation4 + $0x28] sm:$0xff] %vm2395_vm5, %v12628_v2  ;;  %v12136_v9 = vadd.f32 %v15762_v34, %v12100_v36  ;;  %v11960_v56 = vpop.f32.mrb[11].mxu1  ;;  %v12110_v2 = vld [vmem:[#allocation4 + $0xa8] sm:$0xff]  ;;  %v12109_v36 = vld [vmem:[#allocation4 + $0xa0] sm:$0xff] }
 0x4e0   : > { %v12458_v40 = vpop.f32.mrb[39].mxu0  ;;  %12663 = vst.msk [vmem:[#allocation4 + $0x20] sm:$0xff] %vm2395_vm5, %v12627_v21  ;;  %v12594_v37 = vld [vmem:[#allocation4 + $0x38] sm:$0xff]  ;;  %v12135_v6 = vadd.f32 %v12099_v19, %v11960_v56 }
 0x4e1   : > { %v12630_v11 = vadd.f32 %v15812_v28, %v12594_v37  ;;  %v12593_v20 = vld [vmem:[#allocation4 + $0x30] sm:$0xff]  ;;  %12172 = vst.msk [vmem:[#allocation4 + $0x58] sm:$0xff] %vm2395_vm5, %v12136_v9 }
 0x4e2   : > { %v12629_v38 = vadd.f32 %v12593_v20, %v12438_v48  ;;  %12171 = vst.msk [vmem:[#allocation4 + $0x50] sm:$0xff] %vm2395_vm5, %v12135_v6  ;;  %v15765_v18 = vpop.f32.mrb[12].mxu1 }
 0x4e3   : > { %v15821_v52 = vpop.f32.mrb[40].mxu0  ;;  %12666 = vst.msk [vmem:[#allocation4 + $0x38] sm:$0xff] %vm2395_vm5, %v12630_v11  ;;  %v12138_v50 = vadd.f32 %v15765_v18, %v12102_v22  ;;  %v11970_v44 = vpop.f32.mrb[13].mxu1  ;;  %v12112_v11 = vld [vmem:[#allocation4 + $0xb8] sm:$0xff]  ;;  %v12111_v22 = vld [vmem:[#allocation4 + $0xb0] sm:$0xff] }
 0x4e4   : > { %v12468_v63 = vpop.f32.mrb[41].mxu0  ;;  %12665 = vst.msk [vmem:[#allocation4 + $0x30] sm:$0xff] %vm2395_vm5, %v12629_v38  ;;  %v12596_v25 = vld [vmem:[#allocation4 + $0x48] sm:$0xff]  ;;  %v12137_v27 = vadd.f32 %v12101_v32, %v11970_v44 }
 0x4e5   : > { %v12632_v10 = vadd.f32 %v15815_v26, %v12596_v25  ;;  %v12595_v45 = vld [vmem:[#allocation4 + $0x40] sm:$0xff]  ;;  %12174 = vst.msk [vmem:[#allocation4 + $0x68] sm:$0xff] %vm2395_vm5, %v12138_v50 }
 0x4e6   : > { %v12631_v12 = vadd.f32 %v12595_v45, %v12448_v41  ;;  %12173 = vst.msk [vmem:[#allocation4 + $0x60] sm:$0xff] %vm2395_vm5, %v12137_v27  ;;  %v15768_v53 = vpop.f32.mrb[14].mxu1 }
 0x4e7   : > { %v15824_v46 = vpop.f32.mrb[42].mxu0  ;;  %12668 = vst.msk [vmem:[#allocation4 + $0x48] sm:$0xff] %vm2395_vm5, %v12632_v10  ;;  %v12140_v14 = vadd.f32 %v15768_v53, %v12104_v8  ;;  %v11980_v58 = vpop.f32.mrb[15].mxu1  ;;  %v12114_v10 = vld [vmem:[#allocation4 + $0xc8] sm:$0xff]  ;;  %v12113_v8 = vld [vmem:[#allocation4 + $0xc0] sm:$0xff] }
 0x4e8   : > { %v12478_v3 = vpop.f32.mrb[43].mxu0  ;;  %12667 = vst.msk [vmem:[#allocation4 + $0x40] sm:$0xff] %vm2395_vm5, %v12631_v12  ;;  %v12598_v47 = vld [vmem:[#allocation4 + $0x58] sm:$0xff]  ;;  %v12139_v30 = vadd.f32 %v12103_v29, %v11980_v58 }
 0x4e9   : > { %v12634_v43 = vadd.f32 %v15818_v0, %v12598_v47  ;;  %v12597_v31 = vld [vmem:[#allocation4 + $0x50] sm:$0xff]  ;;  %12176 = vst.msk [vmem:[#allocation4 + $0x78] sm:$0xff] %vm2395_vm5, %v12140_v14 }
 0x4ea   : > { %v12633_v54 = vadd.f32 %v12597_v31, %v12458_v40  ;;  %12175 = vst.msk [vmem:[#allocation4 + $0x70] sm:$0xff] %vm2395_vm5, %v12139_v30  ;;  %v15771_v55 = vpop.f32.mrb[16].mxu1 }
 0x4eb   : > { %v15827_v23 = vpop.f32.mrb[44].mxu0  ;;  %12670 = vst.msk [vmem:[#allocation4 + $0x58] sm:$0xff] %vm2395_vm5, %v12634_v43  ;;  %v12142_v62 = vadd.f32 %v15771_v55, %v12106_v42  ;;  %v11990_v4 = vpop.f32.mrb[17].mxu1  ;;  %v12116_v43 = vld [vmem:[#allocation4 + $0xd8] sm:$0xff]  ;;  %v12115_v42 = vld [vmem:[#allocation4 + $0xd0] sm:$0xff] }
 0x4ec   : > { %v12488_v28 = vpop.f32.mrb[45].mxu0  ;;  %12669 = vst.msk [vmem:[#allocation4 + $0x50] sm:$0xff] %vm2395_vm5, %v12633_v54  ;;  %v12600_v7 = vld [vmem:[#allocation4 + $0x68] sm:$0xff]  ;;  %v12141_v24 = vadd.f32 %v12105_v61, %v11990_v4 }
 0x4ed   : > { %v12636_v16 = vadd.f32 %v15821_v52, %v12600_v7  ;;  %v12599_v48 = vld [vmem:[#allocation4 + $0x60] sm:$0xff]  ;;  %12178 = vst.msk [vmem:[#allocation4 + $0x88] sm:$0xff] %vm2395_vm5, %v12142_v62 }
 0x4ee   : > { %v12635_v59 = vadd.f32 %v12599_v48, %v12468_v63  ;;  %12177 = vst.msk [vmem:[#allocation4 + $0x80] sm:$0xff] %vm2395_vm5, %v12141_v24  ;;  %v15774_v5 = vpop.f32.mrb[18].mxu1 }
 0x4ef   : > { %v15830_v51 = vpop.f32.mrb[46].mxu0  ;;  %12672 = vst.msk [vmem:[#allocation4 + $0x68] sm:$0xff] %vm2395_vm5, %v12636_v16  ;;  %v12144_v33 = vadd.f32 %v15774_v5, %v12108_v60  ;;  %v12000_v1 = vpop.f32.mrb[19].mxu1  ;;  %v12118_v16 = vld [vmem:[#allocation4 + $0xe8] sm:$0xff]  ;;  %v12117_v60 = vld [vmem:[#allocation4 + $0xe0] sm:$0xff] }
 0x4f0   : > { %v12498_v26 = vpop.f32.mrb[47].mxu0  ;;  %12671 = vst.msk [vmem:[#allocation4 + $0x60] sm:$0xff] %vm2395_vm5, %v12635_v59  ;;  %v12602_v39 = vld [vmem:[#allocation4 + $0x78] sm:$0xff]  ;;  %v12143_v15 = vadd.f32 %v12107_v49, %v12000_v1 }
 0x4f1   : > { %v12638_v17 = vadd.f32 %v15824_v46, %v12602_v39  ;;  %v12601_v41 = vld [vmem:[#allocation4 + $0x70] sm:$0xff]  ;;  %12180 = vst.msk [vmem:[#allocation4 + $0x98] sm:$0xff] %vm2395_vm5, %v12144_v33 }
 0x4f2   : > { %v12637_v35 = vadd.f32 %v12601_v41, %v12478_v3  ;;  %12179 = vst.msk [vmem:[#allocation4 + $0x90] sm:$0xff] %vm2395_vm5, %v12143_v15  ;;  %v15777_v13 = vpop.f32.mrb[20].mxu1 }
 0x4f3   : > { %v15833_v57 = vpop.f32.mrb[48].mxu0  ;;  %12674 = vst.msk [vmem:[#allocation4 + $0x78] sm:$0xff] %vm2395_vm5, %v12638_v17  ;;  %v12146_v21 = vadd.f32 %v15777_v13, %v12110_v2  ;;  %v12010_v34 = vpop.f32.mrb[21].mxu1  ;;  %v12120_v17 = vld [vmem:[#allocation4 + $0xf8] sm:$0xff]  ;;  %v12119_v2 = vld [vmem:[#allocation4 + $0xf0] sm:$0xff] }
 0x4f4   : > { %v12508_v0 = vpop.f32.mrb[49].mxu0  ;;  %12673 = vst.msk [vmem:[#allocation4 + $0x70] sm:$0xff] %vm2395_vm5, %v12637_v35  ;;  %v12604_v9 = vld [vmem:[#allocation4 + $0x88] sm:$0xff]  ;;  %v12145_v56 = vadd.f32 %v12109_v36, %v12010_v34 }
 0x4f5   : > { %v12640_v19 = vadd.f32 %v15827_v23, %v12604_v9  ;;  %v12603_v40 = vld [vmem:[#allocation4 + $0x80] sm:$0xff]  ;;  %12182 = vst.msk [vmem:[#allocation4 + $0xa8] sm:$0xff] %vm2395_vm5, %v12146_v21 }
 0x4f6   : > { %v12639_v37 = vadd.f32 %v12603_v40, %v12488_v28  ;;  %12181 = vst.msk [vmem:[#allocation4 + $0xa0] sm:$0xff] %vm2395_vm5, %v12145_v56  ;;  %v15780_v6 = vpop.f32.mrb[22].mxu1 }
 0x4f7   : > { %v15836_v20 = vpop.f32.mrb[50].mxu0  ;;  %12676 = vst.msk [vmem:[#allocation4 + $0x88] sm:$0xff] %vm2395_vm5, %v12640_v19  ;;  %v12148_v38 = vadd.f32 %v15780_v6, %v12112_v11  ;;  %v12020_v18 = vpop.f32.mrb[23].mxu1  ;;  %v12122_v19 = vld [vmem:[#allocation4 + $0x108] sm:$0xff]  ;;  %v12121_v11 = vld [vmem:[#allocation4 + $0x100] sm:$0xff] }
 0x4f8   : > { %v12518_v52 = vpop.f32.mrb[51].mxu0  ;;  %12675 = vst.msk [vmem:[#allocation4 + $0x80] sm:$0xff] %vm2395_vm5, %v12639_v37  ;;  %v12606_v50 = vld [vmem:[#allocation4 + $0x98] sm:$0xff]  ;;  %v12147_v44 = vadd.f32 %v12111_v22, %v12020_v18 }
 0x4f9   : > { %v12642_v32 = vadd.f32 %v15830_v51, %v12606_v50  ;;  %v12605_v63 = vld [vmem:[#allocation4 + $0x90] sm:$0xff]  ;;  %12184 = vst.msk [vmem:[#allocation4 + $0xb8] sm:$0xff] %vm2395_vm5, %v12148_v38 }
 0x4fa   : > { %v12641_v25 = vadd.f32 %v12605_v63, %v12498_v26  ;;  %12183 = vst.msk [vmem:[#allocation4 + $0xb0] sm:$0xff] %vm2395_vm5, %v12147_v44  ;;  %v15783_v27 = vpop.f32.mrb[24].mxu1 }
 0x4fb   : > { %v15839_v45 = vpop.f32.mrb[52].mxu0  ;;  %12678 = vst.msk [vmem:[#allocation4 + $0x98] sm:$0xff] %vm2395_vm5, %v12642_v32  ;;  %v12150_v12 = vadd.f32 %v15783_v27, %v12114_v10  ;;  %v12030_v53 = vpop.f32.mrb[25].mxu1  ;;  %v12124_v32 = vld [vmem:[#allocation4 + $0x118] sm:$0xff]  ;;  %v12123_v10 = vld [vmem:[#allocation4 + $0x110] sm:$0xff] }
 0x4fc   : > { %v12528_v46 = vpop.f32.mrb[53].mxu0  ;;  %12677 = vst.msk [vmem:[#allocation4 + $0x90] sm:$0xff] %vm2395_vm5, %v12641_v25  ;;  %v12608_v14 = vld [vmem:[#allocation4 + $0xa8] sm:$0xff]  ;;  %v12149_v58 = vadd.f32 %v12113_v8, %v12030_v53 }
 0x4fd   : > { %v12644_v29 = vadd.f32 %v15833_v57, %v12608_v14  ;;  %v12607_v3 = vld [vmem:[#allocation4 + $0xa0] sm:$0xff]  ;;  %12186 = vst.msk [vmem:[#allocation4 + $0xc8] sm:$0xff] %vm2395_vm5, %v12150_v12 }
 0x4fe   : > { %v12643_v47 = vadd.f32 %v12607_v3, %v12508_v0  ;;  %12185 = vst.msk [vmem:[#allocation4 + $0xc0] sm:$0xff] %vm2395_vm5, %v12149_v58  ;;  %v15786_v30 = vpop.f32.mrb[26].mxu1 }
 0x4ff   : > { %v15842_v31 = vpop.f32.mrb[54].mxu0  ;;  %12680 = vst.msk [vmem:[#allocation4 + $0xa8] sm:$0xff] %vm2395_vm5, %v12644_v29  ;;  %v12152_v54 = vadd.f32 %v15786_v30, %v12116_v43  ;;  %v12040_v55 = vpop.f32.mrb[27].mxu1  ;;  %v13086_v29 = vld [vmem:[#allocation4 + $0x8] sm:$0xff]  ;;  %v13085_v43 = vld [vmem:[#allocation4] sm:$0xff] }
 0x500   : > { %v12538_v23 = vpop.f32.mrb[55].mxu0  ;;  %12679 = vst.msk [vmem:[#allocation4 + $0xa0] sm:$0xff] %vm2395_vm5, %v12643_v47  ;;  %v12610_v62 = vld [vmem:[#allocation4 + $0xb8] sm:$0xff]  ;;  %v12151_v4 = vadd.f32 %v12115_v42, %v12040_v55 }
 0x501   : > { %v12646_v61 = vadd.f32 %v15836_v20, %v12610_v62  ;;  %v12609_v28 = vld [vmem:[#allocation4 + $0xb0] sm:$0xff]  ;;  %12188 = vst.msk [vmem:[#allocation4 + $0xd8] sm:$0xff] %vm2395_vm5, %v12152_v54 }
 0x502   : > { %v12645_v7 = vadd.f32 %v12609_v28, %v12518_v52  ;;  %12187 = vst.msk [vmem:[#allocation4 + $0xd0] sm:$0xff] %vm2395_vm5, %v12151_v4  ;;  %v15789_v24 = vpop.f32.mrb[28].mxu1 }
 0x503   : > { %v15845_v48 = vpop.f32.mrb[56].mxu0  ;;  %12682 = vst.msk [vmem:[#allocation4 + $0xb8] sm:$0xff] %vm2395_vm5, %v12646_v61  ;;  %v12154_v59 = vadd.f32 %v15789_v24, %v12118_v16  ;;  %v12050_v5 = vpop.f32.mrb[29].mxu1  ;;  %v13088_v61 = vld [vmem:[#allocation4 + $0x18] sm:$0xff]  ;;  %v13087_v16 = vld [vmem:[#allocation4 + $0x10] sm:$0xff] }
 0x504   : > { %v12548_v51 = vpop.f32.mrb[57].mxu0  ;;  %12681 = vst.msk [vmem:[#allocation4 + $0xb0] sm:$0xff] %vm2395_vm5, %v12645_v7  ;;  %v12612_v33 = vld [vmem:[#allocation4 + $0xc8] sm:$0xff]  ;;  %v12153_v1 = vadd.f32 %v12117_v60, %v12050_v5 }
 0x505   : > { %v12648_v49 = vadd.f32 %v15839_v45, %v12612_v33  ;;  %v12611_v26 = vld [vmem:[#allocation4 + $0xc0] sm:$0xff]  ;;  %12190 = vst.msk [vmem:[#allocation4 + $0xe8] sm:$0xff] %vm2395_vm5, %v12154_v59 }
 0x506   : > { %v12647_v39 = vadd.f32 %v12611_v26, %v12528_v46  ;;  %12189 = vst.msk [vmem:[#allocation4 + $0xe0] sm:$0xff] %vm2395_vm5, %v12153_v1  ;;  %v15792_v15 = vpop.f32.mrb[30].mxu1 }
 0x507   : > { %v15848_v41 = vpop.f32.mrb[58].mxu0  ;;  %12684 = vst.msk [vmem:[#allocation4 + $0xc8] sm:$0xff] %vm2395_vm5, %v12648_v49  ;;  %v12156_v35 = vadd.f32 %v15792_v15, %v12120_v17  ;;  %v12060_v13 = vpop.f32.mrb[31].mxu1  ;;  %v13090_v49 = vld [vmem:[#allocation4 + $0x28] sm:$0xff]  ;;  %v13089_v17 = vld [vmem:[#allocation4 + $0x20] sm:$0xff] }
 0x508   : > { %v12558_v57 = vpop.f32.mrb[59].mxu0  ;;  %12683 = vst.msk [vmem:[#allocation4 + $0xc0] sm:$0xff] %vm2395_vm5, %v12647_v39  ;;  %v12614_v21 = vld [vmem:[#allocation4 + $0xd8] sm:$0xff]  ;;  %v12155_v34 = vadd.f32 %v12119_v2, %v12060_v13 }
 0x509   : > { %v12650_v36 = vadd.f32 %v15842_v31, %v12614_v21  ;;  %v12613_v0 = vld [vmem:[#allocation4 + $0xd0] sm:$0xff]  ;;  %12192 = vst.msk [vmem:[#allocation4 + $0xf8] sm:$0xff] %vm2395_vm5, %v12156_v35  ;;  %v13092_v21 = vld [vmem:[#allocation4 + $0x38] sm:$0xff] }
 0x50a   : > { %v12649_v9 = vadd.f32 %v12613_v0, %v12538_v23  ;;  %12191 = vst.msk [vmem:[#allocation4 + $0xf0] sm:$0xff] %vm2395_vm5, %v12155_v34  ;;  %v15795_v56 = vpop.f32.mrb[32].mxu1  ;;  %v19807_v34 = vld [vmem:[%s19967_s9] ss:$0 sm:$0xff] }
 0x50b   : > { %v15851_v40 = vpop.f32.mrb[60].mxu0  ;;  %12686 = vst.msk [vmem:[#allocation4 + $0xd8] sm:$0xff] %vm2395_vm5, %v12650_v36  ;;  %v12158_v37 = vadd.f32 %v15795_v56, %v12122_v19  ;;  %v12070_v6 = vpop.f32.mrb[33].mxu1  ;;  %v13091_v56 = vld [vmem:[#allocation4 + $0x30] sm:$0xff] }
 0x50c   : > { %v12568_v20 = vpop.f32.mrb[61].mxu0  ;;  %12685 = vst.msk [vmem:[#allocation4 + $0xd0] sm:$0xff] %vm2395_vm5, %v12649_v9  ;;  %v12616_v38 = vld [vmem:[#allocation4 + $0xe8] sm:$0xff]  ;;  %v12157_v18 = vadd.f32 %v12121_v11, %v12070_v6 }
 0x50d   : > { %v12652_v22 = vadd.f32 %v15845_v48, %v12616_v38  ;;  %v12615_v52 = vld [vmem:[#allocation4 + $0xe0] sm:$0xff]  ;;  %12194 = vst.msk [vmem:[#allocation4 + $0x108] sm:$0xff] %vm2395_vm5, %v12158_v37  ;;  %v13094_v11 = vld [vmem:[#allocation4 + $0x48] sm:$0xff] }
 0x50e   : > { %v12651_v50 = vadd.f32 %v12615_v52, %v12548_v51  ;;  %12193 = vst.msk [vmem:[#allocation4 + $0x100] sm:$0xff] %vm2395_vm5, %v12157_v18  ;;  %v15798_v44 = vpop.f32.mrb[34].mxu1  ;;  %v13093_v18 = vld [vmem:[#allocation4 + $0x40] sm:$0xff] }
 0x50f   : > { %v15854_v63 = vpop.f32.mrb[62].mxu0  ;;  %12688 = vst.msk [vmem:[#allocation4 + $0xe8] sm:$0xff] %vm2395_vm5, %v12652_v22  ;;  %v12160_v25 = vadd.f32 %v15798_v44, %v12124_v32  ;;  %v12080_v27 = vpop.f32.mrb[35].mxu1  ;;  %v19820_v22 = vld [vmem:[%s19965_s7] ss:$0 sm:$0xff] }
 0x510   : > { %v12578_v45 = vpop.f32.mrb[63].mxu0  ;;  %12687 = vst.msk [vmem:[#allocation4 + $0xe0] sm:$0xff] %vm2395_vm5, %v12651_v50  ;;  %v12618_v12 = vld [vmem:[#allocation4 + $0xf8] sm:$0xff]  ;;  %v12159_v53 = vadd.f32 %v12123_v10, %v12080_v27 }
 0x511   : > { %v12654_v8 = vadd.f32 %v15848_v41, %v12618_v12  ;;  %v12617_v46 = vld [vmem:[#allocation4 + $0xf0] sm:$0xff]  ;;  %12196 = vst.msk [vmem:[#allocation4 + $0x118] sm:$0xff] %vm2395_vm5, %v12160_v25  ;;  %v13096_v27 = vld [vmem:[#allocation4 + $0x58] sm:$0xff] }
 0x512   : > { %v12653_v14 = vadd.f32 %v12617_v46, %v12558_v57  ;;  %12195 = vst.msk [vmem:[#allocation4 + $0x110] sm:$0xff] %vm2395_vm5, %v12159_v53  ;;  %v15859_v58 = vpop.f32.mrb[36].mxu1  ;;  %v13095_v12 = vld [vmem:[#allocation4 + $0x50] sm:$0xff] }
 0x513   : > { %v19780_v3 = vpop.f32.mrb[64].mxu0  ;;  %12690 = vst.msk [vmem:[#allocation4 + $0xf8] sm:$0xff] %vm2395_vm5, %v12654_v8  ;;  %v13122_v47 = vadd.f32 %v15859_v58, %v13086_v29  ;;  %v12906_v30 = vpop.f32.mrb[37].mxu1  ;;  %v13098_v58 = vld [vmem:[#allocation4 + $0x68] sm:$0xff] }
 0x514   : > { %v13382_v31 = vpop.f32.mrb[65].mxu0  ;;  %12689 = vst.msk [vmem:[#allocation4 + $0xf0] sm:$0xff] %vm2395_vm5, %v12653_v14  ;;  %v12620_v54 = vld [vmem:[#allocation4 + $0x108] sm:$0xff]  ;;  %v13121_v55 = vadd.f32 %v13085_v43, %v12906_v30  ;;  %v13097_v30 = vld [vmem:[#allocation4 + $0x60] sm:$0xff] }
 0x515   : > { %v12656_v42 = vadd.f32 %v15851_v40, %v12620_v54  ;;  %v12619_v23 = vld [vmem:[#allocation4 + $0x100] sm:$0xff]  ;;  %13158 = vst.msk [vmem:[#allocation4 + $0x8] sm:$0xff] %vm2395_vm5, %v13122_v47  ;;  %v13428_v50 = vadd.f32 %v19807_v34, %v13382_v31 }
 0x516   : > { %v12655_v62 = vadd.f32 %v12619_v23, %v12568_v20  ;;  %13157 = vst.msk [vmem:[#allocation4] sm:$0xff] %vm2395_vm5, %v13121_v55  ;;  %v15862_v4 = vpop.f32.mrb[38].mxu1  ;;  %v13100_v55 = vld [vmem:[#allocation4 + $0x78] sm:$0xff] }
 0x517   : > { %v19786_v28 = vpop.f32.mrb[66].mxu0  ;;  %12692 = vst.msk [vmem:[#allocation4 + $0x108] sm:$0xff] %vm2395_vm5, %v12656_v42  ;;  %v13124_v7 = vadd.f32 %v15862_v4, %v13088_v61  ;;  %v12916_v24 = vpop.f32.mrb[39].mxu1  ;;  %v13429_v4 = vadd.f32 %v19780_v3, %v19807_v34 }
 0x518   : > { %v19789_v48 = vpop.f32.mrb[67].mxu0  ;;  %12691 = vst.msk [vmem:[#allocation4 + $0x100] sm:$0xff] %vm2395_vm5, %v12655_v62  ;;  %v13123_v59 = vadd.f32 %v13087_v16, %v12916_v24  ;;  %v12622_v5 = vld [vmem:[#allocation4 + $0x118] sm:$0xff]  ;;  %v13099_v62 = vld [vmem:[#allocation4 + $0x70] sm:$0xff] }
 0x519   : > { %13160 = vst.msk [vmem:[#allocation4 + $0x18] sm:$0xff] %vm2395_vm5, %v13124_v7  ;;  %v12658_v60 = vadd.f32 %v15854_v63, %v12622_v5  ;;  %v12621_v51 = vld [vmem:[#allocation4 + $0x110] sm:$0xff]  ;;  %v13102_v5 = vld [vmem:[#allocation4 + $0x88] sm:$0xff] }
 0x51a   : > { %13159 = vst.msk [vmem:[#allocation4 + $0x10] sm:$0xff] %vm2395_vm5, %v13123_v59  ;;  %v12657_v33 = vadd.f32 %v12621_v51, %v12578_v45  ;;  %v15865_v1 = vpop.f32.mrb[40].mxu1 }
 0x51b   : > { %v19794_v26 = vpop.f32.mrb[68].mxu0  ;;  %12694 = vst.msk [vmem:[#allocation4 + $0x118] sm:$0xff] %vm2395_vm5, %v12658_v60  ;;  %v13126_v39 = vadd.f32 %v15865_v1, %v13090_v49  ;;  %v12926_v15 = vpop.f32.mrb[41].mxu1 }
 0x51c   : > { %v19797_v41 = vpop.f32.mrb[69].mxu0  ;;  %v13194_v35 = vld [vmem:[#allocation4 + $0x8] sm:$0xff]  ;;  %12693 = vst.msk [vmem:[#allocation4 + $0x110] sm:$0xff] %vm2395_vm5, %v12657_v33  ;;  %v13125_v13 = vadd.f32 %v13089_v17, %v12926_v15  ;;  %v13101_v33 = vld [vmem:[#allocation4 + $0x80] sm:$0xff] }
 0x51d   : > { %13197 = vst.msk [vmem:[#allocation5 + $0x8] sm:$0xff] %vm2395_vm5, %v13194_v35  ;;  %v13193_v2 = vld [vmem:[#allocation4] sm:$0xff]  ;;  %13162 = vst.msk [vmem:[#allocation4 + $0x28] sm:$0xff] %vm2395_vm5, %v13126_v39  ;;  %v13104_v39 = vld [vmem:[#allocation4 + $0x98] sm:$0xff] }
 0x51e   : > { %13196 = vst.msk [vmem:[#allocation5] sm:$0xff] %vm2395_vm5, %v13193_v2  ;;  %13161 = vst.msk [vmem:[#allocation4 + $0x20] sm:$0xff] %vm2395_vm5, %v13125_v13  ;;  %v15868_v57 = vpop.f32.mrb[42].mxu1  ;;  %v13103_v35 = vld [vmem:[#allocation4 + $0x90] sm:$0xff]  ;;  %v13430_v2 = vadd.f32 %v19807_v34, %v19789_v48 }
 0x51f   : > { %v15924_v36 = vpop.f32.mrb[70].mxu0  ;;  %v13128_v0 = vadd.f32 %v15868_v57, %v13092_v21  ;;  %v12936_v9 = vpop.f32.mrb[43].mxu1 }
 0x520   : > { %v19810_v19 = vadd.f32 %v15924_v36, %v19807_v34  ;;  %v19812_v40 = vpop.f32.mrb[71].mxu0  ;;  %v13127_v37 = vadd.f32 %v13091_v56, %v12936_v9  ;;  %v13106_v56 = vld [vmem:[#allocation4 + $0xa8] sm:$0xff] }
 0x521   : > { %13164 = vst.msk [vmem:[#allocation4 + $0x38] sm:$0xff] %vm2395_vm5, %v13128_v0 }
 0x522   : > { %13163 = vst.msk [vmem:[#allocation4 + $0x30] sm:$0xff] %vm2395_vm5, %v13127_v37  ;;  %v15871_v6 = vpop.f32.mrb[44].mxu1 }
 0x523   : > { %v13130_v20 = vadd.f32 %v15871_v6, %v13094_v11  ;;  %v12946_v38 = vpop.f32.mrb[45].mxu1  ;;  %v13105_v11 = vld [vmem:[#allocation4 + $0xa0] sm:$0xff] }
 0x524   : > { %v13129_v52 = vadd.f32 %v13093_v18, %v12946_v38  ;;  %v13108_v18 = vld [vmem:[#allocation4 + $0xb8] sm:$0xff] }
 0x525   : > { %v13200_v44 = vld [vmem:[#allocation4 + $0x24] sm:$0xff]  ;;  %13166 = vst.msk [vmem:[#allocation4 + $0x48] sm:$0xff] %vm2395_vm5, %v13130_v20 }
 0x526   : > { %v13250_v32 = vld [vmem:[#allocation5 + $0x1] ss:$2 sm:$0xff]  ;;  %13204 = vst.msk [vmem:[#allocation5 + $0x18] sm:$0xff] %vm2395_vm5, %v13200_v44  ;;  %13165 = vst.msk [vmem:[#allocation4 + $0x40] sm:$0xff] %vm2395_vm5, %v13129_v52  ;;  %v15874_v25 = vpop.f32.mrb[46].mxu1  ;;  %v13107_v44 = vld [vmem:[#allocation4 + $0xb0] sm:$0xff] }
 0x527   : > { %v13272_v63 = vadd.f32 %v19820_v22, %v13250_v32  ;;  %v13132_v10 = vadd.f32 %v15874_v25, %v13096_v27  ;;  %v12956_v45 = vpop.f32.mrb[47].mxu1 }
 0x528   : > { %v13131_v8 = vadd.f32 %v13095_v12, %v12956_v45 }
 0x529   : > { %v13436_v53 = vadd.f32 %v13428_v50, %v13272_v63  ;;  %v13201_v46 = vld [vmem:[#allocation4 + $0x2c] sm:$0xff]  ;;  %13168 = vst.msk [vmem:[#allocation4 + $0x58] sm:$0xff] %vm2395_vm5, %v13132_v10  ;;  %v13431_v63 = vadd.f32 %v19786_v28, %v19807_v34 }
 0x52a   : > { %13205 = vst.msk [vmem:[#allocation5 + $0x20] sm:$0xff] %vm2395_vm5, %v13201_v46  ;;  %13167 = vst.msk [vmem:[#allocation4 + $0x50] sm:$0xff] %vm2395_vm5, %v13131_v8  ;;  %v15877_v14 = vpop.f32.mrb[48].mxu1 }
 0x52b   : > { %13444 = vst.msk [vmem:[%s19831_s11] sm:$0xff] %vm2395_vm5, %v13436_v53  ;;  %v13134_v29 = vadd.f32 %v15877_v14, %v13098_v58  ;;  %v12966_v47 = vpop.f32.mrb[49].mxu1  ;;  %v13110_v53 = vld [vmem:[#allocation4 + $0xc8] sm:$0xff]  ;;  %v13109_v14 = vld [vmem:[#allocation4 + $0xc0] sm:$0xff] }
 0x52c   : > { %v13207_v43 = vld [vmem:[#allocation4 + $0x48] sm:$0xff]  ;;  %v13133_v31 = vadd.f32 %v13097_v30, %v12966_v47  ;;  %v13112_v47 = vld [vmem:[#allocation4 + $0xd8] sm:$0xff] }
 0x52d   : > { %13211 = vst.msk [vmem:[#allocation5 + $0x30] sm:$0xff] %vm2395_vm5, %v13207_v43  ;;  %13170 = vst.msk [vmem:[#allocation4 + $0x68] sm:$0xff] %vm2395_vm5, %v13134_v29 }
 0x52e   : > { %13169 = vst.msk [vmem:[#allocation4 + $0x60] sm:$0xff] %vm2395_vm5, %v13133_v31  ;;  %v15880_v54 = vpop.f32.mrb[50].mxu1  ;;  %v13111_v31 = vld [vmem:[#allocation4 + $0xd0] sm:$0xff] }
 0x52f   : > { %v13136_v42 = vadd.f32 %v15880_v54, %v13100_v55  ;;  %v12976_v23 = vpop.f32.mrb[51].mxu1  ;;  %v13432_v55 = vadd.f32 %v19807_v34, %v19797_v41 }
 0x530   : > { %v13135_v61 = vadd.f32 %v13099_v62, %v12976_v23 }
 0x531   : > { %v13252_v7 = vld [vmem:[#allocation5 + $0x19] ss:$2 sm:$0xff]  ;;  %v13208_v24 = vld [vmem:[#allocation4 + $0x50] sm:$0xff]  ;;  %13172 = vst.msk [vmem:[#allocation4 + $0x78] sm:$0xff] %vm2395_vm5, %v13136_v42 }
 0x532   : > { %v13273_v16 = vadd.f32 %v19820_v22, %v13252_v7  ;;  %13212 = vst.msk [vmem:[#allocation5 + $0x38] sm:$0xff] %vm2395_vm5, %v13208_v24  ;;  %13171 = vst.msk [vmem:[#allocation4 + $0x70] sm:$0xff] %vm2395_vm5, %v13135_v61  ;;  %v15883_v59 = vpop.f32.mrb[52].mxu1  ;;  %v13114_v61 = vld [vmem:[#allocation4 + $0xe8] sm:$0xff] }
 0x533   : > { %v13138_v60 = vadd.f32 %v15883_v59, %v13102_v5  ;;  %v12986_v51 = vpop.f32.mrb[53].mxu1 }
 0x534   : > { %v13437_v1 = vadd.f32 %v13429_v4, %v13273_v16  ;;  %v13137_v49 = vadd.f32 %v13101_v33, %v12986_v51  ;;  %v13113_v16 = vld [vmem:[#allocation4 + $0xe0] sm:$0xff]  ;;  %v13116_v51 = vld [vmem:[#allocation4 + $0xf8] sm:$0xff] }
 0x535   : > { %13174 = vst.msk [vmem:[#allocation4 + $0x88] sm:$0xff] %vm2395_vm5, %v13138_v60 }
 0x536   : > { %13445 = vst.msk [vmem:[%s19831_s11 + $0x8] sm:$0xff] %vm2395_vm5, %v13437_v1  ;;  %13173 = vst.msk [vmem:[#allocation4 + $0x80] sm:$0xff] %vm2395_vm5, %v13137_v49  ;;  %v15886_v3 = vpop.f32.mrb[54].mxu1  ;;  %v13115_v49 = vld [vmem:[#allocation4 + $0xf0] sm:$0xff] }
 0x537   : > { %v13140_v15 = vadd.f32 %v15886_v3, %v13104_v39  ;;  %v12996_v17 = vpop.f32.mrb[55].mxu1 }
 0x538   : > { %v13139_v13 = vadd.f32 %v13103_v35, %v12996_v17  ;;  %v13118_v17 = vld [vmem:[#allocation4 + $0x108] sm:$0xff] }
 0x539   : > { %v13214_v57 = vld [vmem:[#allocation4 + $0x6c] sm:$0xff]  ;;  %v13215_v21 = vld [vmem:[#allocation4 + $0x74] sm:$0xff]  ;;  %13176 = vst.msk [vmem:[#allocation4 + $0x98] sm:$0xff] %vm2395_vm5, %v13140_v15 }
 0x53a   : > { %v13254_v36 = vld [vmem:[#allocation5 + $0x31] ss:$2 sm:$0xff]  ;;  %13218 = vst.msk [vmem:[#allocation5 + $0x48] sm:$0xff] %vm2395_vm5, %v13214_v57  ;;  %13219 = vst.msk [vmem:[#allocation5 + $0x50] sm:$0xff] %vm2395_vm5, %v13215_v21  ;;  %v15889_v9 = vpop.f32.mrb[56].mxu1  ;;  %v13433_v57 = vadd.f32 %v19794_v26, %v19807_v34 }
 0x53b   : > { %13175 = vst.msk [vmem:[#allocation4 + $0x90] sm:$0xff] %vm2395_vm5, %v13139_v13  ;;  %v13274_v0 = vadd.f32 %v19820_v22, %v13254_v36  ;;  %v13142_v37 = vadd.f32 %v15889_v9, %v13106_v56  ;;  %v13006_v6 = vpop.f32.mrb[57].mxu1 }
 0x53c   : > { %v13141_v20 = vadd.f32 %v13105_v11, %v13006_v6 }
 0x53d   : > { %v13438_v48 = vadd.f32 %v13430_v2, %v13274_v0  ;;  %13178 = vst.msk [vmem:[#allocation4 + $0xa8] sm:$0xff] %vm2395_vm5, %v13142_v37  ;;  %v13117_v2 = vld [vmem:[#allocation4 + $0x100] sm:$0xff]  ;;  %v13120_v37 = vld [vmem:[#allocation4 + $0x118] sm:$0xff] }
 0x53e   : > { %13177 = vst.msk [vmem:[#allocation4 + $0xa0] sm:$0xff] %vm2395_vm5, %v13141_v20  ;;  %v15892_v38 = vpop.f32.mrb[58].mxu1 }
 0x53f   : > { %13446 = vst.msk [vmem:[%s19831_s11 + $0x10] sm:$0xff] %vm2395_vm5, %v13438_v48  ;;  %v13144_v52 = vadd.f32 %v15892_v38, %v13108_v18  ;;  %v13016_v50 = vpop.f32.mrb[59].mxu1  ;;  %v13119_v48 = vld [vmem:[#allocation4 + $0x110] sm:$0xff]  ;;  %v13434_v38 = vadd.f32 %v19807_v34, %v19812_v40 }
 0x540   : > { %v13222_v32 = vld [vmem:[#allocation4 + $0x98] sm:$0xff]  ;;  %v13143_v25 = vadd.f32 %v13107_v44, %v13016_v50 }
 0x541   : > { %13226 = vst.msk [vmem:[#allocation5 + $0x68] sm:$0xff] %vm2395_vm5, %v13222_v32  ;;  %v13256_v10 = vld [vmem:[#allocation5 + $0x49] ss:$2 sm:$0xff]  ;;  %13180 = vst.msk [vmem:[#allocation4 + $0xb8] sm:$0xff] %vm2395_vm5, %v13144_v52 }
 0x542   : > { %v13221_v27 = vld [vmem:[#allocation4 + $0x90] sm:$0xff]  ;;  %v13275_v45 = vadd.f32 %v19820_v22, %v13256_v10  ;;  %13179 = vst.msk [vmem:[#allocation4 + $0xb0] sm:$0xff] %vm2395_vm5, %v13143_v25  ;;  %v15895_v12 = vpop.f32.mrb[60].mxu1 }
 0x543   : > { %13225 = vst.msk [vmem:[#allocation5 + $0x60] sm:$0xff] %vm2395_vm5, %v13221_v27  ;;  %v13146_v8 = vadd.f32 %v15895_v12, %v13110_v53  ;;  %v13026_v46 = vpop.f32.mrb[61].mxu1 }
 0x544   : > { %v13439_v28 = vadd.f32 %v13431_v63, %v13275_v45  ;;  %v13145_v58 = vadd.f32 %v13109_v14, %v13026_v46 }
 0x545   : > { %13182 = vst.msk [vmem:[#allocation4 + $0xc8] sm:$0xff] %vm2395_vm5, %v13146_v8 }
 0x546   : > { %13447 = vst.msk [vmem:[%s19831_s11 + $0x18] sm:$0xff] %vm2395_vm5, %v13439_v28  ;;  %13181 = vst.msk [vmem:[#allocation4 + $0xc0] sm:$0xff] %vm2395_vm5, %v13145_v58  ;;  %v15898_v29 = vpop.f32.mrb[62].mxu1 }
 0x547   : > { %v13148_v30 = vadd.f32 %v15898_v29, %v13112_v47  ;;  %v13036_v43 = vpop.f32.mrb[63].mxu1 }
 0x548   : > { %v13147_v54 = vadd.f32 %v13111_v31, %v13036_v43 }
 0x549   : > { %v13228_v42 = vld [vmem:[#allocation4 + $0xb4] sm:$0xff]  ;;  %13184 = vst.msk [vmem:[#allocation4 + $0xd8] sm:$0xff] %vm2395_vm5, %v13148_v30 }
 0x54a   : > { %v13258_v23 = vld [vmem:[#allocation5 + $0x61] ss:$2 sm:$0xff]  ;;  %13232 = vst.msk [vmem:[#allocation5 + $0x78] sm:$0xff] %vm2395_vm5, %v13228_v42  ;;  %13183 = vst.msk [vmem:[#allocation4 + $0xd0] sm:$0xff] %vm2395_vm5, %v13147_v54  ;;  %v15901_v4 = vpop.f32.mrb[64].mxu1 }
 0x54b   : > { %v13276_v62 = vadd.f32 %v19820_v22, %v13258_v23  ;;  %v13150_v7 = vadd.f32 %v15901_v4, %v13114_v61  ;;  %v13046_v24 = vpop.f32.mrb[65].mxu1 }
 0x54c   : > { %v13149_v5 = vadd.f32 %v13113_v16, %v13046_v24 }
 0x54d   : > { %v13440_v59 = vadd.f32 %v13432_v55, %v13276_v62  ;;  %v13229_v60 = vld [vmem:[#allocation4 + $0xbc] sm:$0xff]  ;;  %13186 = vst.msk [vmem:[#allocation4 + $0xe8] sm:$0xff] %vm2395_vm5, %v13150_v7 }
 0x54e   : > { %13233 = vst.msk [vmem:[#allocation5 + $0x80] sm:$0xff] %vm2395_vm5, %v13229_v60  ;;  %13185 = vst.msk [vmem:[#allocation4 + $0xe0] sm:$0xff] %vm2395_vm5, %v13149_v5  ;;  %v15904_v41 = vpop.f32.mrb[66].mxu1 }
 0x54f   : > { %13448 = vst.msk [vmem:[%s19831_s11 + $0x20] sm:$0xff] %vm2395_vm5, %v13440_v59  ;;  %v13152_v33 = vadd.f32 %v15904_v41, %v13116_v51  ;;  %v13056_v1 = vpop.f32.mrb[67].mxu1 }
 0x550   : > { %v13235_v3 = vld [vmem:[#allocation4 + $0xd8] sm:$0xff]  ;;  %v13151_v39 = vadd.f32 %v13115_v49, %v13056_v1 }
 0x551   : > { %13239 = vst.msk [vmem:[#allocation5 + $0x90] sm:$0xff] %vm2395_vm5, %v13235_v3  ;;  %13188 = vst.msk [vmem:[#allocation4 + $0xf8] sm:$0xff] %vm2395_vm5, %v13152_v33 }
 0x552   : > { %13187 = vst.msk [vmem:[#allocation4 + $0xf0] sm:$0xff] %vm2395_vm5, %v13151_v39  ;;  %v15907_v15 = vpop.f32.mrb[68].mxu1 }
 0x553   : > { %v13154_v35 = vadd.f32 %v15907_v15, %v13118_v17  ;;  %v13066_v13 = vpop.f32.mrb[69].mxu1 }
 0x554   : > { %v13153_v21 = vadd.f32 %v13117_v2, %v13066_v13 }
 0x555   : > { %v13260_v36 = vld [vmem:[#allocation5 + $0x79] ss:$2 sm:$0xff]  ;;  %13190 = vst.msk [vmem:[#allocation4 + $0x108] sm:$0xff] %vm2395_vm5, %v13154_v35 }
 0x556   : > { %v13236_v0 = vld [vmem:[#allocation4 + $0xe0] sm:$0xff]  ;;  %v13277_v9 = vadd.f32 %v19820_v22, %v13260_v36  ;;  %13189 = vst.msk [vmem:[#allocation4 + $0x100] sm:$0xff] %vm2395_vm5, %v13153_v21  ;;  %v15910_v56 = vpop.f32.mrb[70].mxu1 }
 0x557   : > { %13240 = vst.msk [vmem:[#allocation5 + $0x98] sm:$0xff] %vm2395_vm5, %v13236_v0  ;;  %v13156_v6 = vadd.f32 %v15910_v56, %v13120_v37  ;;  %v13076_v11 = vpop.f32.mrb[71].mxu1 }
 0x558   : > { %v13441_v26 = vadd.f32 %v13433_v57, %v13277_v9  ;;  %v13155_v20 = vadd.f32 %v13119_v48, %v13076_v11 }
 0x559   : > { %13192 = vst.msk [vmem:[#allocation4 + $0x118] sm:$0xff] %vm2395_vm5, %v13156_v6 }
 0x55a   : > { %13449 = vst.msk [vmem:[%s19831_s11 + $0x28] sm:$0xff] %vm2395_vm5, %v13441_v26  ;;  %13191 = vst.msk [vmem:[#allocation4 + $0x110] sm:$0xff] %vm2395_vm5, %v13155_v20 }
 0x55d   : > { %v13242_v18 = vld [vmem:[#allocation4 + $0xfc] sm:$0xff]  ;;  %v13243_v52 = vld [vmem:[#allocation4 + $0x104] sm:$0xff] }
 0x55e   : > { %v13262_v50 = vld [vmem:[#allocation5 + $0x91] ss:$2 sm:$0xff]  ;;  %13246 = vst.msk [vmem:[#allocation5 + $0xa8] sm:$0xff] %vm2395_vm5, %v13242_v18  ;;  %13247 = vst.msk [vmem:[#allocation5 + $0xb0] sm:$0xff] %vm2395_vm5, %v13243_v52 }
 0x55f   : > { %v13278_v44 = vadd.f32 %v19820_v22, %v13262_v50 }
 0x561   : > { %v13442_v32 = vadd.f32 %v13434_v38, %v13278_v44 }
 0x563   : > { %13450 = vst.msk [vmem:[%s19831_s11 + $0x30] sm:$0xff] %vm2395_vm5, %v13442_v32 }
 0x565   : > { %v13264_v63 = vld [vmem:[#allocation5 + $0xa9] ss:$2 sm:$0xff] }
 0x566   : > { %v13279_v34 = vadd.f32 %v19820_v22, %v13264_v63 }
 0x568   : > { %v13443_v40 = vadd.f32 %v19810_v19, %v13279_v34 }
 0x56a   : > { %13451 = vst.msk [vmem:[%s19831_s11 + $0x38] sm:$0xff] %vm2395_vm5, %v13443_v40 }
 0x56b   : > { %16029 = shalt.err (!%p16026_p3)
}
 0x56c   : > { %s16030_s27 = scalar_lea.hbm %s19908_s29, 1024  ;;  %s16034_s20 = scalar_lea.hbm %s19968_s10, 2048 }
 0x56d   : > { %p16031_p4 = scmp.ne.s32.totalorder %s19908_s29, %s16030_s27  ;;  %p16035_p9 = scmp.lt.u32.totalorder %s19908_s29, %s19968_s10 }
 0x56e   : > { %p16036_p10 = scmp.lt.u32.totalorder %s16034_s20, %s16030_s27  ;;  %p16038_p12 = scmp.lt.u32.totalorder %s16030_s27, %s19908_s29 }
 0x56f   : > { %p16032_p7 = pnand %p16031_p4, %p16183_p5 }
 0x570   : > { %p16037_p11 = por %p16036_p10, %p16035_p9 }
 0x571   : > { %p16033_p8 = pneg %p16032_p7 }
 0x572   : > { %p16039_p13 = por %p16038_p12, %p16037_p11 }
 0x574   : > { %p16040_p0 = pnand %p16039_p13, %p16033_p8 }
 0x576   : > { %16043 = shalt.err (!%p16040_p0)
}
 0x577   : > { %s16088_s25 = smov 128   ;;  %s16089_s30 = smov 8  }
 0x578   : > { %15928 = dma.vmem_to_hbm [thread:$0]  (%p16183_p5), %s19910_s18, 1024, %s19908_s29, %s19917_s17, %s16088_s25, %s16088_s25, %s16089_s30  }
 0x579 PF: > { %p15934_p1 = scmp.ge.s32.totalorder %s16078_s16, 2  ;;  %s13481_s26 = sand.u32 1, %s16066_s13  }
 0x57a   : > { %s13482_s27 = scalar_lea.sflag [#allocation7], %s13481_s26 }
 0x57b   : > { %p15931_p2 = pnand %p15934_p1, %p16187_p6 }
 0x57d   : > { %16061 = dma.done.wait (!%p15931_p2), %s13482_s27, 1024  }
 0x57e   : > { %16063 = vsyncadd (!%p15931_p2), %s13482_s27, 4294966272  ;;  %p20_p3 = scmp.ge.s32.totalorder %s16170_s19, 4   ;;  %s20199_s13 = smov %s16070_s14 }
 0x57f   : > { %s20200_s14 = smov %s16074_s15  ;;  %s20201_s15 = smov %s16181_s22 }
 0x580   : > { %s20202_s16 = smov %s16170_s19  ;;  %22 = sbr.rel (!%p20_p3) target bundleno = 3 (0x3), region = 113 }
 0x587   :  { %13487 = vsyncpa [#allocation7], 1 }
 0x588   :  { %13489 = vsyncpa [#allocation7 + $0x1], 1 }

</bundles_post_ra>
